<compile_context>
chip_gen: v7x
topology: tpu7x:2x2x1
jax: 0.10.0
libtpu: 0.0.40
codegen_flags: <defaults>
</compile_context>

<pallas_src>
import math

import jax
import jax.numpy as jnp
from jax.experimental import pallas as pl
from jax.experimental.pallas import tpu as pltpu

# ----------------------------- module constants ------------------------------
NUM_LAYERS = 6
HIDDEN = 128
IN1 = 3
IN2 = 3
INTERMEDIATE = 1
OUT = 3
SKIP = 3
FREQS = (2**4, 2**5, 2**5, 2**5, 2**6, 2**6, 2**6, 2**7, 2**7, 2**8)
NF = len(FREQS)                    # 10
DIM1 = IN1 + 2 * NF                # 23  (fourier feature width, stage 1 == stage 2)
MID = INTERMEDIATE + DIM1          # 24  (stage-2 "mid_init" width)
_HALF_PI = math.pi / 2.0


def _round_up(x, m):
  return ((x + m - 1) // m) * m


DIM1P = _round_up(DIM1, 8)         # 24: zero-padded fourier slab (aligned K)


# --------------------------------- kernel ------------------------------------
def _fourier_slab(p, a):
  """[p ; sin(B^T p) ; cos(B^T p)] (zero-padded rows), batch on lanes.

  p: (3, TM) f32.  a: (DIM1P, 3) f32 with rows [I3 ; B^T ; B^T ; 0-pad].
  cos is computed as a pi/2 phase-shifted sin (one EUP pass covers sin+cos);
  the K=3 mapping runs on the VPU in full f32 so the frequency-scaled phases
  stay accurate without HIGHEST-precision matmuls.
  """
  dim, tm = a.shape[0], p.shape[1]
  m = a[:, 0:1] * p[0:1, :]
  for j in range(1, p.shape[0]):
    m = m + a[:, j:j + 1] * p[j:j + 1, :]
  rows = jax.lax.broadcasted_iota(jnp.int32, (dim, tm), 0)
  phase = jnp.where(rows >= IN1 + NF, jnp.float32(_HALF_PI), jnp.float32(0.0))
  return jnp.where(rows < IN1, m, jnp.sin(m + phase))


def _two_stage_mlp_kernel(i1_ref, i2_ref, a1_ref, a2_ref, wsq_ref, wf_ref,
                          ws_ref, ball_ref, wint_ref, bint_ref, wout_ref,
                          bout_ref, o_ref):
  f32, bf16 = jnp.float32, jnp.bfloat16
  relu = lambda v: jnp.maximum(v, 0.0)

  def mm(w, x):          # w: bf16 (M, K), x: f32 (K, TM) -> f32 (M, TM)
    return jnp.dot(w, x.astype(bf16), preferred_element_type=f32)

  def mmb(w, x_b):       # both operands already bf16
    return jnp.dot(w, x_b, preferred_element_type=f32)

  # ---------------- stage 1 ----------------
  f1 = _fourier_slab(i1_ref[...], a1_ref[...])        # (DIM1P, TM) f32
  f1_b = f1.astype(bf16)
  f1r_b = relu(f1).astype(bf16)

  x = mmb(wf_ref[0], f1_b) + ball_ref[0]                              # init
  x = mm(wsq_ref[0], relu(x)) + mmb(wf_ref[1], f1r_b) + ball_ref[1]   # L0 (skip)
  x = mm(wsq_ref[1], relu(x)) + ball_ref[2]                           # L1
  x = mm(wsq_ref[2], relu(x)) + ball_ref[3]                           # L2
  x = mm(wsq_ref[3], relu(x)) + mmb(wf_ref[2], f1r_b) + ball_ref[4]   # L3 (skip)
  x = mm(wsq_ref[4], relu(x)) + ball_ref[5]                           # L4
  x = mm(wsq_ref[5], relu(x)) + ball_ref[6]                           # L5
  s = jax.nn.sigmoid(mm(wint_ref[...], relu(x)) + bint_ref[...])      # (1, TM)

  # ---------------- stage 2 ----------------
  f2 = _fourier_slab(i2_ref[...], a2_ref[...])        # (DIM1P, TM) f32
  f2_b = f2.astype(bf16)
  f2r_b = relu(f2).astype(bf16)
  # relu(mid_init) = [s, relu(f2)]  (sigmoid output is > 0, so relu(s) == s)

  x = mmb(wf_ref[3], f2_b) + ws_ref[0] * s + ball_ref[7]              # from_inter
  x = (mm(wsq_ref[6], relu(x)) + mmb(wf_ref[4], f2r_b)
       + ws_ref[1] * s + ball_ref[8])                                 # L0 (skip)
  x = mm(wsq_ref[7], relu(x)) + ball_ref[9]                           # L1
  x = mm(wsq_ref[8], relu(x)) + ball_ref[10]                          # L2
  x = (mm(wsq_ref[9], relu(x)) + mmb(wf_ref[5], f2r_b)
       + ws_ref[2] * s + ball_ref[11])                                # L3 (skip)
  x = mm(wsq_ref[10], relu(x)) + ball_ref[12]                         # L4
  x = mm(wsq_ref[11], relu(x)) + ball_ref[13]                         # L5

  o_ref[...] = mm(wout_ref[...], relu(x)) + bout_ref[...]             # (OUT, TM)


# ----------------------------- parameter packing -----------------------------
def pack_params(params):
  """Split / stack / cast the torch-layout parameters for the kernel."""
  h = HIDDEN
  f32, bf16 = jnp.float32, jnp.bfloat16
  pad_rows = DIM1P - DIM1
  zpad_a = jnp.zeros((pad_rows, IN1), f32)
  pad_f = lambda w: jnp.pad(w, ((0, 0), (0, pad_rows)))

  a1 = jnp.concatenate(
      [jnp.eye(IN1, dtype=f32), params["basis_1"].T, params["basis_1"].T, zpad_a], axis=0)
  a2 = jnp.concatenate(
      [jnp.eye(IN2, dtype=f32), params["basis_2"].T, params["basis_2"].T, zpad_a], axis=0)

  l1w, l1b = params["l1_w"], params["l1_b"]
  l2w, l2b = params["l2_w"], params["l2_b"]
  fiw = params["from_inter_w"]

  # torch cat orders:  stage-1 skip -> [x | fourier1]
  #                    stage-2 skip -> [x | s | fourier2]
  #                    from_inter   -> [s | fourier2]
  wsq = jnp.stack([
      l1w[0][:, :h], l1w[1], l1w[2], l1w[3][:, :h], l1w[4], l1w[5],
      l2w[0][:, :h], l2w[1], l2w[2], l2w[3][:, :h], l2w[4], l2w[5],
  ]).astype(bf16)                                                     # (12, H, H)
  wf = jnp.stack([
      pad_f(params["init_w"]), pad_f(l1w[0][:, h:]), pad_f(l1w[3][:, h:]),
      pad_f(fiw[:, INTERMEDIATE:]),
      pad_f(l2w[0][:, h + INTERMEDIATE:]), pad_f(l2w[3][:, h + INTERMEDIATE:]),
  ]).astype(bf16)                                                     # (6, H, DIM1P)
  ws = jnp.stack([
      fiw[:, :INTERMEDIATE],
      l2w[0][:, h:h + INTERMEDIATE],
      l2w[3][:, h:h + INTERMEDIATE],
  ]).astype(f32)                                                      # (3, H, 1)
  col = lambda b: b.reshape(h, 1).astype(f32)
  ball = jnp.stack([col(params["init_b"])] + [col(b) for b in l1b]
                   + [col(params["from_inter_b"])] + [col(b) for b in l2b])  # (14, H, 1)
  wint = params["inter_w"].astype(bf16)                               # (1, H)
  bint = params["inter_b"].reshape(INTERMEDIATE, 1).astype(f32)       # (1, 1)
  wout = params["out_w"].astype(bf16)                                 # (OUT, H)
  bout = params["out_b"].reshape(OUT, 1).astype(f32)                  # (OUT, 1)
  return [a1, a2, wsq, wf, ws, ball, wint, bint, wout, bout]


# --------------------------------- wrapper ------------------------------------
def two_stage_mlp_forward(i1, i2, params, tm=1024):
  """Pallas forward.  i1, i2: (..., 3) float -> (..., OUT) float32."""
  assert i1.shape[:-1] == i2.shape[:-1]
  batches = i1.shape[:-1]
  p1 = i1.reshape(-1, IN1).astype(jnp.float32)
  p2 = i2.reshape(-1, IN2).astype(jnp.float32)
  n = p1.shape[0]

  # Tile selection: lane-aligned, as large as requested, but keep >= 2 grid
  # steps when there is enough work so the "parallel" axis can shard across
  # both TensorCores on v7x.  (If you sweep tm past ~4096, raise
  # pltpu.CompilerParams(vmem_limit_bytes=...) to stay within scoped VMEM.)
  tm = _round_up(max(128, min(int(tm), _round_up(n, 128))), 128)
  if n > 128 and _round_up(n, tm) // tm < 2:
    tm = max(128, _round_up((n + 1) // 2, 128))
  n_pad = _round_up(n, tm)

  if n_pad != n:
    p1 = jnp.pad(p1, ((0, n_pad - n), (0, 0)))
    p2 = jnp.pad(p2, ((0, n_pad - n), (0, 0)))
  p1t = p1.T                      # (IN1, n_pad): batch on lanes (lane-dense)
  p2t = p2.T

  weights = pack_params(params)
  in_specs = [pl.BlockSpec((IN1, tm), lambda i: (0, i)),
              pl.BlockSpec((IN2, tm), lambda i: (0, i))]
  for w in weights:               # resident full-block weights, constant index map
    in_specs.append(pl.BlockSpec(w.shape, lambda i, r=w.ndim: (0,) * r))

  flops = 2 * n_pad * (6 * HIDDEN * DIM1P + 12 * HIDDEN * HIDDEN
                       + INTERMEDIATE * HIDDEN + OUT * HIDDEN)
  param_bytes = sum(int(w.size) * w.dtype.itemsize for w in weights)
  cost = pl.CostEstimate(
      flops=int(flops),
      transcendentals=int((2 * DIM1P + 2) * n_pad),
      bytes_accessed=int((IN1 + IN2 + OUT) * 4 * n_pad + param_bytes))

  out = pl.pallas_call(
      _two_stage_mlp_kernel,
      out_shape=jax.ShapeDtypeStruct((OUT, n_pad), jnp.float32),
      grid=(n_pad // tm,),
      in_specs=in_specs,
      out_specs=pl.BlockSpec((OUT, tm), lambda i: (0, i)),
      compiler_params=pltpu.CompilerParams(dimension_semantics=("parallel",)),
      cost_estimate=cost,
  )(p1t, p2t, *weights)

  return out[:, :n].T.reshape(*batches, OUT)


# ------------------------------ synthetic params ------------------------------
def init_params(key):
  """Deterministic synthetic parameters matching TwoStageMLP's shapes (torch layout)."""
  n_linear = 1 + NUM_LAYERS + 1 + 1 + NUM_LAYERS + 1     # 16 Linear layers
  keys = list(jax.random.split(key, 2 * n_linear + 2))
  it = iter(keys)

  def lin(fan_in, fan_out):
    bound = 1.0 / math.sqrt(fan_in)
    w = jax.random.uniform(next(it), (fan_out, fan_in), jnp.float32, -bound, bound)
    b = jax.random.uniform(next(it), (fan_out,), jnp.float32, -bound, bound)
    return w, b

  freqs = jnp.asarray(FREQS, jnp.float32)
  basis_1 = jax.random.normal(next(it), (IN1, NF), jnp.float32) * freqs
  basis_2 = jax.random.normal(next(it), (IN2, NF), jnp.float32) * freqs

  init_w, init_b = lin(DIM1, HIDDEN)
  skip1 = HIDDEN + DIM1
  l1 = [lin(skip1 if (i % SKIP == 0 and i != NUM_LAYERS - 1) else HIDDEN, HIDDEN)
        for i in range(NUM_LAYERS)]
  inter_w, inter_b = lin(HIDDEN, INTERMEDIATE)
  fi_w, fi_b = lin(MID, HIDDEN)
  skip2 = HIDDEN + MID
  l2 = [lin(skip2 if (i % SKIP == 0 and i != NUM_LAYERS - 1) else HIDDEN, HIDDEN)
        for i in range(NUM_LAYERS)]
  out_w, out_b = lin(HIDDEN, OUT)

  return dict(
      basis_1=basis_1, basis_2=basis_2,
      init_w=init_w, init_b=init_b,
      l1_w=[w for w, _ in l1], l1_b=[b for _, b in l1],
      inter_w=inter_w, inter_b=inter_b,
      from_inter_w=fi_w, from_inter_b=fi_b,
      l2_w=[w for w, _ in l2], l2_b=[b for _, b in l2],
      out_w=out_w, out_b=out_b)


# --------------------------------- reference ----------------------------------
def reference_forward(i1, i2, params):
  """Pure-JAX replica of the torch forward (cat/cos based), for validation.

  Layer matmuls use bf16 operands with f32 accumulation to match the kernel's
  single-pass MXU precision (perf guidance: no Precision.HIGHEST); the fourier
  mapping itself is kept at full f32 precision, as in the kernel.
  """
  f32, bf16 = jnp.float32, jnp.bfloat16
  relu = jax.nn.relu

  def lin(x, w, b):
    return jnp.dot(x.astype(bf16), w.T.astype(bf16), preferred_element_type=f32) + b

  def fourier(x, basis):
    m = jnp.dot(x, basis, precision=jax.lax.Precision.HIGHEST)
    return jnp.concatenate([x, jnp.sin(m), jnp.cos(m)], axis=-1)

  batches = i1.shape[:-1]
  x1 = i1.reshape(-1, IN1).astype(f32)
  x2 = i2.reshape(-1, IN2).astype(f32)

  init = fourier(x1, params["basis_1"])
  x = lin(init, params["init_w"], params["init_b"])
  for i in range(NUM_LAYERS):
    if i != NUM_LAYERS - 1 and i % SKIP == 0:
      x = jnp.concatenate([x, init], axis=-1)
    x = lin(relu(x), params["l1_w"][i], params["l1_b"][i])
  x = jax.nn.sigmoid(lin(relu(x), params["inter_w"], params["inter_b"]))

  mid = jnp.concatenate([x, fourier(x2, params["basis_2"])], axis=-1)
  x = lin(mid, params["from_inter_w"], params["from_inter_b"])
  for i in range(NUM_LAYERS):
    if i != NUM_LAYERS - 1 and i % SKIP == 0:
      x = jnp.concatenate([x, mid], axis=-1)
    x = lin(relu(x), params["l2_w"][i], params["l2_b"][i])
  out = lin(relu(x), params["out_w"], params["out_b"])
  return out.reshape(*batches, OUT)


# ----------------------------------- demo --------------------------------------
if __name__ == "__main__":
  key = jax.random.PRNGKey(0)
  k1, k2, kp = jax.random.split(key, 3)
  params = init_params(kp)

  # Small demo: batches = (2, 200) -> N = 400 points in [0, 1)^3.
  # The tile heuristic picks tm = 256 -> 2 "parallel" grid steps + padding path.
  i1 = jax.random.uniform(k1, (2, 200, IN1), jnp.float32)
  i2 = jax.random.uniform(k2, (2, 200, IN2), jnp.float32)

  out = jax.block_until_ready(two_stage_mlp_forward(i1, i2, params))
  ref = jax.block_until_ready(reference_forward(i1, i2, params))

  assert out.shape == (2, 200, OUT), out.shape
  max_err = float(jnp.max(jnp.abs(out - ref)))
  assert jnp.allclose(out, ref, atol=1e-3, rtol=1e-3), f"max_err={max_err}"

  print("KERNEL_OK")
</pallas_src>

<mosaic_0001>
module attributes {stable_mosaic.version = 11 : i64} {
  func.func @_two_stage_mlp_kernel(%arg0: i32, %arg1: memref<3x256xf32, #tpu.memory_space<vmem>>, %arg2: memref<3x256xf32, #tpu.memory_space<vmem>>, %arg3: memref<24x3xf32, #tpu.memory_space<vmem>>, %arg4: memref<24x3xf32, #tpu.memory_space<vmem>>, %arg5: memref<12x128x128xbf16, #tpu.memory_space<vmem>>, %arg6: memref<6x128x24xbf16, #tpu.memory_space<vmem>>, %arg7: memref<3x128x1xf32, #tpu.memory_space<vmem>>, %arg8: memref<14x128x1xf32, #tpu.memory_space<vmem>>, %arg9: memref<1x128xbf16, #tpu.memory_space<vmem>>, %arg10: memref<1x1xf32, #tpu.memory_space<vmem>>, %arg11: memref<3x128xbf16, #tpu.memory_space<vmem>>, %arg12: memref<3x1xf32, #tpu.memory_space<vmem>>, %arg13: memref<3x256xf32, #tpu.memory_space<vmem>>) attributes {dimension_semantics = [#tpu.dimension_semantics<parallel>], iteration_bounds = array<i64: 2>, scalar_prefetch = 0 : i64, scratch_operands = 0 : i64, tpu.core_type = #tpu.core_type<tc>, window_params = [{transform_indices = @transform_0, window_bounds = array<i64: 3, 256>}, {transform_indices = @transform_1, window_bounds = array<i64: 3, 256>}, {pipeline_mode = #tpu.pipeline_mode<synchronous>, transform_indices = @transform_2, window_bounds = array<i64: 24, 3>}, {pipeline_mode = #tpu.pipeline_mode<synchronous>, transform_indices = @transform_3, window_bounds = array<i64: 24, 3>}, {pipeline_mode = #tpu.pipeline_mode<synchronous>, transform_indices = @transform_4, window_bounds = array<i64: 12, 128, 128>}, {pipeline_mode = #tpu.pipeline_mode<synchronous>, transform_indices = @transform_5, window_bounds = array<i64: 6, 128, 24>}, {pipeline_mode = #tpu.pipeline_mode<synchronous>, transform_indices = @transform_6, window_bounds = array<i64: 3, 128, 1>}, {pipeline_mode = #tpu.pipeline_mode<synchronous>, transform_indices = @transform_7, window_bounds = array<i64: 14, 128, 1>}, {pipeline_mode = #tpu.pipeline_mode<synchronous>, transform_indices = @transform_8, window_bounds = array<i64: 1, 128>}, {pipeline_mode = #tpu.pipeline_mode<synchronous>, transform_indices = @transform_9, window_bounds = array<i64: 1, 1>}, {pipeline_mode = #tpu.pipeline_mode<synchronous>, transform_indices = @transform_10, window_bounds = array<i64: 3, 128>}, {pipeline_mode = #tpu.pipeline_mode<synchronous>, transform_indices = @transform_11, window_bounds = array<i64: 3, 1>}, {transform_indices = @transform_12, window_bounds = array<i64: 3, 256>}]} {
    %c0 = arith.constant 0 : index
    %c0_0 = arith.constant 0 : index
    %0 = vector.load %arg1[%c0, %c0_0] : memref<3x256xf32, #tpu.memory_space<vmem>>, vector<3x256xf32>
    %c0_1 = arith.constant 0 : index
    %c0_2 = arith.constant 0 : index
    %1 = vector.load %arg3[%c0_1, %c0_2] : memref<24x3xf32, #tpu.memory_space<vmem>>, vector<24x3xf32>
    %2 = vector.extract_strided_slice %1 {offsets = [0, 0], sizes = [24, 1], strides = [1, 1]} : vector<24x3xf32> to vector<24x1xf32>
    %3 = vector.extract_strided_slice %0 {offsets = [0, 0], sizes = [1, 256], strides = [1, 1]} : vector<3x256xf32> to vector<1x256xf32>
    %4 = vector.broadcast %2 : vector<24x1xf32> to vector<24x256xf32>
    %5 = vector.broadcast %3 : vector<1x256xf32> to vector<24x256xf32>
    %6 = arith.mulf %4, %5 : vector<24x256xf32>
    %7 = vector.extract_strided_slice %1 {offsets = [0, 1], sizes = [24, 1], strides = [1, 1]} : vector<24x3xf32> to vector<24x1xf32>
    %8 = vector.extract_strided_slice %0 {offsets = [1, 0], sizes = [1, 256], strides = [1, 1]} : vector<3x256xf32> to vector<1x256xf32>
    %9 = vector.broadcast %7 : vector<24x1xf32> to vector<24x256xf32>
    %10 = vector.broadcast %8 : vector<1x256xf32> to vector<24x256xf32>
    %11 = arith.mulf %9, %10 : vector<24x256xf32>
    %12 = arith.addf %6, %11 : vector<24x256xf32>
    %13 = vector.extract_strided_slice %1 {offsets = [0, 2], sizes = [24, 1], strides = [1, 1]} : vector<24x3xf32> to vector<24x1xf32>
    %14 = vector.extract_strided_slice %0 {offsets = [2, 0], sizes = [1, 256], strides = [1, 1]} : vector<3x256xf32> to vector<1x256xf32>
    %15 = vector.broadcast %13 : vector<24x1xf32> to vector<24x256xf32>
    %16 = vector.broadcast %14 : vector<1x256xf32> to vector<24x256xf32>
    %17 = arith.mulf %15, %16 : vector<24x256xf32>
    %18 = arith.addf %12, %17 : vector<24x256xf32>
    %19 = tpu.iota {dimensions = array<i32: 0>} : vector<24x256xi32>
    %c13_i32 = arith.constant 13 : i32
    %20 = vector.broadcast %c13_i32 : i32 to vector<24x256xi32>
    %21 = arith.cmpi sge, %19, %20 : vector<24x256xi32>
    %cst = arith.constant 1.57079637 : f32
    %cst_3 = arith.constant 0.000000e+00 : f32
    %22 = vector.broadcast %cst : f32 to vector<24x256xf32>
    %23 = vector.broadcast %cst_3 : f32 to vector<24x256xf32>
    %24 = arith.select %21, %22, %23 : vector<24x256xi1>, vector<24x256xf32>
    %c3_i32 = arith.constant 3 : i32
    %25 = vector.broadcast %c3_i32 : i32 to vector<24x256xi32>
    %26 = arith.cmpi slt, %19, %25 : vector<24x256xi32>
    %27 = arith.addf %18, %24 : vector<24x256xf32>
    %28 = math.sin %27 : vector<24x256xf32>
    %29 = arith.select %26, %18, %28 : vector<24x256xi1>, vector<24x256xf32>
    %30 = arith.truncf %29 : vector<24x256xf32> to vector<24x256xbf16>
    %cst_4 = arith.constant 0.000000e+00 : f32
    %31 = vector.broadcast %cst_4 : f32 to vector<24x256xf32>
    %32 = arith.maximumf %29, %31 : vector<24x256xf32>
    %33 = arith.truncf %32 : vector<24x256xf32> to vector<24x256xbf16>
    %c0_5 = arith.constant 0 : index
    %c0_6 = arith.constant 0 : index
    %c0_7 = arith.constant 0 : index
    %34 = vector.load %arg6[%c0_5, %c0_6, %c0_7] : memref<6x128x24xbf16, #tpu.memory_space<vmem>>, vector<1x128x24xbf16>
    %35 = vector.shape_cast %34 : vector<1x128x24xbf16> to vector<128x24xbf16>
    %cst_8 = arith.constant dense<0.000000e+00> : vector<128x256xf32>
    %36 = tpu.matmul %35, %30, %cst_8 {dimension_numbers = #tpu.dot_dimension_numbers<[1], [0], [0], [1], [0, 0, 1, 1], [], []>} : vector<128x24xbf16>, vector<24x256xbf16>, vector<128x256xf32> -> vector<128x256xf32>
    %c0_9 = arith.constant 0 : index
    %c0_10 = arith.constant 0 : index
    %c0_11 = arith.constant 0 : index
    %37 = vector.load %arg8[%c0_9, %c0_10, %c0_11] : memref<14x128x1xf32, #tpu.memory_space<vmem>>, vector<1x128x1xf32>
    %38 = vector.shape_cast %37 : vector<1x128x1xf32> to vector<128x1xf32>
    %39 = vector.broadcast %38 : vector<128x1xf32> to vector<128x256xf32>
    %40 = arith.addf %36, %39 : vector<128x256xf32>
    %c0_12 = arith.constant 0 : index
    %c0_13 = arith.constant 0 : index
    %c0_14 = arith.constant 0 : index
    %41 = vector.load %arg5[%c0_12, %c0_13, %c0_14] : memref<12x128x128xbf16, #tpu.memory_space<vmem>>, vector<1x128x128xbf16>
    %42 = vector.shape_cast %41 : vector<1x128x128xbf16> to vector<128x128xbf16>
    %cst_15 = arith.constant 0.000000e+00 : f32
    %43 = vector.broadcast %cst_15 : f32 to vector<128x256xf32>
    %44 = arith.maximumf %40, %43 : vector<128x256xf32>
    %45 = arith.truncf %44 : vector<128x256xf32> to vector<128x256xbf16>
    %cst_16 = arith.constant dense<0.000000e+00> : vector<128x256xf32>
    %46 = tpu.matmul %42, %45, %cst_16 {dimension_numbers = #tpu.dot_dimension_numbers<[1], [0], [0], [1], [0, 0, 1, 1], [], []>} : vector<128x128xbf16>, vector<128x256xbf16>, vector<128x256xf32> -> vector<128x256xf32>
    %c1 = arith.constant 1 : index
    %c0_17 = arith.constant 0 : index
    %c0_18 = arith.constant 0 : index
    %47 = vector.load %arg6[%c1, %c0_17, %c0_18] : memref<6x128x24xbf16, #tpu.memory_space<vmem>>, vector<1x128x24xbf16>
    %48 = vector.shape_cast %47 : vector<1x128x24xbf16> to vector<128x24xbf16>
    %cst_19 = arith.constant dense<0.000000e+00> : vector<128x256xf32>
    %49 = tpu.matmul %48, %33, %cst_19 {dimension_numbers = #tpu.dot_dimension_numbers<[1], [0], [0], [1], [0, 0, 1, 1], [], []>} : vector<128x24xbf16>, vector<24x256xbf16>, vector<128x256xf32> -> vector<128x256xf32>
    %50 = arith.addf %46, %49 : vector<128x256xf32>
    %c1_20 = arith.constant 1 : index
    %c0_21 = arith.constant 0 : index
    %c0_22 = arith.constant 0 : index
    %51 = vector.load %arg8[%c1_20, %c0_21, %c0_22] : memref<14x128x1xf32, #tpu.memory_space<vmem>>, vector<1x128x1xf32>
    %52 = vector.shape_cast %51 : vector<1x128x1xf32> to vector<128x1xf32>
    %53 = vector.broadcast %52 : vector<128x1xf32> to vector<128x256xf32>
    %54 = arith.addf %50, %53 : vector<128x256xf32>
    %c1_23 = arith.constant 1 : index
    %c0_24 = arith.constant 0 : index
    %c0_25 = arith.constant 0 : index
    %55 = vector.load %arg5[%c1_23, %c0_24, %c0_25] : memref<12x128x128xbf16, #tpu.memory_space<vmem>>, vector<1x128x128xbf16>
    %56 = vector.shape_cast %55 : vector<1x128x128xbf16> to vector<128x128xbf16>
    %cst_26 = arith.constant 0.000000e+00 : f32
    %57 = vector.broadcast %cst_26 : f32 to vector<128x256xf32>
    %58 = arith.maximumf %54, %57 : vector<128x256xf32>
    %59 = arith.truncf %58 : vector<128x256xf32> to vector<128x256xbf16>
    %cst_27 = arith.constant dense<0.000000e+00> : vector<128x256xf32>
    %60 = tpu.matmul %56, %59, %cst_27 {dimension_numbers = #tpu.dot_dimension_numbers<[1], [0], [0], [1], [0, 0, 1, 1], [], []>} : vector<128x128xbf16>, vector<128x256xbf16>, vector<128x256xf32> -> vector<128x256xf32>
    %c2 = arith.constant 2 : index
    %c0_28 = arith.constant 0 : index
    %c0_29 = arith.constant 0 : index
    %61 = vector.load %arg8[%c2, %c0_28, %c0_29] : memref<14x128x1xf32, #tpu.memory_space<vmem>>, vector<1x128x1xf32>
    %62 = vector.shape_cast %61 : vector<1x128x1xf32> to vector<128x1xf32>
    %63 = vector.broadcast %62 : vector<128x1xf32> to vector<128x256xf32>
    %64 = arith.addf %60, %63 : vector<128x256xf32>
    %c2_30 = arith.constant 2 : index
    %c0_31 = arith.constant 0 : index
    %c0_32 = arith.constant 0 : index
    %65 = vector.load %arg5[%c2_30, %c0_31, %c0_32] : memref<12x128x128xbf16, #tpu.memory_space<vmem>>, vector<1x128x128xbf16>
    %66 = vector.shape_cast %65 : vector<1x128x128xbf16> to vector<128x128xbf16>
    %cst_33 = arith.constant 0.000000e+00 : f32
    %67 = vector.broadcast %cst_33 : f32 to vector<128x256xf32>
    %68 = arith.maximumf %64, %67 : vector<128x256xf32>
    %69 = arith.truncf %68 : vector<128x256xf32> to vector<128x256xbf16>
    %cst_34 = arith.constant dense<0.000000e+00> : vector<128x256xf32>
    %70 = tpu.matmul %66, %69, %cst_34 {dimension_numbers = #tpu.dot_dimension_numbers<[1], [0], [0], [1], [0, 0, 1, 1], [], []>} : vector<128x128xbf16>, vector<128x256xbf16>, vector<128x256xf32> -> vector<128x256xf32>
    %c3 = arith.constant 3 : index
    %c0_35 = arith.constant 0 : index
    %c0_36 = arith.constant 0 : index
    %71 = vector.load %arg8[%c3, %c0_35, %c0_36] : memref<14x128x1xf32, #tpu.memory_space<vmem>>, vector<1x128x1xf32>
    %72 = vector.shape_cast %71 : vector<1x128x1xf32> to vector<128x1xf32>
    %73 = vector.broadcast %72 : vector<128x1xf32> to vector<128x256xf32>
    %74 = arith.addf %70, %73 : vector<128x256xf32>
    %c3_37 = arith.constant 3 : index
    %c0_38 = arith.constant 0 : index
    %c0_39 = arith.constant 0 : index
    %75 = vector.load %arg5[%c3_37, %c0_38, %c0_39] : memref<12x128x128xbf16, #tpu.memory_space<vmem>>, vector<1x128x128xbf16>
    %76 = vector.shape_cast %75 : vector<1x128x128xbf16> to vector<128x128xbf16>
    %cst_40 = arith.constant 0.000000e+00 : f32
    %77 = vector.broadcast %cst_40 : f32 to vector<128x256xf32>
    %78 = arith.maximumf %74, %77 : vector<128x256xf32>
    %79 = arith.truncf %78 : vector<128x256xf32> to vector<128x256xbf16>
    %cst_41 = arith.constant dense<0.000000e+00> : vector<128x256xf32>
    %80 = tpu.matmul %76, %79, %cst_41 {dimension_numbers = #tpu.dot_dimension_numbers<[1], [0], [0], [1], [0, 0, 1, 1], [], []>} : vector<128x128xbf16>, vector<128x256xbf16>, vector<128x256xf32> -> vector<128x256xf32>
    %c2_42 = arith.constant 2 : index
    %c0_43 = arith.constant 0 : index
    %c0_44 = arith.constant 0 : index
    %81 = vector.load %arg6[%c2_42, %c0_43, %c0_44] : memref<6x128x24xbf16, #tpu.memory_space<vmem>>, vector<1x128x24xbf16>
    %82 = vector.shape_cast %81 : vector<1x128x24xbf16> to vector<128x24xbf16>
    %cst_45 = arith.constant dense<0.000000e+00> : vector<128x256xf32>
    %83 = tpu.matmul %82, %33, %cst_45 {dimension_numbers = #tpu.dot_dimension_numbers<[1], [0], [0], [1], [0, 0, 1, 1], [], []>} : vector<128x24xbf16>, vector<24x256xbf16>, vector<128x256xf32> -> vector<128x256xf32>
    %84 = arith.addf %80, %83 : vector<128x256xf32>
    %c4 = arith.constant 4 : index
    %c0_46 = arith.constant 0 : index
    %c0_47 = arith.constant 0 : index
    %85 = vector.load %arg8[%c4, %c0_46, %c0_47] : memref<14x128x1xf32, #tpu.memory_space<vmem>>, vector<1x128x1xf32>
    %86 = vector.shape_cast %85 : vector<1x128x1xf32> to vector<128x1xf32>
    %87 = vector.broadcast %86 : vector<128x1xf32> to vector<128x256xf32>
    %88 = arith.addf %84, %87 : vector<128x256xf32>
    %c4_48 = arith.constant 4 : index
    %c0_49 = arith.constant 0 : index
    %c0_50 = arith.constant 0 : index
    %89 = vector.load %arg5[%c4_48, %c0_49, %c0_50] : memref<12x128x128xbf16, #tpu.memory_space<vmem>>, vector<1x128x128xbf16>
    %90 = vector.shape_cast %89 : vector<1x128x128xbf16> to vector<128x128xbf16>
    %cst_51 = arith.constant 0.000000e+00 : f32
    %91 = vector.broadcast %cst_51 : f32 to vector<128x256xf32>
    %92 = arith.maximumf %88, %91 : vector<128x256xf32>
    %93 = arith.truncf %92 : vector<128x256xf32> to vector<128x256xbf16>
    %cst_52 = arith.constant dense<0.000000e+00> : vector<128x256xf32>
    %94 = tpu.matmul %90, %93, %cst_52 {dimension_numbers = #tpu.dot_dimension_numbers<[1], [0], [0], [1], [0, 0, 1, 1], [], []>} : vector<128x128xbf16>, vector<128x256xbf16>, vector<128x256xf32> -> vector<128x256xf32>
    %c5 = arith.constant 5 : index
    %c0_53 = arith.constant 0 : index
    %c0_54 = arith.constant 0 : index
    %95 = vector.load %arg8[%c5, %c0_53, %c0_54] : memref<14x128x1xf32, #tpu.memory_space<vmem>>, vector<1x128x1xf32>
    %96 = vector.shape_cast %95 : vector<1x128x1xf32> to vector<128x1xf32>
    %97 = vector.broadcast %96 : vector<128x1xf32> to vector<128x256xf32>
    %98 = arith.addf %94, %97 : vector<128x256xf32>
    %c5_55 = arith.constant 5 : index
    %c0_56 = arith.constant 0 : index
    %c0_57 = arith.constant 0 : index
    %99 = vector.load %arg5[%c5_55, %c0_56, %c0_57] : memref<12x128x128xbf16, #tpu.memory_space<vmem>>, vector<1x128x128xbf16>
    %100 = vector.shape_cast %99 : vector<1x128x128xbf16> to vector<128x128xbf16>
    %cst_58 = arith.constant 0.000000e+00 : f32
    %101 = vector.broadcast %cst_58 : f32 to vector<128x256xf32>
    %102 = arith.maximumf %98, %101 : vector<128x256xf32>
    %103 = arith.truncf %102 : vector<128x256xf32> to vector<128x256xbf16>
    %cst_59 = arith.constant dense<0.000000e+00> : vector<128x256xf32>
    %104 = tpu.matmul %100, %103, %cst_59 {dimension_numbers = #tpu.dot_dimension_numbers<[1], [0], [0], [1], [0, 0, 1, 1], [], []>} : vector<128x128xbf16>, vector<128x256xbf16>, vector<128x256xf32> -> vector<128x256xf32>
    %c6 = arith.constant 6 : index
    %c0_60 = arith.constant 0 : index
    %c0_61 = arith.constant 0 : index
    %105 = vector.load %arg8[%c6, %c0_60, %c0_61] : memref<14x128x1xf32, #tpu.memory_space<vmem>>, vector<1x128x1xf32>
    %106 = vector.shape_cast %105 : vector<1x128x1xf32> to vector<128x1xf32>
    %107 = vector.broadcast %106 : vector<128x1xf32> to vector<128x256xf32>
    %108 = arith.addf %104, %107 : vector<128x256xf32>
    %c0_62 = arith.constant 0 : index
    %c0_63 = arith.constant 0 : index
    %109 = vector.load %arg9[%c0_62, %c0_63] : memref<1x128xbf16, #tpu.memory_space<vmem>>, vector<1x128xbf16>
    %cst_64 = arith.constant 0.000000e+00 : f32
    %110 = vector.broadcast %cst_64 : f32 to vector<128x256xf32>
    %111 = arith.maximumf %108, %110 : vector<128x256xf32>
    %112 = arith.truncf %111 : vector<128x256xf32> to vector<128x256xbf16>
    %cst_65 = arith.constant dense<0.000000e+00> : vector<1x256xf32>
    %113 = tpu.matmul %109, %112, %cst_65 {dimension_numbers = #tpu.dot_dimension_numbers<[1], [0], [0], [1], [0, 0, 1, 1], [], []>} : vector<1x128xbf16>, vector<128x256xbf16>, vector<1x256xf32> -> vector<1x256xf32>
    %c0_66 = arith.constant 0 : index
    %c0_67 = arith.constant 0 : index
    %114 = vector.load %arg10[%c0_66, %c0_67] : memref<1x1xf32, #tpu.memory_space<vmem>>, vector<1x1xf32>
    %115 = vector.broadcast %114 : vector<1x1xf32> to vector<1x256xf32>
    %116 = arith.addf %113, %115 : vector<1x256xf32>
    %117 = arith.negf %116 : vector<1x256xf32>
    %118 = math.exp %117 : vector<1x256xf32>
    %cst_68 = arith.constant 1.000000e+00 : f32
    %119 = vector.broadcast %cst_68 : f32 to vector<1x256xf32>
    %120 = arith.addf %119, %118 : vector<1x256xf32>
    %121 = arith.divf %119, %120 : vector<1x256xf32>
    %c0_69 = arith.constant 0 : index
    %c0_70 = arith.constant 0 : index
    %122 = vector.load %arg2[%c0_69, %c0_70] : memref<3x256xf32, #tpu.memory_space<vmem>>, vector<3x256xf32>
    %c0_71 = arith.constant 0 : index
    %c0_72 = arith.constant 0 : index
    %123 = vector.load %arg4[%c0_71, %c0_72] : memref<24x3xf32, #tpu.memory_space<vmem>>, vector<24x3xf32>
    %124 = vector.extract_strided_slice %123 {offsets = [0, 0], sizes = [24, 1], strides = [1, 1]} : vector<24x3xf32> to vector<24x1xf32>
    %125 = vector.extract_strided_slice %122 {offsets = [0, 0], sizes = [1, 256], strides = [1, 1]} : vector<3x256xf32> to vector<1x256xf32>
    %126 = vector.broadcast %124 : vector<24x1xf32> to vector<24x256xf32>
    %127 = vector.broadcast %125 : vector<1x256xf32> to vector<24x256xf32>
    %128 = arith.mulf %126, %127 : vector<24x256xf32>
    %129 = vector.extract_strided_slice %123 {offsets = [0, 1], sizes = [24, 1], strides = [1, 1]} : vector<24x3xf32> to vector<24x1xf32>
    %130 = vector.extract_strided_slice %122 {offsets = [1, 0], sizes = [1, 256], strides = [1, 1]} : vector<3x256xf32> to vector<1x256xf32>
    %131 = vector.broadcast %129 : vector<24x1xf32> to vector<24x256xf32>
    %132 = vector.broadcast %130 : vector<1x256xf32> to vector<24x256xf32>
    %133 = arith.mulf %131, %132 : vector<24x256xf32>
    %134 = arith.addf %128, %133 : vector<24x256xf32>
    %135 = vector.extract_strided_slice %123 {offsets = [0, 2], sizes = [24, 1], strides = [1, 1]} : vector<24x3xf32> to vector<24x1xf32>
    %136 = vector.extract_strided_slice %122 {offsets = [2, 0], sizes = [1, 256], strides = [1, 1]} : vector<3x256xf32> to vector<1x256xf32>
    %137 = vector.broadcast %135 : vector<24x1xf32> to vector<24x256xf32>
    %138 = vector.broadcast %136 : vector<1x256xf32> to vector<24x256xf32>
    %139 = arith.mulf %137, %138 : vector<24x256xf32>
    %140 = arith.addf %134, %139 : vector<24x256xf32>
    %141 = tpu.iota {dimensions = array<i32: 0>} : vector<24x256xi32>
    %c13_i32_73 = arith.constant 13 : i32
    %142 = vector.broadcast %c13_i32_73 : i32 to vector<24x256xi32>
    %143 = arith.cmpi sge, %141, %142 : vector<24x256xi32>
    %cst_74 = arith.constant 1.57079637 : f32
    %cst_75 = arith.constant 0.000000e+00 : f32
    %144 = vector.broadcast %cst_74 : f32 to vector<24x256xf32>
    %145 = vector.broadcast %cst_75 : f32 to vector<24x256xf32>
    %146 = arith.select %143, %144, %145 : vector<24x256xi1>, vector<24x256xf32>
    %c3_i32_76 = arith.constant 3 : i32
    %147 = vector.broadcast %c3_i32_76 : i32 to vector<24x256xi32>
    %148 = arith.cmpi slt, %141, %147 : vector<24x256xi32>
    %149 = arith.addf %140, %146 : vector<24x256xf32>
    %150 = math.sin %149 : vector<24x256xf32>
    %151 = arith.select %148, %140, %150 : vector<24x256xi1>, vector<24x256xf32>
    %152 = arith.truncf %151 : vector<24x256xf32> to vector<24x256xbf16>
    %cst_77 = arith.constant 0.000000e+00 : f32
    %153 = vector.broadcast %cst_77 : f32 to vector<24x256xf32>
    %154 = arith.maximumf %151, %153 : vector<24x256xf32>
    %155 = arith.truncf %154 : vector<24x256xf32> to vector<24x256xbf16>
    %c3_78 = arith.constant 3 : index
    %c0_79 = arith.constant 0 : index
    %c0_80 = arith.constant 0 : index
    %156 = vector.load %arg6[%c3_78, %c0_79, %c0_80] : memref<6x128x24xbf16, #tpu.memory_space<vmem>>, vector<1x128x24xbf16>
    %157 = vector.shape_cast %156 : vector<1x128x24xbf16> to vector<128x24xbf16>
    %cst_81 = arith.constant dense<0.000000e+00> : vector<128x256xf32>
    %158 = tpu.matmul %157, %152, %cst_81 {dimension_numbers = #tpu.dot_dimension_numbers<[1], [0], [0], [1], [0, 0, 1, 1], [], []>} : vector<128x24xbf16>, vector<24x256xbf16>, vector<128x256xf32> -> vector<128x256xf32>
    %c0_82 = arith.constant 0 : index
    %c0_83 = arith.constant 0 : index
    %c0_84 = arith.constant 0 : index
    %159 = vector.load %arg7[%c0_82, %c0_83, %c0_84] : memref<3x128x1xf32, #tpu.memory_space<vmem>>, vector<1x128x1xf32>
    %160 = vector.shape_cast %159 : vector<1x128x1xf32> to vector<128x1xf32>
    %161 = vector.broadcast %160 : vector<128x1xf32> to vector<128x256xf32>
    %162 = vector.broadcast %121 : vector<1x256xf32> to vector<128x256xf32>
    %163 = arith.mulf %161, %162 : vector<128x256xf32>
    %164 = arith.addf %158, %163 : vector<128x256xf32>
    %c7 = arith.constant 7 : index
    %c0_85 = arith.constant 0 : index
    %c0_86 = arith.constant 0 : index
    %165 = vector.load %arg8[%c7, %c0_85, %c0_86] : memref<14x128x1xf32, #tpu.memory_space<vmem>>, vector<1x128x1xf32>
    %166 = vector.shape_cast %165 : vector<1x128x1xf32> to vector<128x1xf32>
    %167 = vector.broadcast %166 : vector<128x1xf32> to vector<128x256xf32>
    %168 = arith.addf %164, %167 : vector<128x256xf32>
    %c6_87 = arith.constant 6 : index
    %c0_88 = arith.constant 0 : index
    %c0_89 = arith.constant 0 : index
    %169 = vector.load %arg5[%c6_87, %c0_88, %c0_89] : memref<12x128x128xbf16, #tpu.memory_space<vmem>>, vector<1x128x128xbf16>
    %170 = vector.shape_cast %169 : vector<1x128x128xbf16> to vector<128x128xbf16>
    %cst_90 = arith.constant 0.000000e+00 : f32
    %171 = vector.broadcast %cst_90 : f32 to vector<128x256xf32>
    %172 = arith.maximumf %168, %171 : vector<128x256xf32>
    %173 = arith.truncf %172 : vector<128x256xf32> to vector<128x256xbf16>
    %cst_91 = arith.constant dense<0.000000e+00> : vector<128x256xf32>
    %174 = tpu.matmul %170, %173, %cst_91 {dimension_numbers = #tpu.dot_dimension_numbers<[1], [0], [0], [1], [0, 0, 1, 1], [], []>} : vector<128x128xbf16>, vector<128x256xbf16>, vector<128x256xf32> -> vector<128x256xf32>
    %c4_92 = arith.constant 4 : index
    %c0_93 = arith.constant 0 : index
    %c0_94 = arith.constant 0 : index
    %175 = vector.load %arg6[%c4_92, %c0_93, %c0_94] : memref<6x128x24xbf16, #tpu.memory_space<vmem>>, vector<1x128x24xbf16>
    %176 = vector.shape_cast %175 : vector<1x128x24xbf16> to vector<128x24xbf16>
    %cst_95 = arith.constant dense<0.000000e+00> : vector<128x256xf32>
    %177 = tpu.matmul %176, %155, %cst_95 {dimension_numbers = #tpu.dot_dimension_numbers<[1], [0], [0], [1], [0, 0, 1, 1], [], []>} : vector<128x24xbf16>, vector<24x256xbf16>, vector<128x256xf32> -> vector<128x256xf32>
    %178 = arith.addf %174, %177 : vector<128x256xf32>
    %c1_96 = arith.constant 1 : index
    %c0_97 = arith.constant 0 : index
    %c0_98 = arith.constant 0 : index
    %179 = vector.load %arg7[%c1_96, %c0_97, %c0_98] : memref<3x128x1xf32, #tpu.memory_space<vmem>>, vector<1x128x1xf32>
    %180 = vector.shape_cast %179 : vector<1x128x1xf32> to vector<128x1xf32>
    %181 = vector.broadcast %180 : vector<128x1xf32> to vector<128x256xf32>
    %182 = vector.broadcast %121 : vector<1x256xf32> to vector<128x256xf32>
    %183 = arith.mulf %181, %182 : vector<128x256xf32>
    %184 = arith.addf %178, %183 : vector<128x256xf32>
    %c8 = arith.constant 8 : index
    %c0_99 = arith.constant 0 : index
    %c0_100 = arith.constant 0 : index
    %185 = vector.load %arg8[%c8, %c0_99, %c0_100] : memref<14x128x1xf32, #tpu.memory_space<vmem>>, vector<1x128x1xf32>
    %186 = vector.shape_cast %185 : vector<1x128x1xf32> to vector<128x1xf32>
    %187 = vector.broadcast %186 : vector<128x1xf32> to vector<128x256xf32>
    %188 = arith.addf %184, %187 : vector<128x256xf32>
    %c7_101 = arith.constant 7 : index
    %c0_102 = arith.constant 0 : index
    %c0_103 = arith.constant 0 : index
    %189 = vector.load %arg5[%c7_101, %c0_102, %c0_103] : memref<12x128x128xbf16, #tpu.memory_space<vmem>>, vector<1x128x128xbf16>
    %190 = vector.shape_cast %189 : vector<1x128x128xbf16> to vector<128x128xbf16>
    %cst_104 = arith.constant 0.000000e+00 : f32
    %191 = vector.broadcast %cst_104 : f32 to vector<128x256xf32>
    %192 = arith.maximumf %188, %191 : vector<128x256xf32>
    %193 = arith.truncf %192 : vector<128x256xf32> to vector<128x256xbf16>
    %cst_105 = arith.constant dense<0.000000e+00> : vector<128x256xf32>
    %194 = tpu.matmul %190, %193, %cst_105 {dimension_numbers = #tpu.dot_dimension_numbers<[1], [0], [0], [1], [0, 0, 1, 1], [], []>} : vector<128x128xbf16>, vector<128x256xbf16>, vector<128x256xf32> -> vector<128x256xf32>
    %c9 = arith.constant 9 : index
    %c0_106 = arith.constant 0 : index
    %c0_107 = arith.constant 0 : index
    %195 = vector.load %arg8[%c9, %c0_106, %c0_107] : memref<14x128x1xf32, #tpu.memory_space<vmem>>, vector<1x128x1xf32>
    %196 = vector.shape_cast %195 : vector<1x128x1xf32> to vector<128x1xf32>
    %197 = vector.broadcast %196 : vector<128x1xf32> to vector<128x256xf32>
    %198 = arith.addf %194, %197 : vector<128x256xf32>
    %c8_108 = arith.constant 8 : index
    %c0_109 = arith.constant 0 : index
    %c0_110 = arith.constant 0 : index
    %199 = vector.load %arg5[%c8_108, %c0_109, %c0_110] : memref<12x128x128xbf16, #tpu.memory_space<vmem>>, vector<1x128x128xbf16>
    %200 = vector.shape_cast %199 : vector<1x128x128xbf16> to vector<128x128xbf16>
    %cst_111 = arith.constant 0.000000e+00 : f32
    %201 = vector.broadcast %cst_111 : f32 to vector<128x256xf32>
    %202 = arith.maximumf %198, %201 : vector<128x256xf32>
    %203 = arith.truncf %202 : vector<128x256xf32> to vector<128x256xbf16>
    %cst_112 = arith.constant dense<0.000000e+00> : vector<128x256xf32>
    %204 = tpu.matmul %200, %203, %cst_112 {dimension_numbers = #tpu.dot_dimension_numbers<[1], [0], [0], [1], [0, 0, 1, 1], [], []>} : vector<128x128xbf16>, vector<128x256xbf16>, vector<128x256xf32> -> vector<128x256xf32>
    %c10 = arith.constant 10 : index
    %c0_113 = arith.constant 0 : index
    %c0_114 = arith.constant 0 : index
    %205 = vector.load %arg8[%c10, %c0_113, %c0_114] : memref<14x128x1xf32, #tpu.memory_space<vmem>>, vector<1x128x1xf32>
    %206 = vector.shape_cast %205 : vector<1x128x1xf32> to vector<128x1xf32>
    %207 = vector.broadcast %206 : vector<128x1xf32> to vector<128x256xf32>
    %208 = arith.addf %204, %207 : vector<128x256xf32>
    %c9_115 = arith.constant 9 : index
    %c0_116 = arith.constant 0 : index
    %c0_117 = arith.constant 0 : index
    %209 = vector.load %arg5[%c9_115, %c0_116, %c0_117] : memref<12x128x128xbf16, #tpu.memory_space<vmem>>, vector<1x128x128xbf16>
    %210 = vector.shape_cast %209 : vector<1x128x128xbf16> to vector<128x128xbf16>
    %cst_118 = arith.constant 0.000000e+00 : f32
    %211 = vector.broadcast %cst_118 : f32 to vector<128x256xf32>
    %212 = arith.maximumf %208, %211 : vector<128x256xf32>
    %213 = arith.truncf %212 : vector<128x256xf32> to vector<128x256xbf16>
    %cst_119 = arith.constant dense<0.000000e+00> : vector<128x256xf32>
    %214 = tpu.matmul %210, %213, %cst_119 {dimension_numbers = #tpu.dot_dimension_numbers<[1], [0], [0], [1], [0, 0, 1, 1], [], []>} : vector<128x128xbf16>, vector<128x256xbf16>, vector<128x256xf32> -> vector<128x256xf32>
    %c5_120 = arith.constant 5 : index
    %c0_121 = arith.constant 0 : index
    %c0_122 = arith.constant 0 : index
    %215 = vector.load %arg6[%c5_120, %c0_121, %c0_122] : memref<6x128x24xbf16, #tpu.memory_space<vmem>>, vector<1x128x24xbf16>
    %216 = vector.shape_cast %215 : vector<1x128x24xbf16> to vector<128x24xbf16>
    %cst_123 = arith.constant dense<0.000000e+00> : vector<128x256xf32>
    %217 = tpu.matmul %216, %155, %cst_123 {dimension_numbers = #tpu.dot_dimension_numbers<[1], [0], [0], [1], [0, 0, 1, 1], [], []>} : vector<128x24xbf16>, vector<24x256xbf16>, vector<128x256xf32> -> vector<128x256xf32>
    %218 = arith.addf %214, %217 : vector<128x256xf32>
    %c2_124 = arith.constant 2 : index
    %c0_125 = arith.constant 0 : index
    %c0_126 = arith.constant 0 : index
    %219 = vector.load %arg7[%c2_124, %c0_125, %c0_126] : memref<3x128x1xf32, #tpu.memory_space<vmem>>, vector<1x128x1xf32>
    %220 = vector.shape_cast %219 : vector<1x128x1xf32> to vector<128x1xf32>
    %221 = vector.broadcast %220 : vector<128x1xf32> to vector<128x256xf32>
    %222 = vector.broadcast %121 : vector<1x256xf32> to vector<128x256xf32>
    %223 = arith.mulf %221, %222 : vector<128x256xf32>
    %224 = arith.addf %218, %223 : vector<128x256xf32>
    %c11 = arith.constant 11 : index
    %c0_127 = arith.constant 0 : index
    %c0_128 = arith.constant 0 : index
    %225 = vector.load %arg8[%c11, %c0_127, %c0_128] : memref<14x128x1xf32, #tpu.memory_space<vmem>>, vector<1x128x1xf32>
    %226 = vector.shape_cast %225 : vector<1x128x1xf32> to vector<128x1xf32>
    %227 = vector.broadcast %226 : vector<128x1xf32> to vector<128x256xf32>
    %228 = arith.addf %224, %227 : vector<128x256xf32>
    %c10_129 = arith.constant 10 : index
    %c0_130 = arith.constant 0 : index
    %c0_131 = arith.constant 0 : index
    %229 = vector.load %arg5[%c10_129, %c0_130, %c0_131] : memref<12x128x128xbf16, #tpu.memory_space<vmem>>, vector<1x128x128xbf16>
    %230 = vector.shape_cast %229 : vector<1x128x128xbf16> to vector<128x128xbf16>
    %cst_132 = arith.constant 0.000000e+00 : f32
    %231 = vector.broadcast %cst_132 : f32 to vector<128x256xf32>
    %232 = arith.maximumf %228, %231 : vector<128x256xf32>
    %233 = arith.truncf %232 : vector<128x256xf32> to vector<128x256xbf16>
    %cst_133 = arith.constant dense<0.000000e+00> : vector<128x256xf32>
    %234 = tpu.matmul %230, %233, %cst_133 {dimension_numbers = #tpu.dot_dimension_numbers<[1], [0], [0], [1], [0, 0, 1, 1], [], []>} : vector<128x128xbf16>, vector<128x256xbf16>, vector<128x256xf32> -> vector<128x256xf32>
    %c12 = arith.constant 12 : index
    %c0_134 = arith.constant 0 : index
    %c0_135 = arith.constant 0 : index
    %235 = vector.load %arg8[%c12, %c0_134, %c0_135] : memref<14x128x1xf32, #tpu.memory_space<vmem>>, vector<1x128x1xf32>
    %236 = vector.shape_cast %235 : vector<1x128x1xf32> to vector<128x1xf32>
    %237 = vector.broadcast %236 : vector<128x1xf32> to vector<128x256xf32>
    %238 = arith.addf %234, %237 : vector<128x256xf32>
    %c11_136 = arith.constant 11 : index
    %c0_137 = arith.constant 0 : index
    %c0_138 = arith.constant 0 : index
    %239 = vector.load %arg5[%c11_136, %c0_137, %c0_138] : memref<12x128x128xbf16, #tpu.memory_space<vmem>>, vector<1x128x128xbf16>
    %240 = vector.shape_cast %239 : vector<1x128x128xbf16> to vector<128x128xbf16>
    %cst_139 = arith.constant 0.000000e+00 : f32
    %241 = vector.broadcast %cst_139 : f32 to vector<128x256xf32>
    %242 = arith.maximumf %238, %241 : vector<128x256xf32>
    %243 = arith.truncf %242 : vector<128x256xf32> to vector<128x256xbf16>
    %cst_140 = arith.constant dense<0.000000e+00> : vector<128x256xf32>
    %244 = tpu.matmul %240, %243, %cst_140 {dimension_numbers = #tpu.dot_dimension_numbers<[1], [0], [0], [1], [0, 0, 1, 1], [], []>} : vector<128x128xbf16>, vector<128x256xbf16>, vector<128x256xf32> -> vector<128x256xf32>
    %c13 = arith.constant 13 : index
    %c0_141 = arith.constant 0 : index
    %c0_142 = arith.constant 0 : index
    %245 = vector.load %arg8[%c13, %c0_141, %c0_142] : memref<14x128x1xf32, #tpu.memory_space<vmem>>, vector<1x128x1xf32>
    %246 = vector.shape_cast %245 : vector<1x128x1xf32> to vector<128x1xf32>
    %247 = vector.broadcast %246 : vector<128x1xf32> to vector<128x256xf32>
    %248 = arith.addf %244, %247 : vector<128x256xf32>
    %c0_143 = arith.constant 0 : index
    %c0_144 = arith.constant 0 : index
    %249 = vector.load %arg11[%c0_143, %c0_144] : memref<3x128xbf16, #tpu.memory_space<vmem>>, vector<3x128xbf16>
    %cst_145 = arith.constant 0.000000e+00 : f32
    %250 = vector.broadcast %cst_145 : f32 to vector<128x256xf32>
    %251 = arith.maximumf %248, %250 : vector<128x256xf32>
    %252 = arith.truncf %251 : vector<128x256xf32> to vector<128x256xbf16>
    %cst_146 = arith.constant dense<0.000000e+00> : vector<3x256xf32>
    %253 = tpu.matmul %249, %252, %cst_146 {dimension_numbers = #tpu.dot_dimension_numbers<[1], [0], [0], [1], [0, 0, 1, 1], [], []>} : vector<3x128xbf16>, vector<128x256xbf16>, vector<3x256xf32> -> vector<3x256xf32>
    %c0_147 = arith.constant 0 : index
    %c0_148 = arith.constant 0 : index
    %254 = vector.load %arg12[%c0_147, %c0_148] : memref<3x1xf32, #tpu.memory_space<vmem>>, vector<3x1xf32>
    %255 = vector.broadcast %254 : vector<3x1xf32> to vector<3x256xf32>
    %256 = arith.addf %253, %255 : vector<3x256xf32>
    %c0_149 = arith.constant 0 : index
    %c0_150 = arith.constant 0 : index
    %257 = vector.load %arg13[%c0_149, %c0_150] : memref<3x256xf32, #tpu.memory_space<vmem>>, vector<3x256xf32>
    tpu.vector_store %arg13[%c0_149, %c0_150], %256 {strides = array<i32>} : memref<3x256xf32, #tpu.memory_space<vmem>>, vector<3x256xf32>,
    return
  }
  func.func @transform_0(%arg0: i32) -> (i32, i32) {
    %c0_i32 = arith.constant 0 : i32
    %c0_i32_0 = arith.constant 0 : i32
    return %c0_i32, %arg0 : i32, i32
  }
  func.func @transform_1(%arg0: i32) -> (i32, i32) {
    %c0_i32 = arith.constant 0 : i32
    %c0_i32_0 = arith.constant 0 : i32
    return %c0_i32, %arg0 : i32, i32
  }
  func.func @transform_2(%arg0: i32) -> (i32, i32) {
    %c0_i32 = arith.constant 0 : i32
    %c0_i32_0 = arith.constant 0 : i32
    %c0_i32_1 = arith.constant 0 : i32
    return %c0_i32, %c0_i32_0 : i32, i32
  }
  func.func @transform_3(%arg0: i32) -> (i32, i32) {
    %c0_i32 = arith.constant 0 : i32
    %c0_i32_0 = arith.constant 0 : i32
    %c0_i32_1 = arith.constant 0 : i32
    return %c0_i32, %c0_i32_0 : i32, i32
  }
  func.func @transform_4(%arg0: i32) -> (i32, i32, i32) {
    %c0_i32 = arith.constant 0 : i32
    %c0_i32_0 = arith.constant 0 : i32
    %c0_i32_1 = arith.constant 0 : i32
    %c0_i32_2 = arith.constant 0 : i32
    return %c0_i32, %c0_i32_0, %c0_i32_1 : i32, i32, i32
  }
  func.func @transform_5(%arg0: i32) -> (i32, i32, i32) {
    %c0_i32 = arith.constant 0 : i32
    %c0_i32_0 = arith.constant 0 : i32
    %c0_i32_1 = arith.constant 0 : i32
    %c0_i32_2 = arith.constant 0 : i32
    return %c0_i32, %c0_i32_0, %c0_i32_1 : i32, i32, i32
  }
  func.func @transform_6(%arg0: i32) -> (i32, i32, i32) {
    %c0_i32 = arith.constant 0 : i32
    %c0_i32_0 = arith.constant 0 : i32
    %c0_i32_1 = arith.constant 0 : i32
    %c0_i32_2 = arith.constant 0 : i32
    return %c0_i32, %c0_i32_0, %c0_i32_1 : i32, i32, i32
  }
  func.func @transform_7(%arg0: i32) -> (i32, i32, i32) {
    %c0_i32 = arith.constant 0 : i32
    %c0_i32_0 = arith.constant 0 : i32
    %c0_i32_1 = arith.constant 0 : i32
    %c0_i32_2 = arith.constant 0 : i32
    return %c0_i32, %c0_i32_0, %c0_i32_1 : i32, i32, i32
  }
  func.func @transform_8(%arg0: i32) -> (i32, i32) {
    %c0_i32 = arith.constant 0 : i32
    %c0_i32_0 = arith.constant 0 : i32
    %c0_i32_1 = arith.constant 0 : i32
    return %c0_i32, %c0_i32_0 : i32, i32
  }
  func.func @transform_9(%arg0: i32) -> (i32, i32) {
    %c0_i32 = arith.constant 0 : i32
    %c0_i32_0 = arith.constant 0 : i32
    %c0_i32_1 = arith.constant 0 : i32
    return %c0_i32, %c0_i32_0 : i32, i32
  }
  func.func @transform_10(%arg0: i32) -> (i32, i32) {
    %c0_i32 = arith.constant 0 : i32
    %c0_i32_0 = arith.constant 0 : i32
    %c0_i32_1 = arith.constant 0 : i32
    return %c0_i32, %c0_i32_0 : i32, i32
  }
  func.func @transform_11(%arg0: i32) -> (i32, i32) {
    %c0_i32 = arith.constant 0 : i32
    %c0_i32_0 = arith.constant 0 : i32
    %c0_i32_1 = arith.constant 0 : i32
    return %c0_i32, %c0_i32_0 : i32, i32
  }
  func.func @transform_12(%arg0: i32) -> (i32, i32) {
    %c0_i32 = arith.constant 0 : i32
    %c0_i32_0 = arith.constant 0 : i32
    return %c0_i32, %arg0 : i32, i32
  }
}

</mosaic_0001>

<bundles_post_ra>
// kernel: tpu_custom_call.1
= control target key start
LH: loop header
LB: loop body
LE: loop exit
PB: predicated region body
PF: predicated region fallthrough
CT: control target
= control target key end

     0   :  { %s13284_s0 = inlined_call_operand.vmem [shape: f32[3,512], index: 0, kind: input, shape index: {}]   ;;  %s13285_s1 = inlined_call_operand.vmem [shape: f32[3,512], index: 1, kind: input, shape index: {}]   ;;  %s13286_s2 = inlined_call_operand.vmem [shape: f32[24,3], index: 2, kind: input, shape index: {}]   ;;  %s13287_s3 = inlined_call_operand.vmem [shape: f32[24,3], index: 3, kind: input, shape index: {}]   ;;  %s13288_s4 = inlined_call_operand.vmem [shape: bf16[12,128,128], index: 4, kind: input, shape index: {}]   ;;  %s13289_s5 = inlined_call_operand.vmem [shape: bf16[6,128,24], index: 5, kind: input, shape index: {}]   ;;  %s13290_s6 = inlined_call_operand.vmem [shape: f32[3,128,1], index: 6, kind: input, shape index: {}]   ;;  %s13291_s7 = inlined_call_operand.vmem [shape: f32[14,128,1], index: 7, kind: input, shape index: {}]   ;;  %s13292_s8 = inlined_call_operand.vmem [shape: bf16[1,128], index: 8, kind: input, shape index: {}]   ;;  %s13293_s9 = inlined_call_operand.<no memory space> [shape: f32[1,1], index: 9, kind: input, shape index: {}]   ;;  %s13294_s10 = inlined_call_operand.vmem [shape: bf16[3,128], index: 10, kind: input, shape index: {}]   ;;  %s13295_s11 = inlined_call_operand.vmem [shape: f32[3,1], index: 11, kind: input, shape index: {}]   ;;  %s13296_s12 = inlined_call_operand.hbm [shape: f32[3,512], index: 12, kind: output, shape index: {}]  }
   0x1   :  { %13480 = sst [smem:[#allocation99_spill]] %s13286_s2  ;;  %v17_v0 = vstv %s13293_s9 }
   0x2   :  { %18 = vst [vmem:[#allocation2] sm:$0x1] %v17_v0 }
   0x3   :  { %19 = vsyncpa [#allocation4], 0 }
   0x4   :  { %21 = vsyncpa [#allocation4 + $0x1], 0  ;;  %s9528_s23 = smov 0   ;;  %s9530_s24 = smov 0  }
   0x5   :  { %s9532_s25 = smov 0   ;;  %s9534_s26 = smov 0  }
   0x6 LB: > { %s9549_s9 = sadd.s32 4294967295, %s9447_s26   ;;  %s8183_s27 = sadd.s32 4294967294, %s9447_s26   ;;  %s9447_s26 = sphi %s9534_s26, %s13834_s26   ;;  %s9443_s25 = sphi %s9532_s25, %s13833_s25   ;;  %s9439_s24 = sphi %s9530_s24, %s13832_s24   ;;  %s9435_s23 = sphi %s9528_s23, %s13831_s23  }
   0x7   : > { %s9553_s28 = sadd.s32 1, %s9447_s26   ;;  %s296_s29 = sadd.s32 1, %s9443_s25 }
   0x8   : > { %s293_s30 = ssub.s32 %s9447_s26, %s9553_s28  ;;  %p306_p0 = scmp.ne.s32.totalorder %s9443_s25, %s9439_s24 }
   0x9   : > { %p294_p1 = scmp.eq.s32.totalorder %s293_s30, 0  ;;  %p307_p2 = scmp.eq.s32.totalorder %s9549_s9, 1 }
   0xa   : > { %p312_p3 = scmp.ne.s32.totalorder %s9439_s24, %s9435_s23  ;;  %p313_p4 = scmp.eq.s32.totalorder %s8183_s27, 1 }
   0xb   : > { %s9564_s13 = scalar_select %p294_p1, %s9443_s25, %s296_s29  }
   0xc   : > { %p9566_p5 = por %p307_p2, %p306_p0  ;;  %p9570_p6 = por %p313_p4, %p312_p3 }
   0xd   : > { %13481 = sst [smem:[#allocation6_spill]] %s9564_s13  ;;  %p8186_p7 = scmp.ge.s32.totalorder %s9447_s26, 1 }
   0xe   : > { %p379_p8 = scmp.lt.s32.totalorder %s9447_s26, 3 }
  0x10   : > { %p380_p9 = pnand %p8186_p7, %p379_p8 }
  0x12   : > { %383 = sbr.rel (%p380_p9) target bundleno = 4553 (0x11c9), region = 68 }
  0x19   : > { %s13484_s2 = sld [smem:[#allocation99_spill]]  ;;  %v13300_v3 = vmov 0   ;;  %v13304_v4 = vmov 1   ;;  %v13302_v5 = vmov 2   ;;  %v1248_v7 = vld [vmem:[%s13291_s7 + $0x8] sm:$0xff]  ;;  %v1251_v8 = vld [vmem:[%s13291_s7 + $0x20] sm:$0xff]  ;;  %v460_v23 = vlaneseq }
  0x1a   : > { %9169 = vset.pattern.permute.xlu1 %v13300_v3  ;;  %9167 = vset.pattern.permute.xlu0 %v13300_v3  ;;  %v1247_v9 = vld [vmem:[%s13291_s7] sm:$0xff]  ;;  %v1253_v10 = vld [vmem:[%s13291_s7 + $0x30] sm:$0xff]  ;;  %v1250_v13 = vld [vmem:[%s13291_s7 + $0x18] sm:$0xff]  ;;  %s8188_s20 = sshll.u32 %s9549_s9, 1  ;;  %s423_s17 = sand.u32 1, %s9439_s24  }
  0x1b   : > { %1447 = vmatprep.mubr.bf16.mxu0 %v13300_v3  ;;  %1711 = vmatprep.mubr.bf16.mxu1 %v13300_v3  ;;  %v1249_v11 = vld [vmem:[%s13291_s7 + $0x10] sm:$0xff]  ;;  %v1255_v12 = vld [vmem:[%s13291_s7 + $0x40] sm:$0xff]  ;;  %v1252_v15 = vld [vmem:[%s13291_s7 + $0x28] sm:$0xff]  ;;  %p427_p10 = scmp.lt.s32.totalorder %s8188_s20, 3  ;;  %v9652_v26 = vshrl.u32 %v460_v23, 7  ;;  %s8187_s18 = sshll.u32 %s423_s17, 3 }
  0x1c   : > { %v1257_v14 = vld [vmem:[%s13291_s7 + $0x50] sm:$0xff]  ;;  %v1259_v16 = vld [vmem:[%s13291_s7 + $0x60] sm:$0xff]  ;;  %v1254_v17 = vld [vmem:[%s13291_s7 + $0x38] sm:$0xff] }
  0x1d   : > { %v1261_v18 = vld [vmem:[%s13291_s7 + $0x70] sm:$0xff]  ;;  %v1256_v19 = vld [vmem:[%s13291_s7 + $0x48] sm:$0xff]  ;;  %v8274_v20 = vld [vmem:[%s13291_s7 + $0x80] sm:$0xff]  ;;  %s13836_s20 = smov (!%p427_p10, %s8188_s20), 3  ;;  %v9663_v29 = vsub.s32 0, %v9652_v26  ;;  %v13299_v61 = vsub.s32 4, %v9652_v26 }
  0x1e   : > { %v1258_v21 = vld [vmem:[%s13291_s7 + $0x58] sm:$0xff]  ;;  %v8276_v22 = vld [vmem:[%s13291_s7 + $0x90] sm:$0xff]  ;;  %v1260_v24 = vld [vmem:[%s13291_s7 + $0x68] sm:$0xff]  ;;  %s8189_s16 = sshll.u32 %s13836_s20, 2  ;;  %v9766_v62 = vsub.s32 1, %v9652_v26  ;;  %v13298_v63 = vsub.s32 5, %v9652_v26 }
  0x1f   : > { %v442_v1 = vld [vmem:[%s13484_s2 + $0x8] sm:$0xff]  ;;  %v441_v2 = vld [vmem:[%s13484_s2] sm:$0xff]  ;;  %v443_v6 = vld [vmem:[%s13484_s2 + $0x10] sm:$0xff]  ;;  %13485 = vst [vmem:[#allocation7_spill] sm:$0xff] %v9663_v29  ;;  %s430_s19 = scalar_lea.vmem %s13284_s0, %s8189_s16  ;;  %s436_s21 = scalar_lea.vmem %s13285_s1, %s8189_s16 }
  0x20   : > { %451 = vperm.xlu0 %9167, %v442_v1   ;;  %446 = vperm.xlu1 %9169, %v441_v2   ;;  %v8278_v25 = vld [vmem:[%s13291_s7 + $0xa0] sm:$0xff]  ;;  %v1262_v27 = vld [vmem:[%s13291_s7 + $0x78] sm:$0xff]  ;;  %v8280_v28 = vld [vmem:[%s13291_s7 + $0xb0] sm:$0xff]  ;;  %s8098_s2 = scalar_lea.sflag [#allocation4], %s423_s17 }
  0x21   : > { %v8275_v30 = vld [vmem:[%s13291_s7 + $0x88] sm:$0xff]  ;;  %v8282_v31 = vld [vmem:[%s13291_s7 + $0xc0] sm:$0xff]  ;;  %v8277_v32 = vld [vmem:[%s13291_s7 + $0x98] sm:$0xff] }
  0x22   : > { %v8284_v33 = vld [vmem:[%s13291_s7 + $0xd0] sm:$0xff]  ;;  %v8279_v34 = vld [vmem:[%s13291_s7 + $0xa8] sm:$0xff]  ;;  %v8286_v35 = vld [vmem:[%s13291_s7 + $0xe0] sm:$0xff] }
  0x23   : > { %v8281_v36 = vld [vmem:[%s13291_s7 + $0xb8] sm:$0xff]  ;;  %v8288_v37 = vld [vmem:[%s13291_s7 + $0xf0] sm:$0xff]  ;;  %v8283_v38 = vld [vmem:[%s13291_s7 + $0xc8] sm:$0xff] }
  0x24   : > { %9168 = vset.pattern.permute.xlu0 %v13304_v4  ;;  %9170 = vset.pattern.permute.xlu1 %v13304_v4  ;;  %v8306_v39 = vld [vmem:[%s13291_s7 + $0x100] sm:$0xff]  ;;  %v8285_v40 = vld [vmem:[%s13291_s7 + $0xd8] sm:$0xff]  ;;  %v8308_v41 = vld [vmem:[%s13291_s7 + $0x110] sm:$0xff] }
  0x25   : > { %489 = vperm.xlu0 %9168, %v442_v1   ;;  %485 = vperm.xlu1 %9170, %v441_v2   ;;  %v8287_v42 = vld [vmem:[%s13291_s7 + $0xe8] sm:$0xff]  ;;  %v8310_v43 = vld [vmem:[%s13291_s7 + $0x120] sm:$0xff]  ;;  %v8289_v44 = vld [vmem:[%s13291_s7 + $0xf8] sm:$0xff] }
  0x26   : > { %v8312_v45 = vld [vmem:[%s13291_s7 + $0x130] sm:$0xff]  ;;  %v8307_v46 = vld [vmem:[%s13291_s7 + $0x108] sm:$0xff]  ;;  %v8314_v47 = vld [vmem:[%s13291_s7 + $0x140] sm:$0xff] }
  0x27   : > { %v8309_v48 = vld [vmem:[%s13291_s7 + $0x118] sm:$0xff]  ;;  %v8316_v49 = vld [vmem:[%s13291_s7 + $0x150] sm:$0xff]  ;;  %v8311_v50 = vld [vmem:[%s13291_s7 + $0x128] sm:$0xff] }
  0x28   : > { %v8318_v51 = vld [vmem:[%s13291_s7 + $0x160] sm:$0xff]  ;;  %v8313_v52 = vld [vmem:[%s13291_s7 + $0x138] sm:$0xff]  ;;  %v8320_v53 = vld [vmem:[%s13291_s7 + $0x170] sm:$0xff] }
  0x29   : > { %9172 = vset.pattern.permute.xlu0 %v13302_v5  ;;  %9171 = vset.pattern.permute.xlu1 %v13302_v5  ;;  %v8315_v54 = vld [vmem:[%s13291_s7 + $0x148] sm:$0xff]  ;;  %v8346_v55 = vld [vmem:[%s13291_s7 + $0x180] sm:$0xff]  ;;  %v8317_v56 = vld [vmem:[%s13291_s7 + $0x158] sm:$0xff] }
  0x2a   : > { %527 = vperm.xlu0 %9172, %v441_v2   ;;  %531 = vperm.xlu1 %9171, %v442_v1   ;;  %v8348_v57 = vld [vmem:[%s13291_s7 + $0x190] sm:$0xff]  ;;  %v8319_v58 = vld [vmem:[%s13291_s7 + $0x168] sm:$0xff]  ;;  %v8350_v59 = vld [vmem:[%s13291_s7 + $0x1a0] sm:$0xff] }
  0x2b   : > { %v8321_v60 = vld [vmem:[%s13291_s7 + $0x178] sm:$0xff]  ;;  %v8352_v0 = vld [vmem:[%s13291_s7 + $0x1b0] sm:$0xff]  ;;  %v8347_v1 = vld [vmem:[%s13291_s7 + $0x188] sm:$0xff] }
  0x2c   : > { %v440_v2 = vld [vmem:[%s430_s19] sm:$0x77]  ;;  %v8351_v23 = vld [vmem:[%s13291_s7 + $0x1a8] sm:$0xff]  ;;  %s8941_s19 = sshll.u32 %s9549_s9, 7  ;;  %s9459_s9 = smov [#allocation3]  }
  0x2d   : > { %s13242_s16 = scalar_lea.hbm %s13296_s12, %s8941_s19  ;;  %s9389_s29 = sshll.u32 %s9459_s9, 4  ;;  %s9390_s29 = int_to_ptr.vmem [resolvable:$false] %s9389_s29 }
  0x2e   : > { %9173 = vset.pattern.permute.xlu1 %v13300_v3  ;;  %535 = vperm.xlu0 %9172, %v443_v6   ;;  %s9391_s30 = scalar_lea.vmem %s9390_s29, 256 }
  0x2f   : > { %456 = vperm.xlu1 %9173, %v443_v6  }
  0x32   : > { %9176 = vset.pattern.permute.xlu0 %v13300_v3 }
  0x33   : > { %9174 = vset.pattern.permute.xlu1 %v13304_v4  ;;  %1270 = vperm.xlu0 %9176, %v1248_v7   ;;  %v499_v7 = vrot.slane %v440_v2, %v9766_v62 }
  0x34   : > { %493 = vperm.xlu1 %9174, %v443_v6   ;;  %v8354_v6 = vld [vmem:[%s13291_s7 + $0x1c0] sm:$0xff] }
  0x37   : > { %1285 = vperm.xlu0 %9176, %v1251_v8   ;;  %v503_v8 = vrot.slane %v440_v2, %v13298_v63 }
  0x38   : > { %9175 = vset.pattern.permute.xlu1 %v13300_v3 }
  0x39   : > { %1265 = vperm.xlu1 %9175, %v1247_v9   ;;  %v463_v9 = vrot.slane %v440_v2, %v9663_v29 }
  0x3b   : > { %1295 = vperm.xlu0 %9176, %v1253_v10   ;;  %v467_v10 = vrot.slane %v440_v2, %v13299_v61 }
  0x3d   : > { %1275 = vperm.xlu1 %9175, %v1249_v11   ;;  %v9785_v11 = vsub.s32 2, %v9652_v26 }
  0x3f   : > { %1305 = vperm.xlu0 %9176, %v1255_v12   ;;  %v13297_v12 = vsub.s32 6, %v9652_v26 }
  0x41   : > { %1280 = vperm.xlu1 %9175, %v1250_v13   ;;  %v8349_v13 = vld [vmem:[%s13291_s7 + $0x198] sm:$0xff] }
  0x43   : > { %1315 = vperm.xlu0 %9176, %v1257_v14  }
  0x45   : > { %1290 = vperm.xlu1 %9175, %v1252_v15  }
  0x47   : > { %1325 = vperm.xlu0 %9176, %v1259_v16   ;;  %v8356_v16 = vld [vmem:[%s13291_s7 + $0x1d0] sm:$0xff] }
  0x49   : > { %1300 = vperm.xlu1 %9175, %v1254_v17   ;;  %v9795_v17 = vrot.slane %v499_v7, %v9766_v62 }
  0x4b   : > { %1335 = vperm.xlu0 %9176, %v1261_v18   ;;  %v9798_v18 = vrot.slane %v503_v8, %v9766_v62 }
  0x4d   : > { %1310 = vperm.xlu1 %9175, %v1256_v19   ;;  %v9801_v19 = vrot.slane %v463_v9, %v9663_v29 }
  0x4f   : > { %1972 = vperm.xlu0 %9176, %v8274_v20   ;;  %v9804_v20 = vrot.slane %v467_v10, %v9663_v29  ;;  %v8429_v10 = vld [vmem:[%s13291_s7 + $0x210] sm:$0xff] }
  0x51   : > { %1320 = vperm.xlu1 %9175, %v1258_v21   ;;  %v541_v21 = vrot.slane %v440_v2, %v9785_v11 }
  0x53   : > { %1982 = vperm.xlu0 %9176, %v8276_v22   ;;  %v545_v22 = vrot.slane %v440_v2, %v13297_v12  ;;  %v8357_v2 = vld [vmem:[%s13291_s7 + $0x1d8] sm:$0xff] }
  0x55   : > { %1330 = vperm.xlu1 %9175, %v1260_v24  }
  0x57   : > { %1992 = vperm.xlu0 %9176, %v8278_v25  }
  0x59   : > { %1340 = vperm.xlu1 %9175, %v1262_v27  }
  0x5b   : > { %2002 = vperm.xlu0 %9176, %v8280_v28  }
  0x5d   : > { %1977 = vperm.xlu1 %9175, %v8275_v30   ;;  %v570_v30 = vadd.s32 8, %v9652_v26 }
  0x5f   : > { %2012 = vperm.xlu0 %9176, %v8282_v31   ;;  %v8358_v31 = vld [vmem:[%s13291_s7 + $0x1e0] sm:$0xff]  ;;  %vm573_vm0 = vcmp.ge.s32.totalorder %v570_v30, 13 }
  0x61   : > { %1987 = vperm.xlu1 %9175, %v8277_v32  }
  0x63   : > { %2022 = vperm.xlu0 %9176, %v8284_v33  }
  0x65   : > { %1997 = vperm.xlu1 %9175, %v8279_v34  }
  0x67   : > { %2032 = vperm.xlu0 %9176, %v8286_v35  }
  0x69   : > { %2007 = vperm.xlu1 %9175, %v8281_v36   ;;  %v9823_v36 = vrot.slane %v541_v21, %v9785_v11 }
  0x6b   : > { %2042 = vperm.xlu0 %9176, %v8288_v37   ;;  %v555_v37 = vrot.slane %v545_v22, %v9785_v11 }
  0x6d   : > { %2017 = vperm.xlu1 %9175, %v8283_v38   ;;  %v8353_v38 = vld [vmem:[%s13291_s7 + $0x1b8] sm:$0xff] }
  0x6f   : > { %2166 = vperm.xlu0 %9176, %v8306_v39  }
  0x71   : > { %2027 = vperm.xlu1 %9175, %v8285_v40  }
  0x73   : > { %2176 = vperm.xlu0 %9176, %v8308_v41  }
  0x75   : > { %2037 = vperm.xlu1 %9175, %v8287_v42  }
  0x77   : > { %2186 = vperm.xlu0 %9176, %v8310_v43   ;;  %v8360_v43 = vld [vmem:[%s13291_s7 + $0x1f0] sm:$0xff] }
  0x79   : > { %2047 = vperm.xlu1 %9175, %v8289_v44  }
  0x7b   : > { %2196 = vperm.xlu0 %9176, %v8312_v45  }
  0x7d   : > { %2171 = vperm.xlu1 %9175, %v8307_v46  }
  0x7f   : > { %2206 = vperm.xlu0 %9176, %v8314_v47  }
  0x81   : > { %2181 = vperm.xlu1 %9175, %v8309_v48  }
  0x83   : > { %2216 = vperm.xlu0 %9176, %v8316_v49  }
  0x85   : > { %2191 = vperm.xlu1 %9175, %v8311_v50  }
  0x87   : > { %2226 = vperm.xlu0 %9176, %v8318_v51  }
  0x89   : > { %2201 = vperm.xlu1 %9175, %v8313_v52   ;;  %v8355_v52 = vld [vmem:[%s13291_s7 + $0x1c8] sm:$0xff] }
  0x8b   : > { %2236 = vperm.xlu0 %9176, %v8320_v53   ;;  %v9452_v53 = vmov 0.0  }
  0x8d   : > { %2211 = vperm.xlu1 %9175, %v8315_v54   ;;  %v9839_v54 = vsel %vm573_vm0, 1.5707964, %v9452_v53 }
  0x8f   : > { %2489 = vperm.xlu0 %9176, %v8346_v55  }
  0x91   : > { %2221 = vperm.xlu1 %9175, %v8317_v56  }
  0x93   : > { %2499 = vperm.xlu0 %9176, %v8348_v57  }
  0x95   : > { %2231 = vperm.xlu1 %9175, %v8319_v58  }
  0x97   : > { %2509 = vperm.xlu0 %9176, %v8350_v59   ;;  %v8427_v59 = vld [vmem:[%s13291_s7 + $0x200] sm:$0xff] }
  0x99   : > { %2241 = vperm.xlu1 %9175, %v8321_v60  }
  0x9b   : > { %2519 = vperm.xlu0 %9176, %v8352_v0  }
  0x9d   : > { %2494 = vperm.xlu1 %9175, %v8347_v1  }
  0x9f   : > { %v447_v14 = vpop.permute.xlu1 %446  ;;  %v452_v15 = vpop.permute.xlu0 %451  ;;  %2529 = vperm.xlu0 %9176, %v8354_v6  }
  0xa0   : > { %v480_v24 = vmul.f32 %v9801_v19, %v452_v15  ;;  %v481_v25 = vmul.f32 %v9804_v20, %v452_v15  ;;  %v478_v39 = vmul.f32 %v9801_v19, %v447_v14  ;;  %v479_v40 = vmul.f32 %v9804_v20, %v447_v14  ;;  %v8359_v15 = vld [vmem:[%s13291_s7 + $0x1e8] sm:$0xff] }
  0xa1   : > { %2504 = vperm.xlu1 %9175, %v8349_v13  }
  0xa3   : > { %2539 = vperm.xlu0 %9176, %v8356_v16  }
  0xa4   : > { %v486_v27 = vpop.permute.xlu1 %485  ;;  %v490_v28 = vpop.permute.xlu0 %489 }
  0xa5   : > { %v514_v32 = vmul.f32 %v9795_v17, %v486_v27  ;;  %v515_v33 = vmul.f32 %v9798_v18, %v486_v27  ;;  %v516_v34 = vmul.f32 %v9795_v17, %v490_v28  ;;  %v517_v35 = vmul.f32 %v9798_v18, %v490_v28  ;;  %2514 = vperm.xlu1 %9175, %v8351_v23  }
  0xa7   : > { %2549 = vperm.xlu0 %9176, %v8358_v31   ;;  %v522_v41 = vadd.f32 %v516_v34, %v480_v24  ;;  %v523_v42 = vadd.f32 %v517_v35, %v481_v25  ;;  %v520_v44 = vadd.f32 %v514_v32, %v478_v39  ;;  %v521_v45 = vadd.f32 %v515_v33, %v479_v40  ;;  %v8431_v25 = vld [vmem:[%s13291_s7 + $0x220] sm:$0xff]  ;;  %v8361_v31 = vld [vmem:[%s13291_s7 + $0x1f8] sm:$0xff] }
  0xa9   : > { %v528_v46 = vpop.permute.xlu0 %527  ;;  %v532_v47 = vpop.permute.xlu1 %531  ;;  %2524 = vperm.xlu1 %9175, %v8353_v38  }
  0xaa   : > { %v556_v48 = vmul.f32 %v9823_v36, %v528_v46  ;;  %v557_v49 = vmul.f32 %v555_v37, %v528_v46  ;;  %v558_v50 = vmul.f32 %v9823_v36, %v532_v47  ;;  %v559_v51 = vmul.f32 %v555_v37, %v532_v47 }
  0xab   : > { %2559 = vperm.xlu0 %9176, %v8360_v43  }
  0xac   : > { %v9841_v55 = vadd.f32 %v556_v48, %v520_v44  ;;  %v9843_v56 = vadd.f32 %v557_v49, %v521_v45  ;;  %v564_v57 = vadd.f32 %v558_v50, %v522_v41  ;;  %v565_v58 = vadd.f32 %v559_v51, %v523_v42 }
  0xad   : > { %2534 = vperm.xlu1 %9175, %v8355_v52   ;;  %v536_v24 = vpop.permute.xlu0 %535 }
  0xae   : > { %v694_v60 = vand.u32 2139095040, %v9843_v56  ;;  %v9850_v0 = vadd.f32 %v9839_v54, %v565_v58  ;;  %v457_v1 = vpop.permute.xlu1 %456  ;;  %v590_v6 = vand.u32 2139095040, %v9841_v55  ;;  %v9857_v8 = vadd.f32 %v9839_v54, %v564_v57 }
  0xaf   : > { %3167 = vperm.xlu0 %9176, %v8427_v59   ;;  %v483_v28 = vmul.f32 %v9804_v20, %v457_v1  ;;  %v561_v33 = vmul.f32 %v555_v37, %v536_v24  ;;  %v691_v35 = vand.u32 2147483647, %v9843_v56  ;;  %v8428_v37 = vld [vmem:[%s13291_s7 + $0x208] sm:$0xff]  ;;  %v482_v45 = vmul.f32 %v9801_v19, %v457_v1  ;;  %v8435_v19 = vld [vmem:[%s13291_s7 + $0x240] sm:$0xff] }
  0xb0   : > { %v695_v7 = vshrl.u32 %v694_v60, 23  ;;  %v902_v9 = vand.u32 2139095040, %v9850_v0  ;;  %v591_v21 = vshrl.u32 %v590_v6, 23  ;;  %v798_v23 = vand.u32 2139095040, %v9857_v8  ;;  %v8430_v60 = vld [vmem:[%s13291_s7 + $0x218] sm:$0xff] }
  0xb1   : > { %2544 = vperm.xlu1 %9175, %v8357_v2   ;;  %v560_v46 = vmul.f32 %v9823_v36, %v536_v24  ;;  %v9892_v47 = vand.u32 8388607, %v691_v35  ;;  %v13325_v36 = vmov 683565275   ;;  %v13309_v58 = vmov 2475754826  }
  0xb2   : > { %v8196_v13 = vadd.s32 4294967169, %v695_v7  ;;  %v903_v14 = vshrl.u32 %v902_v9, 23  ;;  %v8192_v38 = vadd.s32 4294967169, %v591_v21  ;;  %v799_v40 = vshrl.u32 %v798_v23, 23  ;;  %v9881_v43 = vpop.permute.xlu0 %1270 }
  0xb3   : > { %v494_v16 = vpop.permute.xlu1 %493  ;;  %3177 = vperm.xlu0 %9176, %v8429_v10   ;;  %v13318_v2 = vmov 2131351028   ;;  %vm693_vm11 = vcmp.lt.s32.totalorder %v9843_v56, 0  ;;  %vm10105_vm0 = vcmp.le.f32.partialorder %v691_v35, 0.7853982 }
  0xb4   : > { %v701_v22 = vadd.s32 1, %v8196_v13  ;;  %v8204_v27 = vadd.s32 4294967169, %v903_v14  ;;  %v519_v30 = vmul.f32 %v9798_v18, %v494_v16  ;;  %v8433_v18 = vld [vmem:[%s13291_s7 + $0x230] sm:$0xff]  ;;  %v9894_v48 = vadd.s32 1, %v8192_v38 }
  0xb5   : > { %2554 = vperm.xlu1 %9175, %v8359_v15   ;;  %v8200_v49 = vadd.s32 4294967169, %v799_v40  ;;  %v518_v50 = vmul.f32 %v9795_v17, %v494_v16  ;;  %v13311_v13 = vmov 2102212464   ;;  %v13313_v16 = vmov 920167782   ;;  %v8432_v40 = vld [vmem:[%s13291_s7 + $0x228] sm:$0xff] }
  0xb6   : > { %vm702_vm1 = vcmp.gt.s32.totalorder %v701_v22, 0  ;;  %v525_v34 = vadd.f32 %v519_v30, %v483_v28  ;;  %v909_v20 = vadd.s32 1, %v8204_v27  ;;  %v9917_v9 = vpop.permute.xlu0 %1285  ;;  %v8437_v27 = vld [vmem:[%s13291_s7 + $0x250] sm:$0xff]  ;;  %vm598_vm3 = vcmp.gt.s32.totalorder %v9894_v48, 0 }
  0xb7   : > { %v703_v32 = vsel %vm702_vm1, %v701_v22, 0  ;;  %3187 = vperm.xlu0 %9176, %v8431_v25   ;;  %13486 = vst [vmem:[#allocation8_spill] sm:$0xff] %v9917_v9  ;;  %v524_v23 = vadd.f32 %v518_v50, %v482_v45 }
  0xb8   : > { %v705_v39 = vand.u32 31, %v703_v32  ;;  %v9876_v41 = vpop.permute.xlu1 %1265  ;;  %v567_v42 = vadd.f32 %v561_v33, %v525_v34  ;;  %v9904_v53 = vshrl.u32 %v703_v32, 5  ;;  %vm910_vm2 = vcmp.gt.s32.totalorder %v909_v20, 0 }
  0xb9   : > { %2564 = vperm.xlu1 %9175, %v8361_v31   ;;  %v911_v22 = vsel %vm910_vm2, %v909_v20, 0  ;;  %v13307_v33 = vmov 1326507024   ;;  %v805_v20 = vadd.s32 1, %v8200_v49  ;;  %v566_v45 = vadd.f32 %v560_v46, %v524_v23 }
  0xba   : > { %v9883_v44 = vsub.s32 32, %v705_v39  ;;  %v9897_v51 = vadd.f32 1.5707964, %v567_v42  ;;  %v708_v57 = vshll.u32 %v13325_v36, %v705_v39  ;;  %v711_v1 = vshll.u32 %v13309_v58, %v705_v39  ;;  %v9952_v49 = vpop.permute.xlu0 %1295 }
  0xbb   : > { %3197 = vperm.xlu0 %9176, %v8433_v18   ;;  %v714_v7 = vshll.u32 %v13318_v2, %v705_v39  ;;  %v717_v15 = vshll.u32 %v13311_v13, %v705_v39  ;;  %v720_v32 = vshll.u32 %v13313_v16, %v705_v39  ;;  %v699_v18 = vor.u32 8388608, %v9892_v47  ;;  %13488 = vst [vmem:[#allocation10_spill] sm:$0xff] %v9952_v49 }
  0xbc   : > { %v9899_v52 = vpop.permute.xlu1 %1275  ;;  %v709_v59 = vshrl.u32 %v13309_v58, %v9883_v44  ;;  %v1110_v17 = vand.u32 2139095040, %v9897_v51  ;;  %v712_v6 = vshrl.u32 %v13318_v2, %v9883_v44  ;;  %v715_v14 = vshrl.u32 %v13311_v13, %v9883_v44 }
  0xbd   : > { %3172 = vperm.xlu1 %9175, %v8428_v37   ;;  %v718_v21 = vshrl.u32 %v13313_v16, %v9883_v44  ;;  %v721_v34 = vshrl.u32 %v13307_v33, %v9883_v44  ;;  %vm723_vm4 = vcmp.lt.s32.totalorder %v9904_v53, 1  ;;  %vm726_vm5 = vcmp.lt.s32.totalorder %v9904_v53, 4 }
  0xbe   : > { %v710_v10 = vor.u32 %v709_v59, %v708_v57  ;;  %v1111_v24 = vshrl.u32 %v1110_v17, 23  ;;  %v713_v28 = vor.u32 %v712_v6, %v711_v1  ;;  %v716_v30 = vor.u32 %v715_v14, %v714_v7 }
  0xbf   : > { %3207 = vperm.xlu0 %9176, %v8435_v19   ;;  %v719_v31 = vor.u32 %v718_v21, %v717_v15  ;;  %v722_v42 = vor.u32 %v721_v34, %v720_v32  ;;  %v9942_v37 = vand.u32 31, %v911_v22  ;;  %v8439_v19 = vld [vmem:[%s13291_s7 + $0x260] sm:$0xff]  ;;  %vm725_vm6 = vcmp.lt.s32.totalorder %v9904_v53, 3 }
  0xc0   : > { %v9925_v25 = vpop.permute.xlu1 %1280  ;;  %v8212_v38 = vadd.s32 4294967169, %v1111_v24  ;;  %v731_v39 = vsel %vm723_vm4, %v710_v10, %v713_v28  ;;  %v707_v57 = vshrl.u32 %v13325_v36, %v9883_v44  ;;  %vm724_vm7 = vcmp.lt.s32.totalorder %v9904_v53, 2  ;;  %v8438_v53 = vld [vmem:[%s13291_s7 + $0x258] sm:$0xff] }
  0xc1   : > { %3182 = vperm.xlu1 %9175, %v8430_v60   ;;  %v732_v47 = vsel %vm726_vm5, %v719_v31, 920167782  ;;  %v736_v59 = vsel %vm726_vm5, %v722_v42, 1326507024  ;;  %v8434_v60 = vld [vmem:[%s13291_s7 + $0x238] sm:$0xff]  ;;  %v735_v44 = vsel %vm723_vm4, %v713_v28, %v716_v30  ;;  %v9973_v7 = vsel %vm598_vm3, %v9894_v48, 0 }
  0xc2   : > { %v733_v46 = vsel %vm725_vm6, %v716_v30, %v732_v47  ;;  %v1117_v17 = vadd.s32 1, %v8212_v38  ;;  %v728_v1 = vsel %vm726_vm5, %v716_v30, 2102212464  ;;  %v737_v14 = vsel %vm725_vm6, %v719_v31, %v736_v59  ;;  %v8441_v48 = vld [vmem:[%s13291_s7 + $0x270] sm:$0xff]  ;;  %v8459_v47 = vld [vmem:[%s13291_s7 + $0x280] sm:$0xff] }
  0xc3   : > { %3217 = vperm.xlu0 %9176, %v8437_v27   ;;  %v734_v6 = vsel %vm724_vm7, %v731_v39, %v733_v46  ;;  %v739_v15 = vshll.u32 %v699_v18, 8  ;;  %vm806_vm8 = vcmp.gt.s32.totalorder %v805_v20, 0  ;;  %v914_v21 = vsub.s32 32, %v9942_v37 }
  0xc4   : > { %v9944_v50 = vpop.permute.xlu1 %1290  ;;  %v9978_v23 = vadd.f32 1.5707964, %v566_v45  ;;  %v727_v27 = vsel %vm723_vm4, %v707_v57, %v710_v10  ;;  %v729_v30 = vsel %vm725_vm6, %v713_v28, %v728_v1  ;;  %v738_v31 = vsel %vm724_vm7, %v735_v44, %v737_v14  ;;  %v8436_v10 = vld [vmem:[%s13291_s7 + $0x248] sm:$0xff] }
  0xc5   : > { %13487 = vst [vmem:[#allocation9_spill] sm:$0xff] %v9944_v50  ;;  %3192 = vperm.xlu1 %9175, %v8432_v40   ;;  %v9991_v32 = vmul.u32.u64.low %v739_v15, %v734_v6  ;;  %v9992_v34 = vmul.u32.u64.high %v739_v15, %v734_v6, %v9991_v32  ;;  %vm1118_vm9 = vcmp.gt.s32.totalorder %v1117_v17, 0  ;;  %v13306_v38 = vand.u32 2147483647, %v9850_v0  ;;  %v9999_v40 = vpop.permute.xlu0 %1305 }
  0xc6   : > { %13490 = vst [vmem:[#allocation12_spill] sm:$0xff] %v9999_v40  ;;  %v10001_v18 = vmul.u32.u64.low %v739_v15, %v738_v31  ;;  %v10002_v42 = vmul.u32.u64.high %v739_v15, %v738_v31, %v10001_v18  ;;  %v10005_v28 = vand.u32 31, %v9973_v7  ;;  %v10008_v39 = vsel %vm806_vm8, %v805_v20, 0 }
  0xc7   : > { %3227 = vperm.xlu0 %9176, %v8439_v19   ;;  %v10010_v45 = vshrl.u32 %v911_v22, 5  ;;  %v730_v19 = vsel %vm724_vm7, %v727_v27, %v729_v30  ;;  %v1006_v57 = vand.u32 2139095040, %v9978_v23  ;;  %v10018_v46 = vsel %vm1118_vm9, %v1117_v17, 0 }
  0xc8   : > { %v9980_v24 = vpop.permute.xlu1 %1300  ;;  %v749_v59 = vadd.s32 1, %v9992_v34  ;;  %v906_v22 = vand.u32 8388607, %v13306_v38  ;;  %v916_v1 = vshll.u32 %v13325_v36, %v9942_v37  ;;  %v919_v17 = vshll.u32 %v13309_v58, %v9942_v37 }
  0xc9   : > { %13489 = vst [vmem:[#allocation11_spill] sm:$0xff] %v9980_v24  ;;  %3202 = vperm.xlu1 %9175, %v8434_v60   ;;  %v917_v60 = vshrl.u32 %v13309_v58, %v914_v21  ;;  %v920_v6 = vshrl.u32 %v13318_v2, %v914_v21  ;;  %v746_v44 = vmul.u32 %v739_v15, %v730_v19  ;;  %v8461_v15 = vld [vmem:[%s13291_s7 + $0x290] sm:$0xff]  ;;  %v10046_v18 = vpop.permute.xlu0 %1315  ;;  %vm931_vm12 = vcmp.lt.s32.totalorder %v10010_v45, 1 }
  0xca   : > { %vm748_vm10 = vc.u32 %v10002_v42, %v9991_v32  ;;  %v922_v14 = vshll.u32 %v13318_v2, %v9942_v37  ;;  %v923_v27 = vshrl.u32 %v13311_v13, %v914_v21  ;;  %13492 = vst [vmem:[#allocation14_spill] sm:$0xff] %v10046_v18  ;;  %v926_v63 = vshrl.u32 %v13313_v16, %v914_v21 }
  0xcb   : > { %3237 = vperm.xlu0 %9176, %v8441_v48   ;;  %v10040_v48 = vand.u32 31, %v10018_v46  ;;  %v750_v30 = vsel %vm748_vm10, %v749_v59, %v9992_v34  ;;  %v918_v31 = vor.u32 %v917_v60, %v916_v1  ;;  %v8440_v34 = vld [vmem:[%s13291_s7 + $0x268] sm:$0xff]  ;;  %v907_v59 = vor.u32 8388608, %v906_v22 }
  0xcc   : > { %v10022_v20 = vpop.permute.xlu1 %1310  ;;  %v751_v19 = vadd.s32 %v750_v30, %v746_v44  ;;  %v924_v12 = vor.u32 %v923_v27, %v922_v14  ;;  %v915_v60 = vshrl.u32 %v13325_v36, %v914_v21  ;;  %v928_v1 = vshll.u32 %v13313_v16, %v9942_v37 }
  0xcd   : > { %3212 = vperm.xlu1 %9175, %v8436_v10   ;;  %13491 = vst [vmem:[#allocation13_spill] sm:$0xff] %v10022_v20  ;;  %v921_v10 = vor.u32 %v920_v6, %v919_v17  ;;  %vm932_vm13 = vcmp.lt.s32.totalorder %v10010_v45, 2  ;;  %vm933_vm14 = vcmp.lt.s32.totalorder %v10010_v45, 3  ;;  %vm934_vm15 = vcmp.lt.s32.totalorder %v10010_v45, 4 }
  0xce   : > { %v752_v17 = vadd.s32 536870912, %v751_v19  ;;  %v935_v61 = vsel %vm931_vm12, %v915_v60, %v918_v31  ;;  %v947_v3 = vshll.u32 %v907_v59, 8  ;;  %vm901_vm7 = vcmp.lt.s32.totalorder %v9850_v0, 0 }
  0xcf   : > { %3361 = vperm.xlu0 %9176, %v8459_v47   ;;  %v925_v47 = vshll.u32 %v13311_v13, %v9942_v37  ;;  %v939_v22 = vsel %vm931_vm12, %v918_v31, %v921_v10  ;;  %v936_v37 = vsel %vm934_vm15, %v924_v12, 2102212464 }
  0xd0   : > { %v10061_v44 = vpop.permute.xlu1 %1320  ;;  %v753_v27 = vshrl.u32 %v752_v17, 30  ;;  %v937_v31 = vsel %vm933_vm14, %v921_v10, %v936_v37 }
  0xd1   : > { %3222 = vperm.xlu1 %9175, %v8438_v53   ;;  %v929_v53 = vshrl.u32 %v13307_v33, %v914_v21  ;;  %v927_v6 = vor.u32 %v926_v63, %v925_v47  ;;  %13493 = vst [vmem:[#allocation15_spill] sm:$0xff] %v10061_v44  ;;  %v943_v21 = vsel %vm931_vm12, %v921_v10, %v924_v12  ;;  %v10093_v10 = vsub.s32 32, %v10040_v48 }
  0xd2   : > { %v777_v5 = vsub.s32 4, %v753_v27 }
  0xd3   : > { %3371 = vperm.xlu0 %9176, %v8461_v15   ;;  %v930_v14 = vor.u32 %v929_v53, %v928_v1  ;;  %v940_v30 = vsel %vm934_vm15, %v927_v6, 920167782  ;;  %v8442_v15 = vld [vmem:[%s13291_s7 + $0x278] sm:$0xff]  ;;  %v10070_v1 = vpop.permute.xlu0 %1325  ;;  %v754_v53 = vshll.u32 %v753_v27, 30 }
  0xd4   : > { %v941_v63 = vsel %vm933_vm14, %v924_v12, %v940_v30  ;;  %13494 = vst [vmem:[#allocation16_spill] sm:$0xff] %v10070_v1  ;;  %v778_v37 = vsel %vm693_vm11, %v777_v5, %v753_v27  ;;  %v10113_v5 = vshrl.u32 %v9973_v7, 5  ;;  %v10116_v27 = vshrl.u32 %v10008_v39, 5 }
  0xd5   : > { %3232 = vperm.xlu1 %9175, %v8440_v34   ;;  %v944_v47 = vsel %vm934_vm15, %v930_v14, 1326507024  ;;  %v942_v34 = vsel %vm932_vm13, %v939_v22, %v941_v63  ;;  %v1007_v14 = vshrl.u32 %v1006_v57, 23  ;;  %v10084_v30 = vsub.s32 %v751_v19, %v754_v53  ;;  %v10095_v22 = vpop.permute.xlu1 %1330  ;;  %v8460_v57 = vld [vmem:[%s13291_s7 + $0x288] sm:$0xff] }
  0xd6   : > { %v945_v17 = vsel %vm933_vm14, %v927_v6, %v944_v47  ;;  %v10080_v59 = vmul.u32.u64.low %v947_v3, %v942_v34  ;;  %v10081_v60 = vmul.u32.u64.high %v947_v3, %v942_v34, %v10080_v59  ;;  %v8463_v6 = vld [vmem:[%s13291_s7 + $0x2a0] sm:$0xff]  ;;  %13495 = vst [vmem:[#allocation17_spill] sm:$0xff] %v10095_v22  ;;  %v938_v63 = vsel %vm932_vm13, %v935_v61, %v937_v31  ;;  %v8462_v31 = vld [vmem:[%s13291_s7 + $0x298] sm:$0xff] }
  0xd7   : > { %v946_v12 = vsel %vm932_vm13, %v943_v21, %v945_v17  ;;  %3381 = vperm.xlu0 %9176, %v8463_v6   ;;  %v757_v21 = vsub.s32 0, %v10084_v30  ;;  %v10119_v47 = vand.u32 31, %v10008_v39  ;;  %v10122_v35 = vadd.s32 4294967169, %v1007_v14  ;;  %v10129_v61 = vpop.permute.xlu0 %1335 }
  0xd8   : > { %v10086_v4 = vmul.u32.u64.low %v947_v3, %v946_v12  ;;  %v10087_v38 = vmul.u32.u64.high %v947_v3, %v946_v12, %v10086_v4  ;;  %v780_v34 = vsel %vm10105_vm0, 0, %v778_v37  ;;  %13498 = vst [vmem:[#allocation18_spill] sm:$0xff] %v10129_v61  ;;  %v10133_v7 = vshrl.u32 %v13313_v16, %v10093_v10 }
  0xd9   : > { %3242 = vperm.xlu1 %9175, %v8442_v15   ;;  %v602_v4 = vsub.s32 32, %v10005_v28  ;;  %v957_v15 = vadd.s32 1, %v10081_v60  ;;  %v8197_v53 = vmin.u32 %v757_v21, %v10084_v30  ;;  %v954_v39 = vmul.u32 %v947_v3, %v938_v63  ;;  %v10151_v63 = vpop.permute.xlu1 %1340 }
  0xda   : > { %vm956_vm1 = vc.u32 %v10087_v38, %v10080_v59  ;;  %v10142_v12 = vshrl.u32 %v13307_v33, %v10093_v10  ;;  %v747_v14 = vadd.s32 %v9991_v32, %v10002_v42  ;;  %13499 = vst [vmem:[#allocation19_spill] sm:$0xff] %v10151_v63  ;;  %v613_v33 = vshll.u32 %v13311_v13, %v10005_v28 }
  0xdb   : > { %v958_v45 = vsel %vm956_vm1, %v957_v15, %v10081_v60  ;;  %v759_v6 = vclz %v8197_v53  ;;  %v603_v37 = vshrl.u32 %v13325_v36, %v602_v4  ;;  %v605_v60 = vshrl.u32 %v13309_v58, %v602_v4  ;;  %v10169_v61 = vpop.permute.xlu0 %1972 }
  0xdc   : > { %v959_v3 = vadd.s32 %v958_v45, %v954_v39  ;;  %v611_v21 = vshrl.u32 %v13311_v13, %v602_v4  ;;  %v608_v17 = vshrl.u32 %v13318_v2, %v602_v4  ;;  %v614_v32 = vshrl.u32 %v13313_v16, %v602_v4  ;;  %13503 = vst [vmem:[#allocation20_spill] sm:$0xff] %v10169_v61 }
  0xdd   : > { %3366 = vperm.xlu1 %9175, %v8460_v57   ;;  %v10147_v57 = vadd.s32 3, %v780_v34  ;;  %v8198_v15 = vadd.s32 4294967294, %v759_v6  ;;  %v13500_v53 = vand.u32 2147483647, %v9841_v55  ;;  %v610_v39 = vshll.u32 %v13318_v2, %v10005_v28  ;;  %v8464_v6 = vld [vmem:[%s13291_s7 + $0x2a8] sm:$0xff] }
  0xde   : > { %v960_v42 = vadd.s32 536870912, %v959_v3  ;;  %v13501_v45 = vmov 1326507024   ;;  %v604_v13 = vshll.u32 %v13325_v36, %v10005_v28  ;;  %v13502_v16 = vmov 2475754826  }
  0xdf   : > { %v594_v34 = vand.u32 8388607, %v13500_v53  ;;  %v617_v58 = vshrl.u32 %v13501_v45, %v602_v4  ;;  %vm8199_vm2 = vcmp.lt.s32.totalorder %v8198_v15, 0  ;;  %v615_v63 = vor.u32 %v614_v32, %v613_v33  ;;  %v10177_v33 = vpop.permute.xlu1 %1977 }
  0xe0   : > { %v762_v53 = vsel %vm8199_vm2, 0, %v8198_v15  ;;  %v10171_v22 = vshrl.u32 %v960_v42, 30  ;;  %v612_v2 = vor.u32 %v611_v21, %v610_v39  ;;  %v13504_v4 = vmov 920167782   ;;  %13505 = vst [vmem:[#allocation21_spill] sm:$0xff] %v10177_v33 }
  0xe1   : > { %3376 = vperm.xlu1 %9175, %v8462_v31   ;;  %v607_v31 = vshll.u32 %v13502_v16, %v10005_v28  ;;  %v616_v1 = vshll.u32 %v13504_v4, %v10005_v28  ;;  %v763_v44 = vsub.s32 32, %v762_v53  ;;  %v767_v18 = vsub.s32 4294967266, %v762_v53 }
  0xe2   : > { %v606_v20 = vor.u32 %v605_v60, %v604_v13  ;;  %v962_v36 = vshll.u32 %v10171_v22, 30  ;;  %v595_v24 = vor.u32 8388608, %v594_v34  ;;  %vm622_vm3 = vcmp.lt.s32.totalorder %v10113_v5, 4 }
  0xe3   : > { %v609_v40 = vor.u32 %v608_v17, %v607_v31  ;;  %v618_v49 = vor.u32 %v617_v58, %v616_v1  ;;  %v764_v15 = vshll.u32 %v10084_v30, %v762_v53  ;;  %v765_v32 = vshrl.u32 %v747_v14, %v763_v44  ;;  %v10190_v44 = vpop.permute.xlu0 %1982 }
  0xe4   : > { %v768_v21 = vadd.s32 127, %v767_v18  ;;  %v628_v28 = vsel %vm622_vm3, %v615_v63, 920167782  ;;  %v10182_v42 = vsub.s32 %v959_v3, %v962_v36  ;;  %vm619_vm4 = vcmp.lt.s32.totalorder %v10113_v5, 1  ;;  %13506 = vst [vmem:[#allocation22_spill] sm:$0xff] %v10190_v44 }
  0xe5   : > { %3386 = vperm.xlu1 %9175, %v8464_v6   ;;  %vm621_vm5 = vcmp.lt.s32.totalorder %v10113_v5, 3  ;;  %v624_v58 = vsel %vm622_vm3, %v612_v2, 2102212464  ;;  %v766_v13 = vor.u32 %v765_v32, %v764_v15  ;;  %v627_v17 = vsel %vm619_vm4, %v606_v20, %v609_v40  ;;  %v10205_v15 = vpop.permute.xlu1 %1987 }
  0xe6   : > { %v769_v1 = vshll.u32 %v768_v21, 23  ;;  %v629_v30 = vsel %vm621_vm5, %v612_v2, %v628_v28  ;;  %v965_v18 = vsub.s32 0, %v10182_v42  ;;  %vm620_vm6 = vcmp.lt.s32.totalorder %v10113_v5, 2  ;;  %13507 = vst [vmem:[#allocation23_spill] sm:$0xff] %v10205_v15 }
  0xe7   : > { %v631_v36 = vsel %vm619_vm4, %v609_v40, %v612_v2  ;;  %v632_v14 = vsel %vm622_vm3, %v618_v49, 1326507024  ;;  %v623_v60 = vsel %vm619_vm4, %v603_v37, %v606_v20  ;;  %v635_v39 = vshll.u32 %v595_v24, 8 }
  0xe8   : > { %v770_v3 = vor.u32 4788187, %v769_v1  ;;  %v633_v34 = vsel %vm621_vm5, %v615_v63, %v632_v14  ;;  %v8205_v6 = vmin.u32 %v965_v18, %v10182_v42  ;;  %v625_v31 = vsel %vm621_vm5, %v609_v40, %v624_v58 }
  0xe9   : > { %v630_v53 = vsel %vm620_vm6, %v627_v17, %v629_v30  ;;  %v634_v2 = vsel %vm620_vm6, %v631_v36, %v633_v34  ;;  %v773_v32 = vcvt.s32.f32 %v766_v13  ;;  %v10211_v24 = vsub.s32 32, %v10119_v47  ;;  %v10226_v30 = vpop.permute.xlu0 %1992  ;;  %v10248_v5 = vpop.permute.xlu1 %1997 }
  0xea   : > { %v771_v49 = vand.u32 2147483647, %v770_v3  ;;  %v10207_v20 = vmul.u32.u64.low %v635_v39, %v634_v2  ;;  %v10208_v37 = vmul.u32.u64.high %v635_v39, %v634_v2, %v10207_v20  ;;  %v10214_v63 = vadd.s32 1, %v10122_v35  ;;  %13509 = vst [vmem:[#allocation24_spill] sm:$0xff] %v10226_v30  ;;  %13510 = vst [vmem:[#allocation25_spill] sm:$0xff] %v10248_v5 }
  0xeb   : > { %v13508_v40 = vmov 2102212464   ;;  %v967_v28 = vclz %v8205_v6  ;;  %v10220_v58 = vshll.u32 %v13504_v4, %v10040_v48  ;;  %v10229_v18 = vshrl.u32 %v10018_v46, 5 }
  0xec   : > { %v1133_v21 = vshll.u32 %v13508_v40, %v10040_v48  ;;  %v774_v1 = vmul.f32 %v773_v32, %v771_v49  ;;  %v10222_v17 = vmul.u32.u64.low %v635_v39, %v630_v53  ;;  %v10223_v13 = vmul.u32.u64.high %v635_v39, %v630_v53, %v10222_v17 }
  0xed   : > { %v8206_v36 = vadd.s32 4294967294, %v967_v28  ;;  %v626_v14 = vsel %vm620_vm6, %v623_v60, %v625_v31  ;;  %v10239_v6 = vand.u32 3, %v10147_v57  ;;  %v13329_v53 = vand.u32 2147483647, %v9857_v8 }
  0xee   : > { %v10232_v35 = vor.u32 %v10133_v7, %v1133_v21  ;;  %v775_v34 = vxor.u32 2147483648, %v774_v1  ;;  %v955_v46 = vadd.s32 %v10080_v59, %v10087_v38  ;;  %v985_v7 = vsub.s32 4, %v10171_v22 }
  0xef   : > { %vm8207_vm8 = vcmp.lt.s32.totalorder %v8206_v36, 0  ;;  %vm644_vm9 = vc.u32 %v10208_v37, %v10222_v17  ;;  %v642_v31 = vmul.u32 %v635_v39, %v626_v14  ;;  %v645_v2 = vadd.s32 1, %v10223_v13  ;;  %v10273_v14 = vpop.permute.xlu0 %2002 }
  0xf0   : > { %v776_v60 = vsel %vm693_vm11, %v775_v34, %v774_v1  ;;  %v970_v57 = vsel %vm8207_vm8, 0, %v8206_v36  ;;  %v13511_v38 = vand.u32 2147483647, %v9850_v0  ;;  %v13514_v21 = vmov 683565275   ;;  %v8465_v36 = vld [vmem:[%s13291_s7 + $0x2b0] sm:$0xff] }
  0xf1   : > { %v779_v49 = vsel %vm10105_vm0, %v9843_v56, %v776_v60  ;;  %v971_v32 = vsub.s32 32, %v970_v57  ;;  %v975_v20 = vsub.s32 4294967266, %v970_v57  ;;  %v812_v28 = vshll.u32 %v13514_v21, %v10119_v47  ;;  %13515 = vst [vmem:[#allocation26_spill] sm:$0xff] %v10273_v14  ;;  %v8466_v34 = vld [vmem:[%s13291_s7 + $0x2b8] sm:$0xff]  ;;  %3391 = vperm.xlu0 %9176, %v8465_v36  }
  0xf2   : > { %vm10258_vm10 = vcmp.le.f32.partialorder %v13511_v38, 0.7853982  ;;  %9329 = vcosq.f32 %v779_v49  ;;  %v972_v39 = vshll.u32 %v10182_v42, %v970_v57  ;;  %v646_v1 = vsel %vm644_vm9, %v645_v2, %v10223_v13  ;;  %3396 = vperm.xlu1 %9175, %v8466_v34   ;;  %v10278_v13 = vpop.permute.xlu1 %2007 }
  0xf3   : > { %v10268_v19 = vand.u32 8388607, %v13329_v53  ;;  %9331 = vsinq.f32 %v779_v49  ;;  %v973_v60 = vshrl.u32 %v955_v46, %v971_v32  ;;  %v976_v38 = vadd.s32 127, %v975_v20  ;;  %13516 = vst [vmem:[#allocation27_spill] sm:$0xff] %v10278_v13  ;;  %v8467_v46 = vld [vmem:[%s13291_s7 + $0x2c0] sm:$0xff]  ;;  %v10304_v30 = vpop.permute.xlu0 %2012 }
  0xf4   : > { %v647_v42 = vadd.s32 %v646_v1, %v642_v31  ;;  %v813_v57 = vshrl.u32 %v13502_v16, %v10211_v24  ;;  %v13517_v2 = vmov 2131351028   ;;  %v819_v3 = vshrl.u32 %v13508_v40, %v10211_v24  ;;  %v8468_v31 = vld [vmem:[%s13291_s7 + $0x2c8] sm:$0xff]  ;;  %13518 = vst [vmem:[#allocation28_spill] sm:$0xff] %v10304_v30 }
  0xf5   : > { %v816_v53 = vshrl.u32 %v13517_v2, %v10211_v24  ;;  %v821_v14 = vshll.u32 %v13508_v40, %v10119_v47  ;;  %v974_v49 = vor.u32 %v973_v60, %v972_v39  ;;  %v977_v32 = vshll.u32 %v976_v38, 23  ;;  %3401 = vperm.xlu0 %9176, %v8467_v46  }
  0xf6   : > { %v648_v20 = vadd.s32 536870912, %v647_v42  ;;  %v822_v1 = vshrl.u32 %v13504_v4, %v10211_v24  ;;  %v815_v36 = vshll.u32 %v13502_v16, %v10119_v47  ;;  %v818_v34 = vshll.u32 %v13517_v2, %v10119_v47  ;;  %3406 = vperm.xlu1 %9175, %v8468_v31   ;;  %v10311_v44 = vpop.permute.xlu1 %2017 }
  0xf7   : > { %v824_v13 = vshll.u32 %v13504_v4, %v10119_v47  ;;  %v825_v5 = vshrl.u32 %v13501_v45, %v10211_v24  ;;  %v978_v39 = vor.u32 4788187, %v977_v32  ;;  %v986_v60 = vsel %vm901_vm7, %v985_v7, %v10171_v22 }
  0xf8   : > { %v10309_v38 = vshrl.u32 %v648_v20, 30  ;;  %v823_v15 = vor.u32 %v822_v1, %v821_v14  ;;  %vm787_vm11 = vcmp.eq.s32.totalorder %v10239_v6, 0  ;;  %vm790_vm12 = vcmp.eq.s32.totalorder %v10239_v6, 2 }
  0xf9   : > { %v814_v47 = vor.u32 %v813_v57, %v812_v28  ;;  %v817_v33 = vor.u32 %v816_v53, %v815_v36  ;;  %v820_v61 = vor.u32 %v819_v3, %v818_v34  ;;  %v826_v30 = vor.u32 %v825_v5, %v824_v13  ;;  %v8469_v3 = vld [vmem:[%s13291_s7 + $0x2d0] sm:$0xff]  ;;  %v10327_v53 = vpop.permute.xlu0 %2022  ;;  %v8470_v5 = vld [vmem:[%s13291_s7 + $0x2d8] sm:$0xff] }
  0xfa   : > { %v979_v32 = vand.u32 2147483647, %v978_v39  ;;  %v981_v50 = vcvt.s32.f32 %v974_v49  ;;  %v650_v9 = vshll.u32 %v10309_v38, 30  ;;  %vm830_vm13 = vcmp.lt.s32.totalorder %v10116_v27, 4  ;;  %3411 = vperm.xlu0 %9176, %v8469_v3   ;;  %3416 = vperm.xlu1 %9175, %v8470_v5   ;;  %v8472_v39 = vld [vmem:[%s13291_s7 + $0x2e8] sm:$0xff] }
  0xfb   : > { %v988_v22 = vsel %vm10258_vm10, 0, %v986_v60  ;;  %v803_v7 = vor.u32 8388608, %v10268_v19  ;;  %v811_v14 = vshrl.u32 %v13514_v21, %v10211_v24  ;;  %v836_v28 = vsel %vm830_vm13, %v823_v15, 920167782  ;;  %v10336_v24 = vpop.permute.xlu1 %2027 }
  0xfc   : > { %v982_v13 = vmul.f32 %v981_v50, %v979_v32  ;;  %v10332_v57 = vsub.s32 %v647_v42, %v650_v9  ;;  %vm827_vm14 = vcmp.lt.s32.totalorder %v10116_v27, 1  ;;  %vm829_vm15 = vcmp.lt.s32.totalorder %v10116_v27, 3  ;;  %13519 = vst [vmem:[#allocation29_spill] sm:$0xff] %v10336_v24  ;;  %v9330_v19 = vpop.eup %9329  ;;  %v8471_v50 = vld [vmem:[%s13291_s7 + $0x2e0] sm:$0xff] }
  0xfd   : > { %v832_v46 = vsel %vm830_vm13, %v820_v61, 2102212464  ;;  %v835_v31 = vsel %vm827_vm14, %v814_v47, %v817_v33  ;;  %v839_v49 = vsel %vm827_vm14, %v817_v33, %v820_v61  ;;  %v840_v9 = vsel %vm830_vm13, %v826_v30, 1326507024  ;;  %v9332_v42 = vpop.eup %9331  ;;  %v10359_v3 = vpop.permute.xlu0 %2032 }
  0xfe   : > { %v791_v20 = vxor.u32 2147483648, %v9330_v19  ;;  %v983_v1 = vxor.u32 2147483648, %v982_v13  ;;  %v653_v36 = vsub.s32 0, %v10332_v57  ;;  %v837_v34 = vsel %vm829_vm15, %v820_v61, %v836_v28  ;;  %3421 = vperm.xlu0 %9176, %v8471_v50   ;;  %3426 = vperm.xlu1 %9175, %v8472_v39  }
  0xff   : > { %vm783_vm0 = vweird.f32 %v9843_v56  ;;  %v788_v30 = vxor.u32 2147483648, %v9332_v42  ;;  %v992_v60 = vadd.s32 3, %v988_v22  ;;  %vm828_vm1 = vcmp.lt.s32.totalorder %v10116_v27, 2  ;;  %v10369_v24 = vpop.permute.xlu1 %2037 }
 0x100   : > { %v841_v32 = vsel %vm829_vm15, %v823_v15, %v840_v9  ;;  %vm578_vm2 = vcmp.lt.s32.totalorder %v9652_v26, 3  ;;  %v984_v61 = vsel %vm901_vm7, %v983_v1, %v982_v13  ;;  %v8193_v28 = vmin.u32 %v653_v36, %v10332_v57 }
 0x101   : > { %v831_v5 = vsel %vm827_vm14, %v811_v14, %v814_v47  ;;  %v833_v22 = vsel %vm829_vm15, %v817_v33, %v832_v46  ;;  %v987_v15 = vsel %vm10258_vm10, %v9850_v0, %v984_v61  ;;  %v838_v9 = vsel %vm828_vm1, %v835_v31, %v837_v34  ;;  %v10389_v46 = vpop.permute.xlu0 %2042 }
 0x102   : > { %v842_v13 = vsel %vm828_vm1, %v839_v49, %v841_v32  ;;  %v843_v1 = vshll.u32 %v803_v7, 8  ;;  %v789_v47 = vsel %vm787_vm11, %v9330_v19, %v788_v30  ;;  %v792_v33 = vsel %vm790_vm12, %v791_v20, %v9332_v42  ;;  %v8473_v7 = vld [vmem:[%s13291_s7 + $0x2f0] sm:$0xff]  ;;  %v8474_v19 = vld [vmem:[%s13291_s7 + $0x2f8] sm:$0xff] }
 0x103   : > { %9333 = vcosq.f32 %v987_v15  ;;  %v655_v14 = vclz %v8193_v28  ;;  %vm1014_vm3 = vcmp.gt.s32.totalorder %v10214_v63, 0  ;;  %vm1142_vm4 = vcmp.lt.s32.totalorder %v10229_v18, 4  ;;  %3431 = vperm.xlu0 %9176, %v8473_v7   ;;  %v10398_v42 = vpop.permute.xlu1 %2047  ;;  %3436 = vperm.xlu1 %9175, %v8474_v19  }
 0x104   : > { %9335 = vsinq.f32 %v987_v15  ;;  %v10384_v59 = vand.u32 3, %v992_v60  ;;  %vm786_vm5 = vcmp.lt.s32.totalorder %v10239_v6, 2  ;;  %13520 = vst [vmem:[#allocation30_spill] sm:$0xff] %v10398_v42  ;;  %v834_v36 = vsel %vm828_vm1, %v831_v5, %v833_v22  ;;  %v10409_v6 = vld [vmem:[%s13287_s3 + $0x8] sm:$0xff] }
 0x105   : > { %v8194_v31 = vadd.s32 4294967294, %v655_v14  ;;  %v10395_v49 = vmul.u32.u64.low %v843_v1, %v842_v13  ;;  %v10396_v50 = vmul.u32.u64.high %v843_v1, %v842_v13, %v10395_v49  ;;  %v793_v20 = vsel %vm786_vm5, %v789_v47, %v792_v33  ;;  %v10432_v28 = vpop.permute.xlu0 %2166 }
 0x106   : > { %v10402_v34 = vmul.u32.u64.low %v843_v1, %v838_v9  ;;  %v10403_v39 = vmul.u32.u64.high %v843_v1, %v838_v9, %v10402_v34  ;;  %v10414_v30 = vsel %vm1014_vm3, %v10214_v63, 0  ;;  %v10419_v27 = vsel %vm1142_vm4, %v10232_v35, 920167782  ;;  %13522 = vst [vmem:[#allocation31_spill] sm:$0xff] %v10432_v28 }
 0x107   : > { %v13521_v60 = vor.u32 %v10142_v12, %v10220_v58  ;;  %vm8195_vm6 = vcmp.lt.s32.totalorder %v8194_v31, 0  ;;  %vm995_vm7 = vcmp.eq.s32.totalorder %v10384_v59, 0  ;;  %vm998_vm8 = vcmp.eq.s32.totalorder %v10384_v59, 2  ;;  %4046 = vperm.xlu0 %9176, %v10409_v6   ;;  %v10438_v15 = vpop.permute.xlu1 %2171 }
 0x108   : > { %v643_v63 = vadd.s32 %v10222_v17, %v10208_v37  ;;  %v658_v61 = vsel %vm8195_vm6, 0, %v8194_v31  ;;  %v794_v5 = vsel %vm783_vm0, nan, %v793_v20  ;;  %vm994_vm9 = vcmp.lt.s32.totalorder %v10384_v59, 2  ;;  %13523 = vst [vmem:[#allocation32_spill] sm:$0xff] %v10438_v15 }
 0x109   : > { %v10426_v32 = vsel %vm1142_vm4, %v13521_v60, 1326507024  ;;  %v659_v12 = vsub.s32 32, %v658_v61  ;;  %v663_v58 = vsub.s32 4294967266, %v658_v61  ;;  %v850_v22 = vmul.u32 %v843_v1, %v834_v36  ;;  %v10463_v20 = vpop.permute.xlu0 %2176 }
 0x10a   : > { %vm991_vm10 = vweird.f32 %v9850_v0  ;;  %vm852_vm11 = vc.u32 %v10396_v50, %v10402_v34  ;;  %v853_v37 = vadd.s32 1, %v10403_v39  ;;  %v13347_v17 = vand.u32 2147483647, %v9897_v51  ;;  %13525 = vst [vmem:[#allocation33_spill] sm:$0xff] %v10463_v20 }
 0x10b   : > { %v1125_v9 = vshrl.u32 %v13502_v16, %v10093_v10  ;;  %v13524_v13 = vmov 1   ;;  %v660_v1 = vshll.u32 %v10332_v57, %v658_v61  ;;  %v661_v47 = vshrl.u32 %v643_v63, %v659_v12  ;;  %v4036_v57 = vld [vmem:[%s13287_s3] sm:$0xff] }
 0x10c   : > { %9177 = vset.pattern.permute.xlu1 %v13524_v13  ;;  %v664_v33 = vadd.s32 127, %v663_v58  ;;  %v1128_v14 = vshrl.u32 %v13517_v2, %v10093_v10  ;;  %v1212_v7 = vsel %vm578_vm2, %v9843_v56, %v794_v5  ;;  %v854_v19 = vsel %vm852_vm11, %v853_v37, %v10403_v39  ;;  %4041 = vperm.xlu0 %9176, %v4036_v57   ;;  %v10467_v39 = vpop.permute.xlu1 %2181 }
 0x10d   : > { %4084 = vperm.xlu1 %9177, %v10409_v6   ;;  %v1124_v31 = vshll.u32 %v13514_v21, %v10040_v48  ;;  %v1131_v49 = vshrl.u32 %v13508_v40, %v10093_v10  ;;  %v9334_v36 = vpop.eup %9333  ;;  %v662_v60 = vor.u32 %v661_v47, %v660_v1  ;;  %v855_v61 = vadd.s32 %v854_v19, %v850_v22  ;;  %v10476_v42 = vpop.permute.xlu0 %2186 }
 0x10e   : > { %v665_v63 = vshll.u32 %v664_v33, 23  ;;  %v1127_v56 = vshll.u32 %v13502_v16, %v10040_v48  ;;  %13526 = vst [vmem:[#allocation34_spill] sm:$0xff] %v10467_v39  ;;  %v9336_v5 = vpop.eup %9335  ;;  %v999_v12 = vxor.u32 2147483648, %v9334_v36  ;;  %v1114_v58 = vand.u32 8388607, %v13347_v17 }
 0x10f   : > { %v1126_v37 = vor.u32 %v1125_v9, %v1124_v31  ;;  %v1130_v15 = vshll.u32 %v13517_v2, %v10040_v48  ;;  %v996_v20 = vxor.u32 2147483648, %v9336_v5  ;;  %v856_v1 = vadd.s32 536870912, %v855_v61 }
 0x110   : > { %v666_v28 = vor.u32 4788187, %v665_v63  ;;  %v1129_v47 = vor.u32 %v1128_v14, %v1127_v56  ;;  %v1000_v22 = vsel %vm998_vm8, %v999_v12, %v9336_v5  ;;  %v1222_v33 = vmax.f32 %v1212_v7, 0.0  ;;  %v10483_v14 = vpop.permute.xlu1 %2191 }
 0x111   : > { %4080 = vperm.xlu1 %9177, %v4036_v57   ;;  %v673_v19 = vsub.s32 4, %v10309_v38  ;;  %v1132_v39 = vor.u32 %v1131_v49, %v1130_v15  ;;  %v997_v9 = vsel %vm995_vm7, %v9334_v36, %v996_v20  ;;  %v669_v17 = vcvt.s32.f32 %v662_v60  ;;  %v10501_v0 = vpop.permute.xlu0 %2196 }
 0x112   : > { %v667_v31 = vand.u32 2147483647, %v666_v28  ;;  %v10480_v48 = vshrl.u32 %v856_v1, 30  ;;  %v13527_v63 = vmov 2   ;;  %v1001_v56 = vsel %vm994_vm9, %v997_v9, %v1000_v22  ;;  %13528 = vst [vmem:[#allocation35_spill] sm:$0xff] %v10501_v0 }
 0x113   : > { %9178 = vset.pattern.permute.xlu0 %v13527_v63  ;;  %v1115_v5 = vor.u32 8388608, %v1114_v58  ;;  %vm1139_vm12 = vcmp.lt.s32.totalorder %v10229_v18, 1  ;;  %vm1141_vm13 = vcmp.lt.s32.totalorder %v10229_v18, 3  ;;  %v1002_v28 = vsel %vm991_vm10, nan, %v1001_v56 }
 0x114   : > { %4126 = vperm.xlu0 %9178, %v10409_v6   ;;  %v670_v15 = vmul.f32 %v669_v17, %v667_v31  ;;  %v858_v49 = vshll.u32 %v10480_v48, 30  ;;  %v1147_v20 = vsel %vm1139_vm12, %v1126_v37, %v1129_v47  ;;  %v1218_v59 = vpack.c.bf16 %v1002_v28, %v1212_v7  ;;  %v10512_v58 = vpop.permute.xlu1 %2201 }
 0x115   : > { %9179 = vset.pattern.permute.xlu1 %v13527_v63  ;;  %v1224_v36 = vmax.f32 %v1002_v28, 0.0  ;;  %v1149_v60 = vsel %vm1141_vm13, %v1132_v39, %v10419_v27  ;;  %v1151_v6 = vsel %vm1139_vm12, %v1129_v47, %v1132_v39  ;;  %vm1140_vm14 = vcmp.lt.s32.totalorder %v10229_v18, 2  ;;  %13529 = vst [vmem:[#allocation36_spill] sm:$0xff] %v10512_v58  ;;  %v10530_v31 = vpop.permute.xlu0 %2206 }
 0x116   : > { %4122 = vperm.xlu1 %9179, %v4036_v57   ;;  %v10503_v17 = vsub.s32 %v855_v61, %v858_v49  ;;  %v1144_v12 = vsel %vm1142_vm4, %v1132_v39, 2102212464  ;;  %v1153_v7 = vsel %vm1141_vm13, %v10232_v35, %v10426_v32  ;;  %1415 = vmatprep.subr.bf16.mxu0 %v1218_v59  ;;  %v671_v27 = vxor.u32 2147483648, %v670_v15  ;;  %13530 = vst [vmem:[#allocation37_spill] sm:$0xff] %v10530_v31 }
 0x117   : > { %v10514_v1 = vpack.c.bf16 %v1224_v36, %v1222_v33  ;;  %v1154_v57 = vsel %vm1140_vm14, %v1151_v6, %v1153_v7  ;;  %v1155_v61 = vshll.u32 %v1115_v5, 8  ;;  %vm589_vm15 = vcmp.lt.s32.totalorder %v9841_v55, 0 }
 0x118   : > { %9181 = vset.pattern.permute.xlu0 %v13524_v13  ;;  %v861_v39 = vsub.s32 0, %v10503_v17  ;;  %v1123_v22 = vshrl.u32 %v13514_v21, %v10093_v10  ;;  %v1150_v35 = vsel %vm1140_vm14, %v1147_v20, %v1149_v60  ;;  %v674_v32 = vsel %vm589_vm15, %v673_v19, %v10309_v38  ;;  %v10539_v38 = vpop.permute.xlu1 %2211 }
 0x119   : > { %1679 = vmatprep.subr.bf16.mxu1 %v10514_v1  ;;  %v10527_v33 = vmul.u32.u64.low %v1155_v61, %v1154_v57  ;;  %v10528_v9 = vmul.u32.u64.high %v1155_v61, %v1154_v57, %v10527_v33  ;;  %v13531_v13 = vmov 0   ;;  %v1017_v56 = vand.u32 31, %v10414_v30  ;;  %13532 = vst [vmem:[#allocation38_spill] sm:$0xff] %v10539_v38  ;;  %v10549_v7 = vpop.permute.xlu0 %2216 }
 0x11a   : > { %9180 = vset.pattern.permute.xlu1 %v13531_v13  ;;  %v8201_v5 = vmin.u32 %v861_v39, %v10503_v17  ;;  %v1143_v10 = vsel %vm1139_vm12, %v1123_v22, %v1126_v37  ;;  %v1145_v28 = vsel %vm1141_vm13, %v1129_v47, %v1144_v12  ;;  %v13533_v19 = vand.u32 2147483647, %v9841_v55  ;;  %13534 = vst [vmem:[#allocation39_spill] sm:$0xff] %v10549_v7 }
 0x11b   : > { %v672_v49 = vsel %vm589_vm15, %v671_v27, %v670_v15  ;;  %v10543_v20 = vmul.u32.u64.low %v1155_v61, %v1150_v35  ;;  %v10544_v59 = vmul.u32.u64.high %v1155_v61, %v1150_v35, %v10543_v20  ;;  %v1146_v6 = vsel %vm1140_vm14, %v1143_v10, %v1145_v28 }
 0x11c   : > { %vm588_vm0 = vcmp.le.f32.partialorder %v13533_v19, 0.7853982  ;;  %v863_v60 = vclz %v8201_v5  ;;  %v10554_v12 = vpop.permute.xlu1 %2221  ;;  %v10556_v15 = vsub.s32 32, %v1017_v56  ;;  %v13348_v39 = vand.u32 2147483647, %v9978_v23 }
 0x11d   : > { %v676_v36 = vsel %vm588_vm0, 0, %v674_v32  ;;  %v675_v37 = vsel %vm588_vm0, %v9841_v55, %v672_v49  ;;  %vm1164_vm1 = vc.u32 %v10528_v9, %v10543_v20  ;;  %13535 = vst [vmem:[#allocation40_spill] sm:$0xff] %v10554_v12  ;;  %v1165_v57 = vadd.s32 1, %v10544_v59  ;;  %v10567_v5 = vpop.permute.xlu0 %2226 }
 0x11e   : > { %v8202_v47 = vadd.s32 4294967294, %v863_v60  ;;  %v680_v27 = vadd.s32 3, %v676_v36  ;;  %v10561_v18 = vshrl.u32 %v10414_v30, 5  ;;  %v1162_v22 = vmul.u32 %v1155_v61, %v1146_v6  ;;  %13536 = vst [vmem:[#allocation41_spill] sm:$0xff] %v10567_v5 }
 0x11f   : > { %9337 = vcosq.f32 %v675_v37  ;;  %vm797_vm4 = vcmp.lt.s32.totalorder %v9857_v8, 0  ;;  %v851_v35 = vadd.s32 %v10402_v34, %v10396_v50  ;;  %v1166_v33 = vsel %vm1164_vm1, %v1165_v57, %v10544_v59 }
 0x120   : > { %vm8203_vm3 = vcmp.lt.s32.totalorder %v8202_v47, 0  ;;  %9339 = vsinq.f32 %v675_v37  ;;  %v1167_v19 = vadd.s32 %v1166_v33, %v1162_v22  ;;  %v10569_v49 = vpop.permute.xlu1 %2231  ;;  %v10571_v30 = vand.u32 3, %v680_v27 }
 0x121   : > { %v866_v32 = vsel %vm8203_vm3, 0, %v8202_v47  ;;  %13537 = vst [vmem:[#allocation42_spill] sm:$0xff] %v10569_v49  ;;  %v881_v61 = vsub.s32 4, %v10480_v48  ;;  %v10576_v36 = vand.u32 8388607, %v13348_v39  ;;  %v1027_v50 = vshrl.u32 %v13508_v40, %v10556_v15  ;;  %v10589_v22 = vpop.permute.xlu0 %2236 }
 0x122   : > { %v867_v10 = vsub.s32 32, %v866_v32  ;;  %v871_v28 = vsub.s32 4294967266, %v866_v32  ;;  %v868_v34 = vshll.u32 %v10503_v17, %v866_v32  ;;  %v1168_v6 = vadd.s32 536870912, %v1167_v19  ;;  %13538 = vst [vmem:[#allocation43_spill] sm:$0xff] %v10589_v22 }
 0x123   : > { %v1021_v37 = vshrl.u32 %v13502_v16, %v10556_v15  ;;  %v1024_v47 = vshrl.u32 %v13517_v2, %v10556_v15  ;;  %v1030_v27 = vshrl.u32 %v13504_v4, %v10556_v15  ;;  %v1033_v57 = vshrl.u32 %v13501_v45, %v10556_v15 }
 0x124   : > { %v869_v59 = vshrl.u32 %v851_v35, %v867_v10  ;;  %v872_v60 = vadd.s32 127, %v871_v28  ;;  %v10591_v17 = vshrl.u32 %v1168_v6, 30  ;;  %v1026_v35 = vshll.u32 %v13517_v2, %v1017_v56  ;;  %v10594_v32 = vpop.permute.xlu1 %2241 }
 0x125   : > { %13539 = vst [vmem:[#allocation44_spill] sm:$0xff] %v10594_v32  ;;  %v1020_v10 = vshll.u32 %v13514_v21, %v1017_v56  ;;  %v1023_v28 = vshll.u32 %v13502_v16, %v1017_v56  ;;  %v1029_v63 = vshll.u32 %v13508_v40, %v1017_v56  ;;  %v1032_v49 = vshll.u32 %v13504_v4, %v1017_v56  ;;  %v10607_v38 = vpop.permute.xlu0 %2489 }
 0x126   : > { %v870_v33 = vor.u32 %v869_v59, %v868_v34  ;;  %v873_v39 = vshll.u32 %v872_v60, 23  ;;  %v13540_v5 = vand.u32 2147483647, %v9857_v8  ;;  %v1170_v59 = vshll.u32 %v10591_v17, 30  ;;  %13543 = vst [vmem:[#allocation45_spill] sm:$0xff] %v10607_v38 }
 0x127   : > { %v1028_v60 = vor.u32 %v1027_v50, %v1026_v35  ;;  %v1022_v6 = vor.u32 %v1021_v37, %v1020_v10  ;;  %v1025_v32 = vor.u32 %v1024_v47, %v1023_v28  ;;  %v1031_v12 = vor.u32 %v1030_v27, %v1029_v63 }
 0x128   : > { %vm10602_vm5 = vcmp.le.f32.partialorder %v13540_v5, 0.7853982  ;;  %v874_v34 = vor.u32 4788187, %v873_v39  ;;  %v1034_v7 = vor.u32 %v1033_v57, %v1032_v49  ;;  %v877_v58 = vcvt.s32.f32 %v870_v33  ;;  %v10614_v0 = vpop.permute.xlu1 %2494 }
 0x129   : > { %v882_v56 = vsel %vm797_vm4, %v881_v61, %v10480_v48  ;;  %v10612_v5 = vsub.s32 %v1167_v19, %v1170_v59  ;;  %13544 = vst [vmem:[#allocation46_spill] sm:$0xff] %v10614_v0  ;;  %v9338_v39 = vpop.eup %9337  ;;  %vm683_vm6 = vcmp.eq.s32.totalorder %v10571_v30, 0  ;;  %v1011_v50 = vor.u32 8388608, %v10576_v36  ;;  %v10627_v27 = vpop.permute.xlu0 %2499 }
 0x12a   : > { %v875_v31 = vand.u32 2147483647, %v874_v34  ;;  %vm1035_vm7 = vcmp.lt.s32.totalorder %v10561_v18, 1  ;;  %vm1036_vm8 = vcmp.lt.s32.totalorder %v10561_v18, 2  ;;  %vm1038_vm9 = vcmp.lt.s32.totalorder %v10561_v18, 4  ;;  %v9340_v63 = vpop.eup %9339  ;;  %13545 = vst [vmem:[#allocation47_spill] sm:$0xff] %v10627_v27 }
 0x12b   : > { %v1173_v37 = vsub.s32 0, %v10612_v5  ;;  %vm1037_vm10 = vcmp.lt.s32.totalorder %v10561_v18, 3  ;;  %v1040_v48 = vsel %vm1038_vm9, %v1028_v60, 2102212464  ;;  %v1043_v19 = vsel %vm1035_vm7, %v1022_v6, %v1025_v32 }
 0x12c   : > { %v878_v49 = vmul.f32 %v877_v58, %v875_v31  ;;  %v1044_v61 = vsel %vm1038_vm9, %v1031_v12, 920167782  ;;  %v1047_v36 = vsel %vm1035_vm7, %v1025_v32, %v1028_v60  ;;  %v1048_v47 = vsel %vm1038_vm9, %v1034_v7, 1326507024  ;;  %v10634_v35 = vpop.permute.xlu1 %2504 }
 0x12d   : > { %v8213_v33 = vmin.u32 %v1173_v37, %v10612_v5  ;;  %v1045_v58 = vsel %vm1037_vm10, %v1028_v60, %v1044_v61  ;;  %v1049_v31 = vsel %vm1037_vm10, %v1031_v12, %v1048_v47  ;;  %13546 = vst [vmem:[#allocation48_spill] sm:$0xff] %v10634_v35  ;;  %v684_v10 = vxor.u32 2147483648, %v9340_v63 }
 0x12e   : > { %v879_v57 = vxor.u32 2147483648, %v878_v49  ;;  %v687_v28 = vxor.u32 2147483648, %v9338_v39  ;;  %v1019_v34 = vshrl.u32 %v13514_v21, %v10556_v15  ;;  %v1050_v7 = vsel %vm1036_vm8, %v1047_v36, %v1049_v31  ;;  %v10653_v31 = vpop.permute.xlu0 %2509 }
 0x12f   : > { %v1175_v37 = vclz %v8213_v33  ;;  %v1046_v60 = vsel %vm1036_vm8, %v1043_v19, %v1045_v58  ;;  %v1051_v61 = vshll.u32 %v1011_v50, 8  ;;  %v884_v47 = vsel %vm10602_vm5, 0, %v882_v56  ;;  %13547 = vst [vmem:[#allocation49_spill] sm:$0xff] %v10653_v31 }
 0x130   : > { %v880_v59 = vsel %vm797_vm4, %v879_v57, %v878_v49  ;;  %v1039_v15 = vsel %vm1035_vm7, %v1019_v34, %v1022_v6  ;;  %v1041_v36 = vsel %vm1037_vm10, %v1025_v32, %v1040_v48  ;;  %v10658_v50 = vpop.permute.xlu1 %2514  ;;  %vm686_vm11 = vcmp.eq.s32.totalorder %v10571_v30, 2 }
 0x131   : > { %v883_v12 = vsel %vm10602_vm5, %v9857_v8, %v880_v59  ;;  %v8214_v49 = vadd.s32 4294967294, %v1175_v37  ;;  %v10655_v57 = vmul.u32.u64.low %v1051_v61, %v1050_v7  ;;  %v10656_v19 = vmul.u32.u64.high %v1051_v61, %v1050_v7, %v10655_v57  ;;  %13548 = vst [vmem:[#allocation50_spill] sm:$0xff] %v10658_v50 }
 0x132   : > { %9341 = vcosq.f32 %v883_v12  ;;  %v10661_v22 = vmul.u32.u64.low %v1051_v61, %v1046_v60  ;;  %v10662_v56 = vmul.u32.u64.high %v1051_v61, %v1046_v60, %v10661_v22  ;;  %v685_v6 = vsel %vm683_vm6, %v9338_v39, %v684_v10  ;;  %v10669_v34 = vpop.permute.xlu0 %2519 }
 0x133   : > { %9343 = vsinq.f32 %v883_v12  ;;  %v688_v32 = vsel %vm686_vm11, %v687_v28, %v9340_v63  ;;  %vm8215_vm12 = vcmp.lt.s32.totalorder %v8214_v49, 0  ;;  %v888_v48 = vadd.s32 3, %v884_v47  ;;  %13549 = vst [vmem:[#allocation51_spill] sm:$0xff] %v10669_v34 }
 0x134   : > { %v1178_v33 = vsel %vm8215_vm12, 0, %v8214_v49  ;;  %v1042_v58 = vsel %vm1036_vm8, %v1039_v15, %v1041_v36  ;;  %vm682_vm13 = vcmp.lt.s32.totalorder %v10571_v30, 2  ;;  %v1163_v7 = vadd.s32 %v10543_v20, %v10528_v9  ;;  %v10674_v60 = vpop.permute.xlu1 %2524 }
 0x135   : > { %v1179_v59 = vsub.s32 32, %v1178_v33  ;;  %v1183_v37 = vsub.s32 4294967266, %v1178_v33  ;;  %13550 = vst [vmem:[#allocation52_spill] sm:$0xff] %v10674_v60  ;;  %v689_v12 = vsel %vm682_vm13, %v685_v6, %v688_v32  ;;  %vm1060_vm14 = vc.u32 %v10656_v19, %v10661_v22 }
 0x136   : > { %v1061_v39 = vadd.s32 1, %v10662_v56  ;;  %v1180_v18 = vshll.u32 %v10612_v5, %v1178_v33  ;;  %v1058_v28 = vmul.u32 %v1051_v61, %v1042_v58  ;;  %vm679_vm15 = vweird.f32 %v9841_v55  ;;  %v10682_v20 = vpop.permute.xlu0 %2529 }
 0x137   : > { %v1181_v63 = vshrl.u32 %v1163_v7, %v1179_v59  ;;  %v1184_v10 = vadd.s32 127, %v1183_v37  ;;  %v889_v30 = vand.u32 3, %v888_v48  ;;  %13551 = vst [vmem:[#allocation53_spill] sm:$0xff] %v10682_v20  ;;  %v690_v47 = vsel %vm679_vm15, nan, %v689_v12 }
 0x138   : > { %v1062_v9 = vsel %vm1060_vm14, %v1061_v39, %v10662_v56  ;;  %v10684_v57 = vpop.permute.xlu1 %2534  ;;  %v1211_v61 = vsel %vm578_vm2, %v9841_v55, %v690_v47  ;;  %vm887_vm4 = vweird.f32 %v9857_v8  ;;  %vm1109_vm5 = vcmp.lt.s32.totalorder %v9897_v51, 0 }
 0x139   : > { %v1182_v15 = vor.u32 %v1181_v63, %v1180_v18  ;;  %v1185_v36 = vshll.u32 %v1184_v10, 23  ;;  %v1063_v49 = vadd.s32 %v1062_v9, %v1058_v28  ;;  %13552 = vst [vmem:[#allocation54_spill] sm:$0xff] %v10684_v57  ;;  %vm894_vm0 = vcmp.eq.s32.totalorder %v889_v30, 2 }
 0x13a   : > { %v10689_v48 = vpop.permute.xlu0 %2539  ;;  %vm890_vm1 = vcmp.lt.s32.totalorder %v889_v30, 2  ;;  %vm891_vm3 = vcmp.eq.s32.totalorder %v889_v30, 0  ;;  %v1193_v63 = vsub.s32 4, %v10591_v17  ;;  %v1221_v28 = vmax.f32 %v1211_v61, 0.0 }
 0x13b   : > { %v1186_v32 = vor.u32 4788187, %v1185_v36  ;;  %v1064_v60 = vadd.s32 536870912, %v1063_v49  ;;  %13553 = vst [vmem:[#allocation55_spill] sm:$0xff] %v10689_v48  ;;  %v1189_v7 = vcvt.s32.f32 %v1182_v15  ;;  %vm1199_vm11 = vweird.f32 %v9897_v51 }
 0x13c   : > { %v9342_v6 = vpop.eup %9341  ;;  %v10693_v37 = vpop.permute.xlu1 %2544  ;;  %vm1408_vm12 = vcmask 1043456   ;;  %vm1005_vm13 = vcmp.lt.s32.totalorder %v9978_v23, 0 }
 0x13d   : > { %v9344_v5 = vpop.eup %9343  ;;  %v895_v33 = vxor.u32 2147483648, %v9342_v6  ;;  %v1187_v58 = vand.u32 2147483647, %v1186_v32  ;;  %v10691_v59 = vshrl.u32 %v1064_v60, 30  ;;  %13554 = vst [vmem:[#allocation56_spill] sm:$0xff] %v10693_v37 }
 0x13e   : > { %v892_v56 = vxor.u32 2147483648, %v9344_v5  ;;  %v10698_v9 = vpop.permute.xlu0 %2549 }
 0x13f   : > { %v896_v12 = vsel %vm894_vm0, %v895_v33, %v9344_v5  ;;  %v1190_v18 = vmul.f32 %v1189_v7, %v1187_v58  ;;  %v1066_v10 = vshll.u32 %v10691_v59, 30  ;;  %13555 = vst [vmem:[#allocation57_spill] sm:$0xff] %v10698_v9  ;;  %v1194_v33 = vsel %vm1109_vm5, %v1193_v63, %v10591_v17 }
 0x140   : > { %v893_v39 = vsel %vm891_vm3, %v9342_v6, %v892_v56  ;;  %v10700_v36 = vpop.permute.xlu1 %2554  ;;  %v13557_v6 = vand.u32 2147483647, %v9897_v51  ;;  %vm1095_vm3 = vweird.f32 %v9978_v23 }
 0x141   : > { %v897_v55 = vsel %vm890_vm1, %v893_v39, %v896_v12  ;;  %v1191_v60 = vxor.u32 2147483648, %v1190_v18  ;;  %v1067_v15 = vsub.s32 %v1063_v49, %v1066_v10  ;;  %13556 = vst [vmem:[#allocation58_spill] sm:$0xff] %v10700_v36 }
 0x142   : > { %v898_v47 = vsel %vm887_vm4, nan, %v897_v55  ;;  %vm10705_vm6 = vcmp.le.f32.partialorder %v13557_v6, 0.7853982  ;;  %vm1383_vm4 = vcmask 195584  }
 0x143   : > { %v1217_v32 = vpack.c.bf16 %v898_v47, %v1211_v61  ;;  %v1223_v30 = vmax.f32 %v898_v47, 0.0  ;;  %v1192_v8 = vsel %vm1109_vm5, %v1191_v60, %v1190_v18  ;;  %v1069_v56 = vsub.s32 0, %v1067_v15  ;;  %v10715_v61 = vpop.permute.xlu0 %2559 }
 0x144   : > { %v1195_v49 = vsel %vm10705_vm6, %v9897_v51, %v1192_v8  ;;  %13560 = vst [vmem:[#allocation59_spill] sm:$0xff] %v10715_v61  ;;  %v10717_v12 = vpop.permute.xlu1 %2564  ;;  %v1196_v39 = vsel %vm10705_vm6, 0, %v1194_v33 }
 0x145   : > { %1416 = vmatpush1.bf16.msra.mxu0 %v1217_v32  ;;  %v10710_v58 = vpack.c.bf16 %v1223_v30, %v1221_v28  ;;  %9345 = vcosq.f32 %v1195_v49  ;;  %v8209_v7 = vmin.u32 %v1069_v56, %v1067_v15  ;;  %13561 = vst [vmem:[#allocation60_spill] sm:$0xff] %v10717_v12  ;;  %v1200_v63 = vadd.s32 3, %v1196_v39 }
 0x146   : > { %9347 = vsinq.f32 %v1195_v49  ;;  %v1059_v32 = vadd.s32 %v10661_v22, %v10656_v19 }
 0x147   : > { %1680 = vmatpush1.bf16.msra.mxu1 %v10710_v58  ;;  %v1071_v17 = vclz %v8209_v7  ;;  %v10722_v18 = vpop.permute.xlu0 %3167  ;;  %v1201_v60 = vand.u32 3, %v1200_v63 }
 0x148   : > { %13562 = vst [vmem:[#allocation61_spill] sm:$0xff] %v10722_v18  ;;  %v10724_v55 = vpop.permute.xlu1 %3172 }
 0x149   : > { %v8210_v10 = vadd.s32 4294967294, %v1071_v17  ;;  %13563 = vst [vmem:[#allocation62_spill] sm:$0xff] %v10724_v55  ;;  %vm1206_vm8 = vcmp.eq.s32.totalorder %v1201_v60, 2  ;;  %vm1203_vm9 = vcmp.eq.s32.totalorder %v1201_v60, 0  ;;  %vm1202_vm10 = vcmp.lt.s32.totalorder %v1201_v60, 2 }
 0x14b   : > { %vm8211_vm7 = vcmp.lt.s32.totalorder %v8210_v10, 0  ;;  %v10726_v47 = vpop.permute.xlu0 %3177 }
 0x14c   : > { %v1074_v28 = vsel %vm8211_vm7, 0, %v8210_v10  ;;  %13564 = vst [vmem:[#allocation63_spill] sm:$0xff] %v10726_v47  ;;  %v10730_v5 = vpop.permute.xlu1 %3182 }
 0x14d   : > { %v1075_v30 = vsub.s32 32, %v1074_v28  ;;  %v1079_v6 = vsub.s32 4294967266, %v1074_v28  ;;  %13565 = vst [vmem:[#allocation64_spill] sm:$0xff] %v10730_v5  ;;  %v1076_v33 = vshll.u32 %v1067_v15, %v1074_v28 }
 0x14f   : > { %v9346_v8 = vpop.eup %9345  ;;  %v1077_v56 = vshrl.u32 %v1059_v32, %v1075_v30  ;;  %v1080_v49 = vadd.s32 127, %v1079_v6  ;;  %v10732_v17 = vpop.permute.xlu0 %3187 }
 0x150   : > { %v9348_v7 = vpop.eup %9347  ;;  %v1207_v39 = vxor.u32 2147483648, %v9346_v8  ;;  %13566 = vst [vmem:[#allocation65_spill] sm:$0xff] %v10732_v17  ;;  %v10734_v63 = vpop.permute.xlu1 %3192 }
 0x151   : > { %v1204_v55 = vxor.u32 2147483648, %v9348_v7  ;;  %v1078_v10 = vor.u32 %v1077_v56, %v1076_v33  ;;  %v1081_v47 = vshll.u32 %v1080_v49, 23  ;;  %13567 = vst [vmem:[#allocation66_spill] sm:$0xff] %v10734_v63  ;;  %v1089_v63 = vsub.s32 4, %v10691_v59 }
 0x152   : > { %v1208_v19 = vsel %vm1206_vm8, %v1207_v39, %v9348_v7 }
 0x153   : > { %v1205_v22 = vsel %vm1203_vm9, %v9346_v8, %v1204_v55  ;;  %v1082_v18 = vor.u32 4788187, %v1081_v47  ;;  %v10737_v28 = vpop.permute.xlu0 %3197  ;;  %v1085_v6 = vcvt.s32.f32 %v1078_v10  ;;  %v1090_v7 = vsel %vm1005_vm13, %v1089_v63, %v10691_v59 }
 0x154   : > { %v1209_v15 = vsel %vm1202_vm10, %v1205_v22, %v1208_v19  ;;  %13568 = vst [vmem:[#allocation67_spill] sm:$0xff] %v10737_v28  ;;  %v10739_v17 = vpop.permute.xlu1 %3202 }
 0x155   : > { %v1210_v32 = vsel %vm1199_vm11, nan, %v1209_v15  ;;  %v1083_v30 = vand.u32 2147483647, %v1082_v18  ;;  %13569 = vst [vmem:[#allocation68_spill] sm:$0xff] %v10739_v17  ;;  %v13572_v18 = vand.u32 2147483647, %v9978_v23 }
 0x156   : > { %v1220_v33 = vpack.c.bf16 %v1210_v32, %v1210_v32  ;;  %v1226_v56 = vmax.f32 %v1210_v32, 0.0 }
 0x157   : > { %v1086_v49 = vmul.f32 %v1085_v6, %v1083_v30  ;;  %v10745_v47 = vpop.permute.xlu0 %3207  ;;  %vm1004_vm14 = vcmp.le.f32.partialorder %v13572_v18, 0.7853982 }
 0x158   : > { %8224 = vmatprep.subr.msk.bf16.mxu0 %vm1408_vm12, %v1220_v33  ;;  %v10743_v55 = vpack.c.bf16 %v1226_v56, %v1226_v56  ;;  %13570 = vst [vmem:[#allocation69_spill] sm:$0xff] %v10745_v47  ;;  %v10747_v60 = vpop.permute.xlu1 %3212  ;;  %v1092_v22 = vsel %vm1004_vm14, 0, %v1090_v7 }
 0x159   : > { %v1087_v51 = vxor.u32 2147483648, %v1086_v49  ;;  %13571 = vst [vmem:[#allocation70_spill] sm:$0xff] %v10747_v60  ;;  %v1096_v32 = vadd.s32 3, %v1092_v22 }
 0x15a   : > { %8257 = vmatprep.subr.msk.bf16.mxu1 %vm1408_vm12, %v10743_v55 }
 0x15b   : > { %v1088_v8 = vsel %vm1005_vm13, %v1087_v51, %v1086_v49  ;;  %v10756_v10 = vpop.permute.xlu0 %3217  ;;  %v1097_v33 = vand.u32 3, %v1096_v32 }
 0x15c   : > { %v1091_v39 = vsel %vm1004_vm14, %v9978_v23, %v1088_v8  ;;  %13573 = vst [vmem:[#allocation71_spill] sm:$0xff] %v10756_v10  ;;  %v10758_v19 = vpop.permute.xlu1 %3222 }
 0x15d   : > { %9349 = vcosq.f32 %v1091_v39  ;;  %13574 = vst [vmem:[#allocation72_spill] sm:$0xff] %v10758_v19  ;;  %vm1102_vm15 = vcmp.eq.s32.totalorder %v1097_v33, 2  ;;  %vm1099_vm0 = vcmp.eq.s32.totalorder %v1097_v33, 0  ;;  %vm1098_vm1 = vcmp.lt.s32.totalorder %v1097_v33, 2 }
 0x15e   : > { %9351 = vsinq.f32 %v1091_v39 }
 0x15f   : > { %v10760_v15 = vpop.permute.xlu0 %3227 }
 0x160   : > { %13575 = vst [vmem:[#allocation73_spill] sm:$0xff] %v10760_v15  ;;  %v10762_v30 = vpop.permute.xlu1 %3232 }
 0x161   : > { %13576 = vst [vmem:[#allocation74_spill] sm:$0xff] %v10762_v30 }
 0x163   : > { %v10764_v6 = vpop.permute.xlu0 %3237 }
 0x164   : > { %13577 = vst [vmem:[#allocation75_spill] sm:$0xff] %v10764_v6  ;;  %v10766_v56 = vpop.permute.xlu1 %3242 }
 0x165   : > { %13578 = vst [vmem:[#allocation76_spill] sm:$0xff] %v10766_v56 }
 0x167   : > { %v9350_v59 = vpop.eup %9349  ;;  %v10768_v51 = vpop.permute.xlu0 %3361 }
 0x168   : > { %v9352_v63 = vpop.eup %9351  ;;  %v1103_v49 = vxor.u32 2147483648, %v9350_v59  ;;  %13579 = vst [vmem:[#allocation77_spill] sm:$0xff] %v10768_v51  ;;  %v10770_v8 = vpop.permute.xlu1 %3366 }
 0x169   : > { %v1100_v18 = vxor.u32 2147483648, %v9352_v63  ;;  %13580 = vst [vmem:[#allocation78_spill] sm:$0xff] %v10770_v8  ;;  %v9185_v8 = vld [vmem:[%s13289_s5] sm:$0xff]  }
 0x16a   : > { %v1104_v7 = vsel %vm1102_vm15, %v1103_v49, %v9352_v63 }
 0x16b   : > { %v1101_v39 = vsel %vm1099_vm0, %v9350_v59, %v1100_v18  ;;  %v10773_v6 = vpop.permute.xlu0 %3371  ;;  %v9186_v59 = vld [vmem:[%s13289_s5 + $0x8] sm:$0xff]  }
 0x16c   : > { %v1105_v22 = vsel %vm1098_vm1, %v1101_v39, %v1104_v7  ;;  %13581 = vst [vmem:[#allocation79_spill] sm:$0xff] %v10773_v6  ;;  %v10775_v56 = vpop.permute.xlu1 %3376 }
 0x16d   : > { %v1106_v32 = vsel %vm1095_vm3, nan, %v1105_v22  ;;  %13582 = vst [vmem:[#allocation80_spill] sm:$0xff] %v10775_v56  ;;  %v4035_v22 = vld [vmem:[%s436_s21] sm:$0x77]  ;;  %s425_s21 = scalar_lea.vmem [#allocation3], %s8187_s18 }
 0x16e   : > { %v1219_v30 = vpack.c.bf16 %v1106_v32, %v1106_v32  ;;  %v1225_v15 = vmax.f32 %v1106_v32, 0.0  ;;  %s8112_s22 = sshll.u32 %s425_s21, 4  ;;  %s13244_s22 = int_to_ptr.vmem [resolvable:$true] %s8112_s22 }
 0x16f   : > { %v10781_v63 = vpop.permute.xlu0 %3381  ;;  %s9385_s13 = scalar_lea.vmem %s13244_s22, 128  ;;  %p9392_p0 = scmp.lt.s32.totalorder %s13244_s22, %s9390_s29 }
 0x170   : > { %v1410_v51 = vsel %vm1408_vm12, %v1219_v30, 0  ;;  %v1229_v19 = vpack.c.bf16 %v1225_v15, %v1225_v15  ;;  %13583 = vst [vmem:[#allocation81_spill] sm:$0xff] %v10781_v63  ;;  %v10783_v23 = vpop.permute.xlu1 %3386  ;;  %v13601_v63 = vsub.s32 6, %v9652_v26  ;;  %p9386_p11 = scmp.ne.s32.totalorder %s13244_s22, %s9385_s13  ;;  %p9393_p1 = scmp.lt.s32.totalorder %s9391_s30, %s9385_s13 }
 0x171   : > { %1418 = vmatpush1.bf16.msra.mxu0 %v1410_v51  ;;  %13584 = vst [vmem:[#allocation82_spill] sm:$0xff] %v10783_v23 }
 0x172   : > { %v10786_v33 = vsel %vm1408_vm12, %v1229_v19, 0  ;;  %v4140_v56 = vrot.slane %v4035_v22, %v13601_v63  ;;  %p9387_p12 = pnand %p9386_p11, %p9566_p5  ;;  %p9394_p2 = por %p9393_p1, %p9392_p0 }
 0x173   : > { %1682 = vmatpush1.bf16.msra.mxu1 %v10786_v33  ;;  %v10790_v30 = vpop.permute.xlu0 %3391 }
 0x174   : > { %8225 = vmatmul.mubr.msk.bf16.vlgmr.msra.gmra.mrb[0].mxu0 %vm1383_vm4, %v9185_v8  ;;  %13585 = vst [vmem:[#allocation83_spill] sm:$0xff] %v10790_v30  ;;  %v10793_v15 = vpop.permute.xlu1 %3396  ;;  %v9187_v8 = vld [vmem:[%s13289_s5 + $0x10] sm:$0xff]   ;;  %p9388_p13 = pneg %p9387_p12 }
 0x175   : > { %1457 = vmatprep.mubr.bf16.mxu0 %v13531_v13  ;;  %13586 = vst [vmem:[#allocation84_spill] sm:$0xff] %v10793_v15 }
 0x176   : > { %p9395_p3 = pnand %p9394_p2, %p9388_p13 }
 0x177   : > { %v10798_v49 = vpop.permute.xlu0 %3401 }
 0x178   : > { %13587 = vst [vmem:[#allocation85_spill] sm:$0xff] %v10798_v49  ;;  %v10800_v51 = vpop.permute.xlu1 %3406  ;;  %v13595_v49 = vsub.s32 5, %v9652_v26 }
 0x179   : > { %13588 = vst [vmem:[#allocation86_spill] sm:$0xff] %v10800_v51  ;;  %v4094_v51 = vrot.slane %v4035_v22, %v9766_v62 }
 0x17a   : > { %v4098_v15 = vrot.slane %v4035_v22, %v13595_v49 }
 0x17b   : > { %v10803_v19 = vpop.permute.xlu0 %3411 }
 0x17c   : > { %8226 = vmatmul.mubr.msk.bf16.gmra.mrb[4].mxu0 %vm1383_vm4, %v9186_v59  ;;  %13589 = vst [vmem:[#allocation87_spill] sm:$0xff] %v10803_v19  ;;  %v10806_v18 = vpop.permute.xlu1 %3416  ;;  %v4058_v59 = vrot.slane %v4035_v22, %v9663_v29  ;;  %v10845_v49 = vrot.slane %v4098_v15, %v9766_v62 }
 0x17d   : > { %1467 = vmatprep.mubr.bf16.mxu0 %v13531_v13  ;;  %13590 = vst [vmem:[#allocation88_spill] sm:$0xff] %v10806_v18  ;;  %v13594_v18 = vsub.s32 4, %v9652_v26 }
 0x17e   : > { %13600 = vst [vmem:[#allocation96_spill] sm:$0xff] %v10845_v49 }
 0x17f   : > { %v10816_v7 = vpop.permute.xlu0 %3421  ;;  %v4062_v19 = vrot.slane %v4035_v22, %v13594_v18  ;;  %v10842_v18 = vrot.slane %v4094_v51, %v9766_v62 }
 0x180   : > { %13591 = vst [vmem:[#allocation89_spill] sm:$0xff] %v10816_v7  ;;  %v10818_v39 = vpop.permute.xlu1 %3426 }
 0x181   : > { %13592 = vst [vmem:[#allocation90_spill] sm:$0xff] %v10818_v39  ;;  %v10839_v30 = vrot.slane %v4062_v19, %v9663_v29  ;;  %13599 = vst [vmem:[#allocation95_spill] sm:$0xff] %v10842_v18 }
 0x183   : > { %v10821_v32 = vpop.permute.xlu0 %3431  ;;  %13598 = vst [vmem:[#allocation94_spill] sm:$0xff] %v10839_v30 }
 0x184   : > { %8227 = vmatmul.mubr.msk.bf16.gmra.mrb[8].mxu0 %vm1383_vm4, %v9187_v8  ;;  %13593 = vst [vmem:[#allocation91_spill] sm:$0xff] %v10821_v32  ;;  %v10830_v7 = vpop.permute.xlu1 %3436  ;;  %v9188_v8 = vld [vmem:[%s13289_s5 + $0x18] sm:$0xff]   ;;  %v10836_v32 = vrot.slane %v4058_v59, %v9663_v29 }
 0x185   : > { %1477 = vmatprep.mubr.bf16.mxu0 %v13531_v13  ;;  %13596 = vst [vmem:[#allocation92_spill] sm:$0xff] %v10830_v7  ;;  %v4136_v7 = vrot.slane %v4035_v22, %v9785_v11  ;;  %v10862_v22 = vrot.slane %v4140_v56, %v9785_v11 }
 0x186   : > { %13597 = vst [vmem:[#allocation93_spill] sm:$0xff] %v10836_v32 }
 0x187   : > { %v4047_v39 = vpop.permute.xlu0 %4046  ;;  %v10859_v63 = vrot.slane %v4136_v7, %v9785_v11  ;;  %13603 = vst [vmem:[#allocation98_spill] sm:$0xff] %v10862_v22 }
 0x188   : > { %v4075_v59 = vmul.f32 %v10836_v32, %v4047_v39  ;;  %v4076_v6 = vmul.f32 %v10839_v30, %v4047_v39 }
 0x189   : > { %13602 = vst [vmem:[#allocation97_spill] sm:$0xff] %v10859_v63 }
 0x18b   : > { %v4042_v29 = vpop.permute.xlu0 %4041 }
 0x18c   : > { %v4085_v23 = vpop.permute.xlu1 %4084  ;;  %8228 = vmatmul.mubr.msk.bf16.gmra.mrb[12].mxu0 %vm1383_vm4, %v9188_v8  ;;  %v4073_v62 = vmul.f32 %v10836_v32, %v4042_v29  ;;  %v4074_v15 = vmul.f32 %v10839_v30, %v4042_v29 }
 0x18d   : > { %v4111_v19 = vmul.f32 %v10842_v18, %v4085_v23  ;;  %v4112_v51 = vmul.f32 %v10845_v49, %v4085_v23  ;;  %1487 = vmatprep.mubr.bf16.mxu0 %v13531_v13  ;;  %v9189_v23 = vld [vmem:[%s13289_s5 + $0x20] sm:$0xff]  }
 0x18f   : > { %v4117_v60 = vadd.f32 %v4111_v19, %v4075_v59  ;;  %v4118_v47 = vadd.f32 %v4112_v51, %v4076_v6 }
 0x190   : > { %v4081_v10 = vpop.permute.xlu1 %4080 }
 0x191   : > { %v4109_v39 = vmul.f32 %v10842_v18, %v4081_v10  ;;  %v4110_v8 = vmul.f32 %v10845_v49, %v4081_v10 }
 0x193   : > { %v4127_v32 = vpop.permute.xlu0 %4126  ;;  %v4115_v17 = vadd.f32 %v4109_v39, %v4073_v62  ;;  %v4116_v29 = vadd.f32 %v4110_v8, %v4074_v15 }
 0x194   : > { %v4153_v30 = vmul.f32 %v10859_v63, %v4127_v32  ;;  %v4154_v7 = vmul.f32 %v10862_v22, %v4127_v32  ;;  %8229 = vmatmul.mubr.msk.bf16.gmra.mrb[16].mxu0 %vm1383_vm4, %v9189_v23 }
 0x195   : > { %v4123_v28 = vpop.permute.xlu1 %4122  ;;  %1497 = vmatprep.mubr.bf16.mxu0 %v13531_v13 }
 0x196   : > { %v4159_v11 = vadd.f32 %v4153_v30, %v4117_v60  ;;  %v4160_v56 = vadd.f32 %v4154_v7, %v4118_v47  ;;  %v4151_v10 = vmul.f32 %v10859_v63, %v4123_v28  ;;  %v4152_v49 = vmul.f32 %v10862_v22, %v4123_v28  ;;  %v9190_v47 = vld [vmem:[%s13289_s5 + $0x28] sm:$0xff]  }
 0x198   : > { %v10876_v6 = vadd.f32 %v4159_v11, %v9839_v54  ;;  %v10879_v59 = vadd.f32 %v4160_v56, %v9839_v54  ;;  %v10881_v19 = vadd.f32 %v4151_v10, %v4115_v17  ;;  %v10883_v32 = vadd.f32 %v4152_v49, %v4116_v29 }
 0x19a   : > { %v13397_v60 = vand.u32 2147483647, %v10876_v6  ;;  %v4380_v28 = vand.u32 2139095040, %v10876_v6  ;;  %v4484_v30 = vand.u32 2139095040, %v10879_v59  ;;  %v4172_v51 = vand.u32 2139095040, %v10881_v19 }
 0x19b   : > { %v4276_v62 = vand.u32 2139095040, %v10883_v32  ;;  %v13398_v49 = vand.u32 2147483647, %v10881_v19 }
 0x19c   : > { %v4381_v54 = vshrl.u32 %v4380_v28, 23  ;;  %v4485_v15 = vshrl.u32 %v4484_v30, 23  ;;  %v4384_v17 = vand.u32 8388607, %v13397_v60  ;;  %v4173_v39 = vshrl.u32 %v4172_v51, 23  ;;  %8230 = vmatmul.mubr.msk.bf16.gmra.mrb[20].mxu0 %vm1383_vm4, %v9190_v47  ;;  %v9191_v30 = vld [vmem:[%s13289_s5 + $0x30] sm:$0xff]  }
 0x19d   : > { %1507 = vmatprep.mubr.bf16.mxu0 %v13531_v13  ;;  %v4277_v29 = vshrl.u32 %v4276_v62, 23  ;;  %v4176_v28 = vand.u32 8388607, %v13398_v49 }
 0x19e   : > { %v8533_v8 = vadd.s32 4294967169, %v4381_v54  ;;  %v8537_v23 = vadd.s32 4294967169, %v4485_v15  ;;  %v4385_v56 = vor.u32 8388608, %v4384_v17  ;;  %v8525_v10 = vadd.s32 4294967169, %v4173_v39 }
 0x19f   : > { %v8529_v60 = vadd.s32 4294967169, %v4277_v29  ;;  %v4177_v62 = vor.u32 8388608, %v4176_v28 }
 0x1a0   : > { %v4387_v7 = vadd.s32 1, %v8533_v8  ;;  %v4491_v11 = vadd.s32 1, %v8537_v23  ;;  %v10903_v15 = vshll.u32 %v4385_v56, 8  ;;  %v4179_v8 = vadd.s32 1, %v8525_v10 }
 0x1a1   : > { %v4283_v56 = vadd.s32 1, %v8529_v60 }
 0x1a2   : > { %vm4388_vm5 = vcmp.gt.s32.totalorder %v4387_v7, 0  ;;  %vm4492_vm6 = vcmp.gt.s32.totalorder %v4491_v11, 0  ;;  %vm4180_vm8 = vcmp.gt.s32.totalorder %v4179_v8, 0 }
 0x1a3   : > { %v4389_v51 = vsel %vm4388_vm5, %v4387_v7, 0  ;;  %vm4284_vm13 = vcmp.gt.s32.totalorder %v4283_v56, 0 }
 0x1a4   : > { %v4391_v47 = vand.u32 31, %v4389_v51  ;;  %v4390_v54 = vshrl.u32 %v4389_v51, 5  ;;  %8231 = vmatmul.mubr.msk.bf16.gmra.mrb[24].mxu0 %vm1383_vm4, %v9191_v30  ;;  %v4493_v51 = vsel %vm4492_vm6, %v4491_v11, 0 }
 0x1a5   : > { %1517 = vmatprep.mubr.bf16.mxu0 %v13531_v13 }
 0x1a6   : > { %v4392_v17 = vsub.s32 32, %v4391_v47  ;;  %v4394_v39 = vshll.u32 %v13514_v21, %v4391_v47  ;;  %v4397_v23 = vshll.u32 %v13502_v16, %v4391_v47  ;;  %v4400_v49 = vshll.u32 %v13517_v2, %v4391_v47 }
 0x1a7   : > { %v4403_v29 = vshll.u32 %v13508_v40, %v4391_v47  ;;  %v4406_v7 = vshll.u32 %v13504_v4, %v4391_v47  ;;  %vm4409_vm7 = vcmp.lt.s32.totalorder %v4390_v54, 1  ;;  %v9192_v47 = vld [vmem:[%s13289_s5 + $0x38] sm:$0xff]   ;;  %vm4412_vm9 = vcmp.lt.s32.totalorder %v4390_v54, 4 }
 0x1a8   : > { %v4393_v28 = vshrl.u32 %v13514_v21, %v4392_v17  ;;  %v4395_v10 = vshrl.u32 %v13502_v16, %v4392_v17  ;;  %v4398_v30 = vshrl.u32 %v13517_v2, %v4392_v17  ;;  %v4401_v22 = vshrl.u32 %v13508_v40, %v4392_v17 }
 0x1a9   : > { %v4404_v63 = vshrl.u32 %v13504_v4, %v4392_v17  ;;  %v4407_v18 = vshrl.u32 %v13501_v45, %v4392_v17  ;;  %vm4410_vm10 = vcmp.lt.s32.totalorder %v4390_v54, 2  ;;  %vm4411_vm11 = vcmp.lt.s32.totalorder %v4390_v54, 3 }
 0x1aa   : > { %v4396_v11 = vor.u32 %v4395_v10, %v4394_v39  ;;  %v4399_v60 = vor.u32 %v4398_v30, %v4397_v23  ;;  %v4402_v5 = vor.u32 %v4401_v22, %v4400_v49  ;;  %v10922_v39 = vand.u32 31, %v4493_v51 }
 0x1ab   : > { %v4405_v12 = vor.u32 %v4404_v63, %v4403_v29  ;;  %v4408_v61 = vor.u32 %v4407_v18, %v4406_v7  ;;  %v4181_v22 = vsel %vm4180_vm8, %v4179_v8, 0  ;;  %v10940_v8 = vshll.u32 %v4177_v62, 8 }
 0x1ac   : > { %v4413_v36 = vsel %vm4409_vm7, %v4393_v28, %v4396_v11  ;;  %v4414_v9 = vsel %vm4412_vm9, %v4402_v5, 2102212464  ;;  %v4417_v37 = vsel %vm4409_vm7, %v4396_v11, %v4399_v60  ;;  %v4421_v48 = vsel %vm4409_vm7, %v4399_v60, %v4402_v5  ;;  %8232 = vmatmul.mubr.msk.bf16.gmra.mrb[28].mxu0 %vm1383_vm4, %v9192_v47 }
 0x1ad   : > { %v4415_v57 = vsel %vm4411_vm11, %v4399_v60, %v4414_v9  ;;  %v4418_v17 = vsel %vm4412_vm9, %v4405_v12, 920167782  ;;  %v4422_v20 = vsel %vm4412_vm9, %v4408_v61, 1326507024  ;;  %2324 = vmatprep.mubr.bf16.mxu0 %v13531_v13 }
 0x1ae   : > { %v4419_v34 = vsel %vm4411_vm11, %v4402_v5, %v4418_v17  ;;  %v4423_v50 = vsel %vm4411_vm11, %v4405_v12, %v4422_v20  ;;  %v4416_v18 = vsel %vm4410_vm10, %v4413_v36, %v4415_v57  ;;  %v10938_v20 = vshrl.u32 %v4493_v51, 5 }
 0x1af   : > { %v4420_v63 = vsel %vm4410_vm10, %v4417_v37, %v4419_v34  ;;  %v4424_v49 = vsel %vm4410_vm10, %v4421_v48, %v4423_v50  ;;  %v4183_v12 = vand.u32 31, %v4181_v22  ;;  %v4285_v57 = vsel %vm4284_vm13, %v4283_v56, 0 }
 0x1b0   : > { %v10930_v9 = vmul.u32.u64.low %v10903_v15, %v4424_v49  ;;  %v10931_v61 = vmul.u32.u64.high %v10903_v15, %v4424_v49, %v10930_v9  ;;  %v10934_v23 = vmul.u32.u64.low %v10903_v15, %v4420_v63  ;;  %v10935_v5 = vmul.u32.u64.high %v10903_v15, %v4420_v63, %v10934_v23 }
 0x1b1   : > { %v4432_v34 = vmul.u32 %v10903_v15, %v4416_v18  ;;  %v10944_v50 = vsub.s32 32, %v10922_v39  ;;  %v10948_v48 = vshll.u32 %v13508_v40, %v10922_v39  ;;  %v4182_v37 = vshrl.u32 %v4181_v22, 5 }
 0x1b2   : > { %v4184_v36 = vsub.s32 32, %v4183_v12  ;;  %v4186_v54 = vshll.u32 %v13514_v21, %v4183_v12  ;;  %v4189_v29 = vshll.u32 %v13502_v16, %v4183_v12  ;;  %v10952_v7 = vshrl.u32 %v4285_v57, 5 }
 0x1b3   : > { %vm4434_vm14 = vc.u32 %v10931_v61, %v10934_v23  ;;  %v4435_v15 = vadd.s32 1, %v10935_v5  ;;  %v4192_v62 = vshll.u32 %v13517_v2, %v4183_v12  ;;  %v10958_v51 = vand.u32 31, %v4285_v57 }
 0x1b4   : > { %v4185_v56 = vshrl.u32 %v13514_v21, %v4184_v36  ;;  %v4187_v28 = vshrl.u32 %v13502_v16, %v4184_v36  ;;  %v4190_v10 = vshrl.u32 %v13517_v2, %v4184_v36  ;;  %v4193_v30 = vshrl.u32 %v13508_v40, %v4184_v36 }
 0x1b5   : > { %v4436_v47 = vsel %vm4434_vm14, %v4435_v15, %v10935_v5  ;;  %v4195_v11 = vshll.u32 %v13508_v40, %v4183_v12  ;;  %v4196_v60 = vshrl.u32 %v13504_v4, %v4184_v36  ;;  %v4198_v17 = vshll.u32 %v13504_v4, %v4183_v12 }
 0x1b6   : > { %v4437_v22 = vadd.s32 %v4436_v47, %v4432_v34  ;;  %v4188_v18 = vor.u32 %v4187_v28, %v4186_v54  ;;  %v4191_v63 = vor.u32 %v4190_v10, %v4189_v29  ;;  %v4194_v49 = vor.u32 %v4193_v30, %v4192_v62 }
 0x1b7   : > { %v4197_v9 = vor.u32 %v4196_v60, %v4195_v11  ;;  %v4199_v57 = vshrl.u32 %v13501_v45, %v4184_v36  ;;  %vm4201_vm15 = vcmp.lt.s32.totalorder %v4182_v37, 1  ;;  %vm4202_vm0 = vcmp.lt.s32.totalorder %v4182_v37, 2 }
 0x1b8   : > { %v4438_v31 = vadd.s32 536870912, %v4437_v22  ;;  %vm4203_vm1 = vcmp.lt.s32.totalorder %v4182_v37, 3  ;;  %vm4204_vm3 = vcmp.lt.s32.totalorder %v4182_v37, 4  ;;  %v4205_v35 = vsel %vm4201_vm15, %v4185_v56, %v4188_v18 }
 0x1b9   : > { %v4200_v5 = vor.u32 %v4199_v57, %v4198_v17  ;;  %v4206_v15 = vsel %vm4204_vm3, %v4194_v49, 2102212464  ;;  %v4209_v27 = vsel %vm4201_vm15, %v4188_v18, %v4191_v63  ;;  %v4210_v0 = vsel %vm4204_vm3, %v4197_v9, 920167782 }
 0x1ba   : > { %v10969_v38 = vshrl.u32 %v4438_v31, 30  ;;  %v4207_v12 = vsel %vm4203_vm1, %v4191_v63, %v4206_v15  ;;  %v4211_v34 = vsel %vm4203_vm1, %v4194_v49, %v4210_v0  ;;  %v4213_v54 = vsel %vm4201_vm15, %v4191_v63, %v4194_v49 }
 0x1bb   : > { %v4208_v29 = vsel %vm4202_vm0, %v4205_v35, %v4207_v12  ;;  %v4212_v36 = vsel %vm4202_vm0, %v4209_v27, %v4211_v34  ;;  %v4214_v62 = vsel %vm4204_vm3, %v4200_v5, 1326507024  ;;  %v4288_v28 = vsub.s32 32, %v10958_v51 }
 0x1bc   : > { %v4440_v56 = vshll.u32 %v10969_v38, 30  ;;  %v4215_v10 = vsel %vm4203_vm1, %v4197_v9, %v4214_v62  ;;  %v10979_v30 = vmul.u32.u64.low %v10940_v8, %v4212_v36  ;;  %v10980_v31 = vmul.u32.u64.high %v10940_v8, %v4212_v36, %v10979_v30 }
 0x1bd   : > { %v4216_v47 = vsel %vm4202_vm0, %v4213_v54, %v4215_v10  ;;  %v4224_v0 = vmul.u32 %v10940_v8, %v4208_v29  ;;  %v13418_v35 = vand.u32 2147483647, %v10883_v32  ;;  %v4299_v27 = vshll.u32 %v13508_v40, %v10958_v51 }
 0x1be   : > { %v10988_v11 = vsub.s32 %v4437_v22, %v4440_v56  ;;  %v10991_v60 = vmul.u32.u64.low %v10940_v8, %v4216_v47  ;;  %v10992_v17 = vmul.u32.u64.high %v10940_v8, %v4216_v47, %v10991_v60  ;;  %v4290_v18 = vshll.u32 %v13514_v21, %v10958_v51 }
 0x1bf   : > { %v4280_v37 = vand.u32 8388607, %v13418_v35  ;;  %v4291_v63 = vshrl.u32 %v13502_v16, %v4288_v28  ;;  %v4293_v49 = vshll.u32 %v13502_v16, %v10958_v51  ;;  %v4294_v9 = vshrl.u32 %v13517_v2, %v4288_v28 }
 0x1c0   : > { %v4443_v22 = vsub.s32 0, %v10988_v11  ;;  %v4227_v57 = vadd.s32 1, %v10980_v31  ;;  %v4296_v8 = vshll.u32 %v13517_v2, %v10958_v51  ;;  %v4297_v5 = vshrl.u32 %v13508_v40, %v4288_v28 }
 0x1c1   : > { %v4508_v15 = vshrl.u32 %v13504_v4, %v10944_v50  ;;  %v4281_v12 = vor.u32 8388608, %v4280_v37  ;;  %v4292_v34 = vor.u32 %v4291_v63, %v4290_v18  ;;  %v4300_v54 = vshrl.u32 %v13504_v4, %v4288_v28 }
 0x1c2   : > { %v8534_v29 = vmin.u32 %v4443_v22, %v10988_v11  ;;  %vm4226_vm5 = vc.u32 %v10992_v17, %v10979_v30  ;;  %v4295_v36 = vor.u32 %v4294_v9, %v4293_v49  ;;  %v4298_v62 = vor.u32 %v4297_v5, %v4296_v8 }
 0x1c3   : > { %v4228_v56 = vsel %vm4226_vm5, %v4227_v57, %v10980_v31  ;;  %v4301_v10 = vor.u32 %v4300_v54, %v4299_v27  ;;  %v4302_v47 = vshll.u32 %v13504_v4, %v10958_v51  ;;  %v4303_v60 = vshrl.u32 %v13501_v45, %v4288_v28 }
 0x1c4   : > { %v4445_v35 = vclz %v8534_v29  ;;  %v4229_v37 = vadd.s32 %v4228_v56, %v4224_v0  ;;  %vm4305_vm6 = vcmp.lt.s32.totalorder %v10952_v7, 1  ;;  %vm4306_vm7 = vcmp.lt.s32.totalorder %v10952_v7, 2 }
 0x1c5   : > { %v4289_v18 = vshrl.u32 %v13514_v21, %v4288_v28  ;;  %v4304_v63 = vor.u32 %v4303_v60, %v4302_v47  ;;  %vm4307_vm8 = vcmp.lt.s32.totalorder %v10952_v7, 3  ;;  %vm4308_vm9 = vcmp.lt.s32.totalorder %v10952_v7, 4 }
 0x1c6   : > { %v8535_v31 = vadd.s32 4294967294, %v4445_v35  ;;  %v4230_v27 = vadd.s32 536870912, %v4229_v37  ;;  %v4310_v49 = vsel %vm4308_vm9, %v4298_v62, 2102212464  ;;  %v4313_v51 = vsel %vm4305_vm6, %v4292_v34, %v4295_v36 }
 0x1c7   : > { %v4510_v0 = vshll.u32 %v13504_v4, %v10922_v39  ;;  %v4511_v9 = vshrl.u32 %v13501_v45, %v10944_v50  ;;  %v4314_v22 = vsel %vm4308_vm9, %v4301_v10, 920167782  ;;  %v4309_v28 = vsel %vm4305_vm6, %v4289_v18, %v4292_v34 }
 0x1c8   : > { %v11028_v57 = vshrl.u32 %v4230_v27, 30  ;;  %v4311_v35 = vsel %vm4307_vm8, %v4295_v36, %v4310_v49  ;;  %v4315_v8 = vsel %vm4307_vm8, %v4298_v62, %v4314_v22  ;;  %v4317_v54 = vsel %vm4305_vm6, %v4295_v36, %v4298_v62 }
 0x1c9   : > { %v4316_v5 = vsel %vm4306_vm7, %v4313_v51, %v4315_v8  ;;  %v4318_v29 = vsel %vm4308_vm9, %v4304_v63, 1326507024  ;;  %v4321_v56 = vshll.u32 %v4281_v12, 8  ;;  %vm8536_vm10 = vcmp.lt.s32.totalorder %v8535_v31, 0 }
 0x1ca   : > { %v11041_v47 = vor.u32 %v4508_v15, %v10948_v48  ;;  %vm4516_vm11 = vcmp.lt.s32.totalorder %v10938_v20, 4  ;;  %v4232_v34 = vshll.u32 %v11028_v57, 30  ;;  %v4312_v60 = vsel %vm4306_vm7, %v4309_v28, %v4311_v35 }
 0x1cb   : > { %v4319_v18 = vsel %vm4307_vm8, %v4301_v10, %v4318_v29  ;;  %v11049_v27 = vmul.u32.u64.low %v4321_v56, %v4316_v5  ;;  %v11050_v49 = vmul.u32.u64.high %v4321_v56, %v4316_v5, %v11049_v27  ;;  %v4512_v36 = vor.u32 %v4511_v9, %v4510_v0  ;;  %v9193_v5 = vld [vmem:[%s13289_s5 + $0x40] sm:$0xff]  }
 0x1cc   : > { %v11053_v12 = vsub.s32 %v4229_v37, %v4232_v34  ;;  %v4320_v48 = vsel %vm4306_vm7, %v4317_v54, %v4319_v18  ;;  %v11057_v15 = vsel %vm8536_vm10, 0, %v8535_v31  ;;  %v13419_v51 = vand.u32 2147483647, %v10879_v59  ;;  %8258 = vmatmul.mubr.msk.bf16.vlgmr.msra.gmra.mrb[0].mxu1 %vm1383_vm4, %v9193_v5  ;;  %v9194_v5 = vld [vmem:[%s13289_s5 + $0x48] sm:$0xff]  }
 0x1cd   : > { %v11059_v62 = vmul.u32.u64.low %v4321_v56, %v4320_v48  ;;  %v11060_v63 = vmul.u32.u64.high %v4321_v56, %v4320_v48, %v11059_v62  ;;  %v4522_v10 = vsel %vm4516_vm11, %v11041_v47, 920167782  ;;  %v4328_v28 = vmul.u32 %v4321_v56, %v4312_v60  ;;  %1721 = vmatprep.mubr.bf16.mxu1 %v13531_v13 }
 0x1ce   : > { %v4235_v22 = vsub.s32 0, %v11053_v12  ;;  %v4331_v37 = vadd.s32 1, %v11050_v49  ;;  %v4498_v7 = vshll.u32 %v13514_v21, %v10922_v39  ;;  %v4499_v31 = vshrl.u32 %v13502_v16, %v10944_v50 }
 0x1cf   : > { %v4501_v0 = vshll.u32 %v13502_v16, %v10922_v39  ;;  %v4453_v9 = vsub.s32 4294967266, %v11057_v15  ;;  %v4526_v35 = vsel %vm4516_vm11, %v4512_v36, 1326507024  ;;  %v4502_v54 = vshrl.u32 %v13517_v2, %v10944_v50 }
 0x1d0   : > { %v8526_v8 = vmin.u32 %v4235_v22, %v11053_v12  ;;  %v4433_v29 = vadd.s32 %v10934_v23, %v10931_v61  ;;  %vm4330_vm13 = vc.u32 %v11060_v63, %v11049_v27  ;;  %v4488_v56 = vand.u32 8388607, %v13419_v51 }
 0x1d1   : > { %v4504_v34 = vshll.u32 %v13517_v2, %v10922_v39  ;;  %v4449_v60 = vsub.s32 32, %v11057_v15  ;;  %v4225_v18 = vadd.s32 %v10979_v30, %v10992_v17  ;;  %v4332_v48 = vsel %vm4330_vm13, %v4331_v37, %v11050_v49 }
 0x1d2   : > { %v4237_v36 = vclz %v8526_v8  ;;  %v4333_v61 = vadd.s32 %v4332_v48, %v4328_v28  ;;  %v4500_v23 = vor.u32 %v4499_v31, %v4498_v7  ;;  %v4503_v62 = vor.u32 %v4502_v54, %v4501_v0 }
 0x1d3   : > { %v4505_v22 = vshrl.u32 %v13508_v40, %v10944_v50  ;;  %v4450_v39 = vshll.u32 %v10988_v11, %v11057_v15  ;;  %v4454_v51 = vadd.s32 127, %v4453_v9  ;;  %vm4513_vm14 = vcmp.lt.s32.totalorder %v10938_v20, 1 }
 0x1d4   : > { %v8527_v2 = vadd.s32 4294967294, %v4237_v36  ;;  %v4334_v30 = vadd.s32 536870912, %v4333_v61  ;;  %v4489_v17 = vor.u32 8388608, %v4488_v56  ;;  %vm4515_vm15 = vcmp.lt.s32.totalorder %v10938_v20, 3  ;;  %8259 = vmatmul.mubr.msk.bf16.gmra.mrb[4].mxu1 %vm1383_vm4, %v9194_v5 }
 0x1d5   : > { %v4506_v8 = vor.u32 %v4505_v22, %v4504_v34  ;;  %v4451_v49 = vshrl.u32 %v4433_v29, %v4449_v60  ;;  %v4497_v28 = vshrl.u32 %v13514_v21, %v10944_v50  ;;  %vm4514_vm1 = vcmp.lt.s32.totalorder %v10938_v20, 2  ;;  %1731 = vmatprep.mubr.bf16.mxu1 %v13531_v13 }
 0x1d6   : > { %vm8528_vm0 = vcmp.lt.s32.totalorder %v8527_v2, 0  ;;  %v11106_v7 = vshrl.u32 %v4334_v30, 30  ;;  %v4521_v15 = vsel %vm4513_vm14, %v4500_v23, %v4503_v62  ;;  %v4527_v29 = vsel %vm4515_vm15, %v11041_v47, %v4526_v35 }
 0x1d7   : > { %v4240_v37 = vsel %vm8528_vm0, 0, %v8527_v2  ;;  %v4518_v11 = vsel %vm4516_vm11, %v4506_v8, 2102212464  ;;  %v4523_v50 = vsel %vm4515_vm15, %v4506_v8, %v4522_v10  ;;  %v4455_v2 = vshll.u32 %v4454_v51, 23 }
 0x1d8   : > { %v4241_v31 = vsub.s32 32, %v4240_v37  ;;  %v4242_v0 = vshll.u32 %v11053_v12, %v4240_v37  ;;  %v4245_v9 = vsub.s32 4294967266, %v4240_v37  ;;  %v4336_v54 = vshll.u32 %v11106_v7, 30 }
 0x1d9   : > { %v4529_v56 = vshll.u32 %v4489_v17, 8  ;;  %v4517_v12 = vsel %vm4513_vm14, %v4497_v28, %v4500_v23  ;;  %v4519_v51 = vsel %vm4515_vm15, %v4503_v62, %v4518_v11  ;;  %v4524_v10 = vsel %vm4514_vm1, %v4521_v15, %v4523_v50 }
 0x1da   : > { %v4243_v34 = vshrl.u32 %v4225_v18, %v4241_v31  ;;  %v4246_v60 = vadd.s32 127, %v4245_v9  ;;  %v4337_v36 = vsub.s32 %v4333_v61, %v4336_v54  ;;  %v4525_v47 = vsel %vm4513_vm14, %v4503_v62, %v4506_v8 }
 0x1db   : > { %v4452_v35 = vor.u32 %v4451_v49, %v4450_v39  ;;  %v4528_v22 = vsel %vm4514_vm1, %v4525_v47, %v4527_v29  ;;  %v4456_v30 = vor.u32 4788187, %v4455_v2  ;;  %v4520_v37 = vsel %vm4514_vm1, %v4517_v12, %v4519_v51  ;;  %v9195_v49 = vld [vmem:[%s13289_s5 + $0x50] sm:$0xff]  }
 0x1dc   : > { %v4244_v18 = vor.u32 %v4243_v34, %v4242_v0  ;;  %v4247_v48 = vshll.u32 %v4246_v60, 23  ;;  %v4339_v23 = vsub.s32 0, %v4337_v36  ;;  %v4536_v0 = vmul.u32 %v4529_v56, %v4520_v37  ;;  %8260 = vmatmul.mubr.msk.bf16.gmra.mrb[8].mxu1 %vm1383_vm4, %v9195_v49 }
 0x1dd   : > { %v11134_v17 = vmul.u32.u64.low %v4529_v56, %v4528_v22  ;;  %v11135_v28 = vmul.u32.u64.high %v4529_v56, %v4528_v22, %v11134_v17  ;;  %v11139_v11 = vmul.u32.u64.low %v4529_v56, %v4524_v10  ;;  %v11140_v15 = vmul.u32.u64.high %v4529_v56, %v4524_v10, %v11139_v11  ;;  %1741 = vmatprep.mubr.bf16.mxu1 %v13531_v13 }
 0x1de   : > { %v4248_v61 = vor.u32 4788187, %v4247_v48  ;;  %v8530_v62 = vmin.u32 %v4339_v23, %v4337_v36  ;;  %v4251_v8 = vcvt.s32.f32 %v4244_v18  ;;  %v4457_v9 = vand.u32 2147483647, %v4456_v30  ;;  %v9196_v18 = vld [vmem:[%s13289_s5 + $0x58] sm:$0xff]  }
 0x1df   : > { %vm4538_vm3 = vc.u32 %v11135_v28, %v11139_v11  ;;  %v4459_v5 = vcvt.s32.f32 %v4452_v35  ;;  %v4539_v20 = vadd.s32 1, %v11140_v15  ;;  %v4329_v29 = vadd.s32 %v11049_v27, %v11060_v63 }
 0x1e0   : > { %v4249_v39 = vand.u32 2147483647, %v4248_v61  ;;  %v4341_v31 = vclz %v8530_v62  ;;  %vm4171_vm6 = vcmp.lt.s32.totalorder %v10881_v19, 0  ;;  %vm4379_vm7 = vcmp.lt.s32.totalorder %v10876_v6, 0 }
 0x1e1   : > { %v4540_v54 = vsel %vm4538_vm3, %v4539_v20, %v11140_v15  ;;  %v4460_v34 = vmul.f32 %v4459_v5, %v4457_v9  ;;  %v13604_v15 = vand.u32 2147483647, %v10876_v6  ;;  %v13607_v49 = vand.u32 2147483647, %v10881_v19  ;;  %v9197_v5 = vld [vmem:[%s13289_s5 + $0x60] sm:$0xff]  }
 0x1e2   : > { %v8531_v50 = vadd.s32 4294967294, %v4341_v31  ;;  %v4252_v2 = vmul.f32 %v4251_v8, %v4249_v39  ;;  %v4541_v56 = vadd.s32 %v4540_v54, %v4536_v0  ;;  %vm4275_vm10 = vcmp.lt.s32.totalorder %v10883_v32, 0 }
 0x1e3   : > { %v4461_v27 = vxor.u32 2147483648, %v4460_v34  ;;  %vm11168_vm8 = vcmp.le.f32.partialorder %v13604_v15, 0.7853982  ;;  %vm11176_vm9 = vcmp.le.f32.partialorder %v13607_v49, 0.7853982  ;;  %vm4261_vm1 = vweird.f32 %v10881_v19 }
 0x1e4   : > { %vm8532_vm5 = vcmp.lt.s32.totalorder %v8531_v50, 0  ;;  %v4542_v47 = vadd.s32 536870912, %v4541_v56  ;;  %v4253_v35 = vxor.u32 2147483648, %v4252_v2  ;;  %8261 = vmatmul.mubr.msk.bf16.gmra.mrb[12].mxu1 %vm1383_vm4, %v9196_v18  ;;  %v9198_v18 = vld [vmem:[%s13289_s5 + $0x68] sm:$0xff]   ;;  %vm4483_vm3 = vcmp.lt.s32.totalorder %v10879_v59, 0 }
 0x1e5   : > { %v4344_v60 = vsel %vm8532_vm5, 0, %v8531_v50  ;;  %1751 = vmatprep.mubr.bf16.mxu1 %v13531_v13  ;;  %v4462_v39 = vsel %vm4379_vm7, %v4461_v27, %v4460_v34  ;;  %v4359_v27 = vsub.s32 4, %v11106_v7 }
 0x1e6   : > { %v4345_v12 = vsub.s32 32, %v4344_v60  ;;  %v4346_v51 = vshll.u32 %v4337_v36, %v4344_v60  ;;  %v4349_v10 = vsub.s32 4294967266, %v4344_v60  ;;  %v11158_v30 = vshrl.u32 %v4542_v47, 30 }
 0x1e7   : > { %v4254_v17 = vsel %vm4171_vm6, %v4253_v35, %v4252_v2  ;;  %v4465_v50 = vsel %vm11168_vm8, %v10876_v6, %v4462_v39 }
 0x1e8   : > { %v4347_v48 = vshrl.u32 %v4329_v29, %v4345_v12  ;;  %v4350_v22 = vadd.s32 127, %v4349_v10  ;;  %v4544_v23 = vshll.u32 %v11158_v30, 30  ;;  %v4257_v9 = vsel %vm11176_vm9, %v10881_v19, %v4254_v17 }
 0x1e9   : > { %9353 = vcosq.f32 %v4257_v9 }
 0x1ea   : > { %v4348_v63 = vor.u32 %v4347_v48, %v4346_v51  ;;  %v4351_v36 = vshll.u32 %v4350_v22, 23  ;;  %v4545_v8 = vsub.s32 %v4541_v56, %v4544_v23  ;;  %9355 = vsinq.f32 %v4257_v9 }
 0x1eb   : > { %v4255_v56 = vsub.s32 4, %v11028_v57  ;;  %9357 = vcosq.f32 %v4465_v50  ;;  %v13610_v51 = vand.u32 2147483647, %v10883_v32  ;;  %v4463_v22 = vsub.s32 4, %v10969_v38 }
 0x1ec   : > { %v4352_v61 = vor.u32 4788187, %v4351_v36  ;;  %v4355_v37 = vcvt.s32.f32 %v4348_v63  ;;  %v4547_v20 = vsub.s32 0, %v4545_v8  ;;  %8262 = vmatmul.mubr.msk.bf16.gmra.mrb[16].mxu1 %vm1383_vm4, %v9197_v5  ;;  %9359 = vsinq.f32 %v4465_v50 }
 0x1ed   : > { %1761 = vmatprep.mubr.bf16.mxu1 %v13531_v13  ;;  %v4256_v60 = vsel %vm4171_vm6, %v4255_v56, %v11028_v57  ;;  %vm11198_vm11 = vcmp.le.f32.partialorder %v13610_v51, 0.7853982  ;;  %v4537_v57 = vadd.s32 %v11139_v11, %v11135_v28  ;;  %v4464_v31 = vsel %vm4379_vm7, %v4463_v22, %v10969_v38  ;;  %v9199_v38 = vld [vmem:[%s13289_s5 + $0x70] sm:$0xff]  }
 0x1ee   : > { %v4353_v0 = vand.u32 2147483647, %v4352_v61  ;;  %v8538_v54 = vmin.u32 %v4547_v20, %v4545_v8  ;;  %v4258_v35 = vsel %vm11176_vm9, 0, %v4256_v60  ;;  %v4567_v9 = vsub.s32 4, %v11158_v30 }
 0x1ef   : > { %v4262_v48 = vadd.s32 3, %v4258_v35  ;;  %v13613_v22 = vand.u32 2147483647, %v10879_v59  ;;  %vm4469_vm6 = vweird.f32 %v10876_v6 }
 0x1f0   : > { %v4356_v2 = vmul.f32 %v4355_v37, %v4353_v0  ;;  %v4549_v34 = vclz %v8538_v54  ;;  %v4360_v0 = vsel %vm4275_vm10, %v4359_v27, %v11106_v7  ;;  %v4466_v54 = vsel %vm11168_vm8, 0, %v4464_v31  ;;  %v8845_v31 = vld [vmem:[%s13291_s7 + $0x5a8] sm:$0xff] }
 0x1f1   : > { %v4263_v28 = vand.u32 3, %v4262_v48  ;;  %vm11239_vm5 = vcmp.le.f32.partialorder %v13613_v22, 0.7853982 }
 0x1f2   : > { %v4357_v29 = vxor.u32 2147483648, %v4356_v2  ;;  %v8539_v12 = vadd.s32 4294967294, %v4549_v34  ;;  %v4362_v34 = vsel %vm11198_vm11, 0, %v4360_v0 }
 0x1f3   : > { %v9354_v36 = vpop.eup %9353  ;;  %vm4264_vm14 = vcmp.lt.s32.totalorder %v4263_v28, 2  ;;  %vm4265_vm15 = vcmp.eq.s32.totalorder %v4263_v28, 0  ;;  %vm4268_vm0 = vcmp.eq.s32.totalorder %v4263_v28, 2  ;;  %v4366_v48 = vadd.s32 3, %v4362_v34 }
 0x1f4   : > { %v4358_v47 = vsel %vm4275_vm10, %v4357_v29, %v4356_v2  ;;  %vm8540_vm13 = vcmp.lt.s32.totalorder %v8539_v12, 0  ;;  %8263 = vmatmul.mubr.msk.bf16.gmra.mrb[20].mxu1 %vm1383_vm4, %v9198_v18  ;;  %v9356_v11 = vpop.eup %9355  ;;  %v4269_v49 = vxor.u32 2147483648, %v9354_v36 }
 0x1f5   : > { %v4552_v63 = vsel %vm8540_vm13, 0, %v8539_v12  ;;  %v4361_v23 = vsel %vm11198_vm11, %v10883_v32, %v4358_v47  ;;  %1771 = vmatprep.mubr.bf16.mxu1 %v13531_v13  ;;  %v4266_v2 = vxor.u32 2147483648, %v9356_v11  ;;  %v4470_v12 = vadd.s32 3, %v4466_v54 }
 0x1f6   : > { %v4553_v17 = vsub.s32 32, %v4552_v63  ;;  %v4554_v61 = vshll.u32 %v4545_v8, %v4552_v63  ;;  %v4557_v37 = vsub.s32 4294967266, %v4552_v63  ;;  %9361 = vcosq.f32 %v4361_v23  ;;  %v9358_v8 = vpop.eup %9357 }
 0x1f7   : > { %9363 = vsinq.f32 %v4361_v23  ;;  %v9360_v50 = vpop.eup %9359  ;;  %v4270_v56 = vsel %vm4268_vm0, %v4269_v49, %v9356_v11  ;;  %v4267_v60 = vsel %vm4265_vm15, %v9354_v36, %v4266_v2  ;;  %v4477_v35 = vxor.u32 2147483648, %v9358_v8 }
 0x1f8   : > { %v4555_v15 = vshrl.u32 %v4537_v57, %v4553_v17  ;;  %v4558_v39 = vadd.s32 127, %v4557_v37  ;;  %v4271_v62 = vsel %vm4264_vm14, %v4267_v60, %v4270_v56  ;;  %v4474_v47 = vxor.u32 2147483648, %v9360_v50 }
 0x1f9   : > { %v4272_v18 = vsel %vm4261_vm1, nan, %v4271_v62  ;;  %v4471_v57 = vand.u32 3, %v4470_v12  ;;  %v4568_v63 = vsel %vm4483_vm3, %v4567_v9, %v11158_v30  ;;  %v9200_v30 = vld [vmem:[%s13289_s5 + $0x78] sm:$0xff]   ;;  %vm4365_vm14 = vweird.f32 %v10883_v32 }
 0x1fa   : > { %v4556_v5 = vor.u32 %v4555_v15, %v4554_v61  ;;  %v4559_v20 = vshll.u32 %v4558_v39, 23  ;;  %v11250_v61 = vsel %vm578_vm2, %v10881_v19, %v4272_v18  ;;  %v4367_v15 = vand.u32 3, %v4366_v48 }
 0x1fb   : > { %vm4472_vm7 = vcmp.lt.s32.totalorder %v4471_v57, 2  ;;  %vm4473_vm8 = vcmp.eq.s32.totalorder %v4471_v57, 0  ;;  %vm4476_vm9 = vcmp.eq.s32.totalorder %v4471_v57, 2  ;;  %v4570_v19 = vsel %vm11239_vm5, 0, %v4568_v63 }
 0x1fc   : > { %v4560_v7 = vor.u32 4788187, %v4559_v20  ;;  %v4563_v29 = vcvt.s32.f32 %v4556_v5  ;;  %8264 = vmatmul.mubr.msk.bf16.gmra.mrb[24].mxu1 %vm1383_vm4, %v9199_v38  ;;  %v4475_v23 = vsel %vm4473_vm8, %v9358_v8, %v4474_v47  ;;  %v4478_v17 = vsel %vm4476_vm9, %v4477_v35, %v9360_v50  ;;  %v8833_v47 = vld [vmem:[%s13290_s6 + $0x148] sm:$0xff] }
 0x1fd   : > { %1781 = vmatprep.mubr.bf16.mxu1 %v13531_v13  ;;  %v4479_v28 = vsel %vm4472_vm7, %v4475_v23, %v4478_v17  ;;  %vm4369_vm10 = vcmp.eq.s32.totalorder %v4367_v15, 0  ;;  %vm4372_vm11 = vcmp.eq.s32.totalorder %v4367_v15, 2  ;;  %v4574_v8 = vadd.s32 3, %v4570_v19 }
 0x1fe   : > { %v4561_v51 = vand.u32 2147483647, %v4560_v7  ;;  %v11257_v39 = vsel %vm4469_vm6, nan, %v4479_v28  ;;  %vm4368_vm13 = vcmp.lt.s32.totalorder %v4367_v15, 2 }
 0x1ff   : > { %v4575_v50 = vand.u32 3, %v4574_v8 }
 0x200   : > { %v4564_v27 = vmul.f32 %v4563_v29, %v4561_v51  ;;  %v9362_v37 = vpop.eup %9361 }
 0x201   : > { %v9364_v11 = vpop.eup %9363  ;;  %v4373_v9 = vxor.u32 2147483648, %v9362_v37  ;;  %vm4580_vm15 = vcmp.eq.s32.totalorder %v4575_v50, 2  ;;  %vm4577_vm0 = vcmp.eq.s32.totalorder %v4575_v50, 0  ;;  %vm4576_vm1 = vcmp.lt.s32.totalorder %v4575_v50, 2  ;;  %v13616_v50 = vld [vmem:[#allocation8_spill] sm:$0xff] }
 0x202   : > { %v4565_v36 = vxor.u32 2147483648, %v4564_v27  ;;  %v4370_v0 = vxor.u32 2147483648, %v9364_v11 }
 0x203   : > { %v4374_v20 = vsel %vm4372_vm11, %v4373_v9, %v9364_v11 }
 0x204   : > { %v4566_v6 = vsel %vm4483_vm3, %v4565_v36, %v4564_v27  ;;  %8265 = vmatmul.mubr.msk.bf16.gmra.mrb[28].mxu1 %vm1383_vm4, %v9200_v30  ;;  %v4371_v5 = vsel %vm4369_vm10, %v9362_v37, %v4370_v0  ;;  %vm4573_vm3 = vweird.f32 %v10879_v59 }
 0x205   : > { %v4569_v49 = vsel %vm11239_vm5, %v10879_v59, %v4566_v6  ;;  %1872 = vmatprep.mubr.bf16.mxu1 %v13531_v13  ;;  %v4375_v2 = vsel %vm4368_vm13, %v4371_v5, %v4374_v20 }
 0x206   : > { %9365 = vcosq.f32 %v4569_v49  ;;  %v4376_v7 = vsel %vm4365_vm14, nan, %v4375_v2 }
 0x207   : > { %9367 = vsinq.f32 %v4569_v49  ;;  %v11273_v12 = vsel %vm578_vm2, %v10883_v32, %v4376_v7  ;;  %v13617_v7 = vld [vmem:[#allocation9_spill] sm:$0xff] }
 0x210   : > { %v9366_v54 = vpop.eup %9365 }
 0x211   : > { %v9368_v38 = vpop.eup %9367  ;;  %v4581_v29 = vxor.u32 2147483648, %v9366_v54 }
 0x212   : > { %v4578_v56 = vxor.u32 2147483648, %v9368_v38 }
 0x213   : > { %v4582_v34 = vsel %vm4580_vm15, %v4581_v29, %v9368_v38 }
 0x214   : > { %v4579_v60 = vsel %vm4577_vm0, %v9366_v54, %v4578_v56 }
 0x215   : > { %v4583_v51 = vsel %vm4576_vm1, %v4579_v60, %v4582_v34 }
 0x216   : > { %v11275_v62 = vsel %vm4573_vm3, nan, %v4583_v51 }
 0x247   : > { %v1449_v35 = vpop.f32.mrb[0].mxu0 }
 0x248   : > { %v1450_v18 = vadd.f32 %v1449_v35, %v9876_v41  ;;  %v1451_v57 = vpop.f32.mrb[1].mxu0 }
 0x249   : > { %v1452_v48 = vadd.f32 %v1451_v57, %v9876_v41  ;;  %v1453_v59 = vpop.f32.mrb[2].mxu0 }
 0x24a   : > { %v1454_v22 = vadd.f32 %v1453_v59, %v9881_v43  ;;  %v1455_v10 = vpop.f32.mrb[3].mxu0  ;;  %v1544_v32 = vmax.f32 %v1450_v18, 0.0  ;;  %v13618_v59 = vld [vmem:[#allocation10_spill] sm:$0xff] }
 0x24b   : > { %v1456_v26 = vadd.f32 %v1455_v10, %v9881_v43  ;;  %v1545_v63 = vmax.f32 %v1452_v48, 0.0 }
 0x24c   : > { %v1546_v27 = vmax.f32 %v1454_v22, 0.0 }
 0x24d   : > { %v1547_v36 = vmax.f32 %v1456_v26, 0.0 }
 0x24e   : > { %v1576_v23 = vpack.c.bf16 %v1546_v27, %v1544_v32  ;;  %v13619_v27 = vld [vmem:[#allocation11_spill] sm:$0xff] }
 0x24f   : > { %v1577_v17 = vpack.c.bf16 %v1547_v36, %v1545_v63  ;;  %v1459_v37 = vpop.f32.mrb[4].mxu0 }
 0x250   : > { %v1460_v28 = vadd.f32 %v1459_v37, %v9899_v52  ;;  %v1461_v11 = vpop.f32.mrb[5].mxu0 }
 0x251   : > { %v1462_v30 = vadd.f32 %v1461_v11, %v9899_v52  ;;  %v1463_v15 = vpop.f32.mrb[6].mxu0  ;;  %1840 = vmatprep.subr.bf16.mxu1 %v1577_v17 }
 0x252   : > { %v1464_v41 = vadd.f32 %v1463_v15, %v9925_v25  ;;  %v1465_v6 = vpop.f32.mrb[7].mxu0  ;;  %1841 = vmatpush1.bf16.msra.mxu1 %v1576_v23  ;;  %v1548_v49 = vmax.f32 %v1460_v28, 0.0 }
 0x253   : > { %v1466_v43 = vadd.f32 %v1465_v6, %v9925_v25  ;;  %v1549_v0 = vmax.f32 %v1462_v30, 0.0  ;;  %v13620_v6 = vld [vmem:[#allocation12_spill] sm:$0xff] }
 0x254   : > { %v1550_v19 = vmax.f32 %v1464_v41, 0.0 }
 0x255   : > { %v1551_v9 = vmax.f32 %v1466_v43, 0.0 }
 0x256   : > { %v1578_v8 = vpack.c.bf16 %v1550_v19, %v1548_v49 }
 0x257   : > { %v1579_v5 = vpack.c.bf16 %v1551_v9, %v1549_v0  ;;  %v1469_v20 = vpop.f32.mrb[8].mxu0  ;;  %v13621_v9 = vld [vmem:[#allocation13_spill] sm:$0xff] }
 0x258   : > { %v1470_v2 = vadd.f32 %v1469_v20, %v13616_v50  ;;  %v1471_v54 = vpop.f32.mrb[9].mxu0 }
 0x259   : > { %v1472_v52 = vadd.f32 %v1471_v54, %v13616_v50  ;;  %v1473_v38 = vpop.f32.mrb[10].mxu0  ;;  %1842 = vmatprep.subr.bf16.mxu1 %v1579_v5 }
 0x25a   : > { %v1474_v29 = vadd.f32 %v1473_v38, %v13617_v7  ;;  %v1475_v56 = vpop.f32.mrb[11].mxu0  ;;  %1843 = vmatpush1.bf16.msra.mxu1 %v1578_v8  ;;  %v1552_v34 = vmax.f32 %v1470_v2, 0.0 }
 0x25b   : > { %v1476_v25 = vadd.f32 %v1475_v56, %v13617_v7  ;;  %v1553_v51 = vmax.f32 %v1472_v52, 0.0  ;;  %v13622_v56 = vld [vmem:[#allocation14_spill] sm:$0xff] }
 0x25c   : > { %v1554_v60 = vmax.f32 %v1474_v29, 0.0 }
 0x25d   : > { %v1555_v35 = vmax.f32 %v1476_v25, 0.0 }
 0x25e   : > { %v1580_v18 = vpack.c.bf16 %v1554_v60, %v1552_v34 }
 0x25f   : > { %v1581_v57 = vpack.c.bf16 %v1555_v35, %v1553_v51  ;;  %v1479_v48 = vpop.f32.mrb[12].mxu0  ;;  %v13623_v35 = vld [vmem:[#allocation15_spill] sm:$0xff] }
 0x260   : > { %v1480_v22 = vadd.f32 %v1479_v48, %v13618_v59  ;;  %v1481_v10 = vpop.f32.mrb[13].mxu0 }
 0x261   : > { %v1482_v26 = vadd.f32 %v1481_v10, %v13618_v59  ;;  %v1483_v32 = vpop.f32.mrb[14].mxu0  ;;  %1844 = vmatprep.subr.bf16.mxu1 %v1581_v57 }
 0x262   : > { %v1484_v63 = vadd.f32 %v1483_v32, %v13619_v27  ;;  %v1485_v36 = vpop.f32.mrb[15].mxu0  ;;  %1845 = vmatpush1.bf16.msra.mxu1 %v1580_v18  ;;  %v1556_v17 = vmax.f32 %v1480_v22, 0.0 }
 0x263   : > { %v1486_v23 = vadd.f32 %v1485_v36, %v13619_v27  ;;  %v1557_v28 = vmax.f32 %v1482_v26, 0.0  ;;  %v13624_v36 = vld [vmem:[#allocation16_spill] sm:$0xff] }
 0x264   : > { %v1558_v37 = vmax.f32 %v1484_v63, 0.0 }
 0x265   : > { %v1559_v11 = vmax.f32 %v1486_v23, 0.0 }
 0x266   : > { %v1582_v30 = vpack.c.bf16 %v1558_v37, %v1556_v17 }
 0x267   : > { %v1583_v15 = vpack.c.bf16 %v1559_v11, %v1557_v28  ;;  %v1489_v41 = vpop.f32.mrb[16].mxu0  ;;  %v13625_v11 = vld [vmem:[#allocation17_spill] sm:$0xff] }
 0x268   : > { %v1490_v43 = vadd.f32 %v1489_v41, %v13620_v6  ;;  %v1491_v49 = vpop.f32.mrb[17].mxu0 }
 0x269   : > { %v1492_v19 = vadd.f32 %v1491_v49, %v13620_v6  ;;  %v1493_v0 = vpop.f32.mrb[18].mxu0  ;;  %1846 = vmatprep.subr.bf16.mxu1 %v1583_v15 }
 0x26a   : > { %v1494_v8 = vadd.f32 %v1493_v0, %v13621_v9  ;;  %v1495_v5 = vpop.f32.mrb[19].mxu0  ;;  %1847 = vmatpush1.bf16.msra.mxu1 %v1582_v30  ;;  %v1560_v50 = vmax.f32 %v1490_v43, 0.0 }
 0x26b   : > { %v1496_v20 = vadd.f32 %v1495_v5, %v13621_v9  ;;  %v1561_v54 = vmax.f32 %v1492_v19, 0.0  ;;  %v13626_v5 = vld [vmem:[#allocation18_spill] sm:$0xff] }
 0x26c   : > { %v1562_v2 = vmax.f32 %v1494_v8, 0.0 }
 0x26d   : > { %v1563_v52 = vmax.f32 %v1496_v20, 0.0 }
 0x26e   : > { %v1584_v38 = vpack.c.bf16 %v1562_v2, %v1560_v50 }
 0x26f   : > { %v1585_v7 = vpack.c.bf16 %v1563_v52, %v1561_v54  ;;  %v1499_v29 = vpop.f32.mrb[20].mxu0  ;;  %v13627_v52 = vld [vmem:[#allocation19_spill] sm:$0xff] }
 0x270   : > { %v1500_v25 = vadd.f32 %v1499_v29, %v13622_v56  ;;  %v1501_v34 = vpop.f32.mrb[21].mxu0 }
 0x271   : > { %v1502_v60 = vadd.f32 %v1501_v34, %v13622_v56  ;;  %v1503_v51 = vpop.f32.mrb[22].mxu0  ;;  %1848 = vmatprep.subr.bf16.mxu1 %v1585_v7 }
 0x272   : > { %v1504_v18 = vadd.f32 %v1503_v51, %v13623_v35  ;;  %v1505_v57 = vpop.f32.mrb[23].mxu0  ;;  %1849 = vmatpush1.bf16.msra.mxu1 %v1584_v38  ;;  %v1564_v59 = vmax.f32 %v1500_v25, 0.0 }
 0x273   : > { %v1506_v48 = vadd.f32 %v1505_v57, %v13623_v35  ;;  %v1565_v10 = vmax.f32 %v1502_v60, 0.0  ;;  %v9202_v57 = vld [vmem:[%s13288_s4 + $0x8] sm:$0xff]  }
 0x274   : > { %v1566_v22 = vmax.f32 %v1504_v18, 0.0  ;;  %v9201_v18 = vld [vmem:[%s13288_s4] sm:$0xff]  }
 0x275   : > { %v1567_v26 = vmax.f32 %v1506_v48, 0.0  ;;  %v9207_v48 = vld [vmem:[%s13288_s4 + $0x30] sm:$0xff]  }
 0x276   : > { %v1586_v32 = vpack.c.bf16 %v1566_v22, %v1564_v59  ;;  %v9208_v59 = vld [vmem:[%s13288_s4 + $0x38] sm:$0xff]  }
 0x277   : > { %v1587_v27 = vpack.c.bf16 %v1567_v26, %v1565_v10  ;;  %v1509_v63 = vpop.f32.mrb[24].mxu0  ;;  %v13628_v10 = vld [vmem:[#allocation20_spill] sm:$0xff] }
 0x278   : > { %v1510_v23 = vadd.f32 %v1509_v63, %v13624_v36  ;;  %v1511_v17 = vpop.f32.mrb[25].mxu0 }
 0x279   : > { %v1512_v37 = vadd.f32 %v1511_v17, %v13624_v36  ;;  %v1513_v28 = vpop.f32.mrb[26].mxu0  ;;  %1850 = vmatprep.subr.bf16.mxu1 %v1587_v27  ;;  %v13629_v36 = vld [vmem:[#allocation21_spill] sm:$0xff] }
 0x27a   : > { %v1514_v30 = vadd.f32 %v1513_v28, %v13625_v11  ;;  %v1515_v15 = vpop.f32.mrb[27].mxu0  ;;  %1851 = vmatpush1.bf16.msra.mxu1 %v1586_v32  ;;  %v1568_v6 = vmax.f32 %v1510_v23, 0.0 }
 0x27b   : > { %v1516_v41 = vadd.f32 %v1515_v15, %v13625_v11  ;;  %v1569_v49 = vmax.f32 %v1512_v37, 0.0 }
 0x27c   : > { %v1570_v43 = vmax.f32 %v1514_v30, 0.0 }
 0x27d   : > { %v1571_v19 = vmax.f32 %v1516_v41, 0.0 }
 0x27e   : > { %v1588_v0 = vpack.c.bf16 %v1570_v43, %v1568_v6 }
 0x27f   : > { %v1589_v9 = vpack.c.bf16 %v1571_v19, %v1569_v49  ;;  %v1519_v8 = vpop.f32.mrb[28].mxu0  ;;  %v13630_v49 = vld [vmem:[#allocation22_spill] sm:$0xff] }
 0x280   : > { %v1520_v20 = vadd.f32 %v1519_v8, %v13626_v5  ;;  %v1521_v50 = vpop.f32.mrb[29].mxu0 }
 0x281   : > { %v1522_v2 = vadd.f32 %v1521_v50, %v13626_v5  ;;  %v1523_v54 = vpop.f32.mrb[30].mxu0  ;;  %1852 = vmatprep.subr.bf16.mxu1 %v1589_v9  ;;  %v13631_v5 = vld [vmem:[#allocation23_spill] sm:$0xff] }
 0x282   : > { %v1524_v38 = vadd.f32 %v1523_v54, %v13627_v52  ;;  %v1525_v7 = vpop.f32.mrb[31].mxu0  ;;  %1853 = vmatpush1.bf16.msra.mxu1 %v1588_v0  ;;  %v1572_v56 = vmax.f32 %v1520_v20, 0.0 }
 0x283   : > { %v1526_v29 = vadd.f32 %v1525_v7, %v13627_v52  ;;  %v1573_v34 = vmax.f32 %v1522_v2, 0.0 }
 0x284   : > { %v1574_v25 = vmax.f32 %v1524_v38, 0.0 }
 0x285   : > { %v1575_v60 = vmax.f32 %v1526_v29, 0.0 }
 0x286   : > { %v1590_v51 = vpack.c.bf16 %v1574_v25, %v1572_v56 }
 0x287   : > { %v1591_v35 = vpack.c.bf16 %v1575_v60, %v1573_v34  ;;  %v13632_v34 = vld [vmem:[#allocation24_spill] sm:$0xff] }
 0x289   : > { %1854 = vmatprep.subr.bf16.mxu1 %v1591_v35 }
 0x28a   : > { %1855 = vmatpush1.bf16.msra.mxu1 %v1590_v51 }
 0x28b   : > { %2874 = vmatprep.subr.bf16.mxu1 %v10514_v1  ;;  %v9203_v1 = vld [vmem:[%s13288_s4 + $0x10] sm:$0xff]  }
 0x28d   : > { %1873 = vmatmul.mubr.bf16.vlgmr.msra.gmra.mrb[0].mxu1 %v9201_v18 }
 0x28e   : > { %2875 = vmatpush1.bf16.msra.mxu1 %v10710_v58  ;;  %1882 = vmatprep.mubr.bf16.mxu1 %v13531_v13  ;;  %v9204_v58 = vld [vmem:[%s13288_s4 + $0x18] sm:$0xff]  }
 0x28f   : > { %8410 = vmatprep.subr.msk.bf16.mxu1 %vm1408_vm12, %v10743_v55  ;;  %v9205_v55 = vld [vmem:[%s13288_s4 + $0x20] sm:$0xff]  }
 0x292   : > { %2877 = vmatpush1.bf16.msra.mxu1 %v10786_v33  ;;  %v9206_v33 = vld [vmem:[%s13288_s4 + $0x28] sm:$0xff]  }
 0x295   : > { %1883 = vmatmul.mubr.bf16.gmra.mrb[4].mxu1 %v9202_v57  ;;  %v13633_v57 = vld [vmem:[#allocation25_spill] sm:$0xff] }
 0x296   : > { %1892 = vmatprep.mubr.bf16.mxu1 %v13531_v13 }
 0x29d   : > { %1893 = vmatmul.mubr.bf16.gmra.mrb[8].mxu1 %v9203_v1 }
 0x29e   : > { %1902 = vmatprep.mubr.bf16.mxu1 %v13531_v13 }
 0x2a5   : > { %1903 = vmatmul.mubr.bf16.gmra.mrb[12].mxu1 %v9204_v58 }
 0x2a6   : > { %1912 = vmatprep.mubr.bf16.mxu1 %v13531_v13 }
 0x2ad   : > { %1913 = vmatmul.mubr.bf16.gmra.mrb[16].mxu1 %v9205_v55 }
 0x2ae   : > { %1922 = vmatprep.mubr.bf16.mxu1 %v13531_v13 }
 0x2b5   : > { %1923 = vmatmul.mubr.bf16.gmra.mrb[20].mxu1 %v9206_v33 }
 0x2b6   : > { %1932 = vmatprep.mubr.bf16.mxu1 %v13531_v13 }
 0x2bd   : > { %1933 = vmatmul.mubr.bf16.gmra.mrb[24].mxu1 %v9207_v48 }
 0x2be   : > { %1942 = vmatprep.mubr.bf16.mxu1 %v13531_v13 }
 0x2c5   : > { %1943 = vmatmul.mubr.bf16.gmra.mrb[28].mxu1 %v9208_v59 }
 0x2c6   : > { %2906 = vmatprep.mubr.bf16.mxu1 %v13531_v13 }
 0x360   : > { %v1874_v22 = vpop.f32.mrb[0].mxu1 }
 0x361   : > { %v2050_v26 = vadd.f32 %v13628_v10, %v1874_v22  ;;  %v1876_v32 = vpop.f32.mrb[1].mxu1 }
 0x362   : > { %v2051_v27 = vadd.f32 %v13628_v10, %v1876_v32  ;;  %v1878_v63 = vpop.f32.mrb[2].mxu1 }
 0x363   : > { %v2052_v23 = vadd.f32 %v13629_v36, %v1878_v63  ;;  %v1880_v17 = vpop.f32.mrb[3].mxu1  ;;  %v2099_v28 = vmax.f32 %v2050_v26, 0.0 }
 0x364   : > { %v2053_v37 = vadd.f32 %v13629_v36, %v1880_v17  ;;  %v2100_v30 = vmax.f32 %v2051_v27, 0.0  ;;  %v13634_v27 = vld [vmem:[#allocation26_spill] sm:$0xff] }
 0x365   : > { %v2101_v11 = vmax.f32 %v2052_v23, 0.0 }
 0x366   : > { %v2102_v15 = vmax.f32 %v2053_v37, 0.0  ;;  %v13635_v37 = vld [vmem:[#allocation27_spill] sm:$0xff] }
 0x367   : > { %v2131_v41 = vpack.c.bf16 %v2101_v11, %v2099_v28 }
 0x368   : > { %v2132_v6 = vpack.c.bf16 %v2102_v15, %v2100_v30  ;;  %v1884_v43 = vpop.f32.mrb[4].mxu1 }
 0x369   : > { %v2054_v19 = vadd.f32 %v13630_v49, %v1884_v43  ;;  %v1886_v0 = vpop.f32.mrb[5].mxu1 }
 0x36a   : > { %v2055_v9 = vadd.f32 %v13630_v49, %v1886_v0  ;;  %v1888_v8 = vpop.f32.mrb[6].mxu1  ;;  %2292 = vmatprep.subr.bf16.mxu0 %v2132_v6 }
 0x36b   : > { %v2056_v20 = vadd.f32 %v13631_v5, %v1888_v8  ;;  %v1890_v50 = vpop.f32.mrb[7].mxu1  ;;  %2293 = vmatpush1.bf16.msra.mxu0 %v2131_v41  ;;  %v2103_v54 = vmax.f32 %v2054_v19, 0.0 }
 0x36c   : > { %v2057_v2 = vadd.f32 %v13631_v5, %v1890_v50  ;;  %v2104_v38 = vmax.f32 %v2055_v9, 0.0  ;;  %v13636_v9 = vld [vmem:[#allocation28_spill] sm:$0xff] }
 0x36d   : > { %v2105_v52 = vmax.f32 %v2056_v20, 0.0 }
 0x36e   : > { %v2106_v7 = vmax.f32 %v2057_v2, 0.0 }
 0x36f   : > { %v2133_v29 = vpack.c.bf16 %v2105_v52, %v2103_v54 }
 0x370   : > { %v2134_v56 = vpack.c.bf16 %v2106_v7, %v2104_v38  ;;  %v1894_v25 = vpop.f32.mrb[8].mxu1 }
 0x371   : > { %v2058_v60 = vadd.f32 %v13632_v34, %v1894_v25  ;;  %v1896_v51 = vpop.f32.mrb[9].mxu1 }
 0x372   : > { %v2059_v35 = vadd.f32 %v13632_v34, %v1896_v51  ;;  %v1898_v18 = vpop.f32.mrb[10].mxu1  ;;  %2294 = vmatprep.subr.bf16.mxu0 %v2134_v56 }
 0x373   : > { %v2060_v1 = vadd.f32 %v13633_v57, %v1898_v18  ;;  %v1900_v58 = vpop.f32.mrb[11].mxu1  ;;  %2295 = vmatpush1.bf16.msra.mxu0 %v2133_v29  ;;  %v2107_v33 = vmax.f32 %v2058_v60, 0.0 }
 0x374   : > { %v2061_v55 = vadd.f32 %v13633_v57, %v1900_v58  ;;  %v2108_v59 = vmax.f32 %v2059_v35, 0.0 }
 0x375   : > { %v2109_v48 = vmax.f32 %v2060_v1, 0.0  ;;  %v13637_v1 = vld [vmem:[#allocation29_spill] sm:$0xff] }
 0x376   : > { %v2110_v22 = vmax.f32 %v2061_v55, 0.0 }
 0x377   : > { %v2135_v10 = vpack.c.bf16 %v2109_v48, %v2107_v33 }
 0x378   : > { %v2136_v26 = vpack.c.bf16 %v2110_v22, %v2108_v59  ;;  %v1904_v32 = vpop.f32.mrb[12].mxu1 }
 0x379   : > { %v2062_v63 = vadd.f32 %v13634_v27, %v1904_v32  ;;  %v1906_v36 = vpop.f32.mrb[13].mxu1 }
 0x37a   : > { %v2063_v23 = vadd.f32 %v13634_v27, %v1906_v36  ;;  %v1908_v17 = vpop.f32.mrb[14].mxu1  ;;  %2296 = vmatprep.subr.bf16.mxu0 %v2136_v26 }
 0x37b   : > { %v2064_v28 = vadd.f32 %v13635_v37, %v1908_v17  ;;  %v1910_v11 = vpop.f32.mrb[15].mxu1  ;;  %2297 = vmatpush1.bf16.msra.mxu0 %v2135_v10  ;;  %v2111_v15 = vmax.f32 %v2062_v63, 0.0 }
 0x37c   : > { %v2065_v30 = vadd.f32 %v13635_v37, %v1910_v11  ;;  %v2112_v6 = vmax.f32 %v2063_v23, 0.0 }
 0x37d   : > { %v2113_v41 = vmax.f32 %v2064_v28, 0.0 }
 0x37e   : > { %v2114_v43 = vmax.f32 %v2065_v30, 0.0 }
 0x37f   : > { %v2137_v49 = vpack.c.bf16 %v2113_v41, %v2111_v15 }
 0x380   : > { %v2138_v19 = vpack.c.bf16 %v2114_v43, %v2112_v6  ;;  %v1914_v0 = vpop.f32.mrb[16].mxu1 }
 0x381   : > { %v2066_v8 = vadd.f32 %v13636_v9, %v1914_v0  ;;  %v1916_v5 = vpop.f32.mrb[17].mxu1 }
 0x382   : > { %v2067_v20 = vadd.f32 %v13636_v9, %v1916_v5  ;;  %v1918_v50 = vpop.f32.mrb[18].mxu1  ;;  %2298 = vmatprep.subr.bf16.mxu0 %v2138_v19  ;;  %v13638_v9 = vld [vmem:[#allocation30_spill] sm:$0xff] }
 0x383   : > { %v2068_v2 = vadd.f32 %v10311_v44, %v1918_v50  ;;  %v1920_v54 = vpop.f32.mrb[19].mxu1  ;;  %2299 = vmatpush1.bf16.msra.mxu0 %v2137_v49  ;;  %v2115_v38 = vmax.f32 %v2066_v8, 0.0 }
 0x384   : > { %v2069_v52 = vadd.f32 %v10311_v44, %v1920_v54  ;;  %v2116_v29 = vmax.f32 %v2067_v20, 0.0 }
 0x385   : > { %v2117_v7 = vmax.f32 %v2068_v2, 0.0 }
 0x386   : > { %v2118_v56 = vmax.f32 %v2069_v52, 0.0 }
 0x387   : > { %v2139_v25 = vpack.c.bf16 %v2117_v7, %v2115_v38  ;;  %v9209_v7 = vld [vmem:[%s13288_s4 + $0x40] sm:$0xff]  }
 0x388   : > { %v2140_v34 = vpack.c.bf16 %v2118_v56, %v2116_v29  ;;  %v1924_v60 = vpop.f32.mrb[20].mxu1  ;;  %v9211_v29 = vld [vmem:[%s13288_s4 + $0x50] sm:$0xff]   ;;  %v9212_v56 = vld [vmem:[%s13288_s4 + $0x58] sm:$0xff]  }
 0x389   : > { %v2070_v51 = vadd.f32 %v10327_v53, %v1924_v60  ;;  %v1926_v35 = vpop.f32.mrb[21].mxu1  ;;  %v9215_v60 = vld [vmem:[%s13288_s4 + $0x70] sm:$0xff]  }
 0x38a   : > { %v2071_v18 = vadd.f32 %v10327_v53, %v1926_v35  ;;  %v1928_v57 = vpop.f32.mrb[22].mxu1  ;;  %2300 = vmatprep.subr.bf16.mxu0 %v2140_v34  ;;  %v9214_v34 = vld [vmem:[%s13288_s4 + $0x68] sm:$0xff]  }
 0x38b   : > { %v2072_v58 = vadd.f32 %v13637_v1, %v1928_v57  ;;  %v1930_v55 = vpop.f32.mrb[23].mxu1  ;;  %2301 = vmatpush1.bf16.msra.mxu0 %v2139_v25  ;;  %v2119_v33 = vmax.f32 %v2070_v51, 0.0  ;;  %v9213_v25 = vld [vmem:[%s13288_s4 + $0x60] sm:$0xff]   ;;  %v9216_v51 = vld [vmem:[%s13288_s4 + $0x78] sm:$0xff]  }
 0x38c   : > { %v2073_v44 = vadd.f32 %v13637_v1, %v1930_v55  ;;  %v2120_v59 = vmax.f32 %v2071_v18, 0.0  ;;  %v13639_v18 = vld [vmem:[#allocation31_spill] sm:$0xff] }
 0x38d   : > { %v2121_v48 = vmax.f32 %v2072_v58, 0.0 }
 0x38e   : > { %v2122_v22 = vmax.f32 %v2073_v44, 0.0  ;;  %v13640_v44 = vld [vmem:[#allocation32_spill] sm:$0xff] }
 0x38f   : > { %v2141_v10 = vpack.c.bf16 %v2121_v48, %v2119_v33 }
 0x390   : > { %v2142_v26 = vpack.c.bf16 %v2122_v22, %v2120_v59  ;;  %v1934_v32 = vpop.f32.mrb[24].mxu1 }
 0x391   : > { %v2074_v27 = vadd.f32 %v10359_v3, %v1934_v32  ;;  %v1936_v63 = vpop.f32.mrb[25].mxu1 }
 0x392   : > { %v2075_v53 = vadd.f32 %v10359_v3, %v1936_v63  ;;  %v1938_v36 = vpop.f32.mrb[26].mxu1  ;;  %2302 = vmatprep.subr.bf16.mxu0 %v2142_v26 }
 0x393   : > { %v2076_v23 = vadd.f32 %v10369_v24, %v1938_v36  ;;  %v1940_v17 = vpop.f32.mrb[27].mxu1  ;;  %2303 = vmatpush1.bf16.msra.mxu0 %v2141_v10  ;;  %v2123_v28 = vmax.f32 %v2074_v27, 0.0  ;;  %v13641_v36 = vld [vmem:[#allocation33_spill] sm:$0xff] }
 0x394   : > { %v2077_v37 = vadd.f32 %v10369_v24, %v1940_v17  ;;  %v2124_v30 = vmax.f32 %v2075_v53, 0.0 }
 0x395   : > { %v2125_v11 = vmax.f32 %v2076_v23, 0.0 }
 0x396   : > { %v2126_v15 = vmax.f32 %v2077_v37, 0.0 }
 0x397   : > { %v2143_v41 = vpack.c.bf16 %v2125_v11, %v2123_v28  ;;  %v13642_v11 = vld [vmem:[#allocation34_spill] sm:$0xff] }
 0x398   : > { %v2144_v6 = vpack.c.bf16 %v2126_v15, %v2124_v30  ;;  %v1944_v43 = vpop.f32.mrb[28].mxu1 }
 0x399   : > { %v2078_v49 = vadd.f32 %v10389_v46, %v1944_v43  ;;  %v1946_v19 = vpop.f32.mrb[29].mxu1 }
 0x39a   : > { %v2079_v3 = vadd.f32 %v10389_v46, %v1946_v19  ;;  %v1948_v0 = vpop.f32.mrb[30].mxu1  ;;  %2304 = vmatprep.subr.bf16.mxu0 %v2144_v6  ;;  %v9210_v46 = vld [vmem:[%s13288_s4 + $0x48] sm:$0xff]  }
 0x39b   : > { %v2080_v8 = vadd.f32 %v13638_v9, %v1948_v0  ;;  %v1950_v5 = vpop.f32.mrb[31].mxu1  ;;  %2305 = vmatpush1.bf16.msra.mxu0 %v2143_v41  ;;  %v2127_v20 = vmax.f32 %v2078_v49, 0.0 }
 0x39c   : > { %v2081_v24 = vadd.f32 %v13638_v9, %v1950_v5  ;;  %v2128_v2 = vmax.f32 %v2079_v3, 0.0 }
 0x39d   : > { %v2129_v50 = vmax.f32 %v2080_v8, 0.0 }
 0x39e   : > { %v2130_v54 = vmax.f32 %v2081_v24, 0.0 }
 0x39f   : > { %v2145_v52 = vpack.c.bf16 %v2129_v50, %v2127_v20 }
 0x3a0   : > { %v2146_v38 = vpack.c.bf16 %v2130_v54, %v2128_v2 }
 0x3a2   : > { %2306 = vmatprep.subr.bf16.mxu0 %v2146_v38 }
 0x3a3   : > { %2307 = vmatpush1.bf16.msra.mxu0 %v2145_v52 }
 0x3a6   : > { %2325 = vmatmul.mubr.bf16.vlgmr.msra.gmra.mrb[32].mxu0 %v9209_v7 }
 0x3a7   : > { %2334 = vmatprep.mubr.bf16.mxu0 %v13531_v13 }
 0x3ae   : > { %2335 = vmatmul.mubr.bf16.gmra.mrb[36].mxu0 %v9210_v46 }
 0x3af   : > { %2344 = vmatprep.mubr.bf16.mxu0 %v13531_v13 }
 0x3b6   : > { %2345 = vmatmul.mubr.bf16.gmra.mrb[40].mxu0 %v9211_v29 }
 0x3b7   : > { %2354 = vmatprep.mubr.bf16.mxu0 %v13531_v13 }
 0x3be   : > { %2355 = vmatmul.mubr.bf16.gmra.mrb[44].mxu0 %v9212_v56 }
 0x3bf   : > { %2364 = vmatprep.mubr.bf16.mxu0 %v13531_v13 }
 0x3c6   : > { %2365 = vmatmul.mubr.bf16.gmra.mrb[48].mxu0 %v9213_v25 }
 0x3c7   : > { %2374 = vmatprep.mubr.bf16.mxu0 %v13531_v13 }
 0x3ce   : > { %2375 = vmatmul.mubr.bf16.gmra.mrb[52].mxu0 %v9214_v34  ;;  %v13643_v34 = vld [vmem:[#allocation35_spill] sm:$0xff] }
 0x3cf   : > { %2384 = vmatprep.mubr.bf16.mxu0 %v13531_v13 }
 0x3d6   : > { %2385 = vmatmul.mubr.bf16.gmra.mrb[56].mxu0 %v9215_v60 }
 0x3d7   : > { %2394 = vmatprep.mubr.bf16.mxu0 %v13531_v13 }
 0x3de   : > { %2395 = vmatmul.mubr.bf16.gmra.mrb[60].mxu0 %v9216_v51 }
 0x3df   : > { %2647 = vmatprep.mubr.bf16.mxu0 %v13531_v13 }
 0x479   : > { %v2326_v35 = vpop.f32.mrb[32].mxu0 }
 0x47a   : > { %v2327_v57 = vadd.f32 %v2326_v35, %v13639_v18  ;;  %v2328_v1 = vpop.f32.mrb[33].mxu0 }
 0x47b   : > { %v2329_v58 = vadd.f32 %v2328_v1, %v13639_v18  ;;  %v2330_v55 = vpop.f32.mrb[34].mxu0  ;;  %v13644_v18 = vld [vmem:[#allocation36_spill] sm:$0xff] }
 0x47c   : > { %v2331_v33 = vadd.f32 %v2330_v55, %v13640_v44  ;;  %v2332_v48 = vpop.f32.mrb[35].mxu0  ;;  %v2422_v22 = vmax.f32 %v2327_v57, 0.0 }
 0x47d   : > { %v2333_v59 = vadd.f32 %v2332_v48, %v13640_v44  ;;  %v2423_v26 = vmax.f32 %v2329_v58, 0.0 }
 0x47e   : > { %v2424_v10 = vmax.f32 %v2331_v33, 0.0 }
 0x47f   : > { %v2425_v32 = vmax.f32 %v2333_v59, 0.0 }
 0x480   : > { %v2454_v27 = vpack.c.bf16 %v2424_v10, %v2422_v22  ;;  %v13645_v10 = vld [vmem:[#allocation37_spill] sm:$0xff] }
 0x481   : > { %v2455_v63 = vpack.c.bf16 %v2425_v32, %v2423_v26  ;;  %v2336_v53 = vpop.f32.mrb[36].mxu0 }
 0x482   : > { %v2337_v23 = vadd.f32 %v2336_v53, %v13641_v36  ;;  %v2338_v17 = vpop.f32.mrb[37].mxu0  ;;  %v13646_v53 = vld [vmem:[#allocation38_spill] sm:$0xff] }
 0x483   : > { %v2339_v37 = vadd.f32 %v2338_v17, %v13641_v36  ;;  %v2340_v28 = vpop.f32.mrb[38].mxu0  ;;  %2615 = vmatprep.subr.bf16.mxu0 %v2455_v63 }
 0x484   : > { %v2341_v30 = vadd.f32 %v2340_v28, %v13642_v11  ;;  %v2342_v15 = vpop.f32.mrb[39].mxu0  ;;  %2616 = vmatpush1.bf16.msra.mxu0 %v2454_v27  ;;  %v2426_v6 = vmax.f32 %v2337_v23, 0.0 }
 0x485   : > { %v2343_v41 = vadd.f32 %v2342_v15, %v13642_v11  ;;  %v2427_v49 = vmax.f32 %v2339_v37, 0.0 }
 0x486   : > { %v2428_v43 = vmax.f32 %v2341_v30, 0.0 }
 0x487   : > { %v2429_v19 = vmax.f32 %v2343_v41, 0.0 }
 0x488   : > { %v2456_v3 = vpack.c.bf16 %v2428_v43, %v2426_v6  ;;  %v13647_v43 = vld [vmem:[#allocation39_spill] sm:$0xff] }
 0x489   : > { %v2457_v0 = vpack.c.bf16 %v2429_v19, %v2427_v49  ;;  %v2346_v9 = vpop.f32.mrb[40].mxu0 }
 0x48a   : > { %v2347_v8 = vadd.f32 %v2346_v9, %v10476_v42  ;;  %v2348_v5 = vpop.f32.mrb[41].mxu0  ;;  %v13648_v9 = vld [vmem:[#allocation40_spill] sm:$0xff] }
 0x48b   : > { %v2349_v24 = vadd.f32 %v2348_v5, %v10476_v42  ;;  %v2350_v20 = vpop.f32.mrb[42].mxu0  ;;  %2617 = vmatprep.subr.bf16.mxu0 %v2457_v0 }
 0x48c   : > { %v2351_v50 = vadd.f32 %v2350_v20, %v10483_v14  ;;  %v2352_v2 = vpop.f32.mrb[43].mxu0  ;;  %2618 = vmatpush1.bf16.msra.mxu0 %v2456_v3  ;;  %v2430_v52 = vmax.f32 %v2347_v8, 0.0 }
 0x48d   : > { %v2353_v54 = vadd.f32 %v2352_v2, %v10483_v14  ;;  %v2431_v7 = vmax.f32 %v2349_v24, 0.0 }
 0x48e   : > { %v2432_v38 = vmax.f32 %v2351_v50, 0.0 }
 0x48f   : > { %v2433_v46 = vmax.f32 %v2353_v54, 0.0 }
 0x490   : > { %v2458_v29 = vpack.c.bf16 %v2432_v38, %v2430_v52 }
 0x491   : > { %v2459_v56 = vpack.c.bf16 %v2433_v46, %v2431_v7  ;;  %v2356_v25 = vpop.f32.mrb[44].mxu0  ;;  %v13649_v46 = vld [vmem:[#allocation41_spill] sm:$0xff] }
 0x492   : > { %v2357_v60 = vadd.f32 %v2356_v25, %v13643_v34  ;;  %v2358_v51 = vpop.f32.mrb[45].mxu0 }
 0x493   : > { %v2359_v42 = vadd.f32 %v2358_v51, %v13643_v34  ;;  %v2360_v35 = vpop.f32.mrb[46].mxu0  ;;  %2619 = vmatprep.subr.bf16.mxu0 %v2459_v56 }
 0x494   : > { %v2361_v57 = vadd.f32 %v2360_v35, %v13644_v18  ;;  %v2362_v1 = vpop.f32.mrb[47].mxu0  ;;  %2620 = vmatpush1.bf16.msra.mxu0 %v2458_v29  ;;  %v2434_v58 = vmax.f32 %v2357_v60, 0.0  ;;  %v13650_v60 = vld [vmem:[#allocation42_spill] sm:$0xff] }
 0x495   : > { %v2363_v14 = vadd.f32 %v2362_v1, %v13644_v18  ;;  %v2435_v44 = vmax.f32 %v2359_v42, 0.0 }
 0x496   : > { %v2436_v55 = vmax.f32 %v2361_v57, 0.0 }
 0x497   : > { %v2437_v33 = vmax.f32 %v2363_v14, 0.0 }
 0x498   : > { %v2460_v48 = vpack.c.bf16 %v2436_v55, %v2434_v58 }
 0x499   : > { %v2461_v59 = vpack.c.bf16 %v2437_v33, %v2435_v44  ;;  %v2366_v22 = vpop.f32.mrb[48].mxu0  ;;  %v13651_v33 = vld [vmem:[#allocation43_spill] sm:$0xff] }
 0x49a   : > { %v2367_v26 = vadd.f32 %v2366_v22, %v13645_v10  ;;  %v2368_v32 = vpop.f32.mrb[49].mxu0 }
 0x49b   : > { %v2369_v27 = vadd.f32 %v2368_v32, %v13645_v10  ;;  %v2370_v63 = vpop.f32.mrb[50].mxu0  ;;  %2621 = vmatprep.subr.bf16.mxu0 %v2461_v59 }
 0x49c   : > { %v2371_v36 = vadd.f32 %v2370_v63, %v13646_v53  ;;  %v2372_v23 = vpop.f32.mrb[51].mxu0  ;;  %2622 = vmatpush1.bf16.msra.mxu0 %v2460_v48  ;;  %v2438_v37 = vmax.f32 %v2367_v26, 0.0  ;;  %v13652_v26 = vld [vmem:[#allocation44_spill] sm:$0xff] }
 0x49d   : > { %v2373_v17 = vadd.f32 %v2372_v23, %v13646_v53  ;;  %v2439_v11 = vmax.f32 %v2369_v27, 0.0 }
 0x49e   : > { %v2440_v28 = vmax.f32 %v2371_v36, 0.0 }
 0x49f   : > { %v2441_v30 = vmax.f32 %v2373_v17, 0.0 }
 0x4a0   : > { %v2462_v15 = vpack.c.bf16 %v2440_v28, %v2438_v37 }
 0x4a1   : > { %v2463_v41 = vpack.c.bf16 %v2441_v30, %v2439_v11  ;;  %v2376_v6 = vpop.f32.mrb[52].mxu0  ;;  %v9217_v11 = vld [vmem:[%s13288_s4 + $0x80] sm:$0xff]   ;;  %v9218_v30 = vld [vmem:[%s13288_s4 + $0x88] sm:$0xff]  }
 0x4a2   : > { %v2377_v49 = vadd.f32 %v2376_v6, %v13647_v43  ;;  %v2378_v19 = vpop.f32.mrb[53].mxu0  ;;  %v9221_v6 = vld [vmem:[%s13288_s4 + $0xa0] sm:$0xff]  }
 0x4a3   : > { %v2379_v3 = vadd.f32 %v2378_v19, %v13647_v43  ;;  %v2380_v0 = vpop.f32.mrb[54].mxu0  ;;  %2623 = vmatprep.subr.bf16.mxu0 %v2463_v41  ;;  %v9220_v41 = vld [vmem:[%s13288_s4 + $0x98] sm:$0xff]   ;;  %v9222_v43 = vld [vmem:[%s13288_s4 + $0xa8] sm:$0xff]  }
 0x4a4   : > { %v2381_v8 = vadd.f32 %v2380_v0, %v13648_v9  ;;  %v2382_v5 = vpop.f32.mrb[55].mxu0  ;;  %2624 = vmatpush1.bf16.msra.mxu0 %v2462_v15  ;;  %v2442_v20 = vmax.f32 %v2377_v49, 0.0  ;;  %v9219_v15 = vld [vmem:[%s13288_s4 + $0x90] sm:$0xff]   ;;  %v9224_v19 = vld [vmem:[%s13288_s4 + $0xb8] sm:$0xff]   ;;  %v9226_v0 = vld [vmem:[%s13289_s5 + $0x88] sm:$0xff]  }
 0x4a5   : > { %v2383_v24 = vadd.f32 %v2382_v5, %v13648_v9  ;;  %v2443_v2 = vmax.f32 %v2379_v3, 0.0  ;;  %v9223_v49 = vld [vmem:[%s13288_s4 + $0xb0] sm:$0xff]   ;;  %v9225_v3 = vld [vmem:[%s13289_s5 + $0x80] sm:$0xff]  }
 0x4a6   : > { %v2444_v50 = vmax.f32 %v2381_v8, 0.0  ;;  %8411 = vmatmul.mubr.msk.bf16.vlgmr.msra.gmra.mrb[32].mxu1 %vm1383_vm4, %v9225_v3  ;;  %v9227_v9 = vld [vmem:[%s13289_s5 + $0x90] sm:$0xff]   ;;  %v9228_v8 = vld [vmem:[%s13289_s5 + $0x98] sm:$0xff]   ;;  %v9229_v5 = vld [vmem:[%s13289_s5 + $0xa0] sm:$0xff]  }
 0x4a7   : > { %v2445_v54 = vmax.f32 %v2383_v24, 0.0  ;;  %2916 = vmatprep.mubr.bf16.mxu1 %v13531_v13  ;;  %v9230_v24 = vld [vmem:[%s13289_s5 + $0xa8] sm:$0xff]  }
 0x4a8   : > { %v2464_v52 = vpack.c.bf16 %v2444_v50, %v2442_v20  ;;  %v9231_v20 = vld [vmem:[%s13289_s5 + $0xb0] sm:$0xff]   ;;  %v9232_v50 = vld [vmem:[%s13289_s5 + $0xb8] sm:$0xff]  }
 0x4a9   : > { %v2465_v38 = vpack.c.bf16 %v2445_v54, %v2443_v2  ;;  %v2386_v7 = vpop.f32.mrb[56].mxu0  ;;  %v13653_v54 = vld [vmem:[#allocation45_spill] sm:$0xff] }
 0x4aa   : > { %v2387_v29 = vadd.f32 %v2386_v7, %v13649_v46  ;;  %v2388_v56 = vpop.f32.mrb[57].mxu0 }
 0x4ab   : > { %v2389_v25 = vadd.f32 %v2388_v56, %v13649_v46  ;;  %v2390_v34 = vpop.f32.mrb[58].mxu0  ;;  %2625 = vmatprep.subr.bf16.mxu0 %v2465_v38 }
 0x4ac   : > { %v2391_v51 = vadd.f32 %v2390_v34, %v13650_v60  ;;  %v2392_v42 = vpop.f32.mrb[59].mxu0  ;;  %2626 = vmatpush1.bf16.msra.mxu0 %v2464_v52  ;;  %v2446_v18 = vmax.f32 %v2387_v29, 0.0  ;;  %v13654_v29 = vld [vmem:[#allocation46_spill] sm:$0xff] }
 0x4ad   : > { %v2393_v35 = vadd.f32 %v2392_v42, %v13650_v60  ;;  %v2447_v1 = vmax.f32 %v2389_v25, 0.0 }
 0x4ae   : > { %v2448_v57 = vmax.f32 %v2391_v51, 0.0  ;;  %8412 = vmatmul.mubr.msk.bf16.gmra.mrb[36].mxu1 %vm1383_vm4, %v9226_v0 }
 0x4af   : > { %v2449_v14 = vmax.f32 %v2393_v35, 0.0  ;;  %2926 = vmatprep.mubr.bf16.mxu1 %v13531_v13 }
 0x4b0   : > { %v2466_v58 = vpack.c.bf16 %v2448_v57, %v2446_v18 }
 0x4b1   : > { %v2467_v55 = vpack.c.bf16 %v2449_v14, %v2447_v1  ;;  %v2396_v44 = vpop.f32.mrb[60].mxu0  ;;  %v13655_v14 = vld [vmem:[#allocation47_spill] sm:$0xff] }
 0x4b2   : > { %v2397_v48 = vadd.f32 %v2396_v44, %v13651_v33  ;;  %v2398_v59 = vpop.f32.mrb[61].mxu0 }
 0x4b3   : > { %v2399_v22 = vadd.f32 %v2398_v59, %v13651_v33  ;;  %v2400_v10 = vpop.f32.mrb[62].mxu0  ;;  %2627 = vmatprep.subr.bf16.mxu0 %v2467_v55 }
 0x4b4   : > { %v2401_v32 = vadd.f32 %v2400_v10, %v13652_v26  ;;  %v2402_v27 = vpop.f32.mrb[63].mxu0  ;;  %2628 = vmatpush1.bf16.msra.mxu0 %v2466_v58  ;;  %v2450_v53 = vmax.f32 %v2397_v48, 0.0  ;;  %v13656_v48 = vld [vmem:[#allocation48_spill] sm:$0xff] }
 0x4b5   : > { %v2403_v63 = vadd.f32 %v2402_v27, %v13652_v26  ;;  %v2451_v23 = vmax.f32 %v2399_v22, 0.0 }
 0x4b6   : > { %v2452_v36 = vmax.f32 %v2401_v32, 0.0  ;;  %8413 = vmatmul.mubr.msk.bf16.gmra.mrb[40].mxu1 %vm1383_vm4, %v9227_v9 }
 0x4b7   : > { %v2453_v17 = vmax.f32 %v2403_v63, 0.0  ;;  %2936 = vmatprep.mubr.bf16.mxu1 %v13531_v13 }
 0x4b8   : > { %v2468_v37 = vpack.c.bf16 %v2452_v36, %v2450_v53 }
 0x4b9   : > { %v2469_v28 = vpack.c.bf16 %v2453_v17, %v2451_v23  ;;  %v13657_v17 = vld [vmem:[#allocation49_spill] sm:$0xff] }
 0x4bb   : > { %2629 = vmatprep.subr.bf16.mxu0 %v2469_v28 }
 0x4bc   : > { %2630 = vmatpush1.bf16.msra.mxu0 %v2468_v37 }
 0x4be   : > { %8414 = vmatmul.mubr.msk.bf16.gmra.mrb[44].mxu1 %vm1383_vm4, %v9228_v8 }
 0x4bf   : > { %2648 = vmatmul.mubr.bf16.vlgmr.msra.gmra.mrb[64].mxu0 %v9217_v11  ;;  %2946 = vmatprep.mubr.bf16.mxu1 %v13531_v13 }
 0x4c0   : > { %2657 = vmatprep.mubr.bf16.mxu0 %v13531_v13 }
 0x4c6   : > { %8415 = vmatmul.mubr.msk.bf16.gmra.mrb[48].mxu1 %vm1383_vm4, %v9229_v5 }
 0x4c7   : > { %2658 = vmatmul.mubr.bf16.gmra.mrb[68].mxu0 %v9218_v30  ;;  %2956 = vmatprep.mubr.bf16.mxu1 %v13531_v13 }
 0x4c8   : > { %2667 = vmatprep.mubr.bf16.mxu0 %v13531_v13 }
 0x4ce   : > { %8416 = vmatmul.mubr.msk.bf16.gmra.mrb[52].mxu1 %vm1383_vm4, %v9230_v24  ;;  %v13659_v24 = vld [vmem:[#allocation51_spill] sm:$0xff] }
 0x4cf   : > { %2668 = vmatmul.mubr.bf16.gmra.mrb[72].mxu0 %v9219_v15  ;;  %2966 = vmatprep.mubr.bf16.mxu1 %v13531_v13  ;;  %v13658_v15 = vld [vmem:[#allocation50_spill] sm:$0xff] }
 0x4d0   : > { %2677 = vmatprep.mubr.bf16.mxu0 %v13531_v13 }
 0x4d6   : > { %8417 = vmatmul.mubr.msk.bf16.gmra.mrb[56].mxu1 %vm1383_vm4, %v9231_v20 }
 0x4d7   : > { %2678 = vmatmul.mubr.bf16.gmra.mrb[76].mxu0 %v9220_v41  ;;  %2976 = vmatprep.mubr.bf16.mxu1 %v13531_v13 }
 0x4d8   : > { %2687 = vmatprep.mubr.bf16.mxu0 %v13531_v13 }
 0x4de   : > { %8418 = vmatmul.mubr.msk.bf16.gmra.mrb[60].mxu1 %vm1383_vm4, %v9232_v50 }
 0x4df   : > { %2688 = vmatmul.mubr.bf16.gmra.mrb[80].mxu0 %v9221_v6  ;;  %3067 = vmatprep.mubr.bf16.mxu1 %v13531_v13 }
 0x4e0   : > { %2697 = vmatprep.mubr.bf16.mxu0 %v13531_v13 }
 0x4e7   : > { %2698 = vmatmul.mubr.bf16.gmra.mrb[84].mxu0 %v9222_v43 }
 0x4e8   : > { %2707 = vmatprep.mubr.bf16.mxu0 %v13531_v13 }
 0x4ef   : > { %2708 = vmatmul.mubr.bf16.gmra.mrb[88].mxu0 %v9223_v49 }
 0x4f0   : > { %2717 = vmatprep.mubr.bf16.mxu0 %v13531_v13 }
 0x4f7   : > { %2718 = vmatmul.mubr.bf16.gmra.mrb[92].mxu0 %v9224_v19 }
 0x4f8   : > { %3519 = vmatprep.mubr.bf16.mxu0 %v13531_v13 }
 0x592   : > { %v2649_v2 = vpop.f32.mrb[64].mxu0 }
 0x593   : > { %v2650_v52 = vadd.f32 %v2649_v2, %v13653_v54  ;;  %v2651_v38 = vpop.f32.mrb[65].mxu0 }
 0x594   : > { %v2652_v7 = vadd.f32 %v2651_v38, %v13653_v54  ;;  %v2653_v46 = vpop.f32.mrb[66].mxu0 }
 0x595   : > { %v2654_v56 = vadd.f32 %v2653_v46, %v13654_v29  ;;  %v2655_v25 = vpop.f32.mrb[67].mxu0  ;;  %v2745_v60 = vmax.f32 %v2650_v52, 0.0  ;;  %v13660_v52 = vld [vmem:[#allocation52_spill] sm:$0xff] }
 0x596   : > { %v2656_v34 = vadd.f32 %v2655_v25, %v13654_v29  ;;  %v2746_v42 = vmax.f32 %v2652_v7, 0.0 }
 0x597   : > { %v2747_v51 = vmax.f32 %v2654_v56, 0.0 }
 0x598   : > { %v2748_v35 = vmax.f32 %v2656_v34, 0.0 }
 0x599   : > { %v2777_v18 = vpack.c.bf16 %v2747_v51, %v2745_v60 }
 0x59a   : > { %v2778_v57 = vpack.c.bf16 %v2748_v35, %v2746_v42  ;;  %v2659_v1 = vpop.f32.mrb[68].mxu0  ;;  %v13661_v35 = vld [vmem:[#allocation53_spill] sm:$0xff] }
 0x59b   : > { %v2660_v58 = vadd.f32 %v2659_v1, %v13655_v14  ;;  %v2661_v55 = vpop.f32.mrb[69].mxu0 }
 0x59c   : > { %v2662_v44 = vadd.f32 %v2661_v55, %v13655_v14  ;;  %v2663_v33 = vpop.f32.mrb[70].mxu0  ;;  %3035 = vmatprep.subr.bf16.mxu1 %v2778_v57 }
 0x59d   : > { %v2664_v59 = vadd.f32 %v2663_v33, %v13656_v48  ;;  %v2665_v22 = vpop.f32.mrb[71].mxu0  ;;  %3036 = vmatpush1.bf16.msra.mxu1 %v2777_v18  ;;  %v2749_v26 = vmax.f32 %v2660_v58, 0.0  ;;  %v13662_v58 = vld [vmem:[#allocation54_spill] sm:$0xff] }
 0x59e   : > { %v2666_v10 = vadd.f32 %v2665_v22, %v13656_v48  ;;  %v2750_v27 = vmax.f32 %v2662_v44, 0.0 }
 0x59f   : > { %v2751_v32 = vmax.f32 %v2664_v59, 0.0 }
 0x5a0   : > { %v2752_v63 = vmax.f32 %v2666_v10, 0.0 }
 0x5a1   : > { %v2779_v53 = vpack.c.bf16 %v2751_v32, %v2749_v26 }
 0x5a2   : > { %v2780_v36 = vpack.c.bf16 %v2752_v63, %v2750_v27  ;;  %v2669_v23 = vpop.f32.mrb[72].mxu0  ;;  %v13663_v63 = vld [vmem:[#allocation55_spill] sm:$0xff] }
 0x5a3   : > { %v2670_v37 = vadd.f32 %v2669_v23, %v13657_v17  ;;  %v2671_v28 = vpop.f32.mrb[73].mxu0 }
 0x5a4   : > { %v2672_v11 = vadd.f32 %v2671_v28, %v13657_v17  ;;  %v2673_v30 = vpop.f32.mrb[74].mxu0  ;;  %3037 = vmatprep.subr.bf16.mxu1 %v2780_v36 }
 0x5a5   : > { %v2674_v41 = vadd.f32 %v2673_v30, %v13658_v15  ;;  %v2675_v6 = vpop.f32.mrb[75].mxu0  ;;  %3038 = vmatpush1.bf16.msra.mxu1 %v2779_v53  ;;  %v2753_v49 = vmax.f32 %v2670_v37, 0.0  ;;  %v13664_v37 = vld [vmem:[#allocation56_spill] sm:$0xff] }
 0x5a6   : > { %v2676_v43 = vadd.f32 %v2675_v6, %v13658_v15  ;;  %v2754_v3 = vmax.f32 %v2672_v11, 0.0 }
 0x5a7   : > { %v2755_v19 = vmax.f32 %v2674_v41, 0.0 }
 0x5a8   : > { %v2756_v0 = vmax.f32 %v2676_v43, 0.0 }
 0x5a9   : > { %v2781_v9 = vpack.c.bf16 %v2755_v19, %v2753_v49 }
 0x5aa   : > { %v2782_v8 = vpack.c.bf16 %v2756_v0, %v2754_v3  ;;  %v2679_v5 = vpop.f32.mrb[76].mxu0  ;;  %v13665_v0 = vld [vmem:[#allocation57_spill] sm:$0xff] }
 0x5ab   : > { %v2680_v20 = vadd.f32 %v2679_v5, %v13659_v24  ;;  %v2681_v50 = vpop.f32.mrb[77].mxu0 }
 0x5ac   : > { %v2682_v2 = vadd.f32 %v2681_v50, %v13659_v24  ;;  %v2683_v54 = vpop.f32.mrb[78].mxu0  ;;  %3039 = vmatprep.subr.bf16.mxu1 %v2782_v8 }
 0x5ad   : > { %v2684_v38 = vadd.f32 %v2683_v54, %v13660_v52  ;;  %v2685_v7 = vpop.f32.mrb[79].mxu0  ;;  %3040 = vmatpush1.bf16.msra.mxu1 %v2781_v9  ;;  %v2757_v29 = vmax.f32 %v2680_v20, 0.0  ;;  %v13666_v20 = vld [vmem:[#allocation58_spill] sm:$0xff] }
 0x5ae   : > { %v2686_v46 = vadd.f32 %v2685_v7, %v13660_v52  ;;  %v2758_v25 = vmax.f32 %v2682_v2, 0.0 }
 0x5af   : > { %v2759_v56 = vmax.f32 %v2684_v38, 0.0 }
 0x5b0   : > { %v2760_v34 = vmax.f32 %v2686_v46, 0.0 }
 0x5b1   : > { %v2783_v60 = vpack.c.bf16 %v2759_v56, %v2757_v29 }
 0x5b2   : > { %v2784_v51 = vpack.c.bf16 %v2760_v34, %v2758_v25  ;;  %v2689_v42 = vpop.f32.mrb[80].mxu0  ;;  %v13667_v34 = vld [vmem:[#allocation59_spill] sm:$0xff] }
 0x5b3   : > { %v2690_v18 = vadd.f32 %v2689_v42, %v13661_v35  ;;  %v2691_v57 = vpop.f32.mrb[81].mxu0 }
 0x5b4   : > { %v2692_v1 = vadd.f32 %v2691_v57, %v13661_v35  ;;  %v2693_v14 = vpop.f32.mrb[82].mxu0  ;;  %3041 = vmatprep.subr.bf16.mxu1 %v2784_v51 }
 0x5b5   : > { %v2694_v55 = vadd.f32 %v2693_v14, %v13662_v58  ;;  %v2695_v44 = vpop.f32.mrb[83].mxu0  ;;  %3042 = vmatpush1.bf16.msra.mxu1 %v2783_v60  ;;  %v2761_v48 = vmax.f32 %v2690_v18, 0.0  ;;  %v13668_v18 = vld [vmem:[#allocation60_spill] sm:$0xff] }
 0x5b6   : > { %v2696_v33 = vadd.f32 %v2695_v44, %v13662_v58  ;;  %v2762_v22 = vmax.f32 %v2692_v1, 0.0 }
 0x5b7   : > { %v2763_v59 = vmax.f32 %v2694_v55, 0.0 }
 0x5b8   : > { %v2764_v10 = vmax.f32 %v2696_v33, 0.0 }
 0x5b9   : > { %v2785_v26 = vpack.c.bf16 %v2763_v59, %v2761_v48 }
 0x5ba   : > { %v2786_v32 = vpack.c.bf16 %v2764_v10, %v2762_v22  ;;  %v2699_v27 = vpop.f32.mrb[84].mxu0  ;;  %v9233_v22 = vld [vmem:[%s13288_s4 + $0xc0] sm:$0xff]   ;;  %v9234_v10 = vld [vmem:[%s13288_s4 + $0xc8] sm:$0xff]  }
 0x5bb   : > { %v2700_v53 = vadd.f32 %v2699_v27, %v13663_v63  ;;  %v2701_v36 = vpop.f32.mrb[85].mxu0  ;;  %v9237_v27 = vld [vmem:[%s13288_s4 + $0xe0] sm:$0xff]  }
 0x5bc   : > { %v2702_v23 = vadd.f32 %v2701_v36, %v13663_v63  ;;  %v2703_v17 = vpop.f32.mrb[86].mxu0  ;;  %3043 = vmatprep.subr.bf16.mxu1 %v2786_v32  ;;  %v9236_v32 = vld [vmem:[%s13288_s4 + $0xd8] sm:$0xff]   ;;  %v9238_v63 = vld [vmem:[%s13288_s4 + $0xe8] sm:$0xff]  }
 0x5bd   : > { %v2704_v28 = vadd.f32 %v2703_v17, %v13664_v37  ;;  %v2705_v11 = vpop.f32.mrb[87].mxu0  ;;  %3044 = vmatpush1.bf16.msra.mxu1 %v2785_v26  ;;  %v2765_v15 = vmax.f32 %v2700_v53, 0.0  ;;  %v9235_v26 = vld [vmem:[%s13288_s4 + $0xd0] sm:$0xff]   ;;  %v9240_v36 = vld [vmem:[%s13288_s4 + $0xf8] sm:$0xff]   ;;  %v13669_v17 = vmov 2  }
 0x5be   : > { %v2706_v30 = vadd.f32 %v2705_v11, %v13664_v37  ;;  %v2766_v6 = vmax.f32 %v2702_v23, 0.0  ;;  %v9239_v53 = vld [vmem:[%s13288_s4 + $0xf0] sm:$0xff]   ;;  %v8499_v37 = vld [vmem:[%s13291_s7 + $0x300] sm:$0xff]  ;;  %v8500_v11 = vld [vmem:[%s13291_s7 + $0x308] sm:$0xff] }
 0x5bf   : > { %v2767_v41 = vmax.f32 %v2704_v28, 0.0  ;;  %v4038_v23 = vld [vmem:[%s13287_s3 + $0x10] sm:$0xff] }
 0x5c0   : > { %v2768_v43 = vmax.f32 %v2706_v30, 0.0  ;;  %4051 = vperm.xlu1 %9180, %v4038_v23   ;;  %4088 = vperm.xlu0 %9181, %v4038_v23   ;;  %v8501_v28 = vld [vmem:[%s13291_s7 + $0x310] sm:$0xff]  ;;  %v8502_v30 = vld [vmem:[%s13291_s7 + $0x318] sm:$0xff] }
 0x5c1   : > { %v2787_v49 = vpack.c.bf16 %v2767_v41, %v2765_v15  ;;  %v8503_v15 = vld [vmem:[%s13291_s7 + $0x320] sm:$0xff]  ;;  %v8504_v41 = vld [vmem:[%s13291_s7 + $0x328] sm:$0xff] }
 0x5c2   : > { %v2788_v19 = vpack.c.bf16 %v2768_v43, %v2766_v6  ;;  %v2709_v3 = vpop.f32.mrb[88].mxu0  ;;  %v8505_v6 = vld [vmem:[%s13291_s7 + $0x330] sm:$0xff]  ;;  %v8506_v43 = vld [vmem:[%s13291_s7 + $0x338] sm:$0xff] }
 0x5c3   : > { %v2710_v9 = vadd.f32 %v2709_v3, %v13665_v0  ;;  %v2711_v8 = vpop.f32.mrb[89].mxu0  ;;  %v8509_v3 = vld [vmem:[%s13291_s7 + $0x350] sm:$0xff] }
 0x5c4   : > { %v2712_v5 = vadd.f32 %v2711_v8, %v13665_v0  ;;  %v2713_v24 = vpop.f32.mrb[90].mxu0  ;;  %3045 = vmatprep.subr.bf16.mxu1 %v2788_v19  ;;  %9182 = vset.pattern.permute.xlu1 %v13669_v17  ;;  %v8508_v19 = vld [vmem:[%s13291_s7 + $0x348] sm:$0xff]  ;;  %v8510_v0 = vld [vmem:[%s13291_s7 + $0x358] sm:$0xff]  ;;  %v8511_v8 = vld [vmem:[%s13291_s7 + $0x360] sm:$0xff] }
 0x5c5   : > { %v2714_v50 = vadd.f32 %v2713_v24, %v13666_v20  ;;  %v2715_v2 = vpop.f32.mrb[91].mxu0  ;;  %3046 = vmatpush1.bf16.msra.mxu1 %v2787_v49  ;;  %v2769_v52 = vmax.f32 %v2710_v9, 0.0  ;;  %9184 = vset.pattern.permute.xlu0 %v13531_v13  ;;  %v8507_v49 = vld [vmem:[%s13291_s7 + $0x340] sm:$0xff] }
 0x5c6   : > { %v2716_v54 = vadd.f32 %v2715_v2, %v13666_v20  ;;  %v2770_v7 = vmax.f32 %v2712_v5, 0.0  ;;  %4130 = vperm.xlu1 %9182, %v4038_v23   ;;  %3689 = vperm.xlu0 %9184, %v8500_v11   ;;  %v8512_v5 = vld [vmem:[%s13291_s7 + $0x368] sm:$0xff] }
 0x5c7   : > { %v2771_v38 = vmax.f32 %v2714_v50, 0.0  ;;  %v13670_v24 = vld [vmem:[#allocation61_spill] sm:$0xff] }
 0x5c8   : > { %v2772_v46 = vmax.f32 %v2716_v54, 0.0  ;;  %v13674_v11 = vld [vmem:[#allocation65_spill] sm:$0xff] }
 0x5c9   : > { %v2789_v29 = vpack.c.bf16 %v2771_v38, %v2769_v52  ;;  %v13671_v52 = vld [vmem:[#allocation62_spill] sm:$0xff] }
 0x5ca   : > { %v2790_v56 = vpack.c.bf16 %v2772_v46, %v2770_v7  ;;  %v2719_v25 = vpop.f32.mrb[92].mxu0  ;;  %9183 = vset.pattern.permute.xlu1 %v13531_v13  ;;  %3704 = vperm.xlu0 %9184, %v8503_v15  }
 0x5cb   : > { %v2720_v60 = vadd.f32 %v2719_v25, %v13667_v34  ;;  %v2721_v51 = vpop.f32.mrb[93].mxu0  ;;  %3684 = vperm.xlu1 %9183, %v8499_v37  }
 0x5cc   : > { %v2722_v42 = vadd.f32 %v2721_v51, %v13667_v34  ;;  %v2723_v35 = vpop.f32.mrb[94].mxu0  ;;  %3047 = vmatprep.subr.bf16.mxu1 %v2790_v56  ;;  %v8514_v56 = vld [vmem:[%s13291_s7 + $0x378] sm:$0xff] }
 0x5cd   : > { %v2724_v57 = vadd.f32 %v2723_v35, %v13668_v18  ;;  %v2725_v1 = vpop.f32.mrb[95].mxu0  ;;  %3048 = vmatpush1.bf16.msra.mxu1 %v2789_v29  ;;  %v2773_v58 = vmax.f32 %v2720_v60, 0.0  ;;  %v8513_v29 = vld [vmem:[%s13291_s7 + $0x370] sm:$0xff] }
 0x5ce   : > { %v2726_v14 = vadd.f32 %v2725_v1, %v13668_v18  ;;  %v2774_v44 = vmax.f32 %v2722_v42, 0.0  ;;  %3714 = vperm.xlu0 %9184, %v8505_v6   ;;  %v13672_v1 = vld [vmem:[#allocation63_spill] sm:$0xff] }
 0x5cf   : > { %v2775_v55 = vmax.f32 %v2724_v57, 0.0  ;;  %3694 = vperm.xlu1 %9183, %v8501_v28   ;;  %v3972_v57 = vld [vmem:[#allocation2] sm:$0x1]  ;;  %v4833_v28 = vld [vmem:[%s13290_s6 + $0x18] sm:$0xff] }
 0x5d0   : > { %v2776_v33 = vmax.f32 %v2726_v14, 0.0 }
 0x5d1   : > { %v2791_v48 = vpack.c.bf16 %v2775_v55, %v2773_v58  ;;  %v4830_v55 = vld [vmem:[%s13290_s6] sm:$0xff] }
 0x5d2   : > { %v2792_v59 = vpack.c.bf16 %v2776_v33, %v2774_v44  ;;  %3724 = vperm.xlu0 %9184, %v8507_v49   ;;  %v13675_v49 = vld [vmem:[#allocation66_spill] sm:$0xff] }
 0x5d3   : > { %3699 = vperm.xlu1 %9183, %v8502_v30  }
 0x5d4   : > { %3049 = vmatprep.subr.bf16.mxu1 %v2792_v59 }
 0x5d5   : > { %3050 = vmatpush1.bf16.msra.mxu1 %v2791_v48  ;;  %v13673_v48 = vld [vmem:[#allocation64_spill] sm:$0xff] }
 0x5d6   : > { %3734 = vperm.xlu0 %9184, %v8509_v3  }
 0x5d7   : > { %3709 = vperm.xlu1 %9183, %v8504_v41   ;;  %v8582_v41 = vld [vmem:[%s13291_s7 + $0x380] sm:$0xff] }
 0x5d8   : > { %3068 = vmatmul.mubr.bf16.vlgmr.msra.gmra.mrb[32].mxu1 %v9233_v22 }
 0x5d9   : > { %3077 = vmatprep.mubr.bf16.mxu1 %v13531_v13 }
 0x5da   : > { %3744 = vperm.xlu0 %9184, %v8511_v8  }
 0x5db   : > { %3719 = vperm.xlu1 %9183, %v8506_v43  }
 0x5de   : > { %3754 = vperm.xlu0 %9184, %v8513_v29  }
 0x5df   : > { %3729 = vperm.xlu1 %9183, %v8508_v19  }
 0x5e0   : > { %3078 = vmatmul.mubr.bf16.gmra.mrb[36].mxu1 %v9234_v10 }
 0x5e1   : > { %3087 = vmatprep.mubr.bf16.mxu1 %v13531_v13 }
 0x5e2   : > { %3975 = vperm.xlu0 %9184, %v3972_v57  }
 0x5e3   : > { %3739 = vperm.xlu1 %9183, %v8510_v0  }
 0x5e7   : > { %3749 = vperm.xlu1 %9183, %v8512_v5  }
 0x5e8   : > { %3088 = vmatmul.mubr.bf16.gmra.mrb[40].mxu1 %v9235_v26  ;;  %v4831_v26 = vld [vmem:[%s13290_s6 + $0x8] sm:$0xff] }
 0x5e9   : > { %3097 = vmatprep.mubr.bf16.mxu1 %v13531_v13  ;;  %4853 = vperm.xlu0 %9184, %v4831_v26  }
 0x5eb   : > { %3759 = vperm.xlu1 %9183, %v8514_v56   ;;  %v8584_v56 = vld [vmem:[%s13291_s7 + $0x390] sm:$0xff] }
 0x5ed   : > { %4863 = vperm.xlu0 %9184, %v4833_v28  }
 0x5ef   : > { %4848 = vperm.xlu1 %9183, %v4830_v55  }
 0x5f0   : > { %3098 = vmatmul.mubr.bf16.gmra.mrb[44].mxu1 %v9236_v32 }
 0x5f1   : > { %3107 = vmatprep.mubr.bf16.mxu1 %v13531_v13 }
 0x5f8   : > { %3108 = vmatmul.mubr.bf16.gmra.mrb[48].mxu1 %v9237_v27 }
 0x5f9   : > { %3117 = vmatprep.mubr.bf16.mxu1 %v13531_v13 }
 0x600   : > { %3118 = vmatmul.mubr.bf16.gmra.mrb[52].mxu1 %v9238_v63  ;;  %v4832_v63 = vld [vmem:[%s13290_s6 + $0x10] sm:$0xff] }
 0x601   : > { %3127 = vmatprep.mubr.bf16.mxu1 %v13531_v13  ;;  %4858 = vperm.xlu1 %9183, %v4832_v63  }
 0x605   : > { %5168 = vperm.xlu1 %9183, %v8582_v41  }
 0x608   : > { %3128 = vmatmul.mubr.bf16.gmra.mrb[56].mxu1 %v9239_v53 }
 0x609   : > { %3137 = vmatprep.mubr.bf16.mxu1 %v13531_v13 }
 0x610   : > { %3138 = vmatmul.mubr.bf16.gmra.mrb[60].mxu1 %v9240_v36 }
 0x611   : > { %4014 = vmatprep.mubr.bf16.mxu1 %v13531_v13 }
 0x6ab   : > { %v3069_v9 = vpop.f32.mrb[32].mxu1 }
 0x6ac   : > { %v3245_v20 = vadd.f32 %v13670_v24, %v3069_v9  ;;  %v3071_v50 = vpop.f32.mrb[33].mxu1  ;;  %v8583_v9 = vld [vmem:[%s13291_s7 + $0x388] sm:$0xff] }
 0x6ad   : > { %v3246_v2 = vadd.f32 %v13670_v24, %v3071_v50  ;;  %v3073_v54 = vpop.f32.mrb[34].mxu1  ;;  %v4834_v24 = vld [vmem:[%s13290_s6 + $0x20] sm:$0xff]  ;;  %5173 = vperm.xlu0 %9184, %v8583_v9  }
 0x6ae   : > { %v3247_v38 = vadd.f32 %v13671_v52, %v3073_v54  ;;  %v3075_v7 = vpop.f32.mrb[35].mxu1  ;;  %v3294_v25 = vmax.f32 %v3245_v20, 0.0  ;;  %4868 = vperm.xlu1 %9183, %v4834_v24  }
 0x6af   : > { %v3248_v46 = vadd.f32 %v13671_v52, %v3075_v7  ;;  %v3295_v60 = vmax.f32 %v3246_v2, 0.0  ;;  %v13676_v7 = vld [vmem:[#allocation67_spill] sm:$0xff] }
 0x6b0   : > { %v3296_v34 = vmax.f32 %v3247_v38, 0.0  ;;  %v4835_v38 = vld [vmem:[%s13290_s6 + $0x28] sm:$0xff] }
 0x6b1   : > { %v3297_v51 = vmax.f32 %v3248_v46, 0.0  ;;  %4873 = vperm.xlu0 %9184, %v4835_v38  }
 0x6b2   : > { %v3326_v42 = vpack.c.bf16 %v3296_v34, %v3294_v25  ;;  %5178 = vperm.xlu1 %9183, %v8584_v56  }
 0x6b3   : > { %v3327_v35 = vpack.c.bf16 %v3297_v51, %v3295_v60  ;;  %v3079_v18 = vpop.f32.mrb[36].mxu1  ;;  %v13677_v60 = vld [vmem:[#allocation68_spill] sm:$0xff] }
 0x6b4   : > { %v3249_v14 = vadd.f32 %v13672_v1, %v3079_v18  ;;  %v3081_v58 = vpop.f32.mrb[37].mxu1  ;;  %v8585_v18 = vld [vmem:[%s13291_s7 + $0x398] sm:$0xff] }
 0x6b5   : > { %v3250_v44 = vadd.f32 %v13672_v1, %v3081_v58  ;;  %v3083_v33 = vpop.f32.mrb[38].mxu1  ;;  %3487 = vmatprep.subr.bf16.mxu0 %v3327_v35  ;;  %5183 = vperm.xlu0 %9184, %v8585_v18  }
 0x6b6   : > { %v3251_v59 = vadd.f32 %v13673_v48, %v3083_v33  ;;  %v3085_v22 = vpop.f32.mrb[39].mxu1  ;;  %3488 = vmatpush1.bf16.msra.mxu0 %v3326_v42  ;;  %v3298_v32 = vmax.f32 %v3249_v14, 0.0  ;;  %v4836_v14 = vld [vmem:[%s13290_s6 + $0x30] sm:$0xff] }
 0x6b7   : > { %v3252_v10 = vadd.f32 %v13673_v48, %v3085_v22  ;;  %v3299_v53 = vmax.f32 %v3250_v44, 0.0  ;;  %4878 = vperm.xlu1 %9183, %v4836_v14   ;;  %v13678_v22 = vld [vmem:[#allocation69_spill] sm:$0xff] }
 0x6b8   : > { %v3300_v27 = vmax.f32 %v3251_v59, 0.0  ;;  %v4837_v59 = vld [vmem:[%s13290_s6 + $0x38] sm:$0xff] }
 0x6b9   : > { %v3301_v36 = vmax.f32 %v3252_v10, 0.0  ;;  %4883 = vperm.xlu0 %9184, %v4837_v59  }
 0x6ba   : > { %v3328_v23 = vpack.c.bf16 %v3300_v27, %v3298_v32  ;;  %v8586_v32 = vld [vmem:[%s13291_s7 + $0x3a0] sm:$0xff] }
 0x6bb   : > { %v3329_v17 = vpack.c.bf16 %v3301_v36, %v3299_v53  ;;  %v3089_v37 = vpop.f32.mrb[40].mxu1  ;;  %v13679_v53 = vld [vmem:[#allocation70_spill] sm:$0xff]  ;;  %5188 = vperm.xlu1 %9183, %v8586_v32  }
 0x6bc   : > { %v3253_v30 = vadd.f32 %v13674_v11, %v3089_v37  ;;  %v3091_v15 = vpop.f32.mrb[41].mxu1  ;;  %v8587_v37 = vld [vmem:[%s13291_s7 + $0x3a8] sm:$0xff] }
 0x6bd   : > { %v3254_v6 = vadd.f32 %v13674_v11, %v3091_v15  ;;  %v3093_v43 = vpop.f32.mrb[42].mxu1  ;;  %3489 = vmatprep.subr.bf16.mxu0 %v3329_v17  ;;  %5193 = vperm.xlu0 %9184, %v8587_v37  }
 0x6be   : > { %v3255_v19 = vadd.f32 %v13675_v49, %v3093_v43  ;;  %v3095_v3 = vpop.f32.mrb[43].mxu1  ;;  %3490 = vmatpush1.bf16.msra.mxu0 %v3328_v23  ;;  %v3302_v8 = vmax.f32 %v3253_v30, 0.0  ;;  %v4838_v30 = vld [vmem:[%s13290_s6 + $0x40] sm:$0xff] }
 0x6bf   : > { %v3256_v0 = vadd.f32 %v13675_v49, %v3095_v3  ;;  %v3303_v20 = vmax.f32 %v3254_v6, 0.0  ;;  %4888 = vperm.xlu1 %9183, %v4838_v30   ;;  %v13680_v3 = vld [vmem:[#allocation71_spill] sm:$0xff] }
 0x6c0   : > { %v3304_v5 = vmax.f32 %v3255_v19, 0.0  ;;  %v4839_v19 = vld [vmem:[%s13290_s6 + $0x48] sm:$0xff] }
 0x6c1   : > { %v3305_v50 = vmax.f32 %v3256_v0, 0.0  ;;  %4893 = vperm.xlu0 %9184, %v4839_v19  }
 0x6c2   : > { %v3330_v2 = vpack.c.bf16 %v3304_v5, %v3302_v8  ;;  %v8588_v8 = vld [vmem:[%s13291_s7 + $0x3b0] sm:$0xff] }
 0x6c3   : > { %v3331_v54 = vpack.c.bf16 %v3305_v50, %v3303_v20  ;;  %v3099_v52 = vpop.f32.mrb[44].mxu1  ;;  %v13681_v20 = vld [vmem:[#allocation72_spill] sm:$0xff]  ;;  %5198 = vperm.xlu1 %9183, %v8588_v8  }
 0x6c4   : > { %v3257_v46 = vadd.f32 %v13676_v7, %v3099_v52  ;;  %v3101_v29 = vpop.f32.mrb[45].mxu1  ;;  %v8589_v52 = vld [vmem:[%s13291_s7 + $0x3b8] sm:$0xff] }
 0x6c5   : > { %v3258_v25 = vadd.f32 %v13676_v7, %v3101_v29  ;;  %v3103_v34 = vpop.f32.mrb[46].mxu1  ;;  %3491 = vmatprep.subr.bf16.mxu0 %v3331_v54  ;;  %5203 = vperm.xlu0 %9184, %v8589_v52   ;;  %v8596_v52 = vld [vmem:[%s13291_s7 + $0x3f0] sm:$0xff] }
 0x6c6   : > { %v3259_v51 = vadd.f32 %v13677_v60, %v3103_v34  ;;  %v3105_v42 = vpop.f32.mrb[47].mxu1  ;;  %3492 = vmatpush1.bf16.msra.mxu0 %v3330_v2  ;;  %v3306_v57 = vmax.f32 %v3257_v46, 0.0  ;;  %v4840_v46 = vld [vmem:[%s13290_s6 + $0x50] sm:$0xff] }
 0x6c7   : > { %v3260_v35 = vadd.f32 %v13677_v60, %v3105_v42  ;;  %v3307_v58 = vmax.f32 %v3258_v25, 0.0  ;;  %4898 = vperm.xlu1 %9183, %v4840_v46   ;;  %v13682_v42 = vld [vmem:[#allocation73_spill] sm:$0xff] }
 0x6c8   : > { %v3308_v1 = vmax.f32 %v3259_v51, 0.0  ;;  %v4841_v51 = vld [vmem:[%s13290_s6 + $0x58] sm:$0xff]  ;;  %v9242_v46 = vld [vmem:[%s13288_s4 + $0x108] sm:$0xff]  }
 0x6c9   : > { %v3309_v55 = vmax.f32 %v3260_v35, 0.0  ;;  %4903 = vperm.xlu0 %9184, %v4841_v51   ;;  %v8672_v51 = vld [vmem:[%s13291_s7 + $0x408] sm:$0xff] }
 0x6ca   : > { %v3332_v44 = vpack.c.bf16 %v3308_v1, %v3306_v57  ;;  %v8590_v57 = vld [vmem:[%s13291_s7 + $0x3c0] sm:$0xff] }
 0x6cb   : > { %v3333_v33 = vpack.c.bf16 %v3309_v55, %v3307_v58  ;;  %v3109_v48 = vpop.f32.mrb[48].mxu1  ;;  %v13683_v58 = vld [vmem:[#allocation74_spill] sm:$0xff]  ;;  %5208 = vperm.xlu1 %9183, %v8590_v57   ;;  %v9244_v57 = vld [vmem:[%s13288_s4 + $0x118] sm:$0xff]  }
 0x6cc   : > { %v3261_v10 = vadd.f32 %v13678_v22, %v3109_v48  ;;  %v3111_v26 = vpop.f32.mrb[49].mxu1  ;;  %v8591_v48 = vld [vmem:[%s13291_s7 + $0x3c8] sm:$0xff] }
 0x6cd   : > { %v3262_v27 = vadd.f32 %v13678_v22, %v3111_v26  ;;  %v3113_v63 = vpop.f32.mrb[50].mxu1  ;;  %3493 = vmatprep.subr.bf16.mxu0 %v3333_v33  ;;  %5213 = vperm.xlu0 %9184, %v8591_v48   ;;  %v9245_v48 = vld [vmem:[%s13288_s4 + $0x120] sm:$0xff]  }
 0x6ce   : > { %v3263_v36 = vadd.f32 %v13679_v53, %v3113_v63  ;;  %v3115_v23 = vpop.f32.mrb[51].mxu1  ;;  %3494 = vmatpush1.bf16.msra.mxu0 %v3332_v44  ;;  %v3310_v28 = vmax.f32 %v3261_v10, 0.0  ;;  %v4842_v10 = vld [vmem:[%s13290_s6 + $0x60] sm:$0xff] }
 0x6cf   : > { %v3264_v17 = vadd.f32 %v13679_v53, %v3115_v23  ;;  %v3311_v15 = vmax.f32 %v3262_v27, 0.0  ;;  %4908 = vperm.xlu1 %9183, %v4842_v10   ;;  %v13684_v23 = vld [vmem:[#allocation75_spill] sm:$0xff] }
 0x6d0   : > { %v3312_v11 = vmax.f32 %v3263_v36, 0.0  ;;  %v4843_v36 = vld [vmem:[%s13290_s6 + $0x68] sm:$0xff] }
 0x6d1   : > { %v3313_v41 = vmax.f32 %v3264_v17, 0.0  ;;  %4913 = vperm.xlu0 %9184, %v4843_v36   ;;  %v8678_v36 = vld [vmem:[%s13291_s7 + $0x438] sm:$0xff] }
 0x6d2   : > { %v3334_v6 = vpack.c.bf16 %v3312_v11, %v3310_v28  ;;  %v8592_v28 = vld [vmem:[%s13291_s7 + $0x3d0] sm:$0xff] }
 0x6d3   : > { %v3335_v43 = vpack.c.bf16 %v3313_v41, %v3311_v15  ;;  %v3119_v49 = vpop.f32.mrb[52].mxu1  ;;  %v13685_v15 = vld [vmem:[#allocation76_spill] sm:$0xff]  ;;  %5218 = vperm.xlu1 %9183, %v8592_v28  }
 0x6d4   : > { %v3265_v0 = vadd.f32 %v13680_v3, %v3119_v49  ;;  %v3121_v9 = vpop.f32.mrb[53].mxu1  ;;  %v8593_v49 = vld [vmem:[%s13291_s7 + $0x3d8] sm:$0xff] }
 0x6d5   : > { %v3266_v5 = vadd.f32 %v13680_v3, %v3121_v9  ;;  %v3123_v24 = vpop.f32.mrb[54].mxu1  ;;  %3495 = vmatprep.subr.bf16.mxu0 %v3335_v43  ;;  %5223 = vperm.xlu0 %9184, %v8593_v49   ;;  %v8666_v28 = vld [vmem:[%s13290_s6 + $0xd8] sm:$0xff] }
 0x6d6   : > { %v3267_v50 = vadd.f32 %v13681_v20, %v3123_v24  ;;  %v3125_v2 = vpop.f32.mrb[55].mxu1  ;;  %3496 = vmatpush1.bf16.msra.mxu0 %v3334_v6  ;;  %v3314_v38 = vmax.f32 %v3265_v0, 0.0  ;;  %v4844_v0 = vld [vmem:[%s13290_s6 + $0x70] sm:$0xff] }
 0x6d7   : > { %v3268_v54 = vadd.f32 %v13681_v20, %v3125_v2  ;;  %v3315_v29 = vmax.f32 %v3266_v5, 0.0  ;;  %4918 = vperm.xlu1 %9183, %v4844_v0   ;;  %v4845_v20 = vld [vmem:[%s13290_s6 + $0x78] sm:$0xff]  ;;  %v9241_v2 = vld [vmem:[%s13288_s4 + $0x100] sm:$0xff]   ;;  %v8681_v0 = vld [vmem:[%s13291_s7 + $0x450] sm:$0xff] }
 0x6d8   : > { %v3316_v7 = vmax.f32 %v3267_v50, 0.0  ;;  %v8594_v50 = vld [vmem:[%s13291_s7 + $0x3e0] sm:$0xff] }
 0x6d9   : > { %v3317_v56 = vmax.f32 %v3268_v54, 0.0  ;;  %4923 = vperm.xlu0 %9184, %v4845_v20   ;;  %v8595_v54 = vld [vmem:[%s13291_s7 + $0x3e8] sm:$0xff] }
 0x6da   : > { %v3336_v25 = vpack.c.bf16 %v3316_v7, %v3314_v38  ;;  %v8597_v38 = vld [vmem:[%s13291_s7 + $0x3f8] sm:$0xff]  ;;  %v8655_v7 = vld [vmem:[%s13290_s6 + $0x80] sm:$0xff] }
 0x6db   : > { %v3337_v34 = vpack.c.bf16 %v3317_v56, %v3315_v29  ;;  %v3129_v60 = vpop.f32.mrb[56].mxu1  ;;  %5228 = vperm.xlu1 %9183, %v8594_v50   ;;  %v8656_v29 = vld [vmem:[%s13290_s6 + $0x88] sm:$0xff]  ;;  %v8657_v56 = vld [vmem:[%s13290_s6 + $0x90] sm:$0xff]  ;;  %v8670_v50 = vld [vmem:[%s13290_s6 + $0xf8] sm:$0xff] }
 0x6dc   : > { %v3269_v35 = vadd.f32 %v13682_v42, %v3129_v60  ;;  %v3131_v18 = vpop.f32.mrb[57].mxu1  ;;  %v9243_v60 = vld [vmem:[%s13288_s4 + $0x110] sm:$0xff]  }
 0x6dd   : > { %v3270_v1 = vadd.f32 %v13682_v42, %v3131_v18  ;;  %v3133_v14 = vpop.f32.mrb[58].mxu1  ;;  %3497 = vmatprep.subr.bf16.mxu0 %v3337_v34  ;;  %5233 = vperm.xlu0 %9184, %v8595_v54   ;;  %v8671_v34 = vld [vmem:[%s13291_s7 + $0x400] sm:$0xff]  ;;  %v8673_v18 = vld [vmem:[%s13291_s7 + $0x410] sm:$0xff] }
 0x6de   : > { %v3271_v55 = vadd.f32 %v13683_v58, %v3133_v14  ;;  %v3135_v44 = vpop.f32.mrb[59].mxu1  ;;  %3498 = vmatpush1.bf16.msra.mxu0 %v3336_v25  ;;  %v3318_v59 = vmax.f32 %v3269_v35, 0.0  ;;  %v8658_v25 = vld [vmem:[%s13290_s6 + $0x98] sm:$0xff]  ;;  %v8659_v42 = vld [vmem:[%s13290_s6 + $0xa0] sm:$0xff]  ;;  %v8660_v35 = vld [vmem:[%s13290_s6 + $0xa8] sm:$0xff] }
 0x6df   : > { %v3272_v33 = vadd.f32 %v13683_v58, %v3135_v44  ;;  %v3319_v26 = vmax.f32 %v3270_v1, 0.0  ;;  %5238 = vperm.xlu1 %9183, %v8596_v52   ;;  %v11804_v1 = vpop.permute.xlu1 %4051  ;;  %v8674_v14 = vld [vmem:[%s13291_s7 + $0x418] sm:$0xff]  ;;  %v8661_v58 = vld [vmem:[%s13290_s6 + $0xb0] sm:$0xff]  ;;  %v8684_v52 = vld [vmem:[%s13291_s7 + $0x468] sm:$0xff] }
 0x6e0   : > { %v3320_v22 = vmax.f32 %v3271_v55, 0.0  ;;  %v8662_v44 = vld [vmem:[%s13290_s6 + $0xb8] sm:$0xff] }
 0x6e1   : > { %v3321_v32 = vmax.f32 %v3272_v33, 0.0  ;;  %5243 = vperm.xlu0 %9184, %v8597_v38   ;;  %v8675_v33 = vld [vmem:[%s13291_s7 + $0x420] sm:$0xff] }
 0x6e2   : > { %v3338_v27 = vpack.c.bf16 %v3320_v22, %v3318_v59  ;;  %v8676_v59 = vld [vmem:[%s13291_s7 + $0x428] sm:$0xff]  ;;  %v8663_v22 = vld [vmem:[%s13290_s6 + $0xc0] sm:$0xff] }
 0x6e3   : > { %v3339_v63 = vpack.c.bf16 %v3321_v32, %v3319_v26  ;;  %v3139_v53 = vpop.f32.mrb[60].mxu1  ;;  %5723 = vperm.xlu1 %9183, %v8655_v7   ;;  %v11813_v55 = vpop.permute.xlu1 %4130  ;;  %v8664_v32 = vld [vmem:[%s13290_s6 + $0xc8] sm:$0xff]  ;;  %v8685_v7 = vld [vmem:[%s13291_s7 + $0x470] sm:$0xff] }
 0x6e4   : > { %v3273_v17 = vadd.f32 %v13684_v23, %v3139_v53  ;;  %v3141_v37 = vpop.f32.mrb[61].mxu1  ;;  %v11833_v26 = vpop.permute.xlu0 %4088 }
 0x6e5   : > { %v3274_v11 = vadd.f32 %v13684_v23, %v3141_v37  ;;  %v3143_v30 = vpop.f32.mrb[62].mxu1  ;;  %3499 = vmatprep.subr.bf16.mxu0 %v3339_v63  ;;  %5728 = vperm.xlu0 %9184, %v8656_v29   ;;  %v9246_v63 = vld [vmem:[%s13288_s4 + $0x128] sm:$0xff]   ;;  %v8665_v23 = vld [vmem:[%s13290_s6 + $0xd0] sm:$0xff]  ;;  %v8703_v29 = vld [vmem:[%s13291_s7 + $0x480] sm:$0xff] }
 0x6e6   : > { %v3275_v41 = vadd.f32 %v13685_v15, %v3143_v30  ;;  %v3145_v6 = vpop.f32.mrb[63].mxu1  ;;  %3500 = vmatpush1.bf16.msra.mxu0 %v3338_v27  ;;  %v3322_v19 = vmax.f32 %v3273_v17, 0.0  ;;  %v8677_v27 = vld [vmem:[%s13291_s7 + $0x430] sm:$0xff] }
 0x6e7   : > { %v3276_v43 = vadd.f32 %v13685_v15, %v3145_v6  ;;  %v3323_v9 = vmax.f32 %v3274_v11, 0.0  ;;  %5733 = vperm.xlu1 %9183, %v8657_v56   ;;  %v11830_v10 = vpop.permute.xlu1 %3684  ;;  %v8679_v11 = vld [vmem:[%s13291_s7 + $0x440] sm:$0xff]  ;;  %v9247_v30 = vld [vmem:[%s13288_s4 + $0x130] sm:$0xff]   ;;  %v8680_v6 = vld [vmem:[%s13291_s7 + $0x448] sm:$0xff] }
 0x6e8   : > { %v3324_v3 = vmax.f32 %v3275_v41, 0.0  ;;  %v11852_v17 = vpop.permute.xlu0 %3689 }
 0x6e9   : > { %v3325_v8 = vmax.f32 %v3276_v43, 0.0  ;;  %5738 = vperm.xlu0 %9184, %v8658_v25   ;;  %v8667_v43 = vld [vmem:[%s13290_s6 + $0xe0] sm:$0xff] }
 0x6ea   : > { %v3340_v5 = vpack.c.bf16 %v3324_v3, %v3322_v19  ;;  %v8668_v19 = vld [vmem:[%s13290_s6 + $0xe8] sm:$0xff] }
 0x6eb   : > { %v3341_v24 = vpack.c.bf16 %v3325_v8, %v3323_v9  ;;  %5884 = vperm.xlu1 %9183, %v8671_v34   ;;  %v11844_v53 = vpop.permute.xlu1 %3694  ;;  %v9248_v9 = vld [vmem:[%s13288_s4 + $0x138] sm:$0xff]   ;;  %v8704_v34 = vld [vmem:[%s13291_s7 + $0x488] sm:$0xff] }
 0x6ec   : > { %v11866_v15 = vpop.permute.xlu0 %3704  ;;  %v8682_v8 = vld [vmem:[%s13291_s7 + $0x458] sm:$0xff] }
 0x6ed   : > { %3501 = vmatprep.subr.bf16.mxu0 %v3341_v24  ;;  %5889 = vperm.xlu0 %9184, %v8672_v51  }
 0x6ee   : > { %3502 = vmatpush1.bf16.msra.mxu0 %v3340_v5  ;;  %v8669_v5 = vld [vmem:[%s13290_s6 + $0xf0] sm:$0xff] }
 0x6ef   : > { %5743 = vperm.xlu1 %9183, %v8659_v42   ;;  %v11854_v37 = vpop.permute.xlu1 %3699  ;;  %v8706_v42 = vld [vmem:[%s13291_s7 + $0x498] sm:$0xff] }
 0x6f0   : > { %v11877_v49 = vpop.permute.xlu0 %3714 }
 0x6f1   : > { %3520 = vmatmul.mubr.bf16.vlgmr.msra.gmra.mrb[96].mxu0 %v9241_v2  ;;  %5748 = vperm.xlu0 %9184, %v8660_v35   ;;  %v8683_v2 = vld [vmem:[%s13291_s7 + $0x460] sm:$0xff] }
 0x6f2   : > { %3529 = vmatprep.mubr.bf16.mxu0 %v13531_v13 }
 0x6f3   : > { %5894 = vperm.xlu1 %9183, %v8673_v18   ;;  %v11868_v41 = vpop.permute.xlu1 %3709  ;;  %v8707_v18 = vld [vmem:[%s13291_s7 + $0x4a0] sm:$0xff] }
 0x6f4   : > { %v11896_v24 = vpop.permute.xlu0 %3724 }
 0x6f5   : > { %5899 = vperm.xlu0 %9184, %v8674_v14   ;;  %v8709_v14 = vld [vmem:[%s13291_s7 + $0x4b0] sm:$0xff] }
 0x6f7   : > { %5753 = vperm.xlu1 %9183, %v8661_v58   ;;  %v11882_v3 = vpop.permute.xlu1 %3719 }
 0x6f8   : > { %v11907_v54 = vpop.permute.xlu0 %3734 }
 0x6f9   : > { %3530 = vmatmul.mubr.bf16.gmra.mrb[100].mxu0 %v9242_v46  ;;  %5758 = vperm.xlu0 %9184, %v8662_v44   ;;  %v8686_v46 = vld [vmem:[%s13291_s7 + $0x478] sm:$0xff] }
 0x6fa   : > { %3539 = vmatprep.mubr.bf16.mxu0 %v13531_v13 }
 0x6fb   : > { %5904 = vperm.xlu1 %9183, %v8675_v33   ;;  %v11898_v20 = vpop.permute.xlu1 %3729 }
 0x6fc   : > { %v11923_v56 = vpop.permute.xlu0 %3744 }
 0x6fd   : > { %5909 = vperm.xlu0 %9184, %v8676_v59   ;;  %v8710_v59 = vld [vmem:[%s13291_s7 + $0x4b8] sm:$0xff] }
 0x6ff   : > { %5763 = vperm.xlu1 %9183, %v8663_v22   ;;  %v11912_v38 = vpop.permute.xlu1 %3739  ;;  %v8711_v22 = vld [vmem:[%s13291_s7 + $0x4c0] sm:$0xff] }
 0x700   : > { %v11933_v51 = vpop.permute.xlu0 %3754 }
 0x701   : > { %3540 = vmatmul.mubr.bf16.gmra.mrb[104].mxu0 %v9243_v60  ;;  %5768 = vperm.xlu0 %9184, %v8664_v32   ;;  %v8705_v60 = vld [vmem:[%s13291_s7 + $0x490] sm:$0xff] }
 0x702   : > { %3549 = vmatprep.mubr.bf16.mxu0 %v13531_v13 }
 0x703   : > { %5914 = vperm.xlu1 %9183, %v8677_v27   ;;  %v11925_v25 = vpop.permute.xlu1 %3749  ;;  %v8712_v27 = vld [vmem:[%s13291_s7 + $0x4c8] sm:$0xff] }
 0x704   : > { %v11949_v58 = vpop.permute.xlu0 %3975 }
 0x705   : > { %5919 = vperm.xlu0 %9184, %v8678_v36  }
 0x707   : > { %5773 = vperm.xlu1 %9183, %v8665_v23   ;;  %v11938_v35 = vpop.permute.xlu1 %3759 }
 0x708   : > { %v11953_v33 = vpop.permute.xlu0 %4853 }
 0x709   : > { %3550 = vmatmul.mubr.bf16.gmra.mrb[108].mxu0 %v9244_v57  ;;  %5778 = vperm.xlu0 %9184, %v8666_v28   ;;  %v8708_v57 = vld [vmem:[%s13291_s7 + $0x4a8] sm:$0xff]  ;;  %v8714_v28 = vld [vmem:[%s13291_s7 + $0x4d8] sm:$0xff] }
 0x70a   : > { %3559 = vmatprep.mubr.bf16.mxu0 %v13531_v13 }
 0x70b   : > { %5924 = vperm.xlu1 %9183, %v8679_v11   ;;  %v11951_v44 = vpop.permute.xlu1 %4848  ;;  %v8715_v11 = vld [vmem:[%s13291_s7 + $0x4e0] sm:$0xff] }
 0x70c   : > { %v11963_v32 = vpop.permute.xlu0 %4863 }
 0x70d   : > { %5929 = vperm.xlu0 %9184, %v8680_v6   ;;  %v8716_v6 = vld [vmem:[%s13291_s7 + $0x4e8] sm:$0xff] }
 0x70f   : > { %5783 = vperm.xlu1 %9183, %v8667_v43   ;;  %v8717_v43 = vld [vmem:[%s13291_s7 + $0x4f0] sm:$0xff] }
 0x711   : > { %3560 = vmatmul.mubr.bf16.gmra.mrb[112].mxu0 %v9245_v48  ;;  %5788 = vperm.xlu0 %9184, %v8668_v19   ;;  %v11955_v48 = vpop.permute.xlu1 %4858 }
 0x712   : > { %3569 = vmatprep.mubr.bf16.mxu0 %v13531_v13 }
 0x713   : > { %5934 = vperm.xlu1 %9183, %v8681_v0  }
 0x715   : > { %5939 = vperm.xlu0 %9184, %v8682_v8   ;;  %v11971_v36 = vpop.permute.xlu1 %5168  ;;  %v8743_v8 = vld [vmem:[%s13291_s7 + $0x500] sm:$0xff] }
 0x717   : > { %5793 = vperm.xlu1 %9183, %v8669_v5   ;;  %v8744_v5 = vld [vmem:[%s13291_s7 + $0x508] sm:$0xff] }
 0x719   : > { %3570 = vmatmul.mubr.bf16.gmra.mrb[116].mxu0 %v9246_v63  ;;  %5798 = vperm.xlu0 %9184, %v8670_v50   ;;  %v8713_v63 = vld [vmem:[%s13291_s7 + $0x4d0] sm:$0xff] }
 0x71a   : > { %3579 = vmatprep.mubr.bf16.mxu0 %v13531_v13  ;;  %v8745_v50 = vld [vmem:[%s13291_s7 + $0x510] sm:$0xff] }
 0x71b   : > { %5944 = vperm.xlu1 %9183, %v8683_v2  }
 0x71d   : > { %5949 = vperm.xlu0 %9184, %v8684_v52  }
 0x71f   : > { %5954 = vperm.xlu1 %9183, %v8685_v7   ;;  %v8746_v7 = vld [vmem:[%s13291_s7 + $0x518] sm:$0xff] }
 0x721   : > { %3580 = vmatmul.mubr.bf16.gmra.mrb[120].mxu0 %v9247_v30  ;;  %5959 = vperm.xlu0 %9184, %v8686_v46   ;;  %v8747_v46 = vld [vmem:[%s13291_s7 + $0x520] sm:$0xff] }
 0x722   : > { %3589 = vmatprep.mubr.bf16.mxu0 %v13531_v13 }
 0x723   : > { %6078 = vperm.xlu1 %9183, %v8703_v29  }
 0x725   : > { %6083 = vperm.xlu0 %9184, %v8704_v34   ;;  %v8748_v34 = vld [vmem:[%s13291_s7 + $0x528] sm:$0xff] }
 0x727   : > { %6088 = vperm.xlu1 %9183, %v8705_v60   ;;  %v8749_v60 = vld [vmem:[%s13291_s7 + $0x530] sm:$0xff] }
 0x729   : > { %3590 = vmatmul.mubr.bf16.gmra.mrb[124].mxu0 %v9248_v9  ;;  %6093 = vperm.xlu0 %9184, %v8706_v42   ;;  %v8718_v9 = vld [vmem:[%s13291_s7 + $0x4f8] sm:$0xff] }
 0x72a   : > { %3842 = vmatprep.mubr.bf16.mxu0 %v13531_v13 }
 0x72b   : > { %6098 = vperm.xlu1 %9183, %v8707_v18  }
 0x72c   : > { %v11973_v23 = vpop.permute.xlu0 %5173 }
 0x72d   : > { %6103 = vperm.xlu0 %9184, %v8708_v57   ;;  %v11981_v30 = vpop.permute.xlu1 %4868  ;;  %v8750_v57 = vld [vmem:[%s13291_s7 + $0x538] sm:$0xff] }
 0x72e   : > { %13686 = vst [vmem:[#allocation8_spill] sm:$0xff] %v11981_v30 }
 0x72f   : > { %6108 = vperm.xlu1 %9183, %v8709_v14   ;;  %v8751_v14 = vld [vmem:[%s13291_s7 + $0x540] sm:$0xff] }
 0x730   : > { %v11989_v19 = vpop.permute.xlu0 %4873 }
 0x731   : > { %6113 = vperm.xlu0 %9184, %v8710_v59   ;;  %13687 = vst [vmem:[#allocation9_spill] sm:$0xff] %v11989_v19  ;;  %v11991_v0 = vpop.permute.xlu1 %5178 }
 0x733   : > { %6118 = vperm.xlu1 %9183, %v8711_v22   ;;  %v8752_v22 = vld [vmem:[%s13291_s7 + $0x548] sm:$0xff] }
 0x734   : > { %v12005_v2 = vpop.permute.xlu0 %5183 }
 0x735   : > { %6123 = vperm.xlu0 %9184, %v8712_v27   ;;  %v8753_v27 = vld [vmem:[%s13291_s7 + $0x550] sm:$0xff] }
 0x736   : > { %v12007_v52 = vpop.permute.xlu1 %4878 }
 0x737   : > { %6128 = vperm.xlu1 %9183, %v8713_v63   ;;  %13688 = vst [vmem:[#allocation10_spill] sm:$0xff] %v12007_v52 }
 0x738   : > { %v12015_v29 = vpop.permute.xlu0 %4883 }
 0x739   : > { %6133 = vperm.xlu0 %9184, %v8714_v28   ;;  %13689 = vst [vmem:[#allocation11_spill] sm:$0xff] %v12015_v29 }
 0x73a   : > { %v12023_v42 = vpop.permute.xlu1 %5188 }
 0x73b   : > { %6138 = vperm.xlu1 %9183, %v8715_v11   ;;  %13690 = vst [vmem:[#allocation12_spill] sm:$0xff] %v12023_v42  ;;  %v8754_v11 = vld [vmem:[%s13291_s7 + $0x558] sm:$0xff] }
 0x73c   : > { %v12025_v18 = vpop.permute.xlu0 %5193 }
 0x73d   : > { %6143 = vperm.xlu0 %9184, %v8716_v6   ;;  %13691 = vst [vmem:[#allocation13_spill] sm:$0xff] %v12025_v18  ;;  %v8755_v6 = vld [vmem:[%s13291_s7 + $0x560] sm:$0xff]  ;;  %v13749_v18 = vld [vmem:[#allocation87_spill] sm:$0xff] }
 0x73e   : > { %v12033_v59 = vpop.permute.xlu1 %4888 }
 0x73f   : > { %6148 = vperm.xlu1 %9183, %v8717_v43   ;;  %13692 = vst [vmem:[#allocation14_spill] sm:$0xff] %v12033_v59  ;;  %v8756_v43 = vld [vmem:[%s13291_s7 + $0x568] sm:$0xff] }
 0x740   : > { %v12041_v63 = vpop.permute.xlu0 %4893 }
 0x741   : > { %6153 = vperm.xlu0 %9184, %v8718_v9   ;;  %13693 = vst [vmem:[#allocation15_spill] sm:$0xff] %v12041_v63  ;;  %v8757_v9 = vld [vmem:[%s13291_s7 + $0x570] sm:$0xff] }
 0x742   : > { %v12043_v28 = vpop.permute.xlu1 %5198 }
 0x743   : > { %6401 = vperm.xlu1 %9183, %v8743_v8   ;;  %13694 = vst [vmem:[#allocation16_spill] sm:$0xff] %v12043_v28 }
 0x744   : > { %v12057_v8 = vpop.permute.xlu0 %5203 }
 0x745   : > { %6406 = vperm.xlu0 %9184, %v8744_v5   ;;  %13695 = vst [vmem:[#allocation17_spill] sm:$0xff] %v12057_v8 }
 0x746   : > { %v12059_v5 = vpop.permute.xlu1 %4898 }
 0x747   : > { %6411 = vperm.xlu1 %9183, %v8745_v50   ;;  %13696 = vst [vmem:[#allocation18_spill] sm:$0xff] %v12059_v5  ;;  %v8758_v50 = vld [vmem:[%s13291_s7 + $0x578] sm:$0xff] }
 0x749   : > { %6416 = vperm.xlu0 %9184, %v8746_v7   ;;  %v8824_v7 = vld [vmem:[%s13290_s6 + $0x100] sm:$0xff] }
 0x74b   : > { %6421 = vperm.xlu1 %9183, %v8747_v46   ;;  %v12067_v46 = vpop.permute.xlu0 %4903 }
 0x74c   : > { %13697 = vst [vmem:[#allocation19_spill] sm:$0xff] %v12067_v46 }
 0x74d   : > { %6426 = vperm.xlu0 %9184, %v8748_v34   ;;  %v8825_v34 = vld [vmem:[%s13290_s6 + $0x108] sm:$0xff] }
 0x74f   : > { %6431 = vperm.xlu1 %9183, %v8749_v60   ;;  %v8826_v60 = vld [vmem:[%s13290_s6 + $0x110] sm:$0xff] }
 0x751   : > { %6436 = vperm.xlu0 %9184, %v8750_v57   ;;  %v12075_v57 = vpop.permute.xlu1 %5208 }
 0x752   : > { %13698 = vst [vmem:[#allocation20_spill] sm:$0xff] %v12075_v57  ;;  %v8879_v57 = vld [vmem:[%s13291_s7 + $0x638] sm:$0xff] }
 0x753   : > { %6441 = vperm.xlu1 %9183, %v8751_v14   ;;  %v12077_v14 = vpop.permute.xlu0 %5213 }
 0x754   : > { %13699 = vst [vmem:[#allocation21_spill] sm:$0xff] %v12077_v14 }
 0x755   : > { %6446 = vperm.xlu0 %9184, %v8752_v22   ;;  %v8827_v22 = vld [vmem:[%s13290_s6 + $0x118] sm:$0xff] }
 0x757   : > { %6451 = vperm.xlu1 %9183, %v8753_v27   ;;  %v8840_v27 = vld [vmem:[%s13291_s7 + $0x580] sm:$0xff] }
 0x759   : > { %6456 = vperm.xlu0 %9184, %v8754_v11   ;;  %v12085_v11 = vpop.permute.xlu1 %4908 }
 0x75a   : > { %13700 = vst [vmem:[#allocation22_spill] sm:$0xff] %v12085_v11 }
 0x75b   : > { %6461 = vperm.xlu1 %9183, %v8755_v6   ;;  %v8841_v6 = vld [vmem:[%s13291_s7 + $0x588] sm:$0xff] }
 0x75d   : > { %6466 = vperm.xlu0 %9184, %v8756_v43   ;;  %v8828_v43 = vld [vmem:[%s13290_s6 + $0x120] sm:$0xff] }
 0x75f   : > { %6471 = vperm.xlu1 %9183, %v8757_v9   ;;  %v12093_v9 = vpop.permute.xlu0 %4913 }
 0x760   : > { %13701 = vst [vmem:[#allocation23_spill] sm:$0xff] %v12093_v9 }
 0x761   : > { %6476 = vperm.xlu0 %9184, %v8758_v50   ;;  %v8829_v50 = vld [vmem:[%s13290_s6 + $0x128] sm:$0xff] }
 0x763   : > { %7079 = vperm.xlu1 %9183, %v8824_v7   ;;  %v8842_v7 = vld [vmem:[%s13291_s7 + $0x590] sm:$0xff] }
 0x765   : > { %7084 = vperm.xlu0 %9184, %v8825_v34   ;;  %v12101_v34 = vpop.permute.xlu1 %5218 }
 0x766   : > { %13702 = vst [vmem:[#allocation24_spill] sm:$0xff] %v12101_v34 }
 0x767   : > { %7089 = vperm.xlu1 %9183, %v8826_v60   ;;  %v8843_v60 = vld [vmem:[%s13291_s7 + $0x598] sm:$0xff] }
 0x769   : > { %7094 = vperm.xlu0 %9184, %v8827_v22   ;;  %v8830_v22 = vld [vmem:[%s13290_s6 + $0x130] sm:$0xff] }
 0x76b   : > { %7240 = vperm.xlu1 %9183, %v8840_v27   ;;  %v12109_v27 = vpop.permute.xlu0 %5223 }
 0x76c   : > { %13703 = vst [vmem:[#allocation25_spill] sm:$0xff] %v12109_v27 }
 0x76d   : > { %7245 = vperm.xlu0 %9184, %v8841_v6   ;;  %v12111_v6 = vpop.permute.xlu1 %4918 }
 0x76e   : > { %13704 = vst [vmem:[#allocation26_spill] sm:$0xff] %v12111_v6  ;;  %v13721_v6 = vld [vmem:[#allocation77_spill] sm:$0xff] }
 0x76f   : > { %7099 = vperm.xlu1 %9183, %v8828_v43   ;;  %v8831_v43 = vld [vmem:[%s13290_s6 + $0x138] sm:$0xff] }
 0x771   : > { %7104 = vperm.xlu0 %9184, %v8829_v50   ;;  %v8844_v50 = vld [vmem:[%s13291_s7 + $0x5a0] sm:$0xff] }
 0x773   : > { %7250 = vperm.xlu1 %9183, %v8842_v7   ;;  %v12119_v7 = vpop.permute.xlu0 %4923 }
 0x774   : > { %13705 = vst [vmem:[#allocation27_spill] sm:$0xff] %v12119_v7 }
 0x775   : > { %7255 = vperm.xlu0 %9184, %v8843_v60   ;;  %v8832_v60 = vld [vmem:[%s13290_s6 + $0x140] sm:$0xff] }
 0x777   : > { %7109 = vperm.xlu1 %9183, %v8830_v22   ;;  %v12127_v22 = vpop.permute.xlu1 %5228 }
 0x778   : > { %13706 = vst [vmem:[#allocation28_spill] sm:$0xff] %v12127_v22  ;;  %v8847_v22 = vld [vmem:[%s13291_s7 + $0x5b8] sm:$0xff] }
 0x779   : > { %7114 = vperm.xlu0 %9184, %v8831_v43   ;;  %v8846_v43 = vld [vmem:[%s13291_s7 + $0x5b0] sm:$0xff] }
 0x77b   : > { %7260 = vperm.xlu1 %9183, %v8844_v50   ;;  %v12135_v50 = vpop.permute.xlu0 %5233  ;;  %v12137_v7 = vpop.permute.xlu1 %5238 }
 0x77c   : > { %13707 = vst [vmem:[#allocation29_spill] sm:$0xff] %v12135_v50  ;;  %13708 = vst [vmem:[#allocation30_spill] sm:$0xff] %v12137_v7  ;;  %v8835_v50 = vld [vmem:[%s13290_s6 + $0x158] sm:$0xff]  ;;  %v8849_v7 = vld [vmem:[%s13291_s7 + $0x5c8] sm:$0xff] }
 0x77d   : > { %7265 = vperm.xlu0 %9184, %v8845_v31   ;;  %v8834_v31 = vld [vmem:[%s13290_s6 + $0x150] sm:$0xff] }
 0x77f   : > { %7119 = vperm.xlu1 %9183, %v8832_v60   ;;  %v12145_v60 = vpop.permute.xlu0 %5243 }
 0x780   : > { %13709 = vst [vmem:[#allocation31_spill] sm:$0xff] %v12145_v60 }
 0x781   : > { %7124 = vperm.xlu0 %9184, %v8833_v47   ;;  %v8848_v47 = vld [vmem:[%s13291_s7 + $0x5c0] sm:$0xff] }
 0x783   : > { %7270 = vperm.xlu1 %9183, %v8846_v43   ;;  %v12153_v43 = vpop.permute.xlu1 %5723 }
 0x784   : > { %13710 = vst [vmem:[#allocation32_spill] sm:$0xff] %v12153_v43  ;;  %v8837_v43 = vld [vmem:[%s13290_s6 + $0x168] sm:$0xff] }
 0x785   : > { %7275 = vperm.xlu0 %9184, %v8847_v22   ;;  %v8836_v22 = vld [vmem:[%s13290_s6 + $0x160] sm:$0xff] }
 0x787   : > { %7129 = vperm.xlu1 %9183, %v8834_v31   ;;  %v12161_v31 = vpop.permute.xlu0 %5728  ;;  %v12163_v60 = vpop.permute.xlu1 %5733 }
 0x788   : > { %13711 = vst [vmem:[#allocation33_spill] sm:$0xff] %v12161_v31  ;;  %13712 = vst [vmem:[#allocation34_spill] sm:$0xff] %v12163_v60  ;;  %v8851_v31 = vld [vmem:[%s13291_s7 + $0x5d8] sm:$0xff] }
 0x789   : > { %7134 = vperm.xlu0 %9184, %v8835_v50   ;;  %v8850_v50 = vld [vmem:[%s13291_s7 + $0x5d0] sm:$0xff]  ;;  %v8839_v60 = vld [vmem:[%s13290_s6 + $0x178] sm:$0xff] }
 0x78b   : > { %7280 = vperm.xlu1 %9183, %v8848_v47   ;;  %v12171_v47 = vpop.permute.xlu0 %5738 }
 0x78c   : > { %13713 = vst [vmem:[#allocation35_spill] sm:$0xff] %v12171_v47 }
 0x78d   : > { %7285 = vperm.xlu0 %9184, %v8849_v7   ;;  %v8838_v7 = vld [vmem:[%s13290_s6 + $0x170] sm:$0xff] }
 0x78f   : > { %7139 = vperm.xlu1 %9183, %v8836_v22   ;;  %v12179_v22 = vpop.permute.xlu1 %5884 }
 0x790   : > { %13714 = vst [vmem:[#allocation36_spill] sm:$0xff] %v12179_v22  ;;  %v8853_v22 = vld [vmem:[%s13291_s7 + $0x5e8] sm:$0xff] }
 0x791   : > { %7144 = vperm.xlu0 %9184, %v8837_v43   ;;  %v8852_v43 = vld [vmem:[%s13291_s7 + $0x5e0] sm:$0xff] }
 0x793   : > { %7290 = vperm.xlu1 %9183, %v8850_v50   ;;  %v12187_v50 = vpop.permute.xlu0 %5889  ;;  %v12189_v47 = vpop.permute.xlu1 %5743 }
 0x794   : > { %13715 = vst [vmem:[#allocation37_spill] sm:$0xff] %v12187_v50  ;;  %13716 = vst [vmem:[#allocation38_spill] sm:$0xff] %v12189_v47  ;;  %v8855_v50 = vld [vmem:[%s13291_s7 + $0x5f8] sm:$0xff]  ;;  %v8873_v47 = vld [vmem:[%s13291_s7 + $0x608] sm:$0xff] }
 0x795   : > { %7295 = vperm.xlu0 %9184, %v8851_v31   ;;  %v8854_v31 = vld [vmem:[%s13291_s7 + $0x5f0] sm:$0xff] }
 0x797   : > { %7149 = vperm.xlu1 %9183, %v8838_v7   ;;  %v12197_v7 = vpop.permute.xlu0 %5748 }
 0x798   : > { %13717 = vst [vmem:[#allocation39_spill] sm:$0xff] %v12197_v7 }
 0x799   : > { %7154 = vperm.xlu0 %9184, %v8839_v60   ;;  %v8872_v60 = vld [vmem:[%s13291_s7 + $0x600] sm:$0xff] }
 0x79b   : > { %7300 = vperm.xlu1 %9183, %v8852_v43   ;;  %v12205_v43 = vpop.permute.xlu1 %5894 }
 0x79c   : > { %13718 = vst [vmem:[#allocation40_spill] sm:$0xff] %v12205_v43  ;;  %v8875_v43 = vld [vmem:[%s13291_s7 + $0x618] sm:$0xff] }
 0x79d   : > { %7305 = vperm.xlu0 %9184, %v8853_v22   ;;  %v8874_v22 = vld [vmem:[%s13291_s7 + $0x610] sm:$0xff] }
 0x79f   : > { %7310 = vperm.xlu1 %9183, %v8854_v31   ;;  %v12213_v31 = vpop.permute.xlu0 %5899  ;;  %v12215_v7 = vpop.permute.xlu1 %5753 }
 0x7a0   : > { %13719 = vst [vmem:[#allocation41_spill] sm:$0xff] %v12213_v31  ;;  %13720 = vst [vmem:[#allocation42_spill] sm:$0xff] %v12215_v7 }
 0x7a1   : > { %7315 = vperm.xlu0 %9184, %v8855_v50   ;;  %v8876_v50 = vld [vmem:[%s13291_s7 + $0x620] sm:$0xff] }
 0x7a3   : > { %7434 = vperm.xlu1 %9183, %v8872_v60   ;;  %v12224_v27 = vpop.permute.xlu0 %5758  ;;  %v12233_v34 = vpop.permute.xlu1 %5904 }
 0x7a4   : > { %13722 = vst [vmem:[#allocation43_spill] sm:$0xff] %v12224_v27  ;;  %13723 = vst [vmem:[#allocation44_spill] sm:$0xff] %v12233_v34 }
 0x7a5   : > { %7439 = vperm.xlu0 %9184, %v8873_v47   ;;  %v8877_v47 = vld [vmem:[%s13291_s7 + $0x628] sm:$0xff] }
 0x7a7   : > { %7444 = vperm.xlu1 %9183, %v8874_v22   ;;  %v8878_v22 = vld [vmem:[%s13291_s7 + $0x630] sm:$0xff]  ;;  %v12243_v63 = vpop.permute.xlu0 %5909 }
 0x7a8   : > { %13725 = vst [vmem:[#allocation45_spill] sm:$0xff] %v12243_v63 }
 0x7a9   : > { %7449 = vperm.xlu0 %9184, %v8875_v43   ;;  %v13724_v43 = vld [vmem:[#allocation78_spill] sm:$0xff] }
 0x7ab   : > { %7454 = vperm.xlu1 %9183, %v8876_v50  }
 0x7ad   : > { %7459 = vperm.xlu0 %9184, %v8877_v47  }
 0x7af   : > { %7464 = vperm.xlu1 %9183, %v8878_v22  }
 0x7b1   : > { %7469 = vperm.xlu0 %9184, %v8879_v57  }
 0x7c4   : > { %v3521_v60 = vpop.f32.mrb[96].mxu0 }
 0x7c5   : > { %v3522_v9 = vadd.f32 %v3521_v60, %v13721_v6  ;;  %v3523_v11 = vpop.f32.mrb[97].mxu0 }
 0x7c6   : > { %v3524_v7 = vadd.f32 %v3523_v11, %v13721_v6  ;;  %v3525_v31 = vpop.f32.mrb[98].mxu0  ;;  %v8880_v11 = vld [vmem:[%s13291_s7 + $0x640] sm:$0xff] }
 0x7c7   : > { %v3526_v50 = vadd.f32 %v3525_v31, %v13724_v43  ;;  %v3527_v14 = vpop.f32.mrb[99].mxu0  ;;  %v3617_v27 = vmax.f32 %v3522_v9, 0.0  ;;  %7474 = vperm.xlu1 %9183, %v8880_v11   ;;  %v13727_v9 = vld [vmem:[#allocation79_spill] sm:$0xff] }
 0x7c8   : > { %v3528_v60 = vadd.f32 %v3527_v14, %v13724_v43  ;;  %v3618_v6 = vmax.f32 %v3524_v7, 0.0  ;;  %v12245_v14 = vpop.permute.xlu1 %5763  ;;  %v8881_v43 = vld [vmem:[%s13291_s7 + $0x648] sm:$0xff]  ;;  %v8882_v7 = vld [vmem:[%s13291_s7 + $0x650] sm:$0xff] }
 0x7c9   : > { %v3619_v46 = vmax.f32 %v3526_v50, 0.0  ;;  %13726 = vst [vmem:[#allocation46_spill] sm:$0xff] %v12245_v14  ;;  %7479 = vperm.xlu0 %9184, %v8881_v43   ;;  %v8883_v14 = vld [vmem:[%s13291_s7 + $0x658] sm:$0xff] }
 0x7ca   : > { %v3620_v5 = vmax.f32 %v3528_v60, 0.0 }
 0x7cb   : > { %v3649_v34 = vpack.c.bf16 %v3619_v46, %v3617_v27  ;;  %7484 = vperm.xlu1 %9183, %v8882_v7  }
 0x7cc   : > { %v3650_v31 = vpack.c.bf16 %v3620_v5, %v3618_v6  ;;  %v3531_v59 = vpop.f32.mrb[100].mxu0  ;;  %v13728_v5 = vld [vmem:[#allocation80_spill] sm:$0xff]  ;;  %v12257_v6 = vpop.permute.xlu0 %5768 }
 0x7cd   : > { %v3532_v47 = vadd.f32 %v3531_v59, %v13727_v9  ;;  %v3533_v22 = vpop.f32.mrb[101].mxu0  ;;  %13729 = vst [vmem:[#allocation47_spill] sm:$0xff] %v12257_v6  ;;  %7489 = vperm.xlu0 %9184, %v8883_v14   ;;  %v8886_v6 = vld [vmem:[%s13291_s7 + $0x670] sm:$0xff] }
 0x7ce   : > { %v3534_v46 = vadd.f32 %v3533_v22, %v13727_v9  ;;  %v3535_v27 = vpop.f32.mrb[102].mxu0  ;;  %3810 = vmatprep.subr.bf16.mxu0 %v3650_v31  ;;  %v8884_v31 = vld [vmem:[%s13291_s7 + $0x660] sm:$0xff] }
 0x7cf   : > { %v3536_v50 = vadd.f32 %v3535_v27, %v13728_v5  ;;  %v3537_v60 = vpop.f32.mrb[103].mxu0  ;;  %3811 = vmatpush1.bf16.msra.mxu0 %v3649_v34  ;;  %v3621_v59 = vmax.f32 %v3532_v47, 0.0  ;;  %v12265_v27 = vpop.permute.xlu1 %5914  ;;  %7494 = vperm.xlu1 %9183, %v8884_v31   ;;  %v13731_v47 = vld [vmem:[#allocation81_spill] sm:$0xff] }
 0x7d0   : > { %v3538_v57 = vadd.f32 %v3537_v60, %v13728_v5  ;;  %v3622_v9 = vmax.f32 %v3534_v46, 0.0  ;;  %13730 = vst [vmem:[#allocation48_spill] sm:$0xff] %v12265_v27  ;;  %v8885_v60 = vld [vmem:[%s13291_s7 + $0x668] sm:$0xff]  ;;  %v12276_v14 = vpop.permute.xlu0 %5919 }
 0x7d1   : > { %v3623_v11 = vmax.f32 %v3536_v50, 0.0  ;;  %13733 = vst [vmem:[#allocation49_spill] sm:$0xff] %v12276_v14  ;;  %7499 = vperm.xlu0 %9184, %v8885_v60  }
 0x7d2   : > { %v3624_v22 = vmax.f32 %v3538_v57, 0.0 }
 0x7d3   : > { %v3651_v34 = vpack.c.bf16 %v3623_v11, %v3621_v59  ;;  %v13732_v59 = vld [vmem:[#allocation82_spill] sm:$0xff]  ;;  %7504 = vperm.xlu1 %9183, %v8886_v6  }
 0x7d4   : > { %v3652_v5 = vpack.c.bf16 %v3624_v22, %v3622_v9  ;;  %v3541_v43 = vpop.f32.mrb[104].mxu0  ;;  %v12279_v22 = vpop.permute.xlu1 %5773 }
 0x7d5   : > { %v3542_v7 = vadd.f32 %v3541_v43, %v13731_v47  ;;  %v3543_v50 = vpop.f32.mrb[105].mxu0  ;;  %13734 = vst [vmem:[#allocation50_spill] sm:$0xff] %v12279_v22 }
 0x7d6   : > { %v3544_v46 = vadd.f32 %v3543_v50, %v13731_v47  ;;  %v3545_v57 = vpop.f32.mrb[106].mxu0  ;;  %3812 = vmatprep.subr.bf16.mxu0 %v3652_v5  ;;  %v8887_v47 = vld [vmem:[%s13291_s7 + $0x678] sm:$0xff]  ;;  %v8912_v5 = vld [vmem:[%s13291_s7 + $0x680] sm:$0xff] }
 0x7d7   : > { %v3546_v11 = vadd.f32 %v3545_v57, %v13732_v59  ;;  %v3547_v9 = vpop.f32.mrb[107].mxu0  ;;  %3813 = vmatpush1.bf16.msra.mxu0 %v3651_v34  ;;  %v3625_v43 = vmax.f32 %v3542_v7, 0.0  ;;  %7509 = vperm.xlu0 %9184, %v8887_v47   ;;  %v12288_v7 = vpop.permute.xlu0 %5778 }
 0x7d8   : > { %v3548_v31 = vadd.f32 %v3547_v9, %v13732_v59  ;;  %v3626_v50 = vmax.f32 %v3544_v46, 0.0  ;;  %7757 = vperm.xlu1 %9183, %v8912_v5   ;;  %v13735_v59 = vld [vmem:[#allocation83_spill] sm:$0xff]  ;;  %13736 = vst [vmem:[#allocation51_spill] sm:$0xff] %v12288_v7 }
 0x7d9   : > { %v3627_v27 = vmax.f32 %v3546_v11, 0.0  ;;  %v8913_v11 = vld [vmem:[%s13291_s7 + $0x688] sm:$0xff]  ;;  %v8914_v9 = vld [vmem:[%s13291_s7 + $0x690] sm:$0xff]  ;;  %v8915_v7 = vld [vmem:[%s13291_s7 + $0x698] sm:$0xff] }
 0x7da   : > { %v3628_v34 = vmax.f32 %v3548_v31, 0.0  ;;  %v12297_v31 = vpop.permute.xlu1 %5924 }
 0x7db   : > { %v3653_v57 = vpack.c.bf16 %v3627_v27, %v3625_v43  ;;  %13737 = vst [vmem:[#allocation52_spill] sm:$0xff] %v12297_v31  ;;  %v13738_v43 = vld [vmem:[#allocation84_spill] sm:$0xff]  ;;  %7762 = vperm.xlu0 %9184, %v8913_v11  }
 0x7dc   : > { %v3654_v14 = vpack.c.bf16 %v3628_v34, %v3626_v50  ;;  %v3551_v63 = vpop.f32.mrb[108].mxu0  ;;  %7767 = vperm.xlu1 %9183, %v8914_v9  }
 0x7dd   : > { %v3552_v60 = vadd.f32 %v3551_v63, %v13735_v59  ;;  %v3553_v6 = vpop.f32.mrb[109].mxu0 }
 0x7de   : > { %v3554_v46 = vadd.f32 %v3553_v6, %v13735_v59  ;;  %v3555_v27 = vpop.f32.mrb[110].mxu0  ;;  %3814 = vmatprep.subr.bf16.mxu0 %v3654_v14  ;;  %v8916_v14 = vld [vmem:[%s13291_s7 + $0x6a0] sm:$0xff] }
 0x7df   : > { %v3556_v47 = vadd.f32 %v3555_v27, %v13738_v43  ;;  %v3557_v63 = vpop.f32.mrb[111].mxu0  ;;  %3815 = vmatpush1.bf16.msra.mxu0 %v3653_v57  ;;  %v3629_v50 = vmax.f32 %v3552_v60, 0.0  ;;  %v12307_v27 = vpop.permute.xlu0 %5929  ;;  %7772 = vperm.xlu0 %9184, %v8915_v7   ;;  %v13741_v60 = vld [vmem:[#allocation85_spill] sm:$0xff] }
 0x7e0   : > { %v3558_v5 = vadd.f32 %v3557_v63, %v13738_v43  ;;  %v3630_v59 = vmax.f32 %v3554_v46, 0.0  ;;  %13739 = vst [vmem:[#allocation53_spill] sm:$0xff] %v12307_v27  ;;  %v12309_v43 = vpop.permute.xlu1 %5783  ;;  %7777 = vperm.xlu1 %9183, %v8916_v14   ;;  %v8918_v46 = vld [vmem:[%s13291_s7 + $0x6b0] sm:$0xff] }
 0x7e1   : > { %v3631_v34 = vmax.f32 %v3556_v47, 0.0  ;;  %13740 = vst [vmem:[#allocation54_spill] sm:$0xff] %v12309_v43  ;;  %v8917_v47 = vld [vmem:[%s13291_s7 + $0x6a8] sm:$0xff]  ;;  %v8919_v43 = vld [vmem:[%s13291_s7 + $0x6b8] sm:$0xff] }
 0x7e2   : > { %v3632_v6 = vmax.f32 %v3558_v5, 0.0 }
 0x7e3   : > { %v3655_v22 = vpack.c.bf16 %v3631_v34, %v3629_v50  ;;  %v13742_v50 = vld [vmem:[#allocation86_spill] sm:$0xff]  ;;  %7782 = vperm.xlu0 %9184, %v8917_v47  }
 0x7e4   : > { %v3656_v57 = vpack.c.bf16 %v3632_v6, %v3630_v59  ;;  %v3561_v31 = vpop.f32.mrb[112].mxu0  ;;  %7787 = vperm.xlu1 %9183, %v8918_v46   ;;  %v12321_v6 = vpop.permute.xlu0 %5788  ;;  %v13747_v46 = vld [vmem:[#allocation95_spill] sm:$0xff] }
 0x7e5   : > { %v3562_v11 = vadd.f32 %v3561_v31, %v13741_v60  ;;  %v3563_v9 = vpop.f32.mrb[113].mxu0  ;;  %13743 = vst [vmem:[#allocation55_spill] sm:$0xff] %v12321_v6 }
 0x7e6   : > { %v3564_v63 = vadd.f32 %v3563_v9, %v13741_v60  ;;  %v3565_v5 = vpop.f32.mrb[114].mxu0  ;;  %3816 = vmatprep.subr.bf16.mxu0 %v3656_v57  ;;  %v8920_v57 = vld [vmem:[%s13291_s7 + $0x6c0] sm:$0xff] }
 0x7e7   : > { %v3566_v34 = vadd.f32 %v3565_v5, %v13742_v50  ;;  %v3567_v59 = vpop.f32.mrb[115].mxu0  ;;  %3817 = vmatpush1.bf16.msra.mxu0 %v3655_v22  ;;  %v3633_v31 = vmax.f32 %v3562_v11, 0.0  ;;  %v13744_v60 = vld [vmem:[#allocation93_spill] sm:$0xff]  ;;  %v13746_v11 = vld [vmem:[#allocation94_spill] sm:$0xff]  ;;  %7792 = vperm.xlu0 %9184, %v8919_v43  }
 0x7e8   : > { %v3568_v7 = vadd.f32 %v3567_v59, %v13742_v50  ;;  %v4077_v9 = vmul.f32 %v13744_v60, %v11804_v1  ;;  %v3634_v22 = vmax.f32 %v3564_v63, 0.0  ;;  %v12331_v50 = vpop.permute.xlu1 %5934  ;;  %v4078_v47 = vmul.f32 %v13746_v11, %v11804_v1  ;;  %v13748_v59 = vld [vmem:[#allocation96_spill] sm:$0xff]  ;;  %7797 = vperm.xlu1 %9183, %v8920_v57   ;;  %v8922_v1 = vld [vmem:[%s13291_s7 + $0x6d0] sm:$0xff] }
 0x7e9   : > { %v3635_v14 = vmax.f32 %v3566_v34, 0.0  ;;  %13745 = vst [vmem:[#allocation56_spill] sm:$0xff] %v12331_v50  ;;  %v4113_v34 = vmul.f32 %v13747_v46, %v11833_v26  ;;  %v4114_v6 = vmul.f32 %v13748_v59, %v11833_v26  ;;  %v13753_v59 = vld [vmem:[#allocation98_spill] sm:$0xff] }
 0x7ea   : > { %v3636_v5 = vmax.f32 %v3568_v7, 0.0  ;;  %v8921_v7 = vld [vmem:[%s13291_s7 + $0x6c8] sm:$0xff]  ;;  %v4156_v50 = vmul.f32 %v13753_v59, %v11813_v55 }
 0x7eb   : > { %v3657_v27 = vpack.c.bf16 %v3635_v14, %v3633_v31  ;;  %v4119_v26 = vadd.f32 %v4113_v34, %v4077_v9  ;;  %v4120_v31 = vadd.f32 %v4114_v6, %v4078_v47  ;;  %v13750_v14 = vld [vmem:[#allocation88_spill] sm:$0xff]  ;;  %7802 = vperm.xlu0 %9184, %v8921_v7   ;;  %v13755_v7 = vld [vmem:[#allocation89_spill] sm:$0xff] }
 0x7ec   : > { %v3658_v8 = vpack.c.bf16 %v3636_v5, %v3634_v22  ;;  %v3571_v28 = vpop.f32.mrb[116].mxu0  ;;  %v13752_v22 = vld [vmem:[#allocation97_spill] sm:$0xff]  ;;  %v12355_v29 = vpop.permute.xlu1 %5793  ;;  %7807 = vperm.xlu1 %9183, %v8922_v1  }
 0x7ed   : > { %v3572_v60 = vadd.f32 %v3571_v28, %v13749_v18  ;;  %v3573_v63 = vpop.f32.mrb[117].mxu0  ;;  %v12348_v28 = vpop.permute.xlu0 %5939  ;;  %v4155_v5 = vmul.f32 %v13752_v22, %v11813_v55  ;;  %13754 = vst [vmem:[#allocation58_spill] sm:$0xff] %v12355_v29  ;;  %v8924_v6 = vld [vmem:[%s13291_s7 + $0x6e0] sm:$0xff]  ;;  %v4804_v29 = vmax.f32 %v11273_v12, 0.0 }
 0x7ee   : > { %v3574_v11 = vadd.f32 %v3573_v63, %v13749_v18  ;;  %v3575_v46 = vpop.f32.mrb[118].mxu0  ;;  %3818 = vmatprep.subr.bf16.mxu0 %v3658_v8  ;;  %13751 = vst [vmem:[#allocation57_spill] sm:$0xff] %v12348_v28  ;;  %v4162_v63 = vadd.f32 %v4156_v50, %v4120_v31  ;;  %v13758_v31 = vld [vmem:[#allocation90_spill] sm:$0xff] }
 0x7ef   : > { %v3576_v43 = vadd.f32 %v3575_v46, %v13750_v14  ;;  %v3577_v57 = vpop.f32.mrb[119].mxu0  ;;  %3819 = vmatpush1.bf16.msra.mxu0 %v3657_v27  ;;  %v3637_v18 = vmax.f32 %v3572_v60, 0.0  ;;  %v8923_v27 = vld [vmem:[%s13291_s7 + $0x6d8] sm:$0xff]  ;;  %v4161_v55 = vadd.f32 %v4155_v5, %v4119_v26 }
 0x7f0   : > { %v3578_v42 = vadd.f32 %v3577_v57, %v13750_v14  ;;  %v3638_v9 = vmax.f32 %v3574_v11, 0.0  ;;  %7812 = vperm.xlu0 %9184, %v8923_v27   ;;  %7817 = vperm.xlu1 %9183, %v8924_v6   ;;  %v8925_v57 = vld [vmem:[%s13291_s7 + $0x6e8] sm:$0xff]  ;;  %v12373_v26 = vpop.permute.xlu1 %5944 }
 0x7f1   : > { %v3639_v8 = vmax.f32 %v3576_v43, 0.0  ;;  %v12364_v43 = vpop.permute.xlu0 %5798  ;;  %13757 = vst [vmem:[#allocation60_spill] sm:$0xff] %v12373_v26  ;;  %v12376_v59 = vadd.f32 1.5707964, %v4161_v55 }
 0x7f2   : > { %v3640_v47 = vmax.f32 %v3578_v42, 0.0  ;;  %13756 = vst [vmem:[#allocation59_spill] sm:$0xff] %v12364_v43  ;;  %v8926_v42 = vld [vmem:[%s13291_s7 + $0x6f0] sm:$0xff] }
 0x7f3   : > { %v3659_v34 = vpack.c.bf16 %v3639_v8, %v3637_v18  ;;  %v12378_v18 = vadd.f32 1.5707964, %v4162_v63 }
 0x7f4   : > { %v3660_v46 = vpack.c.bf16 %v3640_v47, %v3638_v9  ;;  %v3581_v14 = vpop.f32.mrb[120].mxu0  ;;  %7822 = vperm.xlu0 %9184, %v8925_v57   ;;  %7827 = vperm.xlu1 %9183, %v8926_v42   ;;  %v8927_v9 = vld [vmem:[%s13291_s7 + $0x6f8] sm:$0xff]  ;;  %v8045_v47 = vld [vmem:[%s13295_s11] sm:$0x7] }
 0x7f5   : > { %v3582_v60 = vadd.f32 %v3581_v14, %v13755_v7  ;;  %v3583_v1 = vpop.f32.mrb[121].mxu0  ;;  %v12387_v14 = vpop.permute.xlu0 %5949  ;;  %v4692_v57 = vand.u32 2139095040, %v12378_v18  ;;  %v13761_v42 = vld [vmem:[#allocation91_spill] sm:$0xff] }
 0x7f6   : > { %v3584_v11 = vadd.f32 %v3583_v1, %v13755_v7  ;;  %v3585_v50 = vpop.f32.mrb[122].mxu0  ;;  %3820 = vmatprep.subr.bf16.mxu0 %v3660_v46  ;;  %13759 = vst [vmem:[#allocation61_spill] sm:$0xff] %v12387_v14  ;;  %v12389_v1 = vpop.permute.xlu1 %5954 }
 0x7f7   : > { %v3586_v22 = vadd.f32 %v3585_v50, %v13758_v31  ;;  %v3587_v5 = vpop.f32.mrb[123].mxu0  ;;  %3821 = vmatpush1.bf16.msra.mxu0 %v3659_v34  ;;  %v3641_v27 = vmax.f32 %v3582_v60, 0.0  ;;  %13760 = vst [vmem:[#allocation62_spill] sm:$0xff] %v12389_v1  ;;  %v4588_v60 = vand.u32 2139095040, %v12376_v59 }
 0x7f8   : > { %v3588_v8 = vadd.f32 %v3587_v5, %v13758_v31  ;;  %v3642_v46 = vmax.f32 %v3584_v11, 0.0  ;;  %7832 = vperm.xlu0 %9184, %v8927_v9   ;;  %8048 = vperm.xlu1 %9183, %v8045_v47   ;;  %v13762_v5 = vld [vmem:[#allocation92_spill] sm:$0xff]  ;;  %v4693_v9 = vshrl.u32 %v4692_v57, 23 }
 0x7f9   : > { %v3643_v6 = vmax.f32 %v3586_v22, 0.0 }
 0x7fa   : > { %v3644_v34 = vmax.f32 %v3588_v8, 0.0 }
 0x7fb   : > { %v3661_v55 = vpack.c.bf16 %v3643_v6, %v3641_v27 }
 0x7fc   : > { %v3662_v63 = vpack.c.bf16 %v3644_v34, %v3642_v46  ;;  %v3591_v7 = vpop.f32.mrb[124].mxu0  ;;  %v4589_v46 = vshrl.u32 %v4588_v60, 23  ;;  %v9249_v60 = vld [vmem:[%s13288_s4 + $0x140] sm:$0xff]  }
 0x7fd   : > { %v3592_v50 = vadd.f32 %v3591_v7, %v13761_v42  ;;  %v3593_v31 = vpop.f32.mrb[125].mxu0  ;;  %v4806_v7 = vmax.f32 %v11275_v62, 0.0 }
 0x7fe   : > { %v3594_v22 = vadd.f32 %v3593_v31, %v13761_v42  ;;  %v3595_v11 = vpop.f32.mrb[126].mxu0  ;;  %3822 = vmatprep.subr.bf16.mxu0 %v3662_v63  ;;  %v8541_v31 = vadd.s32 4294967169, %v4589_v46  ;;  %v8545_v63 = vadd.s32 4294967169, %v4693_v9 }
 0x7ff   : > { %v3596_v8 = vadd.f32 %v3595_v11, %v13762_v5  ;;  %v3597_v27 = vpop.f32.mrb[127].mxu0  ;;  %3823 = vmatpush1.bf16.msra.mxu0 %v3661_v55  ;;  %v3645_v47 = vmax.f32 %v3592_v50, 0.0  ;;  %v4803_v11 = vmax.f32 %v11250_v61, 0.0  ;;  %v4805_v55 = vmax.f32 %v11257_v39, 0.0 }
 0x800   : > { %v3598_v6 = vadd.f32 %v3597_v27, %v13762_v5  ;;  %v3646_v1 = vmax.f32 %v3594_v22, 0.0  ;;  %v12401_v5 = vpack.c.bf16 %v4806_v7, %v4804_v29  ;;  %v4595_v57 = vadd.s32 1, %v8541_v31  ;;  %v9250_v29 = vld [vmem:[%s13288_s4 + $0x148] sm:$0xff]   ;;  %v9251_v27 = vld [vmem:[%s13288_s4 + $0x150] sm:$0xff]  }
 0x801   : > { %v3647_v34 = vmax.f32 %v3596_v8, 0.0  ;;  %v4699_v50 = vadd.s32 1, %v8545_v63  ;;  %v12407_v22 = vpack.c.bf16 %v4805_v55, %v4803_v11 }
 0x802   : > { %v3648_v43 = vmax.f32 %v3598_v6, 0.0  ;;  %13763 = vst [vmem:[#allocation63_spill] sm:$0xff] %v12401_v5  ;;  %vm4596_vm2 = vcmp.gt.s32.totalorder %v4595_v57, 0 }
 0x803   : > { %v3663_v14 = vpack.c.bf16 %v3647_v34, %v3645_v47  ;;  %13764 = vst [vmem:[#allocation64_spill] sm:$0xff] %v12407_v22  ;;  %vm4700_vm5 = vcmp.gt.s32.totalorder %v4699_v50, 0 }
 0x804   : > { %v3664_v42 = vpack.c.bf16 %v3648_v43, %v3646_v1  ;;  %v4597_v43 = vsel %vm4596_vm2, %v4595_v57, 0  ;;  %v4701_v1 = vsel %vm4700_vm5, %v4699_v50, 0  ;;  %vm4691_vm2 = vcmp.lt.s32.totalorder %v12378_v18, 0 }
 0x805   : > { %v4703_v8 = vand.u32 31, %v4701_v1  ;;  %v12432_v63 = vshrl.u32 %v4597_v43, 5  ;;  %v12434_v11 = vshrl.u32 %v4701_v1, 5 }
 0x806   : > { %3824 = vmatprep.subr.bf16.mxu0 %v3664_v42 }
 0x807   : > { %3825 = vmatpush1.bf16.msra.mxu0 %v3663_v14  ;;  %v12414_v14 = vand.u32 31, %v4597_v43  ;;  %v4704_v46 = vsub.s32 32, %v4703_v8  ;;  %v4715_v47 = vshll.u32 %v13508_v40, %v4703_v8  ;;  %v4718_v42 = vshll.u32 %v13504_v4, %v4703_v8 }
 0x808   : > { %5430 = vmatprep.subr.bf16.mxu0 %v12401_v5  ;;  %vm4620_vm6 = vcmp.lt.s32.totalorder %v12432_v63, 4  ;;  %vm4724_vm7 = vcmp.lt.s32.totalorder %v12434_v11, 4  ;;  %v13478_v43 = vand.u32 2147483647, %v12376_v59  ;;  %vm4721_vm8 = vcmp.lt.s32.totalorder %v12434_v11, 1 }
 0x809   : > { %v12421_v6 = vsub.s32 32, %v12414_v14  ;;  %v4614_v9 = vshll.u32 %v13504_v4, %v12414_v14  ;;  %v4716_v7 = vshrl.u32 %v13504_v4, %v4704_v46  ;;  %v4719_v31 = vshrl.u32 %v13501_v45, %v4704_v46 }
 0x80a   : > { %3843 = vmatmul.mubr.bf16.vlgmr.msra.gmra.mrb[128].mxu0 %v9249_v60  ;;  %v4611_v55 = vshll.u32 %v13508_v40, %v12414_v14  ;;  %v9252_v60 = vld [vmem:[%s13288_s4 + $0x158] sm:$0xff]   ;;  %vm4723_vm9 = vcmp.lt.s32.totalorder %v12434_v11, 3  ;;  %vm4722_vm10 = vcmp.lt.s32.totalorder %v12434_v11, 2  ;;  %vm4617_vm11 = vcmp.lt.s32.totalorder %v12432_v63, 1 }
 0x80b   : > { %5431 = vmatpush1.bf16.msra.mxu0 %v12407_v22  ;;  %3852 = vmatprep.mubr.bf16.mxu0 %v13531_v13  ;;  %v4615_v34 = vshrl.u32 %v13501_v45, %v12421_v6  ;;  %v4612_v57 = vshrl.u32 %v13504_v4, %v12421_v6  ;;  %v13473_v45 = vand.u32 2147483647, %v12378_v18  ;;  %v4602_v22 = vshll.u32 %v13514_v21, %v12414_v14 }
 0x80c   : > { %v4603_v5 = vshrl.u32 %v13502_v16, %v12421_v6  ;;  %vm4619_vm13 = vcmp.lt.s32.totalorder %v12432_v63, 3  ;;  %vm4618_vm15 = vcmp.lt.s32.totalorder %v12432_v63, 2 }
 0x80d   : > { %v4616_v50 = vor.u32 %v4615_v34, %v4614_v9  ;;  %v4613_v1 = vor.u32 %v4612_v57, %v4611_v55  ;;  %v4696_v9 = vand.u32 8388607, %v13473_v45  ;;  %v4707_v34 = vshrl.u32 %v13502_v16, %v4704_v46 }
 0x80e   : > { %v4592_v57 = vand.u32 8388607, %v13478_v43  ;;  %v4604_v30 = vor.u32 %v4603_v5, %v4602_v22  ;;  %v4605_v5 = vshll.u32 %v13502_v16, %v12414_v14 }
 0x80f   : > { %v4630_v26 = vsel %vm4620_vm6, %v4616_v50, 1326507024  ;;  %v9253_v50 = vld [vmem:[%s13288_s4 + $0x160] sm:$0xff]  }
 0x810   : > { %v4593_v43 = vor.u32 8388608, %v4592_v57 }
 0x812   : > { %3853 = vmatmul.mubr.bf16.gmra.mrb[132].mxu0 %v9250_v29  ;;  %v4717_v29 = vor.u32 %v4716_v7, %v4715_v47  ;;  %v4706_v47 = vshll.u32 %v13514_v21, %v4703_v8  ;;  %v4709_v7 = vshll.u32 %v13502_v16, %v4703_v8 }
 0x813   : > { %3862 = vmatprep.mubr.bf16.mxu0 %v13531_v13 }
 0x814   : > { %v4730_v28 = vsel %vm4724_vm7, %v4717_v29, 920167782  ;;  %v4708_v45 = vor.u32 %v4707_v34, %v4706_v47 }
 0x81a   : > { %3863 = vmatmul.mubr.bf16.gmra.mrb[136].mxu0 %v9251_v27  ;;  %v4720_v27 = vor.u32 %v4719_v31, %v4718_v42  ;;  %v13765_v42 = vmov 2131351028  }
 0x81b   : > { %3872 = vmatprep.mubr.bf16.mxu0 %v13531_v13  ;;  %v4710_v31 = vshrl.u32 %v13765_v42, %v4704_v46  ;;  %v4712_v55 = vshll.u32 %v13765_v42, %v4703_v8  ;;  %v4606_v22 = vshrl.u32 %v13765_v42, %v12421_v6 }
 0x81c   : > { %v4734_v4 = vsel %vm4724_vm7, %v4720_v27, 1326507024  ;;  %v4697_v27 = vor.u32 8388608, %v4696_v9 }
 0x81d   : > { %v4711_v52 = vor.u32 %v4710_v31, %v4709_v7  ;;  %v4735_v7 = vsel %vm4723_vm9, %v4717_v29, %v4734_v4  ;;  %v4601_v29 = vshrl.u32 %v13514_v21, %v12421_v6  ;;  %v4607_v16 = vor.u32 %v4606_v22, %v4605_v5 }
 0x81e   : > { %v4737_v8 = vshll.u32 %v4697_v27, 8 }
 0x81f   : > { %v4729_v9 = vsel %vm4721_vm8, %v4708_v45, %v4711_v52 }
 0x822   : > { %3873 = vmatmul.mubr.bf16.gmra.mrb[140].mxu0 %v9252_v60  ;;  %v4713_v60 = vshrl.u32 %v13508_v40, %v4704_v46 }
 0x823   : > { %3882 = vmatprep.mubr.bf16.mxu0 %v13531_v13 }
 0x824   : > { %v4714_v19 = vor.u32 %v4713_v60, %v4712_v55 }
 0x826   : > { %v4731_v47 = vsel %vm4723_vm9, %v4714_v19, %v4730_v28  ;;  %v4733_v34 = vsel %vm4721_vm8, %v4711_v52, %v4714_v19  ;;  %v4705_v28 = vshrl.u32 %v13514_v21, %v4704_v46  ;;  %v4726_v4 = vsel %vm4724_vm7, %v4714_v19, 2102212464 }
 0x827   : > { %v4732_v31 = vsel %vm4722_vm10, %v4729_v9, %v4731_v47  ;;  %v4736_v55 = vsel %vm4722_vm10, %v4733_v34, %v4735_v7  ;;  %v4727_v46 = vsel %vm4723_vm9, %v4711_v52, %v4726_v4  ;;  %v4608_v47 = vshll.u32 %v13765_v42, %v12414_v14  ;;  %v9254_v34 = vld [vmem:[%s13288_s4 + $0x168] sm:$0xff]  }
 0x828   : > { %v12492_v60 = vmul.u32.u64.low %v4737_v8, %v4736_v55  ;;  %v12493_v57 = vmul.u32.u64.high %v4737_v8, %v4736_v55, %v12492_v60  ;;  %v4725_v9 = vsel %vm4721_vm8, %v4705_v28, %v4708_v45  ;;  %v4609_v21 = vshrl.u32 %v13508_v40, %v12421_v6 }
 0x829   : > { %v4626_v19 = vsel %vm4620_vm6, %v4613_v1, 920167782  ;;  %v4728_v7 = vsel %vm4722_vm10, %v4725_v9, %v4727_v46  ;;  %v4625_v6 = vsel %vm4617_vm11, %v4604_v30, %v4607_v16  ;;  %v4631_v45 = vsel %vm4619_vm13, %v4613_v1, %v4630_v26 }
 0x82a   : > { %3883 = vmatmul.mubr.bf16.gmra.mrb[144].mxu0 %v9253_v50  ;;  %v12499_v50 = vmul.u32.u64.low %v4737_v8, %v4732_v31  ;;  %v12500_v27 = vmul.u32.u64.high %v4737_v8, %v4732_v31, %v12499_v50  ;;  %v4744_v52 = vmul.u32 %v4737_v8, %v4728_v7  ;;  %v4610_v14 = vor.u32 %v4609_v21, %v4608_v47 }
 0x82b   : > { %3892 = vmatprep.mubr.bf16.mxu0 %v13531_v13  ;;  %v4633_v42 = vshll.u32 %v4593_v43, 8  ;;  %v4621_v31 = vsel %vm4617_vm11, %v4601_v29, %v4604_v30 }
 0x82c   : > { %vm4746_vm14 = vc.u32 %v12493_v57, %v12499_v50  ;;  %v4747_v40 = vadd.s32 1, %v12500_v27  ;;  %v4622_v11 = vsel %vm4620_vm6, %v4610_v14, 2102212464  ;;  %v4627_v55 = vsel %vm4619_vm13, %v4610_v14, %v4626_v19 }
 0x82d   : > { %v4629_v5 = vsel %vm4617_vm11, %v4607_v16, %v4610_v14  ;;  %v4623_v22 = vsel %vm4619_vm13, %v4607_v16, %v4622_v11  ;;  %v4628_v28 = vsel %vm4618_vm15, %v4625_v6, %v4627_v55  ;;  %v9255_v16 = vld [vmem:[%s13288_s4 + $0x170] sm:$0xff]   ;;  %v9256_v14 = vld [vmem:[%s13288_s4 + $0x178] sm:$0xff]   ;;  %vm4587_vm6 = vcmp.lt.s32.totalorder %v12376_v59, 0 }
 0x82e   : > { %v4748_v8 = vsel %vm4746_vm14, %v4747_v40, %v12500_v27  ;;  %v4632_v60 = vsel %vm4618_vm15, %v4629_v5, %v4631_v45  ;;  %v4624_v1 = vsel %vm4618_vm15, %v4621_v31, %v4623_v22  ;;  %vm4781_vm11 = vweird.f32 %v12378_v18 }
 0x82f   : > { %v4749_v26 = vadd.s32 %v4748_v8, %v4744_v52  ;;  %v12532_v43 = vmul.u32.u64.low %v4633_v42, %v4632_v60  ;;  %v12533_v30 = vmul.u32.u64.high %v4633_v42, %v4632_v60, %v12532_v43  ;;  %v4640_v46 = vmul.u32 %v4633_v42, %v4624_v1 }
 0x830   : > { %v12537_v29 = vmul.u32.u64.low %v4633_v42, %v4628_v28  ;;  %v12538_v4 = vmul.u32.u64.high %v4633_v42, %v4628_v28, %v12537_v29  ;;  %v4745_v8 = vadd.s32 %v12499_v50, %v12493_v57 }
 0x831   : > { %v4750_v27 = vadd.s32 536870912, %v4749_v26 }
 0x832   : > { %3893 = vmatmul.mubr.bf16.gmra.mrb[148].mxu0 %v9254_v34  ;;  %vm4642_vm0 = vc.u32 %v12533_v30, %v12537_v29  ;;  %v4643_v47 = vadd.s32 1, %v12538_v4 }
 0x833   : > { %3902 = vmatprep.mubr.bf16.mxu0 %v13531_v13  ;;  %v12543_v9 = vshrl.u32 %v4750_v27, 30 }
 0x834   : > { %v4644_v63 = vsel %vm4642_vm0, %v4643_v47, %v12538_v4  ;;  %vm4677_vm0 = vweird.f32 %v12376_v59 }
 0x835   : > { %v4752_v21 = vshll.u32 %v12543_v9, 30  ;;  %v4645_v34 = vadd.s32 %v4644_v63, %v4640_v46  ;;  %v4641_v63 = vadd.s32 %v12537_v29, %v12533_v30 }
 0x837   : > { %v4753_v19 = vsub.s32 %v4749_v26, %v4752_v21  ;;  %v4646_v52 = vadd.s32 536870912, %v4645_v34 }
 0x839   : > { %v4755_v7 = vsub.s32 0, %v4753_v19  ;;  %v4647_v6 = vshrl.u32 %v4646_v52, 30 }
 0x83a   : > { %3903 = vmatmul.mubr.bf16.gmra.mrb[152].mxu0 %v9255_v16 }
 0x83b   : > { %3912 = vmatprep.mubr.bf16.mxu0 %v13531_v13  ;;  %v8546_v40 = vmin.u32 %v4755_v7, %v4753_v19  ;;  %v4648_v42 = vshll.u32 %v4647_v6, 30 }
 0x83d   : > { %v4757_v45 = vclz %v8546_v40  ;;  %v4649_v11 = vsub.s32 %v4645_v34, %v4648_v42 }
 0x83f   : > { %v8547_v31 = vadd.s32 4294967294, %v4757_v45  ;;  %v4651_v55 = vsub.s32 0, %v4649_v11  ;;  %v13766_v45 = vand.u32 2147483647, %v12378_v18 }
 0x841   : > { %vm8548_vm1 = vcmp.lt.s32.totalorder %v8547_v31, 0  ;;  %v8542_v60 = vmin.u32 %v4651_v55, %v4649_v11  ;;  %vm12560_vm5 = vcmp.le.f32.partialorder %v13766_v45, 0.7853982 }
 0x842   : > { %3913 = vmatmul.mubr.bf16.gmra.mrb[156].mxu0 %v9256_v14  ;;  %v4760_v5 = vsel %vm8548_vm1, 0, %v8547_v31 }
 0x843   : > { %5462 = vmatprep.mubr.bf16.mxu0 %v13531_v13  ;;  %v4761_v22 = vsub.s32 32, %v4760_v5  ;;  %v4765_v28 = vsub.s32 4294967266, %v4760_v5  ;;  %v4762_v26 = vshll.u32 %v4753_v19, %v4760_v5  ;;  %v4653_v4 = vclz %v8542_v60 }
 0x844   : > { %v4671_v60 = vsub.s32 4, %v4647_v6 }
 0x845   : > { %v4763_v43 = vshrl.u32 %v4745_v8, %v4761_v22  ;;  %v4766_v1 = vadd.s32 127, %v4765_v28  ;;  %v8543_v46 = vadd.s32 4294967294, %v4653_v4  ;;  %v4775_v28 = vsub.s32 4, %v12543_v9 }
 0x846   : > { %v13769_v4 = vand.u32 2147483647, %v12376_v59 }
 0x847   : > { %v4764_v27 = vor.u32 %v4763_v43, %v4762_v26  ;;  %v4767_v16 = vshll.u32 %v4766_v1, 23  ;;  %vm8544_vm3 = vcmp.lt.s32.totalorder %v8543_v46, 0  ;;  %v4776_v43 = vsel %vm4691_vm2, %v4775_v28, %v12543_v9 }
 0x848   : > { %v4656_v7 = vsel %vm8544_vm3, 0, %v8543_v46  ;;  %v4778_v1 = vsel %vm12560_vm5, 0, %v4776_v43  ;;  %vm4586_vm7 = vcmp.le.f32.partialorder %v13769_v4, 0.7853982 }
 0x849   : > { %v4768_v47 = vor.u32 4788187, %v4767_v16  ;;  %v4771_v21 = vcvt.s32.f32 %v4764_v27  ;;  %v4657_v52 = vsub.s32 32, %v4656_v7  ;;  %v4658_v14 = vshll.u32 %v4649_v11, %v4656_v7 }
 0x84a   : > { %v4661_v57 = vsub.s32 4294967266, %v4656_v7  ;;  %v4672_v16 = vsel %vm4587_vm6, %v4671_v60, %v4647_v6  ;;  %v4782_v46 = vadd.s32 3, %v4778_v1 }
 0x84b   : > { %v4769_v34 = vand.u32 2147483647, %v4768_v47  ;;  %v4659_v19 = vshrl.u32 %v4641_v63, %v4657_v52 }
 0x84c   : > { %v4662_v40 = vadd.s32 127, %v4661_v57 }
 0x84d   : > { %v4772_v50 = vmul.f32 %v4771_v21, %v4769_v34  ;;  %v4660_v55 = vor.u32 %v4659_v19, %v4658_v14  ;;  %v4783_v21 = vand.u32 3, %v4782_v46  ;;  %v4674_v34 = vsel %vm4586_vm7, 0, %v4672_v16 }
 0x84e   : > { %v4663_v30 = vshll.u32 %v4662_v40, 23  ;;  %v4678_v14 = vadd.s32 3, %v4674_v34 }
 0x84f   : > { %v4773_v31 = vxor.u32 2147483648, %v4772_v50  ;;  %v4667_v8 = vcvt.s32.f32 %v4660_v55  ;;  %vm4788_vm8 = vcmp.eq.s32.totalorder %v4783_v21, 2  ;;  %vm4785_vm9 = vcmp.eq.s32.totalorder %v4783_v21, 0 }
 0x850   : > { %v4664_v5 = vor.u32 4788187, %v4663_v30  ;;  %vm4784_vm10 = vcmp.lt.s32.totalorder %v4783_v21, 2  ;;  %v4679_v40 = vand.u32 3, %v4678_v14 }
 0x851   : > { %v4774_v29 = vsel %vm4691_vm2, %v4773_v31, %v4772_v50 }
 0x852   : > { %v4777_v11 = vsel %vm12560_vm5, %v12378_v18, %v4774_v29  ;;  %v4665_v22 = vand.u32 2147483647, %v4664_v5  ;;  %vm4684_vm13 = vcmp.eq.s32.totalorder %v4679_v40, 2  ;;  %vm4681_vm14 = vcmp.eq.s32.totalorder %v4679_v40, 0 }
 0x853   : > { %9369 = vcosq.f32 %v4777_v11  ;;  %vm4680_vm15 = vcmp.lt.s32.totalorder %v4679_v40, 2 }
 0x854   : > { %9371 = vsinq.f32 %v4777_v11  ;;  %v4668_v26 = vmul.f32 %v4667_v8, %v4665_v22 }
 0x856   : > { %v4669_v27 = vxor.u32 2147483648, %v4668_v26 }
 0x858   : > { %v4670_v47 = vsel %vm4587_vm6, %v4669_v27, %v4668_v26 }
 0x859   : > { %v4673_v63 = vsel %vm4586_vm7, %v12376_v59, %v4670_v47 }
 0x85a   : > { %9373 = vcosq.f32 %v4673_v63 }
 0x85b   : > { %9375 = vsinq.f32 %v4673_v63 }
 0x85d   : > { %v9370_v7 = vpop.eup %9369 }
 0x85e   : > { %v9372_v9 = vpop.eup %9371  ;;  %v4789_v52 = vxor.u32 2147483648, %v9370_v7 }
 0x85f   : > { %v4786_v57 = vxor.u32 2147483648, %v9372_v9 }
 0x860   : > { %v4790_v50 = vsel %vm4788_vm8, %v4789_v52, %v9372_v9 }
 0x861   : > { %v4787_v6 = vsel %vm4785_vm9, %v9370_v7, %v4786_v57 }
 0x862   : > { %v4791_v19 = vsel %vm4784_vm10, %v4787_v6, %v4790_v50 }
 0x863   : > { %v12580_v45 = vsel %vm4781_vm11, nan, %v4791_v19 }
 0x864   : > { %v4808_v42 = vmax.f32 %v12580_v45, 0.0  ;;  %v9374_v31 = vpop.eup %9373 }
 0x865   : > { %v9376_v30 = vpop.eup %9375  ;;  %v4685_v29 = vxor.u32 2147483648, %v9374_v31 }
 0x866   : > { %v12583_v55 = vpack.c.bf16 %v4808_v42, %v4808_v42  ;;  %v4682_v18 = vxor.u32 2147483648, %v9376_v30 }
 0x867   : > { %v4686_v11 = vsel %vm4684_vm13, %v4685_v29, %v9376_v30 }
 0x868   : > { %8638 = vmatprep.subr.msk.bf16.mxu0 %vm1408_vm12, %v12583_v55  ;;  %v4683_v5 = vsel %vm4681_vm14, %v9374_v31, %v4682_v18 }
 0x869   : > { %v4687_v8 = vsel %vm4680_vm15, %v4683_v5, %v4686_v11 }
 0x86a   : > { %v12588_v22 = vsel %vm4677_vm0, nan, %v4687_v8 }
 0x86b   : > { %v4807_v28 = vmax.f32 %v12588_v22, 0.0 }
 0x86d   : > { %v4811_v60 = vpack.c.bf16 %v4807_v28, %v4807_v28 }
 0x86f   : > { %v12592_v26 = vsel %vm1408_vm12, %v4811_v60, 0 }
 0x870   : > { %5433 = vmatpush1.bf16.msra.mxu0 %v12592_v26 }
 0x8dd   : > { %v3844_v43 = vpop.f32.mrb[128].mxu0 }
 0x8de   : > { %v3845_v1 = vadd.f32 %v3844_v43, %v11830_v10  ;;  %v3846_v4 = vpop.f32.mrb[129].mxu0 }
 0x8df   : > { %v3847_v27 = vadd.f32 %v3846_v4, %v11830_v10  ;;  %v3848_v59 = vpop.f32.mrb[130].mxu0 }
 0x8e0   : > { %v3849_v16 = vadd.f32 %v3848_v59, %v11852_v17  ;;  %v3850_v46 = vpop.f32.mrb[131].mxu0  ;;  %v3924_v21 = vmax.f32 %v3845_v1, 0.0 }
 0x8e1   : > { %v3851_v47 = vadd.f32 %v3850_v46, %v11852_v17  ;;  %v3925_v34 = vmax.f32 %v3847_v27, 0.0 }
 0x8e2   : > { %v3926_v63 = vmax.f32 %v3849_v16, 0.0 }
 0x8e3   : > { %v3927_v7 = vmax.f32 %v3851_v47, 0.0 }
 0x8e4   : > { %v3956_v9 = vpack.c.bf16 %v3926_v63, %v3924_v21 }
 0x8e5   : > { %v3957_v52 = vpack.c.bf16 %v3927_v7, %v3925_v34  ;;  %v3854_v14 = vpop.f32.mrb[132].mxu0 }
 0x8e6   : > { %v3855_v57 = vadd.f32 %v3854_v14, %v11844_v53  ;;  %v3856_v50 = vpop.f32.mrb[133].mxu0 }
 0x8e7   : > { %v3857_v6 = vadd.f32 %v3856_v50, %v11844_v53  ;;  %v3858_v19 = vpop.f32.mrb[134].mxu0  ;;  %3982 = vmatprep.subr.bf16.mxu1 %v3957_v52 }
 0x8e8   : > { %v3859_v10 = vadd.f32 %v3858_v19, %v11854_v37  ;;  %v3860_v40 = vpop.f32.mrb[135].mxu0  ;;  %3983 = vmatpush1.bf16.msra.mxu1 %v3956_v9  ;;  %v3928_v42 = vmax.f32 %v3855_v57, 0.0 }
 0x8e9   : > { %v3861_v17 = vadd.f32 %v3860_v40, %v11854_v37  ;;  %v3929_v30 = vmax.f32 %v3857_v6, 0.0 }
 0x8ea   : > { %v3930_v31 = vmax.f32 %v3859_v10, 0.0 }
 0x8eb   : > { %v3931_v29 = vmax.f32 %v3861_v17, 0.0 }
 0x8ec   : > { %v3958_v18 = vpack.c.bf16 %v3930_v31, %v3928_v42 }
 0x8ed   : > { %v3959_v11 = vpack.c.bf16 %v3931_v29, %v3929_v30  ;;  %v3864_v5 = vpop.f32.mrb[136].mxu0 }
 0x8ee   : > { %v3865_v8 = vadd.f32 %v3864_v5, %v11866_v15  ;;  %v3866_v28 = vpop.f32.mrb[137].mxu0 }
 0x8ef   : > { %v3867_v53 = vadd.f32 %v3866_v28, %v11866_v15  ;;  %v3868_v60 = vpop.f32.mrb[138].mxu0  ;;  %3984 = vmatprep.subr.bf16.mxu1 %v3959_v11 }
 0x8f0   : > { %v3869_v43 = vadd.f32 %v3868_v60, %v11868_v41  ;;  %v3870_v1 = vpop.f32.mrb[139].mxu0  ;;  %3985 = vmatpush1.bf16.msra.mxu1 %v3958_v18  ;;  %v3932_v4 = vmax.f32 %v3865_v8, 0.0 }
 0x8f1   : > { %v3871_v37 = vadd.f32 %v3870_v1, %v11868_v41  ;;  %v3933_v59 = vmax.f32 %v3867_v53, 0.0 }
 0x8f2   : > { %v3934_v27 = vmax.f32 %v3869_v43, 0.0 }
 0x8f3   : > { %v3935_v16 = vmax.f32 %v3871_v37, 0.0 }
 0x8f4   : > { %v3960_v46 = vpack.c.bf16 %v3934_v27, %v3932_v4 }
 0x8f5   : > { %v3961_v47 = vpack.c.bf16 %v3935_v16, %v3933_v59  ;;  %v3874_v21 = vpop.f32.mrb[140].mxu0 }
 0x8f6   : > { %v3875_v63 = vadd.f32 %v3874_v21, %v11877_v49  ;;  %v3876_v34 = vpop.f32.mrb[141].mxu0 }
 0x8f7   : > { %v3877_v15 = vadd.f32 %v3876_v34, %v11877_v49  ;;  %v3878_v7 = vpop.f32.mrb[142].mxu0  ;;  %3986 = vmatprep.subr.bf16.mxu1 %v3961_v47 }
 0x8f8   : > { %v3879_v9 = vadd.f32 %v3878_v7, %v11882_v3  ;;  %v3880_v52 = vpop.f32.mrb[143].mxu0  ;;  %3987 = vmatpush1.bf16.msra.mxu1 %v3960_v46  ;;  %v3936_v14 = vmax.f32 %v3875_v63, 0.0 }
 0x8f9   : > { %v3881_v41 = vadd.f32 %v3880_v52, %v11882_v3  ;;  %v3937_v50 = vmax.f32 %v3877_v15, 0.0 }
 0x8fa   : > { %v3938_v57 = vmax.f32 %v3879_v9, 0.0 }
 0x8fb   : > { %v3939_v6 = vmax.f32 %v3881_v41, 0.0 }
 0x8fc   : > { %v3962_v19 = vpack.c.bf16 %v3938_v57, %v3936_v14 }
 0x8fd   : > { %v3963_v10 = vpack.c.bf16 %v3939_v6, %v3937_v50  ;;  %v3884_v40 = vpop.f32.mrb[144].mxu0 }
 0x8fe   : > { %v3885_v17 = vadd.f32 %v3884_v40, %v11896_v24  ;;  %v3886_v42 = vpop.f32.mrb[145].mxu0 }
 0x8ff   : > { %v3887_v49 = vadd.f32 %v3886_v42, %v11896_v24  ;;  %v3888_v31 = vpop.f32.mrb[146].mxu0  ;;  %3988 = vmatprep.subr.bf16.mxu1 %v3963_v10 }
 0x900   : > { %v3889_v30 = vadd.f32 %v3888_v31, %v11898_v20  ;;  %v3890_v29 = vpop.f32.mrb[147].mxu0  ;;  %3989 = vmatpush1.bf16.msra.mxu1 %v3962_v19  ;;  %v3940_v18 = vmax.f32 %v3885_v17, 0.0 }
 0x901   : > { %v3891_v3 = vadd.f32 %v3890_v29, %v11898_v20  ;;  %v3941_v5 = vmax.f32 %v3887_v49, 0.0 }
 0x902   : > { %v3942_v11 = vmax.f32 %v3889_v30, 0.0 }
 0x903   : > { %v3943_v8 = vmax.f32 %v3891_v3, 0.0 }
 0x904   : > { %v3964_v28 = vpack.c.bf16 %v3942_v11, %v3940_v18 }
 0x905   : > { %v3965_v53 = vpack.c.bf16 %v3943_v8, %v3941_v5  ;;  %v3894_v60 = vpop.f32.mrb[148].mxu0 }
 0x906   : > { %v3895_v43 = vadd.f32 %v3894_v60, %v11907_v54  ;;  %v3896_v1 = vpop.f32.mrb[149].mxu0  ;;  %v13771_v60 = vpack.c.bf16 %v11257_v39, %v11250_v61  ;;  %v9258_v61 = vld [vmem:[%s13289_s5 + $0xc8] sm:$0xff]   ;;  %v9259_v39 = vld [vmem:[%s13289_s5 + $0xd0] sm:$0xff]  }
 0x907   : > { %v3897_v24 = vadd.f32 %v3896_v1, %v11907_v54  ;;  %v3898_v37 = vpop.f32.mrb[150].mxu0  ;;  %3990 = vmatprep.subr.bf16.mxu1 %v3965_v53  ;;  %v4801_v53 = vpack.c.bf16 %v12588_v22, %v12588_v22  ;;  %v9262_v22 = vld [vmem:[%s13289_s5 + $0xe8] sm:$0xff]   ;;  %v9263_v1 = vld [vmem:[%s13289_s5 + $0xf0] sm:$0xff]  }
 0x908   : > { %v3899_v4 = vadd.f32 %v3898_v37, %v11912_v38  ;;  %v3900_v27 = vpop.f32.mrb[151].mxu0  ;;  %3991 = vmatpush1.bf16.msra.mxu1 %v3964_v28  ;;  %v3944_v59 = vmax.f32 %v3895_v43, 0.0  ;;  %v13770_v28 = vpack.c.bf16 %v11275_v62, %v11273_v12  ;;  %v9257_v12 = vld [vmem:[%s13289_s5 + $0xc0] sm:$0xff]   ;;  %v9260_v62 = vld [vmem:[%s13289_s5 + $0xd8] sm:$0xff]  }
 0x909   : > { %v3901_v20 = vadd.f32 %v3900_v27, %v11912_v38  ;;  %v3945_v46 = vmax.f32 %v3897_v24, 0.0  ;;  %v5031_v43 = vsel %vm1408_vm12, %v4801_v53, 0  ;;  %v9264_v24 = vld [vmem:[%s13289_s5 + $0xf8] sm:$0xff]   ;;  %v9265_v37 = vld [vmem:[%s13289_s5 + $0x100] sm:$0xff]   ;;  %v9267_v27 = vld [vmem:[%s13289_s5 + $0x110] sm:$0xff]  }
 0x90a   : > { %v3946_v16 = vmax.f32 %v3899_v4, 0.0  ;;  %8639 = vmatmul.mubr.msk.bf16.vlgmr.msra.gmra.mrb[160].mxu0 %vm1383_vm4, %v9265_v37  ;;  %v9266_v4 = vld [vmem:[%s13289_s5 + $0x108] sm:$0xff]  }
 0x90b   : > { %v3947_v47 = vmax.f32 %v3901_v20, 0.0  ;;  %5472 = vmatprep.mubr.bf16.mxu0 %v13531_v13  ;;  %v9268_v20 = vld [vmem:[%s13289_s5 + $0x118] sm:$0xff]  }
 0x90c   : > { %v3966_v21 = vpack.c.bf16 %v3946_v16, %v3944_v59  ;;  %v9269_v59 = vld [vmem:[%s13289_s5 + $0x120] sm:$0xff]   ;;  %v9270_v16 = vld [vmem:[%s13289_s5 + $0x128] sm:$0xff]  }
 0x90d   : > { %v3967_v63 = vpack.c.bf16 %v3947_v47, %v3945_v46  ;;  %v3904_v34 = vpop.f32.mrb[152].mxu0  ;;  %v9271_v46 = vld [vmem:[%s13289_s5 + $0x130] sm:$0xff]   ;;  %v9272_v47 = vld [vmem:[%s13289_s5 + $0x138] sm:$0xff]  }
 0x90e   : > { %v3905_v15 = vadd.f32 %v3904_v34, %v11923_v56  ;;  %v3906_v7 = vpop.f32.mrb[153].mxu0 }
 0x90f   : > { %v3907_v54 = vadd.f32 %v3906_v7, %v11923_v56  ;;  %v3908_v9 = vpop.f32.mrb[154].mxu0  ;;  %3992 = vmatprep.subr.bf16.mxu1 %v3967_v63 }
 0x910   : > { %v3909_v52 = vadd.f32 %v3908_v9, %v11925_v25  ;;  %v3910_v41 = vpop.f32.mrb[155].mxu0  ;;  %3993 = vmatpush1.bf16.msra.mxu1 %v3966_v21  ;;  %v3948_v14 = vmax.f32 %v3905_v15, 0.0  ;;  %v13772_v21 = vld [vmem:[#allocation7_spill] sm:$0xff] }
 0x911   : > { %v3911_v38 = vadd.f32 %v3910_v41, %v11925_v25  ;;  %v3949_v50 = vmax.f32 %v3907_v54, 0.0  ;;  %v3981_v63 = vrot.slane %v11949_v58, %v13772_v21 }
 0x912   : > { %v3950_v57 = vmax.f32 %v3909_v52, 0.0  ;;  %8640 = vmatmul.mubr.msk.bf16.gmra.mrb[164].mxu0 %vm1383_vm4, %v9266_v4 }
 0x913   : > { %v3951_v6 = vmax.f32 %v3911_v38, 0.0  ;;  %5482 = vmatprep.mubr.bf16.mxu0 %v13531_v13 }
 0x914   : > { %v3968_v19 = vpack.c.bf16 %v3950_v57, %v3948_v14 }
 0x915   : > { %v3969_v10 = vpack.c.bf16 %v3951_v6, %v3949_v50  ;;  %v3914_v40 = vpop.f32.mrb[156].mxu0 }
 0x916   : > { %v3915_v17 = vadd.f32 %v3914_v40, %v11933_v51  ;;  %v3916_v42 = vpop.f32.mrb[157].mxu0 }
 0x917   : > { %v3917_v56 = vadd.f32 %v3916_v42, %v11933_v51  ;;  %v3918_v49 = vpop.f32.mrb[158].mxu0  ;;  %3994 = vmatprep.subr.bf16.mxu1 %v3969_v10  ;;  %v3923_v51 = vld [vmem:[%s13292_s8] sm:$0x1] }
 0x918   : > { %v3919_v31 = vadd.f32 %v3918_v49, %v11938_v35  ;;  %v3920_v30 = vpop.f32.mrb[159].mxu0  ;;  %3995 = vmatpush1.bf16.msra.mxu1 %v3968_v19  ;;  %v3952_v29 = vmax.f32 %v3915_v17, 0.0 }
 0x919   : > { %v3921_v25 = vadd.f32 %v3920_v30, %v11938_v35  ;;  %v3953_v18 = vmax.f32 %v3917_v56, 0.0  ;;  %v4802_v35 = vpack.c.bf16 %v12580_v45, %v12580_v45  ;;  %v9261_v45 = vld [vmem:[%s13289_s5 + $0xe0] sm:$0xff]  }
 0x91a   : > { %v3954_v3 = vmax.f32 %v3919_v31, 0.0  ;;  %8641 = vmatmul.mubr.msk.bf16.gmra.mrb[168].mxu0 %vm1383_vm4, %v9267_v27 }
 0x91b   : > { %v3955_v11 = vmax.f32 %v3921_v25, 0.0  ;;  %5492 = vmatprep.mubr.bf16.mxu0 %v13531_v13 }
 0x91c   : > { %v3970_v5 = vpack.c.bf16 %v3954_v3, %v3952_v29 }
 0x91d   : > { %v3971_v8 = vpack.c.bf16 %v3955_v11, %v3953_v18 }
 0x91f   : > { %3996 = vmatprep.subr.bf16.mxu1 %v3971_v8 }
 0x920   : > { %3997 = vmatpush1.bf16.msra.mxu1 %v3970_v5 }
 0x921   : > { %5036 = vmatprep.subr.bf16.mxu1 %v13770_v28 }
 0x922   : > { %8642 = vmatmul.mubr.msk.bf16.gmra.mrb[172].mxu0 %vm1383_vm4, %v9268_v20 }
 0x923   : > { %4015 = vmatmul.mubr.bf16.vlgmr.msra.gmra.mrb[64].mxu1 %v3923_v51  ;;  %5502 = vmatprep.mubr.bf16.mxu0 %v13531_v13 }
 0x924   : > { %5037 = vmatpush1.bf16.msra.mxu1 %v13771_v60  ;;  %5068 = vmatprep.mubr.bf16.mxu1 %v13531_v13 }
 0x925   : > { %8573 = vmatprep.subr.msk.bf16.mxu1 %vm1408_vm12, %v4802_v35 }
 0x928   : > { %5039 = vmatpush1.bf16.msra.mxu1 %v5031_v43 }
 0x92a   : > { %8643 = vmatmul.mubr.msk.bf16.gmra.mrb[176].mxu0 %vm1383_vm4, %v9269_v59 }
 0x92b   : > { %8574 = vmatmul.mubr.msk.bf16.vlgmr.msra.gmra.mrb[68].mxu1 %vm1383_vm4, %v9257_v12  ;;  %5512 = vmatprep.mubr.bf16.mxu0 %v13531_v13 }
 0x92c   : > { %5078 = vmatprep.mubr.bf16.mxu1 %v13531_v13 }
 0x932   : > { %8644 = vmatmul.mubr.msk.bf16.gmra.mrb[180].mxu0 %vm1383_vm4, %v9270_v16 }
 0x933   : > { %8575 = vmatmul.mubr.msk.bf16.gmra.mrb[72].mxu1 %vm1383_vm4, %v9258_v61  ;;  %5522 = vmatprep.mubr.bf16.mxu0 %v13531_v13 }
 0x934   : > { %5088 = vmatprep.mubr.bf16.mxu1 %v13531_v13 }
 0x93a   : > { %8645 = vmatmul.mubr.msk.bf16.gmra.mrb[184].mxu0 %vm1383_vm4, %v9271_v46 }
 0x93b   : > { %8576 = vmatmul.mubr.msk.bf16.gmra.mrb[76].mxu1 %vm1383_vm4, %v9259_v39  ;;  %5532 = vmatprep.mubr.bf16.mxu0 %v13531_v13 }
 0x93c   : > { %5098 = vmatprep.mubr.bf16.mxu1 %v13531_v13 }
 0x942   : > { %8646 = vmatmul.mubr.msk.bf16.gmra.mrb[188].mxu0 %vm1383_vm4, %v9272_v47 }
 0x943   : > { %8577 = vmatmul.mubr.msk.bf16.gmra.mrb[80].mxu1 %vm1383_vm4, %v9260_v62  ;;  %5623 = vmatprep.mubr.bf16.mxu0 %v13531_v13 }
 0x944   : > { %5108 = vmatprep.mubr.bf16.mxu1 %v13531_v13 }
 0x94b   : > { %8578 = vmatmul.mubr.msk.bf16.gmra.mrb[84].mxu1 %vm1383_vm4, %v9261_v45 }
 0x94c   : > { %5118 = vmatprep.mubr.bf16.mxu1 %v13531_v13 }
 0x953   : > { %8579 = vmatmul.mubr.msk.bf16.gmra.mrb[88].mxu1 %vm1383_vm4, %v9262_v22 }
 0x954   : > { %5128 = vmatprep.mubr.bf16.mxu1 %v13531_v13 }
 0x95b   : > { %8580 = vmatmul.mubr.msk.bf16.gmra.mrb[92].mxu1 %vm1383_vm4, %v9263_v1 }
 0x95c   : > { %5138 = vmatprep.mubr.bf16.mxu1 %v13531_v13 }
 0x963   : > { %8581 = vmatmul.mubr.msk.bf16.gmra.mrb[96].mxu1 %vm1383_vm4, %v9264_v24 }
 0x964   : > { %6236 = vmatprep.mubr.bf16.mxu1 %v13531_v13 }
 0x9f6   : > { %v4016_v34 = vpop.f32.mrb[64].mxu1 }
 0x9f7   : > { %v4017_v15 = vadd.f32 %v4016_v34, %v3981_v63  ;;  %v4018_v7 = vpop.f32.mrb[65].mxu1 }
 0x9f8   : > { %v4019_v54 = vadd.f32 %v4018_v7, %v3981_v63  ;;  %v4020_v9 = vpop.f32.mrb[66].mxu1 }
 0x9f9   : > { %v8523_v52 = vmul.f32 -1.442695, %v4017_v15  ;;  %v4021_v41 = vpop.f32.mrb[67].mxu1 }
 0x9fa   : > { %v8524_v38 = vmul.f32 -1.442695, %v4019_v54 }
 0x9fb   : > { %9377 = vpow2.f32 %v8523_v52 }
 0x9fc   : > { %9379 = vpow2.f32 %v8524_v38 }
 0x9fe   : > { %v5070_v14 = vpop.f32.mrb[68].mxu1 }
 0x9ff   : > { %v5072_v57 = vpop.f32.mrb[69].mxu1 }
 0xa00   : > { %v5074_v50 = vpop.f32.mrb[70].mxu1 }
 0xa01   : > { %v5076_v6 = vpop.f32.mrb[71].mxu1 }
 0xa05   : > { %v9378_v19 = vpop.eup %9377 }
 0xa06   : > { %v9380_v10 = vpop.eup %9379  ;;  %v5080_v40 = vpop.f32.mrb[72].mxu1  ;;  %v4029_v17 = vadd.f32 1.0, %v9378_v19 }
 0xa07   : > { %v5082_v42 = vpop.f32.mrb[73].mxu1  ;;  %v4030_v58 = vadd.f32 1.0, %v9380_v10 }
 0xa08   : > { %v5084_v56 = vpop.f32.mrb[74].mxu1  ;;  %9381 = vrcp.f32 %v4029_v17  ;;  %v13775_v17 = vld [vmem:[#allocation10_spill] sm:$0xff] }
 0xa09   : > { %v5086_v49 = vpop.f32.mrb[75].mxu1  ;;  %9383 = vrcp.f32 %v4030_v58 }
 0xa0e   : > { %v5090_v31 = vpop.f32.mrb[76].mxu1 }
 0xa0f   : > { %v5092_v30 = vpop.f32.mrb[77].mxu1 }
 0xa10   : > { %v5094_v25 = vpop.f32.mrb[78].mxu1 }
 0xa11   : > { %v5096_v29 = vpop.f32.mrb[79].mxu1 }
 0xa12   : > { %v9382_v3 = vpop.eup %9381 }
 0xa13   : > { %v9384_v18 = vpop.eup %9383  ;;  %v12726_v51 = vrot.slane %v9382_v3, %v13772_v21 }
 0xa14   : > { %v12729_v28 = vrot.slane %v9384_v18, %v13772_v21 }
 0xa15   : > { %v4934_v53 = vmul.f32 %v12726_v51, %v11951_v44  ;;  %v4936_v43 = vmul.f32 %v12726_v51, %v11953_v33  ;;  %v4938_v61 = vmul.f32 %v12726_v51, %v11955_v48  ;;  %v4940_v62 = vmul.f32 %v12726_v51, %v11963_v32 }
 0xa16   : > { %v5100_v11 = vpop.f32.mrb[80].mxu1  ;;  %v4935_v60 = vmul.f32 %v12729_v28, %v11951_v44  ;;  %v4937_v12 = vmul.f32 %v12729_v28, %v11953_v33  ;;  %v4939_v39 = vmul.f32 %v12729_v28, %v11955_v48  ;;  %v4941_v45 = vmul.f32 %v12729_v28, %v11963_v32 }
 0xa17   : > { %v5102_v5 = vpop.f32.mrb[81].mxu1  ;;  %v5071_v44 = vadd.f32 %v5070_v14, %v4934_v53  ;;  %v5075_v24 = vadd.f32 %v5074_v50, %v4936_v43  ;;  %v5081_v33 = vadd.f32 %v5080_v40, %v4938_v61  ;;  %v5085_v20 = vadd.f32 %v5084_v56, %v4940_v62  ;;  %v13776_v53 = vld [vmem:[#allocation11_spill] sm:$0xff] }
 0xa18   : > { %v5104_v8 = vpop.f32.mrb[82].mxu1  ;;  %v5073_v1 = vadd.f32 %v5072_v57, %v4935_v60  ;;  %v5077_v37 = vadd.f32 %v5076_v6, %v4937_v12  ;;  %v5083_v27 = vadd.f32 %v5082_v42, %v4939_v39  ;;  %v5087_v59 = vadd.f32 %v5086_v49, %v4941_v45 }
 0xa19   : > { %v12731_v35 = vpop.f32.mrb[83].mxu1  ;;  %v5246_v48 = vadd.f32 %v11971_v36, %v5071_v44  ;;  %v5248_v32 = vadd.f32 %v11973_v23, %v5075_v24  ;;  %v5250_v63 = vadd.f32 %v11991_v0, %v5081_v33  ;;  %v5252_v15 = vadd.f32 %v12005_v2, %v5085_v20  ;;  %v13777_v44 = vld [vmem:[#allocation12_spill] sm:$0xff] }
 0xa1a   : > { %v5247_v46 = vadd.f32 %v11971_v36, %v5073_v1  ;;  %v5249_v47 = vadd.f32 %v11973_v23, %v5077_v37  ;;  %v5251_v34 = vadd.f32 %v11991_v0, %v5083_v27  ;;  %v5253_v7 = vadd.f32 %v12005_v2, %v5087_v59  ;;  %v13773_v23 = vld [vmem:[#allocation8_spill] sm:$0xff]  ;;  %v13774_v0 = vld [vmem:[#allocation9_spill] sm:$0xff] }
 0xa1b   : > { %v5295_v54 = vmax.f32 %v5246_v48, 0.0  ;;  %v5297_v52 = vmax.f32 %v5248_v32, 0.0  ;;  %v5299_v38 = vmax.f32 %v5250_v63, 0.0  ;;  %v5301_v14 = vmax.f32 %v5252_v15, 0.0  ;;  %v13778_v37 = vld [vmem:[#allocation13_spill] sm:$0xff]  ;;  %v13779_v27 = vld [vmem:[#allocation16_spill] sm:$0xff] }
 0xa1c   : > { %v5296_v9 = vmax.f32 %v5247_v46, 0.0  ;;  %v5298_v41 = vmax.f32 %v5249_v47, 0.0  ;;  %v5300_v36 = vmax.f32 %v5251_v34, 0.0  ;;  %v5302_v57 = vmax.f32 %v5253_v7, 0.0  ;;  %v13780_v46 = vld [vmem:[#allocation17_spill] sm:$0xff] }
 0xa1d   : > { %v5327_v50 = vpack.c.bf16 %v5297_v52, %v5295_v54  ;;  %v4942_v6 = vmul.f32 %v12726_v51, %v13773_v23  ;;  %v4943_v19 = vmul.f32 %v12729_v28, %v13773_v23  ;;  %v4944_v10 = vmul.f32 %v12726_v51, %v13774_v0  ;;  %v13781_v54 = vld [vmem:[#allocation14_spill] sm:$0xff] }
 0xa1e   : > { %v12749_v22 = vpop.f32.mrb[84].mxu1  ;;  %v12771_v40 = vpack.c.bf16 %v5301_v14, %v5299_v38  ;;  %v4945_v2 = vmul.f32 %v12729_v28, %v13774_v0  ;;  %v4946_v42 = vmul.f32 %v12726_v51, %v13775_v17  ;;  %v4947_v58 = vmul.f32 %v12729_v28, %v13775_v17 }
 0xa1f   : > { %v12751_v4 = vpop.f32.mrb[85].mxu1  ;;  %v5091_v49 = vadd.f32 %v5090_v31, %v4942_v6  ;;  %v5093_v3 = vadd.f32 %v5092_v30, %v4943_v19  ;;  %v5095_v18 = vadd.f32 %v5094_v25, %v4944_v10  ;;  %v4948_v60 = vmul.f32 %v12726_v51, %v13776_v53 }
 0xa20   : > { %v12753_v16 = vpop.f32.mrb[86].mxu1  ;;  %v5097_v12 = vadd.f32 %v5096_v29, %v4945_v2  ;;  %v5101_v61 = vadd.f32 %v5100_v11, %v4946_v42  ;;  %v5103_v39 = vadd.f32 %v5102_v5, %v4947_v58  ;;  %v4949_v62 = vmul.f32 %v12729_v28, %v13776_v53 }
 0xa21   : > { %v12759_v21 = vpop.f32.mrb[87].mxu1  ;;  %v5254_v1 = vadd.f32 %v13777_v44, %v5091_v49  ;;  %v5255_v24 = vadd.f32 %v13777_v44, %v5093_v3  ;;  %v5256_v33 = vadd.f32 %v13778_v37, %v5095_v18  ;;  %v5105_v31 = vadd.f32 %v5104_v8, %v4948_v60  ;;  %v13783_v18 = vld [vmem:[#allocation18_spill] sm:$0xff]  ;;  %v13784_v60 = vld [vmem:[#allocation20_spill] sm:$0xff] }
 0xa22   : > { %v5257_v25 = vadd.f32 %v13778_v37, %v5097_v12  ;;  %v5258_v20 = vadd.f32 %v13779_v27, %v5101_v61  ;;  %v5259_v29 = vadd.f32 %v13779_v27, %v5103_v39  ;;  %v5107_v11 = vadd.f32 %v12731_v35, %v4949_v62  ;;  %v13782_v35 = vld [vmem:[#allocation15_spill] sm:$0xff] }
 0xa23   : > { %v5303_v5 = vmax.f32 %v5254_v1, 0.0  ;;  %v5304_v59 = vmax.f32 %v5255_v24, 0.0  ;;  %v5305_v48 = vmax.f32 %v5256_v33, 0.0  ;;  %v5260_v32 = vadd.f32 %v13780_v46, %v5105_v31 }
 0xa24   : > { %v5306_v47 = vmax.f32 %v5257_v25, 0.0  ;;  %v5307_v63 = vmax.f32 %v5258_v20, 0.0  ;;  %v5308_v34 = vmax.f32 %v5259_v29, 0.0  ;;  %v5261_v15 = vadd.f32 %v13780_v46, %v5107_v11  ;;  %v13787_v25 = vld [vmem:[#allocation24_spill] sm:$0xff]  ;;  %v13788_v11 = vld [vmem:[#allocation25_spill] sm:$0xff] }
 0xa25   : > { %v5331_v8 = vpack.c.bf16 %v5305_v48, %v5303_v5  ;;  %v5309_v7 = vmax.f32 %v5260_v32, 0.0  ;;  %v4950_v52 = vmul.f32 %v12726_v51, %v13781_v54  ;;  %v4951_v38 = vmul.f32 %v12729_v28, %v13781_v54 }
 0xa26   : > { %v5120_v56 = vpop.f32.mrb[88].mxu1  ;;  %v5310_v14 = vmax.f32 %v5261_v15, 0.0  ;;  %v4952_v23 = vmul.f32 %v12726_v51, %v13782_v35  ;;  %v5328_v6 = vpack.c.bf16 %v5298_v41, %v5296_v9  ;;  %v4953_v19 = vmul.f32 %v12729_v28, %v13782_v35 }
 0xa27   : > { %v5122_v43 = vpop.f32.mrb[89].mxu1  ;;  %v12800_v10 = vpack.c.bf16 %v5309_v7, %v5307_v63  ;;  %v5111_v2 = vadd.f32 %v12749_v22, %v4950_v52  ;;  %v5113_v17 = vadd.f32 %v12751_v4, %v4951_v38  ;;  %v5330_v42 = vpack.c.bf16 %v5302_v57, %v5300_v36  ;;  %v13785_v4 = vld [vmem:[#allocation19_spill] sm:$0xff]  ;;  %v13786_v57 = vld [vmem:[#allocation21_spill] sm:$0xff] }
 0xa28   : > { %v5124_v45 = vpop.f32.mrb[90].mxu1  ;;  %v5115_v49 = vadd.f32 %v12753_v16, %v4952_v23  ;;  %5591 = vmatprep.subr.bf16.mxu0 %v5328_v6  ;;  %v5117_v3 = vadd.f32 %v12759_v21, %v4953_v19  ;;  %v4954_v9 = vmul.f32 %v12726_v51, %v13783_v18  ;;  %v5332_v41 = vpack.c.bf16 %v5306_v47, %v5304_v59  ;;  %v13790_v52 = vld [vmem:[#allocation23_spill] sm:$0xff]  ;;  %v13792_v19 = vld [vmem:[#allocation28_spill] sm:$0xff] }
 0xa29   : > { %v5126_v30 = vpop.f32.mrb[91].mxu1  ;;  %v5262_v12 = vadd.f32 %v13784_v60, %v5111_v2  ;;  %v5263_v61 = vadd.f32 %v13784_v60, %v5113_v17  ;;  %5592 = vmatpush1.bf16.msra.mxu0 %v5327_v50  ;;  %v4955_v22 = vmul.f32 %v12729_v28, %v13783_v18  ;;  %v4956_v36 = vmul.f32 %v12726_v51, %v13785_v4 }
 0xa2a   : > { %v5264_v39 = vadd.f32 %v13786_v57, %v5115_v49  ;;  %v5265_v21 = vadd.f32 %v13786_v57, %v5117_v3  ;;  %5593 = vmatprep.subr.bf16.mxu0 %v5330_v42  ;;  %v5121_v62 = vadd.f32 %v5120_v56, %v4954_v9  ;;  %v4957_v44 = vmul.f32 %v12729_v28, %v13785_v4  ;;  %v13789_v56 = vld [vmem:[#allocation22_spill] sm:$0xff] }
 0xa2b   : > { %v5311_v1 = vmax.f32 %v5262_v12, 0.0  ;;  %v5312_v24 = vmax.f32 %v5263_v61, 0.0  ;;  %v5123_v37 = vadd.f32 %v5122_v43, %v4955_v22  ;;  %v5125_v50 = vadd.f32 %v5124_v45, %v4956_v36  ;;  %v13793_v12 = vld [vmem:[#allocation27_spill] sm:$0xff]  ;;  %v13794_v22 = vld [vmem:[#allocation29_spill] sm:$0xff] }
 0xa2c   : > { %v5313_v33 = vmax.f32 %v5264_v39, 0.0  ;;  %v5314_v31 = vmax.f32 %v5265_v21, 0.0  ;;  %v5266_v27 = vadd.f32 %v13787_v25, %v5121_v62  ;;  %v5127_v20 = vadd.f32 %v5126_v30, %v4957_v44 }
 0xa2d   : > { %5594 = vmatpush1.bf16.msra.mxu0 %v12771_v40  ;;  %v5267_v29 = vadd.f32 %v13787_v25, %v5123_v37  ;;  %v5268_v5 = vadd.f32 %v13788_v11, %v5125_v50  ;;  %v5334_v59 = vpack.c.bf16 %v5310_v14, %v5308_v34  ;;  %v4958_v48 = vmul.f32 %v12726_v51, %v13789_v56  ;;  %v13791_v14 = vld [vmem:[#allocation26_spill] sm:$0xff] }
 0xa2e   : > { %v5130_v0 = vpop.f32.mrb[92].mxu1  ;;  %v5335_v46 = vpack.c.bf16 %v5313_v33, %v5311_v1  ;;  %v5315_v32 = vmax.f32 %v5266_v27, 0.0  ;;  %5595 = vmatprep.subr.bf16.mxu0 %v5332_v41  ;;  %v5269_v43 = vadd.f32 %v13788_v11, %v5127_v20  ;;  %v5336_v45 = vpack.c.bf16 %v5314_v31, %v5312_v24  ;;  %v13796_v24 = vld [vmem:[#allocation31_spill] sm:$0xff] }
 0xa2f   : > { %v5132_v58 = vpop.f32.mrb[93].mxu1  ;;  %v5316_v63 = vmax.f32 %v5267_v29, 0.0  ;;  %v5317_v15 = vmax.f32 %v5268_v5, 0.0  ;;  %v5131_v30 = vadd.f32 %v5130_v0, %v4958_v48  ;;  %v4959_v40 = vmul.f32 %v12729_v28, %v13789_v56  ;;  %v9273_v5 = vld [vmem:[%s13288_s4 + $0x180] sm:$0xff]   ;;  %v9274_v48 = vld [vmem:[%s13288_s4 + $0x188] sm:$0xff]  }
 0xa30   : > { %v5134_v53 = vpop.f32.mrb[94].mxu1  ;;  %v5318_v54 = vmax.f32 %v5269_v43, 0.0  ;;  %v4960_v34 = vmul.f32 %v12726_v51, %v13790_v52  ;;  %v4961_v38 = vmul.f32 %v12729_v28, %v13790_v52  ;;  %v4962_v35 = vmul.f32 %v12726_v51, %v13791_v14  ;;  %v13798_v56 = vld [vmem:[#allocation64_spill] sm:$0xff]  ;;  %v9279_v43 = vld [vmem:[%s13288_s4 + $0x1b0] sm:$0xff]  }
 0xa31   : > { %v5136_v16 = vpop.f32.mrb[95].mxu1  ;;  %v5337_v6 = vpack.c.bf16 %v5317_v15, %v5315_v32  ;;  %5596 = vmatpush1.bf16.msra.mxu0 %v5331_v8  ;;  %v5270_v2 = vadd.f32 %v13792_v19, %v5131_v30  ;;  %v5133_v0 = vadd.f32 %v5132_v58, %v4959_v40  ;;  %v4963_v17 = vmul.f32 %v12729_v28, %v13791_v14  ;;  %v9278_v32 = vld [vmem:[%s13288_s4 + $0x1a8] sm:$0xff]  }
 0xa32   : > { %5597 = vmatprep.subr.bf16.mxu0 %v5334_v59  ;;  %v5135_v49 = vadd.f32 %v5134_v53, %v4960_v34  ;;  %v5137_v3 = vadd.f32 %v5136_v16, %v4961_v38  ;;  %v5338_v18 = vpack.c.bf16 %v5318_v54, %v5316_v63  ;;  %v4964_v61 = vmul.f32 %v12726_v51, %v13793_v12  ;;  %v13795_v16 = vld [vmem:[#allocation30_spill] sm:$0xff]  ;;  %v13797_v59 = vld [vmem:[#allocation63_spill] sm:$0xff]  ;;  %v13800_v54 = vld [vmem:[#allocation33_spill] sm:$0xff] }
 0xa33   : > { %v5271_v41 = vadd.f32 %v13792_v19, %v5133_v0  ;;  %v4965_v58 = vmul.f32 %v12729_v28, %v13793_v12  ;;  %v5319_v36 = vmax.f32 %v5270_v2, 0.0  ;;  %v5803_v52 = vmul.f32 %v13800_v54, %v12726_v51 }
 0xa34   : > { %v5272_v8 = vadd.f32 %v13794_v22, %v5135_v49  ;;  %v5273_v4 = vadd.f32 %v13794_v22, %v5137_v3  ;;  %v5804_v14 = vmul.f32 %v13800_v54, %v12729_v28 }
 0xa35   : > { %5598 = vmatpush1.bf16.msra.mxu0 %v12800_v10  ;;  %v5320_v53 = vmax.f32 %v5271_v41, 0.0 }
 0xa36   : > { %v5140_v47 = vpop.f32.mrb[96].mxu1  ;;  %5599 = vmatprep.subr.bf16.mxu0 %v5336_v45  ;;  %v5321_v21 = vmax.f32 %v5272_v8, 0.0  ;;  %v5322_v62 = vmax.f32 %v5273_v4, 0.0  ;;  %v9280_v45 = vld [vmem:[%s13288_s4 + $0x1b8] sm:$0xff]  }
 0xa37   : > { %v5142_v7 = vpop.f32.mrb[97].mxu1  ;;  %v5141_v9 = vadd.f32 %v5140_v47, %v4962_v35  ;;  %v13799_v47 = vld [vmem:[#allocation32_spill] sm:$0xff] }
 0xa38   : > { %v5144_v23 = vpop.f32.mrb[98].mxu1  ;;  %v5143_v60 = vadd.f32 %v5142_v7, %v4963_v17  ;;  %v5339_v50 = vpack.c.bf16 %v5321_v21, %v5319_v36  ;;  %v5340_v31 = vpack.c.bf16 %v5322_v62, %v5320_v53  ;;  %v5801_v63 = vmul.f32 %v13799_v47, %v12726_v51  ;;  %v13801_v35 = vld [vmem:[#allocation36_spill] sm:$0xff]  ;;  %v13802_v17 = vld [vmem:[#allocation37_spill] sm:$0xff]  ;;  %v13804_v36 = vld [vmem:[#allocation35_spill] sm:$0xff] }
 0xa39   : > { %v5146_v42 = vpop.f32.mrb[99].mxu1  ;;  %v5274_v57 = vadd.f32 %v13795_v16, %v5141_v9  ;;  %v5145_v39 = vadd.f32 %v5144_v23, %v4964_v61  ;;  %5600 = vmatpush1.bf16.msra.mxu0 %v5335_v46  ;;  %v9275_v46 = vld [vmem:[%s13288_s4 + $0x190] sm:$0xff]   ;;  %v5802_v30 = vmul.f32 %v13799_v47, %v12729_v28  ;;  %v5807_v53 = vmul.f32 %v13804_v36, %v12726_v51  ;;  %v13805_v62 = vld [vmem:[#allocation40_spill] sm:$0xff] }
 0xa3a   : > { %v5275_v44 = vadd.f32 %v13795_v16, %v5143_v60  ;;  %v5147_v1 = vadd.f32 %v5146_v42, %v4965_v58  ;;  %5601 = vmatprep.subr.bf16.mxu0 %v5338_v18  ;;  %v13803_v9 = vld [vmem:[#allocation34_spill] sm:$0xff] }
 0xa3b   : > { %v5276_v37 = vadd.f32 %v13796_v24, %v5145_v39  ;;  %v5323_v25 = vmax.f32 %v5274_v57, 0.0  ;;  %v5805_v41 = vmul.f32 %v13803_v9, %v12726_v51  ;;  %v5806_v22 = vmul.f32 %v13803_v9, %v12729_v28  ;;  %v13812_v9 = vld [vmem:[#allocation43_spill] sm:$0xff] }
 0xa3c   : > { %v5277_v33 = vadd.f32 %v13796_v24, %v5147_v1  ;;  %v5324_v27 = vmax.f32 %v5275_v44, 0.0  ;;  %v5808_v39 = vmul.f32 %v13804_v36, %v12729_v28 }
 0xa3d   : > { %v5325_v10 = vmax.f32 %v5276_v37, 0.0  ;;  %5602 = vmatpush1.bf16.msra.mxu0 %v5337_v6 }
 0xa3e   : > { %v5326_v20 = vmax.f32 %v5277_v33, 0.0  ;;  %5603 = vmatprep.subr.bf16.mxu0 %v5340_v31  ;;  %v13806_v33 = vld [vmem:[#allocation41_spill] sm:$0xff] }
 0xa3f   : > { %v5341_v29 = vpack.c.bf16 %v5325_v10, %v5323_v25 }
 0xa40   : > { %v5342_v11 = vpack.c.bf16 %v5326_v20, %v5324_v27  ;;  %v13807_v20 = vld [vmem:[#allocation38_spill] sm:$0xff] }
 0xa41   : > { %5604 = vmatpush1.bf16.msra.mxu0 %v5339_v50 }
 0xa42   : > { %5605 = vmatprep.subr.bf16.mxu0 %v5342_v11 }
 0xa45   : > { %5606 = vmatpush1.bf16.msra.mxu0 %v5341_v29  ;;  %v5809_v29 = vmul.f32 %v13807_v20, %v12726_v51 }
 0xa46   : > { %6786 = vmatprep.subr.bf16.mxu0 %v13797_v59 }
 0xa48   : > { %5624 = vmatmul.mubr.bf16.vlgmr.msra.gmra.mrb[160].mxu0 %v9273_v5 }
 0xa49   : > { %6787 = vmatpush1.bf16.msra.mxu0 %v13798_v56  ;;  %5633 = vmatprep.mubr.bf16.mxu0 %v13531_v13  ;;  %v5810_v56 = vmul.f32 %v13807_v20, %v12729_v28  ;;  %v13816_v20 = vld [vmem:[#allocation47_spill] sm:$0xff] }
 0xa4a   : > { %8807 = vmatprep.subr.msk.bf16.mxu0 %vm1408_vm12, %v12583_v55  ;;  %v9276_v55 = vld [vmem:[%s13288_s4 + $0x198] sm:$0xff]  }
 0xa4d   : > { %6789 = vmatpush1.bf16.msra.mxu0 %v12592_v26  ;;  %v9277_v26 = vld [vmem:[%s13288_s4 + $0x1a0] sm:$0xff]  }
 0xa50   : > { %5634 = vmatmul.mubr.bf16.gmra.mrb[164].mxu0 %v9274_v48 }
 0xa51   : > { %5643 = vmatprep.mubr.bf16.mxu0 %v13531_v13 }
 0xa58   : > { %5644 = vmatmul.mubr.bf16.gmra.mrb[168].mxu0 %v9275_v46 }
 0xa59   : > { %5653 = vmatprep.mubr.bf16.mxu0 %v13531_v13 }
 0xa60   : > { %5654 = vmatmul.mubr.bf16.gmra.mrb[172].mxu0 %v9276_v55 }
 0xa61   : > { %5663 = vmatprep.mubr.bf16.mxu0 %v13531_v13 }
 0xa68   : > { %5664 = vmatmul.mubr.bf16.gmra.mrb[176].mxu0 %v9277_v26  ;;  %v13808_v26 = vld [vmem:[#allocation39_spill] sm:$0xff] }
 0xa69   : > { %5673 = vmatprep.mubr.bf16.mxu0 %v13531_v13  ;;  %v5812_v47 = vmul.f32 %v13808_v26, %v12729_v28 }
 0xa70   : > { %5674 = vmatmul.mubr.bf16.gmra.mrb[180].mxu0 %v9278_v32  ;;  %v5811_v32 = vmul.f32 %v13808_v26, %v12726_v51 }
 0xa71   : > { %5683 = vmatprep.mubr.bf16.mxu0 %v13531_v13 }
 0xa78   : > { %5684 = vmatmul.mubr.bf16.gmra.mrb[184].mxu0 %v9279_v43 }
 0xa79   : > { %5693 = vmatprep.mubr.bf16.mxu0 %v13531_v13 }
 0xa80   : > { %5694 = vmatmul.mubr.bf16.gmra.mrb[188].mxu0 %v9280_v45 }
 0xa81   : > { %6818 = vmatprep.mubr.bf16.mxu0 %v13531_v13 }
 0xb1b   : > { %v5625_v15 = vpop.f32.mrb[160].mxu0 }
 0xb1c   : > { %v5833_v40 = vadd.f32 %v5801_v63, %v5625_v15  ;;  %v5627_v7 = vpop.f32.mrb[161].mxu0  ;;  %v13809_v15 = vld [vmem:[#allocation44_spill] sm:$0xff] }
 0xb1d   : > { %v5834_v34 = vadd.f32 %v5802_v30, %v5627_v7  ;;  %v5629_v38 = vpop.f32.mrb[162].mxu0 }
 0xb1e   : > { %v5962_v23 = vadd.f32 %v13801_v35, %v5833_v40  ;;  %v5835_v6 = vadd.f32 %v5803_v52, %v5629_v38  ;;  %v5631_v19 = vpop.f32.mrb[163].mxu0 }
 0xb1f   : > { %v5963_v2 = vadd.f32 %v13801_v35, %v5834_v34  ;;  %v5836_v0 = vadd.f32 %v5804_v14, %v5631_v19  ;;  %v13810_v34 = vld [vmem:[#allocation45_spill] sm:$0xff] }
 0xb20   : > { %v5964_v42 = vadd.f32 %v13802_v17, %v5835_v6  ;;  %v6011_v3 = vmax.f32 %v5962_v23, 0.0  ;;  %v13811_v6 = vld [vmem:[#allocation42_spill] sm:$0xff] }
 0xb21   : > { %v5965_v49 = vadd.f32 %v13802_v17, %v5836_v0  ;;  %v6012_v60 = vmax.f32 %v5963_v2, 0.0  ;;  %v5813_v19 = vmul.f32 %v13811_v6, %v12726_v51 }
 0xb22   : > { %v6013_v18 = vmax.f32 %v5964_v42, 0.0  ;;  %v5814_v42 = vmul.f32 %v13811_v6, %v12729_v28  ;;  %v13820_v6 = vld [vmem:[#allocation51_spill] sm:$0xff] }
 0xb23   : > { %v6014_v12 = vmax.f32 %v5965_v49, 0.0  ;;  %v5635_v61 = vpop.f32.mrb[164].mxu0 }
 0xb24   : > { %v6043_v8 = vpack.c.bf16 %v6013_v18, %v6011_v3  ;;  %v5837_v4 = vadd.f32 %v5805_v41, %v5635_v61  ;;  %v5637_v58 = vpop.f32.mrb[165].mxu0  ;;  %v5815_v41 = vmul.f32 %v13812_v9, %v12726_v51  ;;  %v5816_v61 = vmul.f32 %v13812_v9, %v12729_v28 }
 0xb25   : > { %v5838_v16 = vadd.f32 %v5806_v22, %v5637_v58  ;;  %v5639_v57 = vpop.f32.mrb[166].mxu0  ;;  %v6044_v21 = vpack.c.bf16 %v6014_v12, %v6012_v60 }
 0xb26   : > { %v5966_v44 = vadd.f32 %v13805_v62, %v5837_v4  ;;  %v5839_v1 = vadd.f32 %v5807_v53, %v5639_v57  ;;  %v5641_v24 = vpop.f32.mrb[167].mxu0  ;;  %v13814_v57 = vld [vmem:[#allocation49_spill] sm:$0xff] }
 0xb27   : > { %v5967_v37 = vadd.f32 %v13805_v62, %v5838_v16  ;;  %v5840_v50 = vadd.f32 %v5808_v39, %v5641_v24  ;;  %6204 = vmatprep.subr.bf16.mxu1 %v6044_v21 }
 0xb28   : > { %v5968_v31 = vadd.f32 %v13806_v33, %v5839_v1  ;;  %6205 = vmatpush1.bf16.msra.mxu1 %v6043_v8  ;;  %v6015_v10 = vmax.f32 %v5966_v44, 0.0  ;;  %v13813_v8 = vld [vmem:[#allocation48_spill] sm:$0xff]  ;;  %v13815_v1 = vld [vmem:[#allocation46_spill] sm:$0xff] }
 0xb29   : > { %v5969_v25 = vadd.f32 %v13806_v33, %v5840_v50  ;;  %v6016_v11 = vmax.f32 %v5967_v37, 0.0  ;;  %v5817_v24 = vmul.f32 %v13815_v1, %v12726_v51 }
 0xb2a   : > { %v6017_v27 = vmax.f32 %v5968_v31, 0.0  ;;  %v5818_v31 = vmul.f32 %v13815_v1, %v12729_v28  ;;  %v13824_v1 = vld [vmem:[#allocation55_spill] sm:$0xff] }
 0xb2b   : > { %v6018_v5 = vmax.f32 %v5969_v25, 0.0  ;;  %v5645_v59 = vpop.f32.mrb[168].mxu0 }
 0xb2c   : > { %v6045_v48 = vpack.c.bf16 %v6017_v27, %v6015_v10  ;;  %v5841_v46 = vadd.f32 %v5809_v29, %v5645_v59  ;;  %v5647_v55 = vpop.f32.mrb[169].mxu0  ;;  %v5819_v29 = vmul.f32 %v13816_v20, %v12726_v51  ;;  %v5820_v59 = vmul.f32 %v13816_v20, %v12729_v28 }
 0xb2d   : > { %v5842_v43 = vadd.f32 %v5810_v56, %v5647_v55  ;;  %v5649_v45 = vpop.f32.mrb[170].mxu0  ;;  %v6046_v63 = vpack.c.bf16 %v6018_v5, %v6016_v11 }
 0xb2e   : > { %v5970_v30 = vadd.f32 %v13809_v15, %v5841_v46  ;;  %v5843_v40 = vadd.f32 %v5811_v32, %v5649_v45  ;;  %v5651_v7 = vpop.f32.mrb[171].mxu0  ;;  %v13818_v45 = vld [vmem:[#allocation53_spill] sm:$0xff] }
 0xb2f   : > { %v5971_v54 = vadd.f32 %v13809_v15, %v5842_v43  ;;  %v5844_v52 = vadd.f32 %v5812_v47, %v5651_v7  ;;  %6206 = vmatprep.subr.bf16.mxu1 %v6046_v63 }
 0xb30   : > { %v5972_v38 = vadd.f32 %v13810_v34, %v5843_v40  ;;  %6207 = vmatpush1.bf16.msra.mxu1 %v6045_v48  ;;  %v6019_v35 = vmax.f32 %v5970_v30, 0.0  ;;  %v13817_v48 = vld [vmem:[#allocation52_spill] sm:$0xff]  ;;  %v13819_v40 = vld [vmem:[#allocation50_spill] sm:$0xff] }
 0xb31   : > { %v5973_v14 = vadd.f32 %v13810_v34, %v5844_v52  ;;  %v6020_v2 = vmax.f32 %v5971_v54, 0.0  ;;  %v5821_v7 = vmul.f32 %v13819_v40, %v12726_v51 }
 0xb32   : > { %v6021_v23 = vmax.f32 %v5972_v38, 0.0  ;;  %v5822_v38 = vmul.f32 %v13819_v40, %v12729_v28  ;;  %v13828_v40 = vld [vmem:[#allocation59_spill] sm:$0xff] }
 0xb33   : > { %v6022_v0 = vmax.f32 %v5973_v14, 0.0  ;;  %v5655_v17 = vpop.f32.mrb[172].mxu0 }
 0xb34   : > { %v6047_v49 = vpack.c.bf16 %v6021_v23, %v6019_v35  ;;  %v5845_v3 = vadd.f32 %v5813_v19, %v5655_v17  ;;  %v5657_v18 = vpop.f32.mrb[173].mxu0  ;;  %v5823_v19 = vmul.f32 %v13820_v6, %v12726_v51  ;;  %v5824_v17 = vmul.f32 %v13820_v6, %v12729_v28 }
 0xb35   : > { %v5846_v60 = vadd.f32 %v5814_v42, %v5657_v18  ;;  %v5659_v12 = vpop.f32.mrb[174].mxu0  ;;  %v6048_v22 = vpack.c.bf16 %v6022_v0, %v6020_v2 }
 0xb36   : > { %v5974_v4 = vadd.f32 %v13813_v8, %v5845_v3  ;;  %v5847_v58 = vadd.f32 %v5815_v41, %v5659_v12  ;;  %v5661_v36 = vpop.f32.mrb[175].mxu0  ;;  %v13822_v12 = vld [vmem:[#allocation57_spill] sm:$0xff] }
 0xb37   : > { %v5975_v53 = vadd.f32 %v13813_v8, %v5846_v60  ;;  %v5848_v16 = vadd.f32 %v5816_v61, %v5661_v36  ;;  %6208 = vmatprep.subr.bf16.mxu1 %v6048_v22 }
 0xb38   : > { %v5976_v39 = vadd.f32 %v13814_v57, %v5847_v58  ;;  %6209 = vmatpush1.bf16.msra.mxu1 %v6047_v49  ;;  %v6023_v62 = vmax.f32 %v5974_v4, 0.0  ;;  %v13821_v49 = vld [vmem:[#allocation56_spill] sm:$0xff]  ;;  %v13823_v58 = vld [vmem:[#allocation54_spill] sm:$0xff] }
 0xb39   : > { %v5977_v21 = vadd.f32 %v13814_v57, %v5848_v16  ;;  %v6024_v37 = vmax.f32 %v5975_v53, 0.0  ;;  %v5825_v36 = vmul.f32 %v13823_v58, %v12726_v51 }
 0xb3a   : > { %v6025_v44 = vmax.f32 %v5976_v39, 0.0  ;;  %v5826_v39 = vmul.f32 %v13823_v58, %v12729_v28  ;;  %v9286_v58 = vld [vmem:[%s13288_s4 + $0x1e8] sm:$0xff]  }
 0xb3b   : > { %v6026_v50 = vmax.f32 %v5977_v21, 0.0  ;;  %v5665_v33 = vpop.f32.mrb[176].mxu0 }
 0xb3c   : > { %v6049_v25 = vpack.c.bf16 %v6025_v44, %v6023_v62  ;;  %v5849_v10 = vadd.f32 %v5817_v24, %v5665_v33  ;;  %v5667_v27 = vpop.f32.mrb[177].mxu0  ;;  %v5827_v24 = vmul.f32 %v13824_v1, %v12726_v51  ;;  %v5828_v33 = vmul.f32 %v13824_v1, %v12729_v28 }
 0xb3d   : > { %v5850_v11 = vadd.f32 %v5818_v31, %v5667_v27  ;;  %v5669_v5 = vpop.f32.mrb[178].mxu0  ;;  %v6050_v56 = vpack.c.bf16 %v6026_v50, %v6024_v37 }
 0xb3e   : > { %v5978_v46 = vadd.f32 %v13817_v48, %v5849_v10  ;;  %v5851_v55 = vadd.f32 %v5819_v29, %v5669_v5  ;;  %v5671_v26 = vpop.f32.mrb[179].mxu0  ;;  %v13826_v5 = vld [vmem:[#allocation61_spill] sm:$0xff] }
 0xb3f   : > { %v5979_v32 = vadd.f32 %v13817_v48, %v5850_v11  ;;  %v5852_v43 = vadd.f32 %v5820_v59, %v5671_v26  ;;  %6210 = vmatprep.subr.bf16.mxu1 %v6050_v56 }
 0xb40   : > { %v5980_v47 = vadd.f32 %v13818_v45, %v5851_v55  ;;  %6211 = vmatpush1.bf16.msra.mxu1 %v6049_v25  ;;  %v6027_v15 = vmax.f32 %v5978_v46, 0.0  ;;  %v13825_v25 = vld [vmem:[#allocation60_spill] sm:$0xff]  ;;  %v13827_v55 = vld [vmem:[#allocation58_spill] sm:$0xff] }
 0xb41   : > { %v5981_v63 = vadd.f32 %v13818_v45, %v5852_v43  ;;  %v6028_v54 = vmax.f32 %v5979_v32, 0.0  ;;  %v5829_v26 = vmul.f32 %v13827_v55, %v12726_v51 }
 0xb42   : > { %v6029_v30 = vmax.f32 %v5980_v47, 0.0  ;;  %v5830_v47 = vmul.f32 %v13827_v55, %v12729_v28 }
 0xb43   : > { %v6030_v52 = vmax.f32 %v5981_v63, 0.0  ;;  %v5675_v34 = vpop.f32.mrb[180].mxu0 }
 0xb44   : > { %v6051_v14 = vpack.c.bf16 %v6029_v30, %v6027_v15  ;;  %v5853_v35 = vadd.f32 %v5821_v7, %v5675_v34  ;;  %v5677_v23 = vpop.f32.mrb[181].mxu0  ;;  %v5831_v7 = vmul.f32 %v13828_v40, %v12726_v51  ;;  %v5832_v34 = vmul.f32 %v13828_v40, %v12729_v28 }
 0xb45   : > { %v5854_v2 = vadd.f32 %v5822_v38, %v5677_v23  ;;  %v5679_v0 = vpop.f32.mrb[182].mxu0  ;;  %v6052_v42 = vpack.c.bf16 %v6030_v52, %v6028_v54 }
 0xb46   : > { %v5982_v3 = vadd.f32 %v13821_v49, %v5853_v35  ;;  %v5855_v18 = vadd.f32 %v5823_v19, %v5679_v0  ;;  %v5681_v9 = vpop.f32.mrb[183].mxu0  ;;  %v5960_v19 = vpop.permute.xlu0 %5959 }
 0xb47   : > { %v5983_v41 = vadd.f32 %v13821_v49, %v5854_v2  ;;  %v5856_v60 = vadd.f32 %v5824_v17, %v5681_v9  ;;  %6212 = vmatprep.subr.bf16.mxu1 %v6052_v42 }
 0xb48   : > { %v5984_v61 = vadd.f32 %v13822_v12, %v5855_v18  ;;  %6213 = vmatpush1.bf16.msra.mxu1 %v6051_v14  ;;  %v6031_v8 = vmax.f32 %v5982_v3, 0.0  ;;  %v13829_v14 = vld [vmem:[#allocation62_spill] sm:$0xff] }
 0xb49   : > { %v5985_v22 = vadd.f32 %v13822_v12, %v5856_v60  ;;  %v6032_v53 = vmax.f32 %v5983_v41, 0.0  ;;  %v9281_v12 = vld [vmem:[%s13288_s4 + $0x1c0] sm:$0xff]  }
 0xb4a   : > { %v6033_v4 = vmax.f32 %v5984_v61, 0.0  ;;  %v9282_v61 = vld [vmem:[%s13288_s4 + $0x1c8] sm:$0xff]  }
 0xb4b   : > { %v6034_v16 = vmax.f32 %v5985_v22, 0.0  ;;  %v5685_v57 = vpop.f32.mrb[184].mxu0  ;;  %v9283_v22 = vld [vmem:[%s13288_s4 + $0x1d0] sm:$0xff]  }
 0xb4c   : > { %v6053_v21 = vpack.c.bf16 %v6033_v4, %v6031_v8  ;;  %v5857_v62 = vadd.f32 %v5825_v36, %v5685_v57  ;;  %v5687_v44 = vpop.f32.mrb[185].mxu0  ;;  %v9284_v8 = vld [vmem:[%s13288_s4 + $0x1d8] sm:$0xff]   ;;  %v9285_v4 = vld [vmem:[%s13288_s4 + $0x1e0] sm:$0xff]   ;;  %v9287_v36 = vld [vmem:[%s13288_s4 + $0x1f0] sm:$0xff]  }
 0xb4d   : > { %v5858_v37 = vadd.f32 %v5826_v39, %v5687_v44  ;;  %v5689_v50 = vpop.f32.mrb[186].mxu0  ;;  %v6054_v31 = vpack.c.bf16 %v6034_v16, %v6032_v53  ;;  %v9288_v53 = vld [vmem:[%s13288_s4 + $0x1f8] sm:$0xff]   ;;  %v6079_v16 = vpop.permute.xlu1 %6078 }
 0xb4e   : > { %v5986_v10 = vadd.f32 %v13825_v25, %v5857_v62  ;;  %v5859_v27 = vadd.f32 %v5827_v24, %v5689_v50  ;;  %v5691_v20 = vpop.f32.mrb[187].mxu0  ;;  %v6084_v62 = vpop.permute.xlu0 %6083 }
 0xb4f   : > { %v5987_v29 = vadd.f32 %v13825_v25, %v5858_v37  ;;  %v5860_v11 = vadd.f32 %v5828_v33, %v5691_v20  ;;  %6214 = vmatprep.subr.bf16.mxu1 %v6054_v31 }
 0xb50   : > { %v5988_v59 = vadd.f32 %v13826_v5, %v5859_v27  ;;  %6215 = vmatpush1.bf16.msra.mxu1 %v6053_v21  ;;  %v6035_v48 = vmax.f32 %v5986_v10, 0.0 }
 0xb51   : > { %v5989_v56 = vadd.f32 %v13826_v5, %v5860_v11  ;;  %v6036_v32 = vmax.f32 %v5987_v29, 0.0  ;;  %v6089_v20 = vpop.permute.xlu1 %6088 }
 0xb52   : > { %v6037_v46 = vmax.f32 %v5988_v59, 0.0 }
 0xb53   : > { %v6038_v43 = vmax.f32 %v5989_v56, 0.0  ;;  %v5695_v45 = vpop.f32.mrb[188].mxu0  ;;  %v6094_v56 = vpop.permute.xlu0 %6093 }
 0xb54   : > { %v6055_v63 = vpack.c.bf16 %v6037_v46, %v6035_v48  ;;  %v5861_v15 = vadd.f32 %v5829_v26, %v5695_v45  ;;  %v5697_v30 = vpop.f32.mrb[189].mxu0 }
 0xb55   : > { %v5862_v54 = vadd.f32 %v5830_v47, %v5697_v30  ;;  %v5699_v52 = vpop.f32.mrb[190].mxu0  ;;  %v6056_v38 = vpack.c.bf16 %v6038_v43, %v6036_v32  ;;  %v6099_v30 = vpop.permute.xlu1 %6098 }
 0xb56   : > { %v5990_v35 = vadd.f32 %v13829_v14, %v5861_v15  ;;  %v5863_v23 = vadd.f32 %v5831_v7, %v5699_v52  ;;  %v5701_v6 = vpop.f32.mrb[191].mxu0 }
 0xb57   : > { %v5991_v2 = vadd.f32 %v13829_v14, %v5862_v54  ;;  %v5864_v0 = vadd.f32 %v5832_v34, %v5701_v6  ;;  %6216 = vmatprep.subr.bf16.mxu1 %v6056_v38  ;;  %v6104_v34 = vpop.permute.xlu0 %6103 }
 0xb58   : > { %v5992_v17 = vadd.f32 %v5960_v19, %v5863_v23  ;;  %6217 = vmatpush1.bf16.msra.mxu1 %v6055_v63  ;;  %v6039_v49 = vmax.f32 %v5990_v35, 0.0 }
 0xb59   : > { %v5993_v42 = vadd.f32 %v5960_v19, %v5864_v0  ;;  %v6040_v18 = vmax.f32 %v5991_v2, 0.0 }
 0xb5a   : > { %v6041_v3 = vmax.f32 %v5992_v17, 0.0 }
 0xb5b   : > { %v6042_v9 = vmax.f32 %v5993_v42, 0.0 }
 0xb5c   : > { %v6057_v41 = vpack.c.bf16 %v6041_v3, %v6039_v49  ;;  %v6109_v49 = vpop.permute.xlu1 %6108 }
 0xb5d   : > { %v6058_v60 = vpack.c.bf16 %v6042_v9, %v6040_v18 }
 0xb5f   : > { %6218 = vmatprep.subr.bf16.mxu1 %v6058_v60  ;;  %v6114_v60 = vpop.permute.xlu0 %6113 }
 0xb60   : > { %6219 = vmatpush1.bf16.msra.mxu1 %v6057_v41 }
 0xb63   : > { %6237 = vmatmul.mubr.bf16.vlgmr.msra.gmra.mrb[100].mxu1 %v9281_v12 }
 0xb64   : > { %6246 = vmatprep.mubr.bf16.mxu1 %v13531_v13 }
 0xb6b   : > { %6247 = vmatmul.mubr.bf16.gmra.mrb[104].mxu1 %v9282_v61 }
 0xb6c   : > { %6256 = vmatprep.mubr.bf16.mxu1 %v13531_v13 }
 0xb73   : > { %6257 = vmatmul.mubr.bf16.gmra.mrb[108].mxu1 %v9283_v22 }
 0xb74   : > { %6266 = vmatprep.mubr.bf16.mxu1 %v13531_v13 }
 0xb7b   : > { %6267 = vmatmul.mubr.bf16.gmra.mrb[112].mxu1 %v9284_v8 }
 0xb7c   : > { %6276 = vmatprep.mubr.bf16.mxu1 %v13531_v13 }
 0xb83   : > { %6277 = vmatmul.mubr.bf16.gmra.mrb[116].mxu1 %v9285_v4 }
 0xb84   : > { %6286 = vmatprep.mubr.bf16.mxu1 %v13531_v13 }
 0xb8b   : > { %6287 = vmatmul.mubr.bf16.gmra.mrb[120].mxu1 %v9286_v58 }
 0xb8c   : > { %6296 = vmatprep.mubr.bf16.mxu1 %v13531_v13 }
 0xb93   : > { %6297 = vmatmul.mubr.bf16.gmra.mrb[124].mxu1 %v9287_v36 }
 0xb94   : > { %6306 = vmatprep.mubr.bf16.mxu1 %v13531_v13 }
 0xb9b   : > { %6307 = vmatmul.mubr.bf16.gmra.mrb[128].mxu1 %v9288_v53 }
 0xb9c   : > { %6559 = vmatprep.mubr.bf16.mxu1 %v13531_v13 }
 0xc36   : > { %v6238_v57 = vpop.f32.mrb[100].mxu1 }
 0xc37   : > { %v6239_v39 = vadd.f32 %v6238_v57, %v6079_v16  ;;  %v6240_v21 = vpop.f32.mrb[101].mxu1 }
 0xc38   : > { %v6241_v44 = vadd.f32 %v6240_v21, %v6079_v16  ;;  %v6242_v1 = vpop.f32.mrb[102].mxu1 }
 0xc39   : > { %v6243_v24 = vadd.f32 %v6242_v1, %v6084_v62  ;;  %v6244_v37 = vpop.f32.mrb[103].mxu1  ;;  %v6334_v33 = vmax.f32 %v6239_v39, 0.0  ;;  %v6119_v39 = vpop.permute.xlu1 %6118 }
 0xc3a   : > { %v6245_v50 = vadd.f32 %v6244_v37, %v6084_v62  ;;  %v6335_v25 = vmax.f32 %v6241_v44, 0.0 }
 0xc3b   : > { %v6336_v31 = vmax.f32 %v6243_v24, 0.0  ;;  %v6124_v24 = vpop.permute.xlu0 %6123 }
 0xc3c   : > { %v6337_v10 = vmax.f32 %v6245_v50, 0.0 }
 0xc3d   : > { %v6366_v27 = vpack.c.bf16 %v6336_v31, %v6334_v33 }
 0xc3e   : > { %v6367_v29 = vpack.c.bf16 %v6337_v10, %v6335_v25  ;;  %v6248_v11 = vpop.f32.mrb[104].mxu1 }
 0xc3f   : > { %v6249_v5 = vadd.f32 %v6248_v11, %v6089_v20  ;;  %v6250_v59 = vpop.f32.mrb[105].mxu1 }
 0xc40   : > { %v6251_v48 = vadd.f32 %v6250_v59, %v6089_v20  ;;  %v6252_v46 = vpop.f32.mrb[106].mxu1  ;;  %6527 = vmatprep.subr.bf16.mxu1 %v6367_v29 }
 0xc41   : > { %v6253_v55 = vadd.f32 %v6252_v46, %v6094_v56  ;;  %v6254_v26 = vpop.f32.mrb[107].mxu1  ;;  %6528 = vmatpush1.bf16.msra.mxu1 %v6366_v27  ;;  %v6338_v43 = vmax.f32 %v6249_v5, 0.0  ;;  %v6129_v5 = vpop.permute.xlu1 %6128 }
 0xc42   : > { %v6255_v32 = vadd.f32 %v6254_v26, %v6094_v56  ;;  %v6339_v47 = vmax.f32 %v6251_v48, 0.0 }
 0xc43   : > { %v6340_v45 = vmax.f32 %v6253_v55, 0.0  ;;  %v6134_v55 = vpop.permute.xlu0 %6133 }
 0xc44   : > { %v6341_v63 = vmax.f32 %v6255_v32, 0.0 }
 0xc45   : > { %v6368_v15 = vpack.c.bf16 %v6340_v45, %v6338_v43 }
 0xc46   : > { %v6369_v40 = vpack.c.bf16 %v6341_v63, %v6339_v47  ;;  %v6258_v7 = vpop.f32.mrb[108].mxu1 }
 0xc47   : > { %v6259_v54 = vadd.f32 %v6258_v7, %v6099_v30  ;;  %v6260_v52 = vpop.f32.mrb[109].mxu1 }
 0xc48   : > { %v6261_v38 = vadd.f32 %v6260_v52, %v6099_v30  ;;  %v6262_v14 = vpop.f32.mrb[110].mxu1  ;;  %6529 = vmatprep.subr.bf16.mxu1 %v6369_v40 }
 0xc49   : > { %v6263_v35 = vadd.f32 %v6262_v14, %v6104_v34  ;;  %v6264_v23 = vpop.f32.mrb[111].mxu1  ;;  %6530 = vmatpush1.bf16.msra.mxu1 %v6368_v15  ;;  %v6342_v19 = vmax.f32 %v6259_v54, 0.0  ;;  %v6139_v54 = vpop.permute.xlu1 %6138 }
 0xc4a   : > { %v6265_v6 = vadd.f32 %v6264_v23, %v6104_v34  ;;  %v6343_v0 = vmax.f32 %v6261_v38, 0.0 }
 0xc4b   : > { %v6344_v2 = vmax.f32 %v6263_v35, 0.0  ;;  %v6144_v35 = vpop.permute.xlu0 %6143 }
 0xc4c   : > { %v6345_v17 = vmax.f32 %v6265_v6, 0.0 }
 0xc4d   : > { %v6370_v42 = vpack.c.bf16 %v6344_v2, %v6342_v19 }
 0xc4e   : > { %v6371_v3 = vpack.c.bf16 %v6345_v17, %v6343_v0  ;;  %v6268_v18 = vpop.f32.mrb[112].mxu1 }
 0xc4f   : > { %v6269_v9 = vadd.f32 %v6268_v18, %v6109_v49  ;;  %v6270_v41 = vpop.f32.mrb[113].mxu1 }
 0xc50   : > { %v6271_v12 = vadd.f32 %v6270_v41, %v6109_v49  ;;  %v6272_v61 = vpop.f32.mrb[114].mxu1  ;;  %6531 = vmatprep.subr.bf16.mxu1 %v6371_v3 }
 0xc51   : > { %v6273_v22 = vadd.f32 %v6272_v61, %v6114_v60  ;;  %v6274_v8 = vpop.f32.mrb[115].mxu1  ;;  %6532 = vmatpush1.bf16.msra.mxu1 %v6370_v42  ;;  %v6346_v58 = vmax.f32 %v6269_v9, 0.0  ;;  %v6149_v9 = vpop.permute.xlu1 %6148 }
 0xc52   : > { %v6275_v4 = vadd.f32 %v6274_v8, %v6114_v60  ;;  %v6347_v53 = vmax.f32 %v6271_v12, 0.0 }
 0xc53   : > { %v6348_v36 = vmax.f32 %v6273_v22, 0.0  ;;  %v6154_v22 = vpop.permute.xlu0 %6153 }
 0xc54   : > { %v6349_v16 = vmax.f32 %v6275_v4, 0.0 }
 0xc55   : > { %v6372_v57 = vpack.c.bf16 %v6348_v36, %v6346_v58 }
 0xc56   : > { %v6373_v21 = vpack.c.bf16 %v6349_v16, %v6347_v53  ;;  %v6278_v62 = vpop.f32.mrb[116].mxu1 }
 0xc57   : > { %v6279_v44 = vadd.f32 %v6278_v62, %v6119_v39  ;;  %v6280_v1 = vpop.f32.mrb[117].mxu1 }
 0xc58   : > { %v6281_v37 = vadd.f32 %v6280_v1, %v6119_v39  ;;  %v6282_v50 = vpop.f32.mrb[118].mxu1  ;;  %6533 = vmatprep.subr.bf16.mxu1 %v6373_v21  ;;  %v9289_v1 = vld [vmem:[%s13288_s4 + $0x200] sm:$0xff]  }
 0xc59   : > { %v6283_v33 = vadd.f32 %v6282_v50, %v6124_v24  ;;  %v6284_v31 = vpop.f32.mrb[119].mxu1  ;;  %6534 = vmatpush1.bf16.msra.mxu1 %v6372_v57  ;;  %v6350_v10 = vmax.f32 %v6279_v44, 0.0  ;;  %v9292_v50 = vld [vmem:[%s13288_s4 + $0x218] sm:$0xff]  }
 0xc5a   : > { %v6285_v25 = vadd.f32 %v6284_v31, %v6124_v24  ;;  %v6351_v20 = vmax.f32 %v6281_v37, 0.0  ;;  %v9290_v24 = vld [vmem:[%s13288_s4 + $0x208] sm:$0xff]   ;;  %v9291_v37 = vld [vmem:[%s13288_s4 + $0x210] sm:$0xff]  }
 0xc5b   : > { %v6352_v27 = vmax.f32 %v6283_v33, 0.0  ;;  %v9293_v33 = vld [vmem:[%s13288_s4 + $0x220] sm:$0xff]   ;;  %v9294_v31 = vld [vmem:[%s13288_s4 + $0x228] sm:$0xff]  }
 0xc5c   : > { %v6353_v29 = vmax.f32 %v6285_v25, 0.0  ;;  %v9295_v25 = vld [vmem:[%s13288_s4 + $0x230] sm:$0xff]  }
 0xc5d   : > { %v6374_v11 = vpack.c.bf16 %v6352_v27, %v6350_v10  ;;  %v9296_v10 = vld [vmem:[%s13288_s4 + $0x238] sm:$0xff]   ;;  %v9297_v27 = vld [vmem:[%s13289_s5 + $0x140] sm:$0xff]  }
 0xc5e   : > { %v6375_v59 = vpack.c.bf16 %v6353_v29, %v6351_v20  ;;  %v6288_v56 = vpop.f32.mrb[120].mxu1  ;;  %8808 = vmatmul.mubr.msk.bf16.vlgmr.msra.gmra.mrb[192].mxu0 %vm1383_vm4, %v9297_v27  ;;  %v9298_v20 = vld [vmem:[%s13289_s5 + $0x148] sm:$0xff]   ;;  %v9299_v29 = vld [vmem:[%s13289_s5 + $0x150] sm:$0xff]  }
 0xc5f   : > { %v6289_v48 = vadd.f32 %v6288_v56, %v6129_v5  ;;  %v6290_v46 = vpop.f32.mrb[121].mxu1  ;;  %6828 = vmatprep.mubr.bf16.mxu0 %v13531_v13  ;;  %v9303_v56 = vld [vmem:[%s13289_s5 + $0x170] sm:$0xff]  }
 0xc60   : > { %v6291_v26 = vadd.f32 %v6290_v46, %v6129_v5  ;;  %v6292_v32 = vpop.f32.mrb[122].mxu1  ;;  %6535 = vmatprep.subr.bf16.mxu1 %v6375_v59  ;;  %v9301_v5 = vld [vmem:[%s13289_s5 + $0x160] sm:$0xff]   ;;  %v9302_v59 = vld [vmem:[%s13289_s5 + $0x168] sm:$0xff]   ;;  %v6402_v46 = vpop.permute.xlu1 %6401 }
 0xc61   : > { %v6293_v43 = vadd.f32 %v6292_v32, %v6134_v55  ;;  %v6294_v45 = vpop.f32.mrb[123].mxu1  ;;  %6536 = vmatpush1.bf16.msra.mxu1 %v6374_v11  ;;  %v6354_v63 = vmax.f32 %v6289_v48, 0.0  ;;  %v9300_v11 = vld [vmem:[%s13289_s5 + $0x158] sm:$0xff]  }
 0xc62   : > { %v6295_v47 = vadd.f32 %v6294_v45, %v6134_v55  ;;  %v6355_v30 = vmax.f32 %v6291_v26, 0.0  ;;  %v9304_v48 = vld [vmem:[%s13289_s5 + $0x178] sm:$0xff]  }
 0xc63   : > { %v6356_v15 = vmax.f32 %v6293_v43, 0.0  ;;  %v6407_v43 = vpop.permute.xlu0 %6406 }
 0xc64   : > { %v6357_v40 = vmax.f32 %v6295_v47, 0.0 }
 0xc65   : > { %v6376_v7 = vpack.c.bf16 %v6356_v15, %v6354_v63 }
 0xc66   : > { %v6377_v52 = vpack.c.bf16 %v6357_v40, %v6355_v30  ;;  %v6298_v34 = vpop.f32.mrb[124].mxu1  ;;  %8809 = vmatmul.mubr.msk.bf16.gmra.mrb[196].mxu0 %vm1383_vm4, %v9298_v20 }
 0xc67   : > { %v6299_v38 = vadd.f32 %v6298_v34, %v6139_v54  ;;  %v6300_v14 = vpop.f32.mrb[125].mxu1  ;;  %6838 = vmatprep.mubr.bf16.mxu0 %v13531_v13 }
 0xc68   : > { %v6301_v23 = vadd.f32 %v6300_v14, %v6139_v54  ;;  %v6302_v6 = vpop.f32.mrb[126].mxu1  ;;  %6537 = vmatprep.subr.bf16.mxu1 %v6377_v52 }
 0xc69   : > { %v6303_v19 = vadd.f32 %v6302_v6, %v6144_v35  ;;  %v6304_v2 = vpop.f32.mrb[127].mxu1  ;;  %6538 = vmatpush1.bf16.msra.mxu1 %v6376_v7  ;;  %v6358_v17 = vmax.f32 %v6299_v38, 0.0  ;;  %v6412_v38 = vpop.permute.xlu1 %6411 }
 0xc6a   : > { %v6305_v0 = vadd.f32 %v6304_v2, %v6144_v35  ;;  %v6359_v49 = vmax.f32 %v6301_v23, 0.0 }
 0xc6b   : > { %v6360_v42 = vmax.f32 %v6303_v19, 0.0  ;;  %v6417_v19 = vpop.permute.xlu0 %6416 }
 0xc6c   : > { %v6361_v3 = vmax.f32 %v6305_v0, 0.0 }
 0xc6d   : > { %v6378_v18 = vpack.c.bf16 %v6360_v42, %v6358_v17 }
 0xc6e   : > { %v6379_v41 = vpack.c.bf16 %v6361_v3, %v6359_v49  ;;  %v6308_v60 = vpop.f32.mrb[128].mxu1  ;;  %8810 = vmatmul.mubr.msk.bf16.gmra.mrb[200].mxu0 %vm1383_vm4, %v9299_v29 }
 0xc6f   : > { %v6309_v12 = vadd.f32 %v6308_v60, %v6149_v9  ;;  %v6310_v61 = vpop.f32.mrb[129].mxu1  ;;  %6848 = vmatprep.mubr.bf16.mxu0 %v13531_v13 }
 0xc70   : > { %v6311_v8 = vadd.f32 %v6310_v61, %v6149_v9  ;;  %v6312_v4 = vpop.f32.mrb[130].mxu1  ;;  %6539 = vmatprep.subr.bf16.mxu1 %v6379_v41 }
 0xc71   : > { %v6313_v58 = vadd.f32 %v6312_v4, %v6154_v22  ;;  %v6314_v36 = vpop.f32.mrb[131].mxu1  ;;  %6540 = vmatpush1.bf16.msra.mxu1 %v6378_v18  ;;  %v6362_v16 = vmax.f32 %v6309_v12, 0.0  ;;  %v6422_v12 = vpop.permute.xlu1 %6421 }
 0xc72   : > { %v6315_v53 = vadd.f32 %v6314_v36, %v6154_v22  ;;  %v6363_v39 = vmax.f32 %v6311_v8, 0.0 }
 0xc73   : > { %v6364_v57 = vmax.f32 %v6313_v58, 0.0  ;;  %v6427_v58 = vpop.permute.xlu0 %6426 }
 0xc74   : > { %v6365_v21 = vmax.f32 %v6315_v53, 0.0 }
 0xc75   : > { %v6380_v62 = vpack.c.bf16 %v6364_v57, %v6362_v16 }
 0xc76   : > { %v6381_v44 = vpack.c.bf16 %v6365_v21, %v6363_v39  ;;  %8811 = vmatmul.mubr.msk.bf16.gmra.mrb[204].mxu0 %vm1383_vm4, %v9300_v11 }
 0xc77   : > { %6858 = vmatprep.mubr.bf16.mxu0 %v13531_v13 }
 0xc78   : > { %6541 = vmatprep.subr.bf16.mxu1 %v6381_v44 }
 0xc79   : > { %6542 = vmatpush1.bf16.msra.mxu1 %v6380_v62 }
 0xc7c   : > { %6560 = vmatmul.mubr.bf16.vlgmr.msra.gmra.mrb[132].mxu1 %v9289_v1 }
 0xc7d   : > { %6569 = vmatprep.mubr.bf16.mxu1 %v13531_v13 }
 0xc7e   : > { %8812 = vmatmul.mubr.msk.bf16.gmra.mrb[208].mxu0 %vm1383_vm4, %v9301_v5 }
 0xc7f   : > { %6868 = vmatprep.mubr.bf16.mxu0 %v13531_v13 }
 0xc84   : > { %6570 = vmatmul.mubr.bf16.gmra.mrb[136].mxu1 %v9290_v24 }
 0xc85   : > { %6579 = vmatprep.mubr.bf16.mxu1 %v13531_v13 }
 0xc86   : > { %8813 = vmatmul.mubr.msk.bf16.gmra.mrb[212].mxu0 %vm1383_vm4, %v9302_v59 }
 0xc87   : > { %6878 = vmatprep.mubr.bf16.mxu0 %v13531_v13 }
 0xc8c   : > { %6580 = vmatmul.mubr.bf16.gmra.mrb[140].mxu1 %v9291_v37  ;;  %v6432_v37 = vpop.permute.xlu1 %6431 }
 0xc8d   : > { %6589 = vmatprep.mubr.bf16.mxu1 %v13531_v13 }
 0xc8e   : > { %8814 = vmatmul.mubr.msk.bf16.gmra.mrb[216].mxu0 %vm1383_vm4, %v9303_v56 }
 0xc8f   : > { %6888 = vmatprep.mubr.bf16.mxu0 %v13531_v13 }
 0xc94   : > { %6590 = vmatmul.mubr.bf16.gmra.mrb[144].mxu1 %v9292_v50 }
 0xc95   : > { %6599 = vmatprep.mubr.bf16.mxu1 %v13531_v13 }
 0xc96   : > { %8815 = vmatmul.mubr.msk.bf16.gmra.mrb[220].mxu0 %vm1383_vm4, %v9304_v48 }
 0xc97   : > { %6979 = vmatprep.mubr.bf16.mxu0 %v13531_v13 }
 0xc9c   : > { %6600 = vmatmul.mubr.bf16.gmra.mrb[148].mxu1 %v9293_v33 }
 0xc9d   : > { %6609 = vmatprep.mubr.bf16.mxu1 %v13531_v13 }
 0xca4   : > { %6610 = vmatmul.mubr.bf16.gmra.mrb[152].mxu1 %v9294_v31 }
 0xca5   : > { %6619 = vmatprep.mubr.bf16.mxu1 %v13531_v13 }
 0xcac   : > { %6620 = vmatmul.mubr.bf16.gmra.mrb[156].mxu1 %v9295_v25 }
 0xcad   : > { %6629 = vmatprep.mubr.bf16.mxu1 %v13531_v13 }
 0xcb4   : > { %6630 = vmatmul.mubr.bf16.gmra.mrb[160].mxu1 %v9296_v10  ;;  %v6437_v10 = vpop.permute.xlu0 %6436 }
 0xcb5   : > { %7592 = vmatprep.mubr.bf16.mxu1 %v13531_v13 }
 0xd4f   : > { %v6561_v55 = vpop.f32.mrb[132].mxu1 }
 0xd50   : > { %v6562_v26 = vadd.f32 %v6561_v55, %v6402_v46  ;;  %v6563_v32 = vpop.f32.mrb[133].mxu1 }
 0xd51   : > { %v6564_v45 = vadd.f32 %v6563_v32, %v6402_v46  ;;  %v6565_v47 = vpop.f32.mrb[134].mxu1 }
 0xd52   : > { %v6566_v63 = vadd.f32 %v6565_v47, %v6407_v43  ;;  %v6567_v15 = vpop.f32.mrb[135].mxu1  ;;  %v6657_v40 = vmax.f32 %v6562_v26, 0.0  ;;  %v6442_v26 = vpop.permute.xlu1 %6441 }
 0xd53   : > { %v6568_v30 = vadd.f32 %v6567_v15, %v6407_v43  ;;  %v6658_v54 = vmax.f32 %v6564_v45, 0.0 }
 0xd54   : > { %v6659_v7 = vmax.f32 %v6566_v63, 0.0  ;;  %v6447_v63 = vpop.permute.xlu0 %6446 }
 0xd55   : > { %v6660_v52 = vmax.f32 %v6568_v30, 0.0 }
 0xd56   : > { %v6689_v34 = vpack.c.bf16 %v6659_v7, %v6657_v40 }
 0xd57   : > { %v6690_v14 = vpack.c.bf16 %v6660_v52, %v6658_v54  ;;  %v6571_v35 = vpop.f32.mrb[136].mxu1 }
 0xd58   : > { %v6572_v23 = vadd.f32 %v6571_v35, %v6412_v38  ;;  %v6573_v6 = vpop.f32.mrb[137].mxu1 }
 0xd59   : > { %v6574_v2 = vadd.f32 %v6573_v6, %v6412_v38  ;;  %v6575_v0 = vpop.f32.mrb[138].mxu1  ;;  %6947 = vmatprep.subr.bf16.mxu0 %v6690_v14 }
 0xd5a   : > { %v6576_v17 = vadd.f32 %v6575_v0, %v6417_v19  ;;  %v6577_v42 = vpop.f32.mrb[139].mxu1  ;;  %6948 = vmatpush1.bf16.msra.mxu0 %v6689_v34  ;;  %v6661_v3 = vmax.f32 %v6572_v23, 0.0  ;;  %v6452_v23 = vpop.permute.xlu1 %6451 }
 0xd5b   : > { %v6578_v49 = vadd.f32 %v6577_v42, %v6417_v19  ;;  %v6662_v9 = vmax.f32 %v6574_v2, 0.0 }
 0xd5c   : > { %v6663_v18 = vmax.f32 %v6576_v17, 0.0  ;;  %v6457_v17 = vpop.permute.xlu0 %6456 }
 0xd5d   : > { %v6664_v41 = vmax.f32 %v6578_v49, 0.0 }
 0xd5e   : > { %v6691_v60 = vpack.c.bf16 %v6663_v18, %v6661_v3 }
 0xd5f   : > { %v6692_v61 = vpack.c.bf16 %v6664_v41, %v6662_v9  ;;  %v6581_v22 = vpop.f32.mrb[140].mxu1 }
 0xd60   : > { %v6582_v8 = vadd.f32 %v6581_v22, %v6422_v12  ;;  %v6583_v4 = vpop.f32.mrb[141].mxu1 }
 0xd61   : > { %v6584_v36 = vadd.f32 %v6583_v4, %v6422_v12  ;;  %v6585_v53 = vpop.f32.mrb[142].mxu1  ;;  %6949 = vmatprep.subr.bf16.mxu0 %v6692_v61 }
 0xd62   : > { %v6586_v16 = vadd.f32 %v6585_v53, %v6427_v58  ;;  %v6587_v57 = vpop.f32.mrb[143].mxu1  ;;  %6950 = vmatpush1.bf16.msra.mxu0 %v6691_v60  ;;  %v6665_v21 = vmax.f32 %v6582_v8, 0.0  ;;  %v6462_v8 = vpop.permute.xlu1 %6461 }
 0xd63   : > { %v6588_v39 = vadd.f32 %v6587_v57, %v6427_v58  ;;  %v6666_v44 = vmax.f32 %v6584_v36, 0.0 }
 0xd64   : > { %v6667_v62 = vmax.f32 %v6586_v16, 0.0  ;;  %v6467_v16 = vpop.permute.xlu0 %6466 }
 0xd65   : > { %v6668_v1 = vmax.f32 %v6588_v39, 0.0 }
 0xd66   : > { %v6693_v24 = vpack.c.bf16 %v6667_v62, %v6665_v21 }
 0xd67   : > { %v6694_v50 = vpack.c.bf16 %v6668_v1, %v6666_v44  ;;  %v6591_v33 = vpop.f32.mrb[144].mxu1 }
 0xd68   : > { %v6592_v31 = vadd.f32 %v6591_v33, %v6432_v37  ;;  %v6593_v25 = vpop.f32.mrb[145].mxu1 }
 0xd69   : > { %v6594_v27 = vadd.f32 %v6593_v25, %v6432_v37  ;;  %v6595_v20 = vpop.f32.mrb[146].mxu1  ;;  %6951 = vmatprep.subr.bf16.mxu0 %v6694_v50 }
 0xd6a   : > { %v6596_v29 = vadd.f32 %v6595_v20, %v6437_v10  ;;  %v6597_v11 = vpop.f32.mrb[147].mxu1  ;;  %6952 = vmatpush1.bf16.msra.mxu0 %v6693_v24  ;;  %v6669_v59 = vmax.f32 %v6592_v31, 0.0  ;;  %v6472_v31 = vpop.permute.xlu1 %6471 }
 0xd6b   : > { %v6598_v5 = vadd.f32 %v6597_v11, %v6437_v10  ;;  %v6670_v48 = vmax.f32 %v6594_v27, 0.0 }
 0xd6c   : > { %v6671_v56 = vmax.f32 %v6596_v29, 0.0  ;;  %v6477_v29 = vpop.permute.xlu0 %6476 }
 0xd6d   : > { %v6672_v46 = vmax.f32 %v6598_v5, 0.0 }
 0xd6e   : > { %v6695_v55 = vpack.c.bf16 %v6671_v56, %v6669_v59 }
 0xd6f   : > { %v6696_v32 = vpack.c.bf16 %v6672_v46, %v6670_v48  ;;  %v6601_v43 = vpop.f32.mrb[148].mxu1 }
 0xd70   : > { %v6602_v45 = vadd.f32 %v6601_v43, %v6442_v26  ;;  %v6603_v47 = vpop.f32.mrb[149].mxu1 }
 0xd71   : > { %v6604_v15 = vadd.f32 %v6603_v47, %v6442_v26  ;;  %v6605_v30 = vpop.f32.mrb[150].mxu1  ;;  %6953 = vmatprep.subr.bf16.mxu0 %v6696_v32  ;;  %v9305_v47 = vld [vmem:[%s13288_s4 + $0x240] sm:$0xff]  }
 0xd72   : > { %v6606_v40 = vadd.f32 %v6605_v30, %v6447_v63  ;;  %v6607_v7 = vpop.f32.mrb[151].mxu1  ;;  %6954 = vmatpush1.bf16.msra.mxu0 %v6695_v55  ;;  %v6673_v52 = vmax.f32 %v6602_v45, 0.0  ;;  %v9308_v30 = vld [vmem:[%s13288_s4 + $0x258] sm:$0xff]  }
 0xd73   : > { %v6608_v54 = vadd.f32 %v6607_v7, %v6447_v63  ;;  %v6674_v38 = vmax.f32 %v6604_v15, 0.0  ;;  %v9306_v63 = vld [vmem:[%s13288_s4 + $0x248] sm:$0xff]   ;;  %v9307_v15 = vld [vmem:[%s13288_s4 + $0x250] sm:$0xff]  }
 0xd74   : > { %v6675_v34 = vmax.f32 %v6606_v40, 0.0  ;;  %v9309_v40 = vld [vmem:[%s13288_s4 + $0x260] sm:$0xff]   ;;  %v9310_v7 = vld [vmem:[%s13288_s4 + $0x268] sm:$0xff]  }
 0xd75   : > { %v6676_v14 = vmax.f32 %v6608_v54, 0.0  ;;  %v9311_v54 = vld [vmem:[%s13288_s4 + $0x270] sm:$0xff]  }
 0xd76   : > { %v6697_v35 = vpack.c.bf16 %v6675_v34, %v6673_v52  ;;  %v9312_v52 = vld [vmem:[%s13288_s4 + $0x278] sm:$0xff]   ;;  %v7080_v34 = vpop.permute.xlu1 %7079 }
 0xd77   : > { %v6698_v6 = vpack.c.bf16 %v6676_v14, %v6674_v38  ;;  %v6611_v19 = vpop.f32.mrb[152].mxu1  ;;  %v7085_v38 = vpop.permute.xlu0 %7084 }
 0xd78   : > { %v6612_v2 = vadd.f32 %v6611_v19, %v6452_v23  ;;  %v6613_v0 = vpop.f32.mrb[153].mxu1 }
 0xd79   : > { %v6614_v42 = vadd.f32 %v6613_v0, %v6452_v23  ;;  %v6615_v49 = vpop.f32.mrb[154].mxu1  ;;  %6955 = vmatprep.subr.bf16.mxu0 %v6698_v6 }
 0xd7a   : > { %v6616_v3 = vadd.f32 %v6615_v49, %v6457_v17  ;;  %v6617_v18 = vpop.f32.mrb[155].mxu1  ;;  %6956 = vmatpush1.bf16.msra.mxu0 %v6697_v35  ;;  %v6677_v41 = vmax.f32 %v6612_v2, 0.0  ;;  %v7090_v14 = vpop.permute.xlu1 %7089 }
 0xd7b   : > { %v6618_v9 = vadd.f32 %v6617_v18, %v6457_v17  ;;  %v6678_v12 = vmax.f32 %v6614_v42, 0.0  ;;  %v7095_v35 = vpop.permute.xlu0 %7094  ;;  %v7158_v18 = vmul.f32 %v7080_v34, %v12729_v28 }
 0xd7c   : > { %v6679_v60 = vmax.f32 %v6616_v3, 0.0  ;;  %v7157_v3 = vmul.f32 %v7080_v34, %v12726_v51 }
 0xd7d   : > { %v6680_v61 = vmax.f32 %v6618_v9, 0.0 }
 0xd7e   : > { %v6699_v22 = vpack.c.bf16 %v6679_v60, %v6677_v41  ;;  %v7241_v23 = vpop.permute.xlu1 %7240  ;;  %v7159_v41 = vmul.f32 %v7085_v38, %v12726_v51 }
 0xd7f   : > { %v6700_v4 = vpack.c.bf16 %v6680_v61, %v6678_v12  ;;  %v6621_v58 = vpop.f32.mrb[156].mxu1  ;;  %v7246_v6 = vpop.permute.xlu0 %7245 }
 0xd80   : > { %v6622_v36 = vadd.f32 %v6621_v58, %v6462_v8  ;;  %v6623_v53 = vpop.f32.mrb[157].mxu1 }
 0xd81   : > { %v6624_v57 = vadd.f32 %v6623_v53, %v6462_v8  ;;  %v6625_v39 = vpop.f32.mrb[158].mxu1  ;;  %6957 = vmatprep.subr.bf16.mxu0 %v6700_v4 }
 0xd82   : > { %v6626_v21 = vadd.f32 %v6625_v39, %v6467_v16  ;;  %v6627_v62 = vpop.f32.mrb[159].mxu1  ;;  %6958 = vmatpush1.bf16.msra.mxu0 %v6699_v22  ;;  %v6681_v1 = vmax.f32 %v6622_v36, 0.0  ;;  %v7100_v19 = vpop.permute.xlu1 %7099  ;;  %v7160_v22 = vmul.f32 %v7085_v38, %v12729_v28 }
 0xd83   : > { %v6628_v44 = vadd.f32 %v6627_v62, %v6467_v16  ;;  %v6682_v37 = vmax.f32 %v6624_v57, 0.0  ;;  %v7105_v2 = vpop.permute.xlu0 %7104 }
 0xd84   : > { %v6683_v24 = vmax.f32 %v6626_v21, 0.0 }
 0xd85   : > { %v6684_v50 = vmax.f32 %v6628_v44, 0.0  ;;  %v7161_v44 = vmul.f32 %v7090_v14, %v12726_v51 }
 0xd86   : > { %v6701_v33 = vpack.c.bf16 %v6683_v24, %v6681_v1  ;;  %v7251_v0 = vpop.permute.xlu1 %7250 }
 0xd87   : > { %v6702_v25 = vpack.c.bf16 %v6684_v50, %v6682_v37  ;;  %v6631_v10 = vpop.f32.mrb[160].mxu1  ;;  %v7256_v17 = vpop.permute.xlu0 %7255  ;;  %v7162_v50 = vmul.f32 %v7090_v14, %v12729_v28  ;;  %v7167_v14 = vmul.f32 %v7105_v2, %v12726_v51 }
 0xd88   : > { %v6632_v27 = vadd.f32 %v6631_v10, %v6472_v31  ;;  %v6633_v20 = vpop.f32.mrb[161].mxu1  ;;  %v7163_v10 = vmul.f32 %v7095_v35, %v12726_v51 }
 0xd89   : > { %v6634_v11 = vadd.f32 %v6633_v20, %v6472_v31  ;;  %v6635_v5 = vpop.f32.mrb[162].mxu1  ;;  %6959 = vmatprep.subr.bf16.mxu0 %v6702_v25 }
 0xd8a   : > { %v6636_v59 = vadd.f32 %v6635_v5, %v6477_v29  ;;  %v6637_v56 = vpop.f32.mrb[163].mxu1  ;;  %6960 = vmatpush1.bf16.msra.mxu0 %v6701_v33  ;;  %v6685_v46 = vmax.f32 %v6632_v27, 0.0  ;;  %v13115_v42 = vpop.permute.xlu1 %7109  ;;  %v7164_v5 = vmul.f32 %v7095_v35, %v12729_v28 }
 0xd8b   : > { %v6638_v48 = vadd.f32 %v6637_v56, %v6477_v29  ;;  %v6686_v26 = vmax.f32 %v6634_v11, 0.0  ;;  %v13117_v49 = vpop.permute.xlu0 %7114 }
 0xd8c   : > { %v6687_v55 = vmax.f32 %v6636_v59, 0.0 }
 0xd8d   : > { %v6688_v32 = vmax.f32 %v6638_v48, 0.0 }
 0xd8e   : > { %v6703_v43 = vpack.c.bf16 %v6687_v55, %v6685_v46  ;;  %v7261_v61 = vpop.permute.xlu1 %7260 }
 0xd8f   : > { %v6704_v45 = vpack.c.bf16 %v6688_v32, %v6686_v26  ;;  %v7266_v16 = vpop.permute.xlu0 %7265 }
 0xd91   : > { %6961 = vmatprep.subr.bf16.mxu0 %v6704_v45 }
 0xd92   : > { %6962 = vmatpush1.bf16.msra.mxu0 %v6703_v43  ;;  %v13124_v37 = vpop.permute.xlu1 %7119 }
 0xd93   : > { %v13128_v11 = vpop.permute.xlu0 %7124 }
 0xd95   : > { %6980 = vmatmul.mubr.bf16.vlgmr.msra.gmra.mrb[192].mxu0 %v9305_v47 }
 0xd96   : > { %6989 = vmatprep.mubr.bf16.mxu0 %v13531_v13  ;;  %v7271_v47 = vpop.permute.xlu1 %7270 }
 0xd9d   : > { %6990 = vmatmul.mubr.bf16.gmra.mrb[196].mxu0 %v9306_v63 }
 0xd9e   : > { %6999 = vmatprep.mubr.bf16.mxu0 %v13531_v13 }
 0xda5   : > { %7000 = vmatmul.mubr.bf16.gmra.mrb[200].mxu0 %v9307_v15  ;;  %v7165_v15 = vmul.f32 %v7100_v19, %v12726_v51 }
 0xda6   : > { %7009 = vmatprep.mubr.bf16.mxu0 %v13531_v13 }
 0xdad   : > { %7010 = vmatmul.mubr.bf16.gmra.mrb[204].mxu0 %v9308_v30 }
 0xdae   : > { %7019 = vmatprep.mubr.bf16.mxu0 %v13531_v13 }
 0xdb5   : > { %7020 = vmatmul.mubr.bf16.gmra.mrb[208].mxu0 %v9309_v40 }
 0xdb6   : > { %7029 = vmatprep.mubr.bf16.mxu0 %v13531_v13 }
 0xdbd   : > { %7030 = vmatmul.mubr.bf16.gmra.mrb[212].mxu0 %v9310_v7  ;;  %v7276_v7 = vpop.permute.xlu0 %7275 }
 0xdbe   : > { %7039 = vmatprep.mubr.bf16.mxu0 %v13531_v13 }
 0xdc5   : > { %7040 = vmatmul.mubr.bf16.gmra.mrb[216].mxu0 %v9311_v54  ;;  %v7166_v54 = vmul.f32 %v7100_v19, %v12729_v28 }
 0xdc6   : > { %7049 = vmatprep.mubr.bf16.mxu0 %v13531_v13 }
 0xdcd   : > { %7050 = vmatmul.mubr.bf16.gmra.mrb[220].mxu0 %v9312_v52 }
 0xdce   : > { %8083 = vmatprep.mubr.bf16.mxu0 %v13531_v13 }
 0xe68   : > { %v6981_v9 = vpop.f32.mrb[192].mxu0 }
 0xe69   : > { %v7189_v60 = vadd.f32 %v7157_v3, %v6981_v9  ;;  %v6983_v12 = vpop.f32.mrb[193].mxu0 }
 0xe6a   : > { %v7190_v8 = vadd.f32 %v7158_v18, %v6983_v12  ;;  %v6985_v4 = vpop.f32.mrb[194].mxu0  ;;  %v13135_v12 = vpop.permute.xlu1 %7129 }
 0xe6b   : > { %v7318_v58 = vadd.f32 %v7241_v23, %v7189_v60  ;;  %v7191_v36 = vadd.f32 %v7159_v41, %v6985_v4  ;;  %v6987_v53 = vpop.f32.mrb[195].mxu0  ;;  %v13137_v4 = vpop.permute.xlu0 %7134 }
 0xe6c   : > { %v7319_v57 = vadd.f32 %v7241_v23, %v7190_v8  ;;  %v7192_v39 = vadd.f32 %v7160_v22, %v6987_v53 }
 0xe6d   : > { %v7320_v21 = vadd.f32 %v7246_v6, %v7191_v36  ;;  %v7367_v1 = vmax.f32 %v7318_v58, 0.0  ;;  %v7169_v36 = vmul.f32 %v13115_v42, %v12726_v51 }
 0xe6e   : > { %v7321_v62 = vadd.f32 %v7246_v6, %v7192_v39  ;;  %v7368_v33 = vmax.f32 %v7319_v57, 0.0  ;;  %v7170_v57 = vmul.f32 %v13115_v42, %v12729_v28 }
 0xe6f   : > { %v7369_v24 = vmax.f32 %v7320_v21, 0.0  ;;  %v7286_v42 = vpop.permute.xlu0 %7285 }
 0xe70   : > { %v7370_v31 = vmax.f32 %v7321_v62, 0.0  ;;  %v6991_v25 = vpop.f32.mrb[196].mxu0 }
 0xe71   : > { %v7399_v27 = vpack.c.bf16 %v7369_v24, %v7367_v1  ;;  %v7193_v20 = vadd.f32 %v7161_v44, %v6991_v25  ;;  %v6993_v29 = vpop.f32.mrb[197].mxu0 }
 0xe72   : > { %v7194_v59 = vadd.f32 %v7162_v50, %v6993_v29  ;;  %v6995_v56 = vpop.f32.mrb[198].mxu0  ;;  %v7400_v48 = vpack.c.bf16 %v7370_v31, %v7368_v33  ;;  %v7281_v50 = vpop.permute.xlu1 %7280 }
 0xe73   : > { %v7322_v46 = vadd.f32 %v7251_v0, %v7193_v20  ;;  %v7195_v55 = vadd.f32 %v7163_v10, %v6995_v56  ;;  %v6997_v26 = vpop.f32.mrb[199].mxu0 }
 0xe74   : > { %v7323_v32 = vadd.f32 %v7251_v0, %v7194_v59  ;;  %v7196_v43 = vadd.f32 %v7164_v5, %v6997_v26  ;;  %7560 = vmatprep.subr.bf16.mxu1 %v7400_v48  ;;  %v7168_v0 = vmul.f32 %v7105_v2, %v12729_v28  ;;  %v7173_v48 = vmul.f32 %v13124_v37, %v12726_v51 }
 0xe75   : > { %v7324_v45 = vadd.f32 %v7256_v17, %v7195_v55  ;;  %7561 = vmatpush1.bf16.msra.mxu1 %v7399_v27  ;;  %v7371_v30 = vmax.f32 %v7322_v46, 0.0 }
 0xe76   : > { %v7325_v63 = vadd.f32 %v7256_v17, %v7196_v43  ;;  %v7372_v52 = vmax.f32 %v7323_v32, 0.0  ;;  %v7140_v26 = vpop.permute.xlu1 %7139 }
 0xe77   : > { %v7373_v40 = vmax.f32 %v7324_v45, 0.0 }
 0xe78   : > { %v7374_v34 = vmax.f32 %v7325_v63, 0.0  ;;  %v7001_v38 = vpop.f32.mrb[200].mxu0 }
 0xe79   : > { %v7401_v35 = vpack.c.bf16 %v7373_v40, %v7371_v30  ;;  %v7197_v23 = vadd.f32 %v7165_v15, %v7001_v38  ;;  %v7003_v6 = vpop.f32.mrb[201].mxu0  ;;  %v7145_v40 = vpop.permute.xlu0 %7144 }
 0xe7a   : > { %v7198_v3 = vadd.f32 %v7166_v54, %v7003_v6  ;;  %v7005_v18 = vpop.f32.mrb[202].mxu0  ;;  %v7402_v17 = vpack.c.bf16 %v7374_v34, %v7372_v52 }
 0xe7b   : > { %v7326_v9 = vadd.f32 %v7261_v61, %v7197_v23  ;;  %v7199_v41 = vadd.f32 %v7167_v14, %v7005_v18  ;;  %v7007_v60 = vpop.f32.mrb[203].mxu0  ;;  %v7177_v18 = vmul.f32 %v13135_v12, %v12726_v51 }
 0xe7c   : > { %v7327_v22 = vadd.f32 %v7261_v61, %v7198_v3  ;;  %v7200_v19 = vadd.f32 %v7168_v0, %v7007_v60  ;;  %7562 = vmatprep.subr.bf16.mxu1 %v7402_v17  ;;  %v7171_v61 = vmul.f32 %v13117_v49, %v12726_v51  ;;  %v7291_v0 = vpop.permute.xlu1 %7290 }
 0xe7d   : > { %v7328_v8 = vadd.f32 %v7266_v16, %v7199_v41  ;;  %7563 = vmatpush1.bf16.msra.mxu1 %v7401_v35  ;;  %v7375_v2 = vmax.f32 %v7326_v9, 0.0  ;;  %v7296_v41 = vpop.permute.xlu0 %7295 }
 0xe7e   : > { %v7329_v58 = vadd.f32 %v7266_v16, %v7200_v19  ;;  %v7376_v39 = vmax.f32 %v7327_v22, 0.0  ;;  %v7172_v16 = vmul.f32 %v13117_v49, %v12729_v28  ;;  %v7174_v49 = vmul.f32 %v13124_v37, %v12729_v28 }
 0xe7f   : > { %v7377_v53 = vmax.f32 %v7328_v8, 0.0  ;;  %v7179_v8 = vmul.f32 %v13137_v4, %v12726_v51 }
 0xe80   : > { %v7378_v21 = vmax.f32 %v7329_v58, 0.0  ;;  %v7011_v62 = vpop.f32.mrb[204].mxu0 }
 0xe81   : > { %v7403_v44 = vpack.c.bf16 %v7377_v53, %v7375_v2  ;;  %v7201_v1 = vadd.f32 %v7169_v36, %v7011_v62  ;;  %v7013_v24 = vpop.f32.mrb[205].mxu0  ;;  %v7180_v53 = vmul.f32 %v13137_v4, %v12729_v28  ;;  %v7182_v4 = vmul.f32 %v7140_v26, %v12729_v28 }
 0xe82   : > { %v7202_v33 = vadd.f32 %v7170_v57, %v7013_v24  ;;  %v7015_v31 = vpop.f32.mrb[206].mxu0  ;;  %v7404_v25 = vpack.c.bf16 %v7378_v21, %v7376_v39 }
 0xe83   : > { %v7330_v10 = vadd.f32 %v7271_v47, %v7201_v1  ;;  %v7203_v27 = vadd.f32 %v7171_v61, %v7015_v31  ;;  %v7017_v20 = vpop.f32.mrb[207].mxu0  ;;  %v7150_v1 = vpop.permute.xlu1 %7149  ;;  %v7181_v31 = vmul.f32 %v7140_v26, %v12726_v51 }
 0xe84   : > { %v7331_v29 = vadd.f32 %v7271_v47, %v7202_v33  ;;  %v7204_v5 = vadd.f32 %v7172_v16, %v7017_v20  ;;  %7564 = vmatprep.subr.bf16.mxu1 %v7404_v25  ;;  %v7175_v47 = vmul.f32 %v13128_v11, %v12726_v51  ;;  %v7155_v16 = vpop.permute.xlu0 %7154 }
 0xe85   : > { %v7332_v59 = vadd.f32 %v7276_v7, %v7203_v27  ;;  %7565 = vmatpush1.bf16.msra.mxu1 %v7403_v44  ;;  %v7379_v46 = vmax.f32 %v7330_v10, 0.0 }
 0xe86   : > { %v7333_v56 = vadd.f32 %v7276_v7, %v7204_v5  ;;  %v7380_v32 = vmax.f32 %v7331_v29, 0.0  ;;  %v7176_v7 = vmul.f32 %v13128_v11, %v12729_v28  ;;  %v7178_v11 = vmul.f32 %v13135_v12, %v12729_v28 }
 0xe87   : > { %v7381_v55 = vmax.f32 %v7332_v59, 0.0  ;;  %v7183_v29 = vmul.f32 %v7145_v40, %v12726_v51 }
 0xe88   : > { %v7382_v43 = vmax.f32 %v7333_v56, 0.0  ;;  %v7021_v45 = vpop.f32.mrb[208].mxu0 }
 0xe89   : > { %v7405_v63 = vpack.c.bf16 %v7381_v55, %v7379_v46  ;;  %v7205_v15 = vadd.f32 %v7173_v48, %v7021_v45  ;;  %v7023_v30 = vpop.f32.mrb[209].mxu0  ;;  %v7301_v48 = vpop.permute.xlu1 %7300  ;;  %v7184_v46 = vmul.f32 %v7145_v40, %v12729_v28 }
 0xe8a   : > { %v7206_v54 = vadd.f32 %v7174_v49, %v7023_v30  ;;  %v7025_v52 = vpop.f32.mrb[210].mxu0  ;;  %v7406_v34 = vpack.c.bf16 %v7382_v43, %v7380_v32 }
 0xe8b   : > { %v7334_v38 = vadd.f32 %v7281_v50, %v7205_v15  ;;  %v7207_v14 = vadd.f32 %v7175_v47, %v7025_v52  ;;  %v7027_v35 = vpop.f32.mrb[211].mxu0 }
 0xe8c   : > { %v7335_v37 = vadd.f32 %v7281_v50, %v7206_v54  ;;  %v7208_v23 = vadd.f32 %v7176_v7, %v7027_v35  ;;  %7566 = vmatprep.subr.bf16.mxu1 %v7406_v34  ;;  %v7185_v54 = vmul.f32 %v7150_v1, %v12726_v51 }
 0xe8d   : > { %v7336_v6 = vadd.f32 %v7286_v42, %v7207_v14  ;;  %7567 = vmatpush1.bf16.msra.mxu1 %v7405_v63  ;;  %v7383_v17 = vmax.f32 %v7334_v38, 0.0  ;;  %v7306_v63 = vpop.permute.xlu0 %7305  ;;  %v7186_v38 = vmul.f32 %v7150_v1, %v12729_v28  ;;  %v9316_v1 = vld [vmem:[%s13288_s4 + $0x298] sm:$0xff]  }
 0xe8e   : > { %v7337_v3 = vadd.f32 %v7286_v42, %v7208_v23  ;;  %v7384_v60 = vmax.f32 %v7335_v37, 0.0  ;;  %v7187_v37 = vmul.f32 %v7155_v16, %v12726_v51 }
 0xe8f   : > { %v7385_v9 = vmax.f32 %v7336_v6, 0.0 }
 0xe90   : > { %v7386_v22 = vmax.f32 %v7337_v3, 0.0  ;;  %v7031_v19 = vpop.f32.mrb[212].mxu0  ;;  %v7311_v3 = vpop.permute.xlu1 %7310 }
 0xe91   : > { %v7407_v58 = vpack.c.bf16 %v7385_v9, %v7383_v17  ;;  %v7209_v36 = vadd.f32 %v7177_v18, %v7031_v19  ;;  %v7033_v2 = vpop.f32.mrb[213].mxu0  ;;  %v7188_v18 = vmul.f32 %v7155_v16, %v12729_v28  ;;  %v7316_v19 = vpop.permute.xlu0 %7315  ;;  %v9313_v28 = vld [vmem:[%s13288_s4 + $0x280] sm:$0xff]   ;;  %v9320_v16 = vld [vmem:[%s13288_s4 + $0x2b8] sm:$0xff]  }
 0xe92   : > { %v7210_v57 = vadd.f32 %v7178_v11, %v7033_v2  ;;  %v7035_v39 = vpop.f32.mrb[214].mxu0  ;;  %v7408_v21 = vpack.c.bf16 %v7386_v22, %v7384_v60 }
 0xe93   : > { %v7338_v62 = vadd.f32 %v7291_v0, %v7209_v36  ;;  %v7211_v61 = vadd.f32 %v7179_v8, %v7035_v39  ;;  %v7037_v44 = vpop.f32.mrb[215].mxu0 }
 0xe94   : > { %v7339_v12 = vadd.f32 %v7291_v0, %v7210_v57  ;;  %v7212_v24 = vadd.f32 %v7180_v53, %v7037_v44  ;;  %7568 = vmatprep.subr.bf16.mxu1 %v7408_v21  ;;  %v9315_v44 = vld [vmem:[%s13288_s4 + $0x290] sm:$0xff]  }
 0xe95   : > { %v7340_v50 = vadd.f32 %v7296_v41, %v7211_v61  ;;  %7569 = vmatpush1.bf16.msra.mxu1 %v7407_v58  ;;  %v7387_v25 = vmax.f32 %v7338_v62, 0.0  ;;  %v9314_v61 = vld [vmem:[%s13288_s4 + $0x288] sm:$0xff]  }
 0xe96   : > { %v7341_v33 = vadd.f32 %v7296_v41, %v7212_v24  ;;  %v7388_v27 = vmax.f32 %v7339_v12, 0.0  ;;  %v9317_v12 = vld [vmem:[%s13288_s4 + $0x2a0] sm:$0xff]   ;;  %v9318_v24 = vld [vmem:[%s13288_s4 + $0x2a8] sm:$0xff]  }
 0xe97   : > { %v7389_v10 = vmax.f32 %v7340_v50, 0.0  ;;  %v9319_v50 = vld [vmem:[%s13288_s4 + $0x2b0] sm:$0xff]  }
 0xe98   : > { %v7390_v20 = vmax.f32 %v7341_v33, 0.0  ;;  %v7041_v42 = vpop.f32.mrb[216].mxu0  ;;  %v7435_v33 = vpop.permute.xlu1 %7434 }
 0xe99   : > { %v7409_v5 = vpack.c.bf16 %v7389_v10, %v7387_v25  ;;  %v7213_v59 = vadd.f32 %v7181_v31, %v7041_v42  ;;  %v7043_v56 = vpop.f32.mrb[217].mxu0 }
 0xe9a   : > { %v7214_v55 = vadd.f32 %v7182_v4, %v7043_v56  ;;  %v7045_v49 = vpop.f32.mrb[218].mxu0  ;;  %v7410_v32 = vpack.c.bf16 %v7390_v20, %v7388_v27  ;;  %v7440_v4 = vpop.permute.xlu0 %7439 }
 0xe9b   : > { %v7342_v43 = vadd.f32 %v7301_v48, %v7213_v59  ;;  %v7215_v45 = vadd.f32 %v7183_v29, %v7045_v49  ;;  %v7047_v47 = vpop.f32.mrb[219].mxu0 }
 0xe9c   : > { %v7343_v15 = vadd.f32 %v7301_v48, %v7214_v55  ;;  %v7216_v26 = vadd.f32 %v7184_v46, %v7047_v47  ;;  %7570 = vmatprep.subr.bf16.mxu1 %v7410_v32  ;;  %v7445_v49 = vpop.permute.xlu1 %7444 }
 0xe9d   : > { %v7344_v30 = vadd.f32 %v7306_v63, %v7215_v45  ;;  %7571 = vmatpush1.bf16.msra.mxu1 %v7409_v5  ;;  %v7391_v52 = vmax.f32 %v7342_v43, 0.0 }
 0xe9e   : > { %v7345_v7 = vadd.f32 %v7306_v63, %v7216_v26  ;;  %v7392_v40 = vmax.f32 %v7343_v15, 0.0  ;;  %v7450_v63 = vpop.permute.xlu0 %7449 }
 0xe9f   : > { %v7393_v34 = vmax.f32 %v7344_v30, 0.0 }
 0xea0   : > { %v7394_v14 = vmax.f32 %v7345_v7, 0.0  ;;  %v7051_v35 = vpop.f32.mrb[220].mxu0 }
 0xea1   : > { %v7411_v23 = vpack.c.bf16 %v7393_v34, %v7391_v52  ;;  %v7217_v6 = vadd.f32 %v7185_v54, %v7051_v35  ;;  %v7053_v0 = vpop.f32.mrb[221].mxu0  ;;  %v7455_v35 = vpop.permute.xlu1 %7454 }
 0xea2   : > { %v7218_v17 = vadd.f32 %v7186_v38, %v7053_v0  ;;  %v7055_v9 = vpop.f32.mrb[222].mxu0  ;;  %v7412_v41 = vpack.c.bf16 %v7394_v14, %v7392_v40 }
 0xea3   : > { %v7346_v11 = vadd.f32 %v7311_v3, %v7217_v6  ;;  %v7219_v60 = vadd.f32 %v7187_v37, %v7055_v9  ;;  %v7057_v22 = vpop.f32.mrb[223].mxu0 }
 0xea4   : > { %v7347_v8 = vadd.f32 %v7311_v3, %v7218_v17  ;;  %v7220_v58 = vadd.f32 %v7188_v18, %v7057_v22  ;;  %7572 = vmatprep.subr.bf16.mxu1 %v7412_v41  ;;  %v7460_v3 = vpop.permute.xlu0 %7459 }
 0xea5   : > { %v7348_v36 = vadd.f32 %v7316_v19, %v7219_v60  ;;  %7573 = vmatpush1.bf16.msra.mxu1 %v7411_v23  ;;  %v7395_v51 = vmax.f32 %v7346_v11, 0.0 }
 0xea6   : > { %v7349_v2 = vadd.f32 %v7316_v19, %v7220_v58  ;;  %v7396_v57 = vmax.f32 %v7347_v8, 0.0 }
 0xea7   : > { %v7397_v53 = vmax.f32 %v7348_v36, 0.0  ;;  %v7465_v36 = vpop.permute.xlu1 %7464 }
 0xea8   : > { %v7398_v39 = vmax.f32 %v7349_v2, 0.0 }
 0xea9   : > { %v7413_v21 = vpack.c.bf16 %v7397_v53, %v7395_v51 }
 0xeaa   : > { %v7414_v62 = vpack.c.bf16 %v7398_v39, %v7396_v57  ;;  %v7470_v39 = vpop.permute.xlu0 %7469 }
 0xeac   : > { %7574 = vmatprep.subr.bf16.mxu1 %v7414_v62 }
 0xead   : > { %7575 = vmatpush1.bf16.msra.mxu1 %v7413_v21 }
 0xeb0   : > { %7593 = vmatmul.mubr.bf16.vlgmr.msra.gmra.mrb[164].mxu1 %v9313_v28 }
 0xeb1   : > { %7602 = vmatprep.mubr.bf16.mxu1 %v13531_v13 }
 0xeb8   : > { %7603 = vmatmul.mubr.bf16.gmra.mrb[168].mxu1 %v9314_v61 }
 0xeb9   : > { %7612 = vmatprep.mubr.bf16.mxu1 %v13531_v13 }
 0xec0   : > { %7613 = vmatmul.mubr.bf16.gmra.mrb[172].mxu1 %v9315_v44 }
 0xec1   : > { %7622 = vmatprep.mubr.bf16.mxu1 %v13531_v13 }
 0xec8   : > { %7623 = vmatmul.mubr.bf16.gmra.mrb[176].mxu1 %v9316_v1 }
 0xec9   : > { %7632 = vmatprep.mubr.bf16.mxu1 %v13531_v13 }
 0xed0   : > { %7633 = vmatmul.mubr.bf16.gmra.mrb[180].mxu1 %v9317_v12 }
 0xed1   : > { %7642 = vmatprep.mubr.bf16.mxu1 %v13531_v13 }
 0xed8   : > { %7643 = vmatmul.mubr.bf16.gmra.mrb[184].mxu1 %v9318_v24 }
 0xed9   : > { %7652 = vmatprep.mubr.bf16.mxu1 %v13531_v13 }
 0xee0   : > { %7653 = vmatmul.mubr.bf16.gmra.mrb[188].mxu1 %v9319_v50 }
 0xee1   : > { %7662 = vmatprep.mubr.bf16.mxu1 %v13531_v13 }
 0xee8   : > { %7663 = vmatmul.mubr.bf16.gmra.mrb[192].mxu1 %v9320_v16 }
 0xee9   : > { %7915 = vmatprep.mubr.bf16.mxu1 %v13531_v13 }
 0xf83   : > { %v7594_v31 = vpop.f32.mrb[164].mxu1 }
 0xf84   : > { %v7595_v25 = vadd.f32 %v7594_v31, %v7435_v33  ;;  %v7596_v10 = vpop.f32.mrb[165].mxu1 }
 0xf85   : > { %v7597_v27 = vadd.f32 %v7596_v10, %v7435_v33  ;;  %v7598_v20 = vpop.f32.mrb[166].mxu1  ;;  %v7475_v33 = vpop.permute.xlu1 %7474 }
 0xf86   : > { %v7599_v42 = vadd.f32 %v7598_v20, %v7440_v4  ;;  %v7600_v29 = vpop.f32.mrb[167].mxu1  ;;  %v7690_v59 = vmax.f32 %v7595_v25, 0.0 }
 0xf87   : > { %v7601_v5 = vadd.f32 %v7600_v29, %v7440_v4  ;;  %v7691_v48 = vmax.f32 %v7597_v27, 0.0  ;;  %v7480_v27 = vpop.permute.xlu0 %7479 }
 0xf88   : > { %v7692_v56 = vmax.f32 %v7599_v42, 0.0 }
 0xf89   : > { %v7693_v46 = vmax.f32 %v7601_v5, 0.0 }
 0xf8a   : > { %v7722_v55 = vpack.c.bf16 %v7692_v56, %v7690_v59 }
 0xf8b   : > { %v7723_v32 = vpack.c.bf16 %v7693_v46, %v7691_v48  ;;  %v7604_v43 = vpop.f32.mrb[168].mxu1 }
 0xf8c   : > { %v7605_v45 = vadd.f32 %v7604_v43, %v7445_v49  ;;  %v7606_v47 = vpop.f32.mrb[169].mxu1 }
 0xf8d   : > { %v7607_v15 = vadd.f32 %v7606_v47, %v7445_v49  ;;  %v7608_v26 = vpop.f32.mrb[170].mxu1  ;;  %7883 = vmatprep.subr.bf16.mxu1 %v7723_v32  ;;  %v7485_v32 = vpop.permute.xlu1 %7484 }
 0xf8e   : > { %v7609_v30 = vadd.f32 %v7608_v26, %v7450_v63  ;;  %v7610_v7 = vpop.f32.mrb[171].mxu1  ;;  %7884 = vmatpush1.bf16.msra.mxu1 %v7722_v55  ;;  %v7694_v52 = vmax.f32 %v7605_v45, 0.0 }
 0xf8f   : > { %v7611_v54 = vadd.f32 %v7610_v7, %v7450_v63  ;;  %v7695_v38 = vmax.f32 %v7607_v15, 0.0  ;;  %v7490_v15 = vpop.permute.xlu0 %7489 }
 0xf90   : > { %v7696_v34 = vmax.f32 %v7609_v30, 0.0 }
 0xf91   : > { %v7697_v40 = vmax.f32 %v7611_v54, 0.0 }
 0xf92   : > { %v7724_v14 = vpack.c.bf16 %v7696_v34, %v7694_v52 }
 0xf93   : > { %v7725_v37 = vpack.c.bf16 %v7697_v40, %v7695_v38  ;;  %v7614_v23 = vpop.f32.mrb[172].mxu1 }
 0xf94   : > { %v7615_v6 = vadd.f32 %v7614_v23, %v7455_v35  ;;  %v7616_v0 = vpop.f32.mrb[173].mxu1 }
 0xf95   : > { %v7617_v18 = vadd.f32 %v7616_v0, %v7455_v35  ;;  %v7618_v17 = vpop.f32.mrb[174].mxu1  ;;  %7885 = vmatprep.subr.bf16.mxu1 %v7725_v37  ;;  %v7495_v37 = vpop.permute.xlu1 %7494 }
 0xf96   : > { %v7619_v9 = vadd.f32 %v7618_v17, %v7460_v3  ;;  %v7620_v41 = vpop.f32.mrb[175].mxu1  ;;  %7886 = vmatpush1.bf16.msra.mxu1 %v7724_v14  ;;  %v7698_v60 = vmax.f32 %v7615_v6, 0.0 }
 0xf97   : > { %v7621_v11 = vadd.f32 %v7620_v41, %v7460_v3  ;;  %v7699_v19 = vmax.f32 %v7617_v18, 0.0  ;;  %v7500_v18 = vpop.permute.xlu0 %7499 }
 0xf98   : > { %v7700_v22 = vmax.f32 %v7619_v9, 0.0 }
 0xf99   : > { %v7701_v8 = vmax.f32 %v7621_v11, 0.0 }
 0xf9a   : > { %v7726_v58 = vpack.c.bf16 %v7700_v22, %v7698_v60 }
 0xf9b   : > { %v7727_v2 = vpack.c.bf16 %v7701_v8, %v7699_v19  ;;  %v7624_v51 = vpop.f32.mrb[176].mxu1 }
 0xf9c   : > { %v7625_v53 = vadd.f32 %v7624_v51, %v7465_v36  ;;  %v7626_v57 = vpop.f32.mrb[177].mxu1 }
 0xf9d   : > { %v7627_v21 = vadd.f32 %v7626_v57, %v7465_v36  ;;  %v7628_v62 = vpop.f32.mrb[178].mxu1  ;;  %7887 = vmatprep.subr.bf16.mxu1 %v7727_v2  ;;  %v7505_v2 = vpop.permute.xlu1 %7504 }
 0xf9e   : > { %v7629_v28 = vadd.f32 %v7628_v62, %v7470_v39  ;;  %v7630_v61 = vpop.f32.mrb[179].mxu1  ;;  %7888 = vmatpush1.bf16.msra.mxu1 %v7726_v58  ;;  %v7702_v1 = vmax.f32 %v7625_v53, 0.0 }
 0xf9f   : > { %v7631_v44 = vadd.f32 %v7630_v61, %v7470_v39  ;;  %v7703_v24 = vmax.f32 %v7627_v21, 0.0  ;;  %v7510_v21 = vpop.permute.xlu0 %7509 }
 0xfa0   : > { %v7704_v12 = vmax.f32 %v7629_v28, 0.0 }
 0xfa1   : > { %v7705_v50 = vmax.f32 %v7631_v44, 0.0 }
 0xfa2   : > { %v7728_v16 = vpack.c.bf16 %v7704_v12, %v7702_v1 }
 0xfa3   : > { %v7729_v31 = vpack.c.bf16 %v7705_v50, %v7703_v24  ;;  %v7634_v25 = vpop.f32.mrb[180].mxu1 }
 0xfa4   : > { %v7635_v10 = vadd.f32 %v7634_v25, %v7475_v33  ;;  %v7636_v4 = vpop.f32.mrb[181].mxu1  ;;  %v9321_v25 = vld [vmem:[%s13288_s4 + $0x2c0] sm:$0xff]  }
 0xfa5   : > { %v7637_v20 = vadd.f32 %v7636_v4, %v7475_v33  ;;  %v7638_v42 = vpop.f32.mrb[182].mxu1  ;;  %7889 = vmatprep.subr.bf16.mxu1 %v7729_v31  ;;  %v9323_v4 = vld [vmem:[%s13288_s4 + $0x2d0] sm:$0xff]  }
 0xfa6   : > { %v7639_v29 = vadd.f32 %v7638_v42, %v7480_v27  ;;  %v7640_v5 = vpop.f32.mrb[183].mxu1  ;;  %7890 = vmatpush1.bf16.msra.mxu1 %v7728_v16  ;;  %v7706_v56 = vmax.f32 %v7635_v10, 0.0  ;;  %v9322_v10 = vld [vmem:[%s13288_s4 + $0x2c8] sm:$0xff]  }
 0xfa7   : > { %v7641_v59 = vadd.f32 %v7640_v5, %v7480_v27  ;;  %v7707_v46 = vmax.f32 %v7637_v20, 0.0  ;;  %v9324_v27 = vld [vmem:[%s13288_s4 + $0x2d8] sm:$0xff]   ;;  %v9325_v20 = vld [vmem:[%s13288_s4 + $0x2e0] sm:$0xff]   ;;  %v9326_v42 = vld [vmem:[%s13288_s4 + $0x2e8] sm:$0xff]  }
 0xfa8   : > { %v7708_v48 = vmax.f32 %v7639_v29, 0.0  ;;  %v9327_v29 = vld [vmem:[%s13288_s4 + $0x2f0] sm:$0xff]   ;;  %v9328_v5 = vld [vmem:[%s13288_s4 + $0x2f8] sm:$0xff]  }
 0xfa9   : > { %v7709_v55 = vmax.f32 %v7641_v59, 0.0  ;;  %v7758_v59 = vpop.permute.xlu1 %7757 }
 0xfaa   : > { %v7730_v49 = vpack.c.bf16 %v7708_v48, %v7706_v56 }
 0xfab   : > { %v7731_v43 = vpack.c.bf16 %v7709_v55, %v7707_v46  ;;  %v7644_v45 = vpop.f32.mrb[184].mxu1  ;;  %v7763_v55 = vpop.permute.xlu0 %7762 }
 0xfac   : > { %v7645_v47 = vadd.f32 %v7644_v45, %v7485_v32  ;;  %v7646_v63 = vpop.f32.mrb[185].mxu1 }
 0xfad   : > { %v7647_v26 = vadd.f32 %v7646_v63, %v7485_v32  ;;  %v7648_v30 = vpop.f32.mrb[186].mxu1  ;;  %7891 = vmatprep.subr.bf16.mxu1 %v7731_v43 }
 0xfae   : > { %v7649_v7 = vadd.f32 %v7648_v30, %v7490_v15  ;;  %v7650_v54 = vpop.f32.mrb[187].mxu1  ;;  %7892 = vmatpush1.bf16.msra.mxu1 %v7730_v49  ;;  %v7710_v34 = vmax.f32 %v7645_v47, 0.0 }
 0xfaf   : > { %v7651_v52 = vadd.f32 %v7650_v54, %v7490_v15  ;;  %v7711_v40 = vmax.f32 %v7647_v26, 0.0 }
 0xfb0   : > { %v7712_v38 = vmax.f32 %v7649_v7, 0.0  ;;  %v7768_v7 = vpop.permute.xlu1 %7767 }
 0xfb1   : > { %v7713_v14 = vmax.f32 %v7651_v52, 0.0 }
 0xfb2   : > { %v7732_v35 = vpack.c.bf16 %v7712_v38, %v7710_v34 }
 0xfb3   : > { %v7733_v23 = vpack.c.bf16 %v7713_v14, %v7711_v40  ;;  %v7654_v6 = vpop.f32.mrb[188].mxu1  ;;  %v7773_v40 = vpop.permute.xlu0 %7772 }
 0xfb4   : > { %v7655_v0 = vadd.f32 %v7654_v6, %v7495_v37  ;;  %v7656_v3 = vpop.f32.mrb[189].mxu1 }
 0xfb5   : > { %v7657_v17 = vadd.f32 %v7656_v3, %v7495_v37  ;;  %v7658_v9 = vpop.f32.mrb[190].mxu1  ;;  %7893 = vmatprep.subr.bf16.mxu1 %v7733_v23 }
 0xfb6   : > { %v7659_v41 = vadd.f32 %v7658_v9, %v7500_v18  ;;  %v7660_v11 = vpop.f32.mrb[191].mxu1  ;;  %7894 = vmatpush1.bf16.msra.mxu1 %v7732_v35  ;;  %v7714_v22 = vmax.f32 %v7655_v0, 0.0 }
 0xfb7   : > { %v7661_v60 = vadd.f32 %v7660_v11, %v7500_v18  ;;  %v7715_v8 = vmax.f32 %v7657_v17, 0.0 }
 0xfb8   : > { %v7716_v19 = vmax.f32 %v7659_v41, 0.0  ;;  %v7778_v41 = vpop.permute.xlu1 %7777 }
 0xfb9   : > { %v7717_v58 = vmax.f32 %v7661_v60, 0.0 }
 0xfba   : > { %v7734_v36 = vpack.c.bf16 %v7716_v19, %v7714_v22 }
 0xfbb   : > { %v7735_v51 = vpack.c.bf16 %v7717_v58, %v7715_v8  ;;  %v7664_v53 = vpop.f32.mrb[192].mxu1  ;;  %v7783_v8 = vpop.permute.xlu0 %7782 }
 0xfbc   : > { %v7665_v57 = vadd.f32 %v7664_v53, %v7505_v2  ;;  %v7666_v39 = vpop.f32.mrb[193].mxu1 }
 0xfbd   : > { %v7667_v62 = vadd.f32 %v7666_v39, %v7505_v2  ;;  %v7668_v28 = vpop.f32.mrb[194].mxu1  ;;  %7895 = vmatprep.subr.bf16.mxu1 %v7735_v51 }
 0xfbe   : > { %v7669_v61 = vadd.f32 %v7668_v28, %v7510_v21  ;;  %v7670_v44 = vpop.f32.mrb[195].mxu1  ;;  %7896 = vmatpush1.bf16.msra.mxu1 %v7734_v36  ;;  %v7718_v12 = vmax.f32 %v7665_v57, 0.0 }
 0xfbf   : > { %v7671_v1 = vadd.f32 %v7670_v44, %v7510_v21  ;;  %v7719_v50 = vmax.f32 %v7667_v62, 0.0 }
 0xfc0   : > { %v7720_v24 = vmax.f32 %v7669_v61, 0.0  ;;  %v7788_v61 = vpop.permute.xlu1 %7787 }
 0xfc1   : > { %v7721_v16 = vmax.f32 %v7671_v1, 0.0 }
 0xfc2   : > { %v7736_v33 = vpack.c.bf16 %v7720_v24, %v7718_v12 }
 0xfc3   : > { %v7737_v31 = vpack.c.bf16 %v7721_v16, %v7719_v50  ;;  %v7793_v50 = vpop.permute.xlu0 %7792 }
 0xfc5   : > { %7897 = vmatprep.subr.bf16.mxu1 %v7737_v31 }
 0xfc6   : > { %7898 = vmatpush1.bf16.msra.mxu1 %v7736_v33 }
 0xfc9   : > { %7916 = vmatmul.mubr.bf16.vlgmr.msra.gmra.mrb[196].mxu1 %v9321_v25 }
 0xfca   : > { %7925 = vmatprep.mubr.bf16.mxu1 %v13531_v13 }
 0xfd1   : > { %7926 = vmatmul.mubr.bf16.gmra.mrb[200].mxu1 %v9322_v10 }
 0xfd2   : > { %7935 = vmatprep.mubr.bf16.mxu1 %v13531_v13 }
 0xfd9   : > { %7936 = vmatmul.mubr.bf16.gmra.mrb[204].mxu1 %v9323_v4 }
 0xfda   : > { %7945 = vmatprep.mubr.bf16.mxu1 %v13531_v13 }
 0xfe1   : > { %7946 = vmatmul.mubr.bf16.gmra.mrb[208].mxu1 %v9324_v27 }
 0xfe2   : > { %7955 = vmatprep.mubr.bf16.mxu1 %v13531_v13 }
 0xfe9   : > { %7956 = vmatmul.mubr.bf16.gmra.mrb[212].mxu1 %v9325_v20 }
 0xfea   : > { %7965 = vmatprep.mubr.bf16.mxu1 %v13531_v13 }
 0xff1   : > { %7966 = vmatmul.mubr.bf16.gmra.mrb[216].mxu1 %v9326_v42 }
 0xff2   : > { %7975 = vmatprep.mubr.bf16.mxu1 %v13531_v13 }
 0xff9   : > { %7976 = vmatmul.mubr.bf16.gmra.mrb[220].mxu1 %v9327_v29 }
 0xffa   : > { %7985 = vmatprep.mubr.bf16.mxu1 %v13531_v13 }
0x1001   : > { %7986 = vmatmul.mubr.bf16.gmra.mrb[224].mxu1 %v9328_v5  ;;  %v7798_v5 = vpop.permute.xlu1 %7797 }
0x109c   : > { %v7917_v56 = vpop.f32.mrb[196].mxu1 }
0x109d   : > { %v7918_v48 = vadd.f32 %v7917_v56, %v7758_v59  ;;  %v7919_v46 = vpop.f32.mrb[197].mxu1 }
0x109e   : > { %v7920_v49 = vadd.f32 %v7919_v46, %v7758_v59  ;;  %v7921_v32 = vpop.f32.mrb[198].mxu1 }
0x109f   : > { %v7922_v43 = vadd.f32 %v7921_v32, %v7763_v55  ;;  %v7923_v45 = vpop.f32.mrb[199].mxu1  ;;  %v7997_v63 = vmax.f32 %v7918_v48, 0.0 }
0x10a0   : > { %v7924_v47 = vadd.f32 %v7923_v45, %v7763_v55  ;;  %v7998_v26 = vmax.f32 %v7920_v49, 0.0  ;;  %v7803_v55 = vpop.permute.xlu0 %7802 }
0x10a1   : > { %v7999_v15 = vmax.f32 %v7922_v43, 0.0 }
0x10a2   : > { %v8000_v30 = vmax.f32 %v7924_v47, 0.0 }
0x10a3   : > { %v8029_v13 = vpack.c.bf16 %v7999_v15, %v7997_v63 }
0x10a4   : > { %v8030_v54 = vpack.c.bf16 %v8000_v30, %v7998_v26  ;;  %v7927_v52 = vpop.f32.mrb[200].mxu1 }
0x10a5   : > { %v7928_v34 = vadd.f32 %v7927_v52, %v7768_v7  ;;  %v7929_v38 = vpop.f32.mrb[201].mxu1 }
0x10a6   : > { %v7930_v14 = vadd.f32 %v7929_v38, %v7768_v7  ;;  %v7931_v35 = vpop.f32.mrb[202].mxu1  ;;  %8051 = vmatprep.subr.bf16.mxu0 %v8030_v54  ;;  %v7808_v7 = vpop.permute.xlu1 %7807 }
0x10a7   : > { %v7932_v37 = vadd.f32 %v7931_v35, %v7773_v40  ;;  %v7933_v23 = vpop.f32.mrb[203].mxu1  ;;  %8052 = vmatpush1.bf16.msra.mxu0 %v8029_v13  ;;  %v8001_v0 = vmax.f32 %v7928_v34, 0.0 }
0x10a8   : > { %v7934_v6 = vadd.f32 %v7933_v23, %v7773_v40  ;;  %v8002_v18 = vmax.f32 %v7930_v14, 0.0  ;;  %v7813_v40 = vpop.permute.xlu0 %7812 }
0x10a9   : > { %v8003_v3 = vmax.f32 %v7932_v37, 0.0 }
0x10aa   : > { %v8004_v17 = vmax.f32 %v7934_v6, 0.0 }
0x10ab   : > { %v8031_v9 = vpack.c.bf16 %v8003_v3, %v8001_v0 }
0x10ac   : > { %v8032_v11 = vpack.c.bf16 %v8004_v17, %v8002_v18  ;;  %v7937_v60 = vpop.f32.mrb[204].mxu1 }
0x10ad   : > { %v7938_v22 = vadd.f32 %v7937_v60, %v7778_v41  ;;  %v7939_v19 = vpop.f32.mrb[205].mxu1 }
0x10ae   : > { %v7940_v58 = vadd.f32 %v7939_v19, %v7778_v41  ;;  %v7941_v36 = vpop.f32.mrb[206].mxu1  ;;  %8053 = vmatprep.subr.bf16.mxu0 %v8032_v11  ;;  %v7818_v41 = vpop.permute.xlu1 %7817 }
0x10af   : > { %v7942_v2 = vadd.f32 %v7941_v36, %v7783_v8  ;;  %v7943_v51 = vpop.f32.mrb[207].mxu1  ;;  %8054 = vmatpush1.bf16.msra.mxu0 %v8031_v9  ;;  %v8005_v57 = vmax.f32 %v7938_v22, 0.0 }
0x10b0   : > { %v7944_v53 = vadd.f32 %v7943_v51, %v7783_v8  ;;  %v8006_v21 = vmax.f32 %v7940_v58, 0.0  ;;  %v7823_v8 = vpop.permute.xlu0 %7822 }
0x10b1   : > { %v8007_v39 = vmax.f32 %v7942_v2, 0.0 }
0x10b2   : > { %v8008_v62 = vmax.f32 %v7944_v53, 0.0 }
0x10b3   : > { %v8033_v28 = vpack.c.bf16 %v8007_v39, %v8005_v57 }
0x10b4   : > { %v8034_v44 = vpack.c.bf16 %v8008_v62, %v8006_v21  ;;  %v7947_v1 = vpop.f32.mrb[208].mxu1 }
0x10b5   : > { %v7948_v12 = vadd.f32 %v7947_v1, %v7788_v61  ;;  %v7949_v24 = vpop.f32.mrb[209].mxu1 }
0x10b6   : > { %v7950_v16 = vadd.f32 %v7949_v24, %v7788_v61  ;;  %v7951_v33 = vpop.f32.mrb[210].mxu1  ;;  %8055 = vmatprep.subr.bf16.mxu0 %v8034_v44  ;;  %v7828_v61 = vpop.permute.xlu1 %7827 }
0x10b7   : > { %v7952_v31 = vadd.f32 %v7951_v33, %v7793_v50  ;;  %v7953_v25 = vpop.f32.mrb[211].mxu1  ;;  %8056 = vmatpush1.bf16.msra.mxu0 %v8033_v28  ;;  %v8009_v4 = vmax.f32 %v7948_v12, 0.0 }
0x10b8   : > { %v7954_v10 = vadd.f32 %v7953_v25, %v7793_v50  ;;  %v8010_v20 = vmax.f32 %v7950_v16, 0.0  ;;  %v7833_v50 = vpop.permute.xlu0 %7832 }
0x10b9   : > { %v8011_v27 = vmax.f32 %v7952_v31, 0.0 }
0x10ba   : > { %v8012_v42 = vmax.f32 %v7954_v10, 0.0 }
0x10bb   : > { %v8035_v29 = vpack.c.bf16 %v8011_v27, %v8009_v4 }
0x10bc   : > { %v8036_v59 = vpack.c.bf16 %v8012_v42, %v8010_v20  ;;  %v7957_v56 = vpop.f32.mrb[212].mxu1 }
0x10bd   : > { %v7958_v48 = vadd.f32 %v7957_v56, %v7798_v5  ;;  %v7959_v46 = vpop.f32.mrb[213].mxu1  ;;  %v8049_v56 = vpop.permute.xlu1 %8048 }
0x10be   : > { %v7960_v49 = vadd.f32 %v7959_v46, %v7798_v5  ;;  %v7961_v32 = vpop.f32.mrb[214].mxu1  ;;  %8057 = vmatprep.subr.bf16.mxu0 %v8036_v59  ;;  %v7996_v59 = vld [vmem:[%s13294_s10] sm:$0x3] }
0x10bf   : > { %v7962_v43 = vadd.f32 %v7961_v32, %v7803_v55  ;;  %v7963_v45 = vpop.f32.mrb[215].mxu1  ;;  %8058 = vmatpush1.bf16.msra.mxu0 %v8035_v29  ;;  %v8013_v63 = vmax.f32 %v7958_v48, 0.0 }
0x10c0   : > { %v7964_v47 = vadd.f32 %v7963_v45, %v7803_v55  ;;  %v8014_v26 = vmax.f32 %v7960_v49, 0.0 }
0x10c1   : > { %v8015_v15 = vmax.f32 %v7962_v43, 0.0 }
0x10c2   : > { %v8016_v30 = vmax.f32 %v7964_v47, 0.0 }
0x10c3   : > { %v8037_v13 = vpack.c.bf16 %v8015_v15, %v8013_v63 }
0x10c4   : > { %v8038_v54 = vpack.c.bf16 %v8016_v30, %v8014_v26  ;;  %v7967_v52 = vpop.f32.mrb[216].mxu1 }
0x10c5   : > { %v7968_v34 = vadd.f32 %v7967_v52, %v7808_v7  ;;  %v7969_v38 = vpop.f32.mrb[217].mxu1 }
0x10c6   : > { %v7970_v14 = vadd.f32 %v7969_v38, %v7808_v7  ;;  %v7971_v35 = vpop.f32.mrb[218].mxu1  ;;  %8059 = vmatprep.subr.bf16.mxu0 %v8038_v54 }
0x10c7   : > { %v7972_v37 = vadd.f32 %v7971_v35, %v7813_v40  ;;  %v7973_v23 = vpop.f32.mrb[219].mxu1  ;;  %8060 = vmatpush1.bf16.msra.mxu0 %v8037_v13  ;;  %v8017_v0 = vmax.f32 %v7968_v34, 0.0 }
0x10c8   : > { %v7974_v6 = vadd.f32 %v7973_v23, %v7813_v40  ;;  %v8018_v18 = vmax.f32 %v7970_v14, 0.0 }
0x10c9   : > { %v8019_v3 = vmax.f32 %v7972_v37, 0.0 }
0x10ca   : > { %v8020_v17 = vmax.f32 %v7974_v6, 0.0 }
0x10cb   : > { %v8039_v9 = vpack.c.bf16 %v8019_v3, %v8017_v0 }
0x10cc   : > { %v8040_v11 = vpack.c.bf16 %v8020_v17, %v8018_v18  ;;  %v7977_v60 = vpop.f32.mrb[220].mxu1 }
0x10cd   : > { %v7978_v22 = vadd.f32 %v7977_v60, %v7818_v41  ;;  %v7979_v19 = vpop.f32.mrb[221].mxu1 }
0x10ce   : > { %v7980_v58 = vadd.f32 %v7979_v19, %v7818_v41  ;;  %v7981_v36 = vpop.f32.mrb[222].mxu1  ;;  %8061 = vmatprep.subr.bf16.mxu0 %v8040_v11 }
0x10cf   : > { %v7982_v2 = vadd.f32 %v7981_v36, %v7823_v8  ;;  %v7983_v51 = vpop.f32.mrb[223].mxu1  ;;  %8062 = vmatpush1.bf16.msra.mxu0 %v8039_v9  ;;  %v8021_v57 = vmax.f32 %v7978_v22, 0.0 }
0x10d0   : > { %v7984_v53 = vadd.f32 %v7983_v51, %v7823_v8  ;;  %v8022_v21 = vmax.f32 %v7980_v58, 0.0 }
0x10d1   : > { %v8023_v39 = vmax.f32 %v7982_v2, 0.0 }
0x10d2   : > { %v8024_v62 = vmax.f32 %v7984_v53, 0.0 }
0x10d3   : > { %v8041_v28 = vpack.c.bf16 %v8023_v39, %v8021_v57 }
0x10d4   : > { %v8042_v44 = vpack.c.bf16 %v8024_v62, %v8022_v21  ;;  %v7987_v1 = vpop.f32.mrb[224].mxu1 }
0x10d5   : > { %v7988_v12 = vadd.f32 %v7987_v1, %v7828_v61  ;;  %v7989_v24 = vpop.f32.mrb[225].mxu1 }
0x10d6   : > { %v7990_v16 = vadd.f32 %v7989_v24, %v7828_v61  ;;  %v7991_v33 = vpop.f32.mrb[226].mxu1  ;;  %8063 = vmatprep.subr.bf16.mxu0 %v8042_v44 }
0x10d7   : > { %v7992_v31 = vadd.f32 %v7991_v33, %v7833_v50  ;;  %v7993_v25 = vpop.f32.mrb[227].mxu1  ;;  %8064 = vmatpush1.bf16.msra.mxu0 %v8041_v28  ;;  %v8025_v4 = vmax.f32 %v7988_v12, 0.0 }
0x10d8   : > { %v7994_v10 = vadd.f32 %v7993_v25, %v7833_v50  ;;  %v8026_v20 = vmax.f32 %v7990_v16, 0.0 }
0x10d9   : > { %v8027_v27 = vmax.f32 %v7992_v31, 0.0 }
0x10da   : > { %v8028_v42 = vmax.f32 %v7994_v10, 0.0 }
0x10db   : > { %v8043_v29 = vpack.c.bf16 %v8027_v27, %v8025_v4 }
0x10dc   : > { %v8044_v5 = vpack.c.bf16 %v8028_v42, %v8026_v20 }
0x10de   : > { %8065 = vmatprep.subr.bf16.mxu0 %v8044_v5 }
0x10df   : > { %8066 = vmatpush1.bf16.msra.mxu0 %v8043_v29 }
0x10e2   : > { %8084 = vmatmul.mubr.bf16.vlgmr.msra.gmra.mrb[224].mxu0 %v7996_v59 }
0x11b5   : > { %v8085_v48 = vpop.f32.mrb[224].mxu0 }
0x11b6   : > { %v8086_v46 = vadd.f32 %v8085_v48, %v8049_v56  ;;  %v8087_v55 = vpop.f32.mrb[225].mxu0 }
0x11b7   : > { %v8088_v49 = vadd.f32 %v8087_v55, %v8049_v56  ;;  %v8089_v32 = vpop.f32.mrb[226].mxu0 }
0x11b8   : > { %v8090_v43 = vpop.f32.mrb[227].mxu0 }
0x11b9   : > { %v8094_v45 = vcombine.low %v8086_v46, %v8088_v49 }
0x11bb   : > { %8096 = vst [vmem:[%s425_s21] sm:$0x77] %v8094_v45 }
0x11bc   : > { %9398 = shalt.err (!%p9395_p3)
}
0x11bd   : > { %s9399_s17 = scalar_lea.hbm %s13242_s16, 128  ;;  %s9403_s21 = scalar_lea.hbm %s13296_s12, 256 }
0x11be   : > { %p9400_p4 = scmp.ne.s32.totalorder %s13242_s16, %s9399_s17  ;;  %p9404_p9 = scmp.lt.u32.totalorder %s13242_s16, %s13296_s12 }
0x11bf   : > { %p9405_p10 = scmp.lt.u32.totalorder %s9403_s21, %s9399_s17  ;;  %p9407_p12 = scmp.lt.u32.totalorder %s9399_s17, %s13242_s16 }
0x11c0   : > { %p9401_p7 = pnand %p9400_p4, %p9566_p5 }
0x11c1   : > { %p9406_p11 = por %p9405_p10, %p9404_p9 }
0x11c2   : > { %p9402_p8 = pneg %p9401_p7 }
0x11c3   : > { %p9408_p13 = por %p9407_p12, %p9406_p11 }
0x11c5   : > { %p9409_p0 = pnand %p9408_p13, %p9402_p8 }
0x11c7   : > { %9412 = shalt.err (!%p9409_p0)
}
0x11c8   : > { %9118 = dma.vmem_to_hbm [thread:$0]  (%p9566_p5), %s13244_s22, 128, %s13242_s16, %s8098_s2  }
0x11c9 PF: > { %p9124_p1 = scmp.ge.s32.totalorder %s9447_s26, 2  ;;  %s8124_s13 = sand.u32 1, %s9435_s23  }
0x11ca   : > { %s8125_s9 = scalar_lea.sflag [#allocation4], %s8124_s13 }
0x11cb   : > { %p9121_p2 = pnand %p9124_p1, %p9570_p6 }
0x11cd   : > { %9430 = dma.done.wait (!%p9121_p2), %s8125_s9, 128  }
0x11ce   : > { %9432 = vsyncadd (!%p9121_p2), %s8125_s9, 4294967168  ;;  %s13830_s29 = sld [smem:[#allocation6_spill]]  ;;  %p24_p3 = scmp.ge.s32.totalorder %s9553_s28, 4  }
0x11cf   : > { %s13831_s23 = smov %s9439_s24  ;;  %s13832_s24 = smov %s9443_s25 }
0x11d0   : > { %s13834_s26 = smov %s9553_s28  ;;  %26 = sbr.rel (!%p24_p3) target bundleno = 6 (0x6), region = 137 }
0x11d4   : > { %s13833_s25 = smov %s13830_s29 }
0x11d7   :  { %8130 = vsyncpa [#allocation4], 1 }
0x11d8   :  { %8132 = vsyncpa [#allocation4 + $0x1], 1 }

</bundles_post_ra>
